<compile_context>
chip_gen: v5e
topology: v5e:2x2
jax: 0.10.0
libtpu: 0.0.40
codegen_flags: <defaults>
</compile_context>

<pallas_src>
import functools

import jax
import jax.numpy as jnp
from jax.experimental import pallas as pl
from jax.experimental.pallas import tpu as pltpu

EPS = 1e-5      # PyTorch BatchNorm default eps
SLOPE = 0.05    # LeakyReLU slope used in the module
LANE = 128      # MXU-friendly pad of the final layer's tiny Cout


def _round_up(x, m):
    return ((x + m - 1) // m) * m


def _vmem_limit_bytes():
    """Per-generation VMEM budget (v5e/v6e: ~96 MiB, v7x: ~48 MiB)."""
    cap = 64 * 1024 * 1024
    try:
        info = pltpu.get_tpu_info()
        cap = int(getattr(info, "vmem_capacity_bytes", cap))
    except Exception:
        pass
    return min((cap * 3) // 4, 112 * 1024 * 1024)


_VMEM_LIMIT = _vmem_limit_bytes()


# ---------------------------------------------------------------------------
# Small in-kernel helpers
# ---------------------------------------------------------------------------
def _leaky(x):
    return jnp.where(x >= 0.0, x, SLOPE * x)


def _combine_groups(means, m2s, rows_per_group):
    """Combine equal-size row groups: per-channel mean and centered M2."""
    mstack = jnp.concatenate(means, axis=0)                 # (G, C)
    gmean = jnp.mean(mstack, axis=0, keepdims=True)         # (1, C)
    m2 = functools.reduce(jnp.add, m2s) + rows_per_group * jnp.sum(
        (mstack - gmean) ** 2, axis=0, keepdims=True)
    return gmean, m2


def _epilogue_pad(x_ref, sc_ref, sh_ref):
    """Previous-layer BN scale/shift + LeakyReLU, then zero-pad H/W by 1."""
    tn, hh, ww, cin = x_ref.shape
    xe = x_ref[...].astype(jnp.float32) * sc_ref[...] + sh_ref[...]
    xe = _leaky(xe).astype(jnp.bfloat16)
    zr = jnp.zeros((tn, 1, ww, cin), jnp.bfloat16)
    xe = jnp.concatenate([zr, xe, zr], axis=1)
    zc = jnp.zeros((tn, hh + 2, 1, cin), jnp.bfloat16)
    return jnp.concatenate([zc, xe, zc], axis=2)            # (tn, H+2, W+2, C)


def _parity_lhs(xp, ey, ex, hh, ww):
    """im2col for one output-parity plane, entirely in VMEM.

    Taps are concatenated along the contraction dim in (dy, dx) order.  Row
    flattening goes through a concat over H so the final collapse merges a
    second-minor dim of H*W (a multiple of 16 for every layer handled here),
    i.e. it is tile-aligned and never needs an exotic relayout."""
    taps = [xp[:, ey + dy:ey + dy + hh, ex + dx:ex + dx + ww, :]
            for dy in (0, 1) for dx in (0, 1)]
    pcat = jnp.concatenate(taps, axis=-1)                   # (tn, H, W, 4*Cin)
    tn = pcat.shape[0]
    k = pcat.shape[-1]
    rows3 = jnp.concatenate([pcat[:, i] for i in range(hh)], axis=1)
    return rows3.reshape(tn * hh * ww, k)                   # (tn*H*W, 4*Cin)


# ---------------------------------------------------------------------------
# Pallas kernels
# ---------------------------------------------------------------------------
def _fc_deconv0_kernel(x_ref, fcw_ref, fcb_ref, g1_ref, b1_ref, w0_ref,
                       out_ref, stats_ref):
    # Linear -> BatchNorm1d (two-pass batch stats) -> ReLU -> deconv layer 0.
    # At 1x1 input each output parity p=(ey,ex) uses exactly one kernel tap
    # w[:, :, 1+ey, 1+ex], so the deconv is one dense (N,F) @ (F, 4*C0) matmul.
    x = x_ref[...].astype(jnp.bfloat16)
    h = jnp.dot(x, fcw_ref[...], preferred_element_type=jnp.float32) + fcb_ref[...]
    mu = jnp.mean(h, axis=0, keepdims=True)
    var = jnp.mean((h - mu) ** 2, axis=0, keepdims=True)
    h = (h - mu) * jax.lax.rsqrt(var + EPS) * g1_ref[...] + b1_ref[...]
    h = jnp.maximum(h, 0.0).astype(jnp.bfloat16)
    y = jnp.dot(h, w0_ref[...], preferred_element_type=jnp.float32)   # (N, 4*C0)
    out_ref[...] = y.astype(out_ref.dtype)

    c0 = stats_ref.shape[1]
    chunks = [y[:, p * c0:(p + 1) * c0] for p in range(4)]
    means = [jnp.mean(c, axis=0, keepdims=True) for c in chunks]
    m2s = [jnp.sum((c - m) ** 2, axis=0, keepdims=True)
           for c, m in zip(chunks, means)]
    gmean, m2 = _combine_groups(means, m2s, y.shape[0])
    stats_ref[...] = jnp.concatenate([gmean, m2 / (4.0 * y.shape[0])], axis=0)


def _deconv_dense_kernel(x_ref, w_ref, sc_ref, sh_ref, out_ref, stats_ref):
    # Small-spatial ConvTranspose2d layer as one dense matmul on flattened
    # (spatial x channel) axes; previous layer's BN + LeakyReLU fused as the
    # input epilogue.  Boundary handling is baked into the dense weight.
    xe = x_ref[...].astype(jnp.float32) * sc_ref[...] + sh_ref[...]
    xe = _leaky(xe).astype(jnp.bfloat16)
    y = jnp.dot(xe, w_ref[...], preferred_element_type=jnp.float32)   # (N, S*C)
    out_ref[...] = y.astype(out_ref.dtype)

    c = stats_ref.shape[1]
    sout = y.shape[1] // c
    chunks = [y[:, s * c:(s + 1) * c] for s in range(sout)]
    means = [jnp.mean(ck, axis=0, keepdims=True) for ck in chunks]
    m2s = [jnp.sum((ck - m) ** 2, axis=0, keepdims=True)
           for ck, m in zip(chunks, means)]
    gmean, m2 = _combine_groups(means, m2s, y.shape[0])
    stats_ref[...] = jnp.concatenate(
        [gmean, m2 / float(sout * y.shape[0])], axis=0)


def _deconv_sub_kernel(x_ref, w_ref, sc_ref, sh_ref, out_ref, stats_ref):
    # One batch-tile of a hidden ConvTranspose2d(k=4, s=2, p=1): fused input
    # epilogue + zero pad + 4-parity sub-pixel matmuls + raw output + per-tile
    # Welford stats (mean, centered M2) for this layer's BatchNorm.
    tn, hh, ww, _ = x_ref.shape
    coutp = w_ref.shape[2]
    xp = _epilogue_pad(x_ref, sc_ref, sh_ref)
    rows = tn * hh * ww
    means, m2s = [], []
    for ey in (0, 1):
        ys = []
        for ex in (0, 1):
            p = 2 * ey + ex
            lhs = _parity_lhs(xp, ey, ex, hh, ww)
            y = jnp.dot(lhs, w_ref[p], preferred_element_type=jnp.float32)
            m = jnp.mean(y, axis=0, keepdims=True)
            means.append(m)
            m2s.append(jnp.sum((y - m) ** 2, axis=0, keepdims=True))
            ys.append(y.astype(out_ref.dtype))
        ycat = jnp.concatenate(ys, axis=-1)                 # (rows, 2*Coutp)
        y3 = ycat.reshape(tn, hh * ww, 2 * coutp)
        for h in range(hh):
            out_ref[:, h, ey, :, :] = y3[:, h * ww:(h + 1) * ww, :]
    gmean, m2 = _combine_groups(means, m2s, rows)
    stats_ref[0] = jnp.concatenate([gmean, m2], axis=0)     # per-tile [mean; M2]


def _deconv_final_kernel(x_ref, w_ref, sc_ref, sh_ref, out_ref):
    # Last ConvTranspose2d + tanh.  Matmul uses a 128-padded weight for clean
    # MXU lowering, but only im_ch channels ever reach HBM (bf16).
    tn, hh, ww, _ = x_ref.shape
    imch = out_ref.shape[-1] // 2
    xp = _epilogue_pad(x_ref, sc_ref, sh_ref)
    for ey in (0, 1):
        ys = []
        for ex in (0, 1):
            p = 2 * ey + ex
            lhs = _parity_lhs(xp, ey, ex, hh, ww)
            y = jnp.dot(lhs, w_ref[p], preferred_element_type=jnp.float32)
            ys.append(jnp.tanh(y[:, :imch]).astype(out_ref.dtype))
        ycat = jnp.concatenate(ys, axis=-1)                 # (rows, 2*im_ch)
        y3 = ycat.reshape(tn, hh * ww, 2 * imch)
        for h in range(hh):
            out_ref[:, h, ey, :, :] = y3[:, h * ww:(h + 1) * ww, :]


# ---------------------------------------------------------------------------
# pallas_call wrappers
# ---------------------------------------------------------------------------
def _pick_batch_tile(n, hh, ww, cin, mm_out, st_out):
    """Largest batch tile that divides n and keeps the per-step working set
    within ~half the VMEM budget (incl. double buffering); prefers an even
    number of grid steps (megacore balance)."""
    per_row = (hh * ww * cin * 2                       # input block (bf16)
               + (hh + 2) * (ww + 2) * cin * 6         # epilogue f32 + padded copy
               + hh * ww * 4 * cin * 2                 # im2col tile in VMEM
               + 2 * hh * ww * mm_out * 4              # live f32 matmul results
               + hh * ww * 4 * st_out * 2)             # output block (bf16)
    fixed = 2 * 16 * cin * mm_out * 2                  # double-buffered weights
    avail = max(_VMEM_LIMIT // 2 - fixed, per_row)
    cap = max(1, avail // (2 * per_row))
    divs = [t for t in range(1, n + 1) if n % t == 0 and t <= cap]
    even = [t for t in divs if (n // t) % 2 == 0]
    return max(even) if even else max(divs)


def _fc_deconv0(x, prep):
    n = x.shape[0]
    c0x4 = prep["w0"].shape[1]
    return pl.pallas_call(
        _fc_deconv0_kernel,
        out_shape=(jax.ShapeDtypeStruct((n, c0x4), jnp.bfloat16),
                   jax.ShapeDtypeStruct((2, c0x4 // 4), jnp.float32)),
        compiler_params=pltpu.CompilerParams(vmem_limit_bytes=_VMEM_LIMIT),
    )(x, prep["fc_wt"], prep["fc_b"], prep["bn1_g"], prep["bn1_b"], prep["w0"])


def _deconv_dense(xflat, wbig, sc, sh, cout):
    n = xflat.shape[0]
    m = wbig.shape[1]
    return pl.pallas_call(
        _deconv_dense_kernel,
        out_shape=(jax.ShapeDtypeStruct((n, m), jnp.bfloat16),
                   jax.ShapeDtypeStruct((2, cout), jnp.float32)),
        compiler_params=pltpu.CompilerParams(vmem_limit_bytes=_VMEM_LIMIT),
    )(xflat, wbig, sc, sh)


def _deconv_sub(x4, wsub, sc, sh):
    n, hh, ww, cin = x4.shape
    coutp = wsub.shape[2]
    tn = _pick_batch_tile(n, hh, ww, cin, coutp, coutp)
    nt = n // tn
    flops = 2 * n * hh * ww * 4 * (4 * cin) * coutp
    bytes_acc = (x4.size * 2 + wsub.size * 2
                 + n * hh * ww * 4 * coutp * 2 + nt * 2 * coutp * 4)
    return pl.pallas_call(
        _deconv_sub_kernel,
        out_shape=(jax.ShapeDtypeStruct((n, hh, 2, ww, 2 * coutp), jnp.bfloat16),
                   jax.ShapeDtypeStruct((nt, 2, coutp), jnp.float32)),
        grid=(nt,),
        in_specs=[pl.BlockSpec((tn, hh, ww, cin), lambda i: (i, 0, 0, 0)),
                  pl.BlockSpec((4, 4 * cin, coutp), lambda i: (0, 0, 0)),
                  pl.BlockSpec((1, cin), lambda i: (0, 0)),
                  pl.BlockSpec((1, cin), lambda i: (0, 0))],
        out_specs=(pl.BlockSpec((tn, hh, 2, ww, 2 * coutp),
                                lambda i: (i, 0, 0, 0, 0)),
                   pl.BlockSpec((1, 2, coutp), lambda i: (i, 0, 0))),
        compiler_params=pltpu.CompilerParams(
            dimension_semantics=("parallel",),
            vmem_limit_bytes=_VMEM_LIMIT),
        cost_estimate=pl.CostEstimate(flops=flops, transcendentals=0,
                                      bytes_accessed=bytes_acc),
    )(x4, wsub, sc, sh)


def _deconv_final(x4, wsub, sc, sh, im_ch):
    n, hh, ww, cin = x4.shape
    coutp = wsub.shape[2]
    tn = _pick_batch_tile(n, hh, ww, cin, coutp, im_ch)
    nt = n // tn
    flops = 2 * n * hh * ww * 4 * (4 * cin) * coutp
    bytes_acc = x4.size * 2 + wsub.size * 2 + n * hh * ww * 4 * im_ch * 2
    return pl.pallas_call(
        _deconv_final_kernel,
        out_shape=jax.ShapeDtypeStruct((n, hh, 2, ww, 2 * im_ch), jnp.bfloat16),
        grid=(nt,),
        in_specs=[pl.BlockSpec((tn, hh, ww, cin), lambda i: (i, 0, 0, 0)),
                  pl.BlockSpec((4, 4 * cin, coutp), lambda i: (0, 0, 0)),
                  pl.BlockSpec((1, cin), lambda i: (0, 0)),
                  pl.BlockSpec((1, cin), lambda i: (0, 0))],
        out_specs=pl.BlockSpec((tn, hh, 2, ww, 2 * im_ch),
                               lambda i: (i, 0, 0, 0, 0)),
        compiler_params=pltpu.CompilerParams(
            dimension_semantics=("parallel",),
            vmem_limit_bytes=_VMEM_LIMIT),
        cost_estimate=pl.CostEstimate(flops=flops,
                                      transcendentals=n * hh * ww * 4 * im_ch,
                                      bytes_accessed=bytes_acc),
    )(x4, wsub, sc, sh)


# ---------------------------------------------------------------------------
# BatchNorm glue (tiny XLA ops between kernels)
# ---------------------------------------------------------------------------
def _bn_affine(mean, var, gamma, beta, aebn):
    if aebn:
        sc = gamma * jax.lax.rsqrt(jnp.maximum(var, 0.0) + EPS)
        sh = beta - mean * sc
    else:
        sc = jnp.ones_like(mean)
        sh = jnp.zeros_like(mean)
    return sc, sh


def _finalize_tile_stats(stats, rows_per_tile):
    tmean = stats[:, 0, :]
    tm2 = stats[:, 1, :]
    mean = jnp.mean(tmean, axis=0)
    m2 = jnp.sum(tm2, axis=0) + rows_per_tile * jnp.sum((tmean - mean) ** 2,
                                                        axis=0)
    var = m2 / (stats.shape[0] * rows_per_tile)
    return mean, var


# ---------------------------------------------------------------------------
# Full forward pass
# ---------------------------------------------------------------------------
def cnn_decoder_forward(x, prep, aebn=True, im_ch=3):
    n = x.shape[0]

    # fc -> BN1d -> ReLU -> deconv layer 0 (1x1 -> 2x2), fused in one kernel.
    raw, st = _fc_deconv0(x, prep)           # raw: (N, 4*C0) == NHWC (N,2,2,C0)
    mean, var = st[0], st[1]

    # deconv layer 1 (2x2 -> 4x4): one dense matmul on the flattened spatial.
    c1 = prep["bn_g"][1].shape[0]
    sc, sh = _bn_affine(mean, var, prep["bn_g"][0], prep["bn_b"][0], aebn)
    raw, st = _deconv_dense(raw, prep["wdense1"],
                            jnp.tile(sc, (4,))[None, :],
                            jnp.tile(sh, (4,))[None, :], c1)
    mean, var = st[0], st[1]

    # deconv layers 2..4: sub-pixel kernels with fused gather + epilogue.
    m = raw.reshape(n, 4, 4, c1)             # free row-major view: NHWC
    nsub = len(prep["wsub"])
    for k in range(nsub):
        wsub = prep["wsub"][k]
        gi = k + 1                           # BN of the producing layer
        sc, sh = _bn_affine(mean, var, prep["bn_g"][gi], prep["bn_b"][gi], aebn)
        if k < nsub - 1:
            out5, st = _deconv_sub(m, wsub, sc[None, :], sh[None, :])
            rows_tile = 4 * (n // st.shape[0]) * m.shape[1] * m.shape[2]
            mean, var = _finalize_tile_stats(st, rows_tile)
            m = out5.reshape(n, 2 * m.shape[1], 2 * m.shape[2], wsub.shape[2])
        else:
            out5 = _deconv_final(m, wsub, sc[None, :], sh[None, :], im_ch)
            m = out5.reshape(n, 2 * m.shape[1], 2 * m.shape[2], im_ch)

    # back to NCHW to match PyTorch's output convention
    return jnp.transpose(m, (0, 3, 1, 2)).astype(jnp.float32)


# ---------------------------------------------------------------------------
# Parameter construction / one-time preparation
# ---------------------------------------------------------------------------
def init_params(cfg, key):
    """PyTorch-layout parameters (deterministic, synthetic)."""
    input_dim = cfg["aez"]
    channel_mult = int(64 * (cfg["netSi"] + 0.25 * int("F" in cfg["ds"][0])))
    fc_output_dim = channel_mult * 16
    chans = [fc_output_dim, channel_mult * 8, channel_mult * 4,
             channel_mult * 2, channel_mult, cfg["imCh"]]

    k_fc, k_dec = jax.random.split(key)
    params = {
        "fc_w": jax.random.normal(k_fc, (fc_output_dim, input_dim), jnp.float32)
        * (1.0 / jnp.sqrt(input_dim)),
        "fc_b": jnp.zeros((fc_output_dim,), jnp.float32),
        "bn1_g": jnp.ones((fc_output_dim,), jnp.float32),
        "bn1_b": jnp.zeros((fc_output_dim,), jnp.float32),
        "deconv_w": [],
        "bn2_g": [],
        "bn2_b": [],
    }
    dk = jax.random.split(k_dec, len(chans) - 1)
    for i, (cin, cout) in enumerate(zip(chans[:-1], chans[1:])):
        w = jax.random.normal(dk[i], (cin, cout, 4, 4), jnp.float32) \
            * (1.0 / jnp.sqrt(cin * 16))
        params["deconv_w"].append(w)
        if i < len(chans) - 2:
            params["bn2_g"].append(jnp.ones((cout,), jnp.float32))
            params["bn2_b"].append(jnp.zeros((cout,), jnp.float32))
    return params, channel_mult, fc_output_dim


def _pad_vec(v, n):
    return jnp.pad(v.astype(jnp.float32), (0, n - v.shape[0]))


def _subpixel_weights(w, cin_to, cout_to):
    """PyTorch ConvTranspose2d weight (Cin,Cout,4,4) -> (4, 4*cin_to, cout_to).

    Parity p = 2*ey+ex; tap (dy,dx) weight = w[:, :, 3-ey-2dy, 3-ex-2dx].
    Rows/cols beyond the true Cin/Cout are zero-padded."""
    cin, cout = w.shape[0], w.shape[1]
    mats = []
    for ey in (0, 1):
        for ex in (0, 1):
            taps = []
            for dy in (0, 1):
                for dx in (0, 1):
                    t = w[:, :, 3 - ey - 2 * dy, 3 - ex - 2 * dx]
                    taps.append(jnp.pad(t, ((0, cin_to - cin),
                                            (0, cout_to - cout))))
            mats.append(jnp.concatenate(taps, axis=0))
    return jnp.stack(mats, axis=0).astype(jnp.bfloat16)


def _dense_deconv_weight(w, hin, win):
    """ConvTranspose2d(k=4,s=2,p=1) on a tiny hin x win map as one dense
    matmul: (hin*win*Cin, 2hin*2win*Cout), boundary handled by construction."""
    cin, cout = w.shape[0], w.shape[1]
    oh, ow = 2 * hin, 2 * win
    mat = jnp.zeros((hin * win * cin, oh * ow * cout), jnp.float32)
    for ih in range(hin):
        for iw in range(win):
            for kh in range(4):
                for kw in range(4):
                    oy, ox = 2 * ih + kh - 1, 2 * iw + kw - 1
                    if 0 <= oy < oh and 0 <= ox < ow:
                        r = (ih * win + iw) * cin
                        c = (oy * ow + ox) * cout
                        mat = mat.at[r:r + cin, c:c + cout].set(w[:, :, kh, kw])
    return mat.astype(jnp.bfloat16)


def prepare_params(params):
    """Precompute kernel-friendly operands once (not per forward call)."""
    fc_w = params["fc_w"]                                   # (F, Din)
    ws = params["deconv_w"]                                 # 5 x (Cin,Cout,4,4)
    c1 = ws[1].shape[1]
    c2 = ws[2].shape[1]
    c3 = ws[3].shape[1]
    c2p = _round_up(c2, 64)                                 # lane-dense stores
    c3p = _round_up(c3, 64)

    # layer 0 (1x1 -> 2x2): parity p uses w[:, :, 1+ey, 1+ex]
    w0 = jnp.concatenate([ws[0][:, :, 1 + ey, 1 + ex]
                          for ey in (0, 1) for ex in (0, 1)], axis=1)

    prep = {
        "fc_wt": fc_w.T.astype(jnp.bfloat16),
        "fc_b": params["fc_b"][None, :].astype(jnp.float32),
        "bn1_g": params["bn1_g"][None, :].astype(jnp.float32),
        "bn1_b": params["bn1_b"][None, :].astype(jnp.float32),
        "w0": w0.astype(jnp.bfloat16),                      # (F, 4*C0)
        "wdense1": _dense_deconv_weight(ws[1], 2, 2),       # (4*C0, 16*C1)
        "wsub": [
            _subpixel_weights(ws[2], c1, c2p),              # layer 2 (4x4->8x8)
            _subpixel_weights(ws[3], c2p, c3p),             # layer 3 (8x8->16x16)
            _subpixel_weights(ws[4], c3p, LANE),            # layer 4 (final)
        ],
        "bn_g": [params["bn2_g"][0].astype(jnp.float32),
                 params["bn2_g"][1].astype(jnp.float32),
                 _pad_vec(params["bn2_g"][2], c2p),
                 _pad_vec(params["bn2_g"][3], c3p)],
        "bn_b": [params["bn2_b"][0].astype(jnp.float32),
                 params["bn2_b"][1].astype(jnp.float32),
                 _pad_vec(params["bn2_b"][2], c2p),
                 _pad_vec(params["bn2_b"][3], c3p)],
    }
    return prep


# ---------------------------------------------------------------------------
# Pure-JAX (f32) reference for correctness checking
# ---------------------------------------------------------------------------
def _reference_forward(x, params, aebn=True):
    hi = jax.lax.Precision.HIGHEST
    y = jnp.dot(x, params["fc_w"].T, precision=hi) + params["fc_b"]
    mean = y.mean(0)
    var = y.var(0)
    y = (y - mean) * jax.lax.rsqrt(var + EPS) * params["bn1_g"] + params["bn1_b"]
    y = jnp.maximum(y, 0.0)
    h = y.reshape(y.shape[0], -1, 1, 1)                       # NCHW
    nl = len(params["deconv_w"])
    for li, w in enumerate(params["deconv_w"]):
        wk = jnp.transpose(w, (1, 0, 2, 3))[:, :, ::-1, ::-1]  # (Cout,Cin,4,4)
        h = jax.lax.conv_general_dilated(
            h, wk, window_strides=(1, 1), padding=((2, 2), (2, 2)),
            lhs_dilation=(2, 2),
            dimension_numbers=("NCHW", "OIHW", "NCHW"), precision=hi)
        if li < nl - 1:
            if aebn:
                m_ = h.mean(axis=(0, 2, 3), keepdims=True)
                v_ = h.var(axis=(0, 2, 3), keepdims=True)
                h = (h - m_) * jax.lax.rsqrt(v_ + EPS)
                h = (h * params["bn2_g"][li][None, :, None, None]
                     + params["bn2_b"][li][None, :, None, None])
            h = jnp.where(h >= 0.0, h, SLOPE * h)
    return jnp.tanh(h)


if __name__ == "__main__":
    # small config consistent with the module's __init__  (channel_mult = 8)
    cfg = {"aez": 16, "netSi": 0.125, "ds": ["X"], "aebn": True, "imCh": 3}
    key = jax.random.PRNGKey(0)
    pkey, xkey = jax.random.split(key)

    params, channel_mult, fc_output_dim = init_params(cfg, pkey)
    prep = prepare_params(params)
    x = jax.random.normal(xkey, (2, cfg["aez"]), jnp.float32)   # latent input

    fwd = jax.jit(cnn_decoder_forward, static_argnames=("aebn", "im_ch"))
    out = fwd(x, prep, aebn=cfg["aebn"], im_ch=cfg["imCh"])
    out = jax.block_until_ready(out)

    # 5 ConvTranspose2d(k=4,s=2,p=1) layers: 1 -> 2 -> 4 -> 8 -> 16 -> 32
    assert out.shape == (2, cfg["imCh"], 32, 32), out.shape
    assert bool(jnp.all(jnp.isfinite(out)))
    assert bool(jnp.all(jnp.abs(out) <= 1.0))      # tanh output range

    # numerical check vs. f32 XLA reference (bf16 matmul operands -> loose tol)
    ref = _reference_forward(x, params, aebn=cfg["aebn"])
    err = float(jnp.max(jnp.abs(out.astype(jnp.float32) - ref)))
    assert err < 0.15, f"mismatch vs reference: max abs err = {err}"

    print("KERNEL_OK")
</pallas_src>

<mosaic_0001>
module attributes {stable_mosaic.version = 11 : i64} {
  func.func @_fc_deconv0_kernel(%arg0: memref<2x16xf32, #tpu.memory_space<vmem>>, %arg1: memref<16x128xbf16, #tpu.memory_space<vmem>>, %arg2: memref<1x128xf32, #tpu.memory_space<vmem>>, %arg3: memref<1x128xf32, #tpu.memory_space<vmem>>, %arg4: memref<1x128xf32, #tpu.memory_space<vmem>>, %arg5: memref<128x256xbf16, #tpu.memory_space<vmem>>, %arg6: memref<2x256xbf16, #tpu.memory_space<vmem>>, %arg7: memref<2x64xf32, #tpu.memory_space<vmem>>) attributes {dimension_semantics = [], scalar_prefetch = 0 : i64, scratch_operands = 0 : i64, tpu.core_type = #tpu.core_type<tc>} {
    %c0 = arith.constant 0 : index
    %c0_0 = arith.constant 0 : index
    %0 = vector.load %arg0[%c0, %c0_0] : memref<2x16xf32, #tpu.memory_space<vmem>>, vector<2x16xf32>
    %1 = arith.truncf %0 : vector<2x16xf32> to vector<2x16xbf16>
    %c0_1 = arith.constant 0 : index
    %c0_2 = arith.constant 0 : index
    %2 = vector.load %arg1[%c0_1, %c0_2] : memref<16x128xbf16, #tpu.memory_space<vmem>>, vector<16x128xbf16>
    %cst = arith.constant dense<0.000000e+00> : vector<2x128xf32>
    %3 = tpu.matmul %1, %2, %cst {dimension_numbers = #tpu.dot_dimension_numbers<[1], [0], [0], [1], [0, 0, 1, 1], [], []>} : vector<2x16xbf16>, vector<16x128xbf16>, vector<2x128xf32> -> vector<2x128xf32>
    %c0_3 = arith.constant 0 : index
    %c0_4 = arith.constant 0 : index
    %4 = vector.load %arg2[%c0_3, %c0_4] : memref<1x128xf32, #tpu.memory_space<vmem>>, vector<1x128xf32>
    %5 = vector.broadcast %4 : vector<1x128xf32> to vector<2x128xf32>
    %6 = arith.addf %3, %5 : vector<2x128xf32>
    %cst_5 = arith.constant dense<0.000000e+00> : vector<128xf32>
    %7 = vector.multi_reduction <add>, %6, %cst_5 [0] : vector<2x128xf32> to vector<128xf32>
    %8 = vector.shape_cast %7 : vector<128xf32> to vector<1x128xf32>
    %cst_6 = arith.constant 2.000000e+00 : f32
    %9 = vector.broadcast %cst_6 : f32 to vector<1x128xf32>
    %10 = arith.divf %8, %9 : vector<1x128xf32>
    %11 = vector.broadcast %10 : vector<1x128xf32> to vector<2x128xf32>
    %12 = arith.subf %6, %11 : vector<2x128xf32>
    %13 = arith.mulf %12, %12 : vector<2x128xf32>
    %cst_7 = arith.constant dense<0.000000e+00> : vector<128xf32>
    %14 = vector.multi_reduction <add>, %13, %cst_7 [0] : vector<2x128xf32> to vector<128xf32>
    %15 = vector.shape_cast %14 : vector<128xf32> to vector<1x128xf32>
    %cst_8 = arith.constant 2.000000e+00 : f32
    %16 = vector.broadcast %cst_8 : f32 to vector<1x128xf32>
    %17 = arith.divf %15, %16 : vector<1x128xf32>
    %18 = vector.broadcast %10 : vector<1x128xf32> to vector<2x128xf32>
    %19 = arith.subf %6, %18 : vector<2x128xf32>
    %cst_9 = arith.constant 9.99999974E-6 : f32
    %20 = vector.broadcast %cst_9 : f32 to vector<1x128xf32>
    %21 = arith.addf %17, %20 : vector<1x128xf32>
    %22 = math.rsqrt %21 : vector<1x128xf32>
    %23 = vector.broadcast %22 : vector<1x128xf32> to vector<2x128xf32>
    %24 = arith.mulf %19, %23 : vector<2x128xf32>
    %c0_10 = arith.constant 0 : index
    %c0_11 = arith.constant 0 : index
    %25 = vector.load %arg3[%c0_10, %c0_11] : memref<1x128xf32, #tpu.memory_space<vmem>>, vector<1x128xf32>
    %26 = vector.broadcast %25 : vector<1x128xf32> to vector<2x128xf32>
    %27 = arith.mulf %24, %26 : vector<2x128xf32>
    %c0_12 = arith.constant 0 : index
    %c0_13 = arith.constant 0 : index
    %28 = vector.load %arg4[%c0_12, %c0_13] : memref<1x128xf32, #tpu.memory_space<vmem>>, vector<1x128xf32>
    %29 = vector.broadcast %28 : vector<1x128xf32> to vector<2x128xf32>
    %30 = arith.addf %27, %29 : vector<2x128xf32>
    %cst_14 = arith.constant 0.000000e+00 : f32
    %31 = vector.broadcast %cst_14 : f32 to vector<2x128xf32>
    %32 = arith.maximumf %30, %31 : vector<2x128xf32>
    %33 = arith.truncf %32 : vector<2x128xf32> to vector<2x128xbf16>
    %c0_15 = arith.constant 0 : index
    %c0_16 = arith.constant 0 : index
    %34 = vector.load %arg5[%c0_15, %c0_16] : memref<128x256xbf16, #tpu.memory_space<vmem>>, vector<128x256xbf16>
    %cst_17 = arith.constant dense<0.000000e+00> : vector<2x256xf32>
    %35 = tpu.matmul %33, %34, %cst_17 {dimension_numbers = #tpu.dot_dimension_numbers<[1], [0], [0], [1], [0, 0, 1, 1], [], []>} : vector<2x128xbf16>, vector<128x256xbf16>, vector<2x256xf32> -> vector<2x256xf32>
    %36 = arith.truncf %35 : vector<2x256xf32> to vector<2x256xbf16>
    %c0_18 = arith.constant 0 : index
    %c0_19 = arith.constant 0 : index
    %37 = vector.load %arg6[%c0_18, %c0_19] : memref<2x256xbf16, #tpu.memory_space<vmem>>, vector<2x256xbf16>
    tpu.vector_store %arg6[%c0_18, %c0_19], %36 {strides = array<i32>} : memref<2x256xbf16, #tpu.memory_space<vmem>>, vector<2x256xbf16>,
    %38 = vector.extract_strided_slice %35 {offsets = [0, 0], sizes = [2, 64], strides = [1, 1]} : vector<2x256xf32> to vector<2x64xf32>
    %39 = vector.extract_strided_slice %35 {offsets = [0, 64], sizes = [2, 64], strides = [1, 1]} : vector<2x256xf32> to vector<2x64xf32>
    %40 = vector.extract_strided_slice %35 {offsets = [0, 128], sizes = [2, 64], strides = [1, 1]} : vector<2x256xf32> to vector<2x64xf32>
    %41 = vector.extract_strided_slice %35 {offsets = [0, 192], sizes = [2, 64], strides = [1, 1]} : vector<2x256xf32> to vector<2x64xf32>
    %cst_20 = arith.constant dense<0.000000e+00> : vector<64xf32>
    %42 = vector.multi_reduction <add>, %38, %cst_20 [0] : vector<2x64xf32> to vector<64xf32>
    %43 = vector.shape_cast %42 : vector<64xf32> to vector<1x64xf32>
    %cst_21 = arith.constant 2.000000e+00 : f32
    %44 = vector.broadcast %cst_21 : f32 to vector<1x64xf32>
    %45 = arith.divf %43, %44 : vector<1x64xf32>
    %cst_22 = arith.constant dense<0.000000e+00> : vector<64xf32>
    %46 = vector.multi_reduction <add>, %39, %cst_22 [0] : vector<2x64xf32> to vector<64xf32>
    %47 = vector.shape_cast %46 : vector<64xf32> to vector<1x64xf32>
    %cst_23 = arith.constant 2.000000e+00 : f32
    %48 = vector.broadcast %cst_23 : f32 to vector<1x64xf32>
    %49 = arith.divf %47, %48 : vector<1x64xf32>
    %cst_24 = arith.constant dense<0.000000e+00> : vector<64xf32>
    %50 = vector.multi_reduction <add>, %40, %cst_24 [0] : vector<2x64xf32> to vector<64xf32>
    %51 = vector.shape_cast %50 : vector<64xf32> to vector<1x64xf32>
    %cst_25 = arith.constant 2.000000e+00 : f32
    %52 = vector.broadcast %cst_25 : f32 to vector<1x64xf32>
    %53 = arith.divf %51, %52 : vector<1x64xf32>
    %cst_26 = arith.constant dense<0.000000e+00> : vector<64xf32>
    %54 = vector.multi_reduction <add>, %41, %cst_26 [0] : vector<2x64xf32> to vector<64xf32>
    %55 = vector.shape_cast %54 : vector<64xf32> to vector<1x64xf32>
    %cst_27 = arith.constant 2.000000e+00 : f32
    %56 = vector.broadcast %cst_27 : f32 to vector<1x64xf32>
    %57 = arith.divf %55, %56 : vector<1x64xf32>
    %58 = vector.broadcast %45 : vector<1x64xf32> to vector<2x64xf32>
    %59 = arith.subf %38, %58 : vector<2x64xf32>
    %60 = arith.mulf %59, %59 : vector<2x64xf32>
    %cst_28 = arith.constant dense<0.000000e+00> : vector<64xf32>
    %61 = vector.multi_reduction <add>, %60, %cst_28 [0] : vector<2x64xf32> to vector<64xf32>
    %62 = vector.shape_cast %61 : vector<64xf32> to vector<1x64xf32>
    %63 = vector.broadcast %49 : vector<1x64xf32> to vector<2x64xf32>
    %64 = arith.subf %39, %63 : vector<2x64xf32>
    %65 = arith.mulf %64, %64 : vector<2x64xf32>
    %cst_29 = arith.constant dense<0.000000e+00> : vector<64xf32>
    %66 = vector.multi_reduction <add>, %65, %cst_29 [0] : vector<2x64xf32> to vector<64xf32>
    %67 = vector.shape_cast %66 : vector<64xf32> to vector<1x64xf32>
    %68 = vector.broadcast %53 : vector<1x64xf32> to vector<2x64xf32>
    %69 = arith.subf %40, %68 : vector<2x64xf32>
    %70 = arith.mulf %69, %69 : vector<2x64xf32>
    %cst_30 = arith.constant dense<0.000000e+00> : vector<64xf32>
    %71 = vector.multi_reduction <add>, %70, %cst_30 [0] : vector<2x64xf32> to vector<64xf32>
    %72 = vector.shape_cast %71 : vector<64xf32> to vector<1x64xf32>
    %73 = vector.broadcast %57 : vector<1x64xf32> to vector<2x64xf32>
    %74 = arith.subf %41, %73 : vector<2x64xf32>
    %75 = arith.mulf %74, %74 : vector<2x64xf32>
    %cst_31 = arith.constant dense<0.000000e+00> : vector<64xf32>
    %76 = vector.multi_reduction <add>, %75, %cst_31 [0] : vector<2x64xf32> to vector<64xf32>
    %77 = vector.shape_cast %76 : vector<64xf32> to vector<1x64xf32>
    %78 = tpu.concatenate %45, %49, %53, %57 in 0 : vector<1x64xf32>, vector<1x64xf32>, vector<1x64xf32>, vector<1x64xf32> -> vector<4x64xf32>
    %cst_32 = arith.constant dense<0.000000e+00> : vector<64xf32>
    %79 = vector.multi_reduction <add>, %78, %cst_32 [0] : vector<4x64xf32> to vector<64xf32>
    %80 = vector.shape_cast %79 : vector<64xf32> to vector<1x64xf32>
    %cst_33 = arith.constant 4.000000e+00 : f32
    %81 = vector.broadcast %cst_33 : f32 to vector<1x64xf32>
    %82 = arith.divf %80, %81 : vector<1x64xf32>
    %83 = arith.addf %62, %67 : vector<1x64xf32>
    %84 = arith.addf %83, %72 : vector<1x64xf32>
    %85 = arith.addf %84, %77 : vector<1x64xf32>
    %86 = vector.broadcast %82 : vector<1x64xf32> to vector<4x64xf32>
    %87 = arith.subf %78, %86 : vector<4x64xf32>
    %88 = arith.mulf %87, %87 : vector<4x64xf32>
    %cst_34 = arith.constant dense<0.000000e+00> : vector<64xf32>
    %89 = vector.multi_reduction <add>, %88, %cst_34 [0] : vector<4x64xf32> to vector<64xf32>
    %90 = vector.shape_cast %89 : vector<64xf32> to vector<1x64xf32>
    %cst_35 = arith.constant 2.000000e+00 : f32
    %91 = vector.broadcast %cst_35 : f32 to vector<1x64xf32>
    %92 = arith.mulf %91, %90 : vector<1x64xf32>
    %93 = arith.addf %85, %92 : vector<1x64xf32>
    %cst_36 = arith.constant 8.000000e+00 : f32
    %94 = vector.broadcast %cst_36 : f32 to vector<1x64xf32>
    %95 = arith.divf %93, %94 : vector<1x64xf32>
    %96 = tpu.concatenate %82, %95 in 0 : vector<1x64xf32>, vector<1x64xf32> -> vector<2x64xf32>
    %c0_37 = arith.constant 0 : index
    %c0_38 = arith.constant 0 : index
    %97 = vector.load %arg7[%c0_37, %c0_38] : memref<2x64xf32, #tpu.memory_space<vmem>>, vector<2x64xf32>
    tpu.vector_store %arg7[%c0_37, %c0_38], %96 {strides = array<i32>} : memref<2x64xf32, #tpu.memory_space<vmem>>, vector<2x64xf32>,
    return
  }
}

module attributes {stable_mosaic.version = 11 : i64} {
  func.func @_deconv_dense_kernel(%arg0: memref<2x256xbf16, #tpu.memory_space<vmem>>, %arg1: memref<256x512xbf16, #tpu.memory_space<vmem>>, %arg2: memref<1x256xf32, #tpu.memory_space<vmem>>, %arg3: memref<1x256xf32, #tpu.memory_space<vmem>>, %arg4: memref<2x512xbf16, #tpu.memory_space<vmem>>, %arg5: memref<2x32xf32, #tpu.memory_space<vmem>>) attributes {dimension_semantics = [], scalar_prefetch = 0 : i64, scratch_operands = 0 : i64, tpu.core_type = #tpu.core_type<tc>} {
    %c0 = arith.constant 0 : index
    %c0_0 = arith.constant 0 : index
    %0 = vector.load %arg0[%c0, %c0_0] : memref<2x256xbf16, #tpu.memory_space<vmem>>, vector<2x256xbf16>
    %1 = arith.extf %0 : vector<2x256xbf16> to vector<2x256xf32>
    %c0_1 = arith.constant 0 : index
    %c0_2 = arith.constant 0 : index
    %2 = vector.load %arg2[%c0_1, %c0_2] : memref<1x256xf32, #tpu.memory_space<vmem>>, vector<1x256xf32>
    %3 = vector.broadcast %2 : vector<1x256xf32> to vector<2x256xf32>
    %4 = arith.mulf %1, %3 : vector<2x256xf32>
    %c0_3 = arith.constant 0 : index
    %c0_4 = arith.constant 0 : index
    %5 = vector.load %arg3[%c0_3, %c0_4] : memref<1x256xf32, #tpu.memory_space<vmem>>, vector<1x256xf32>
    %6 = vector.broadcast %5 : vector<1x256xf32> to vector<2x256xf32>
    %7 = arith.addf %4, %6 : vector<2x256xf32>
    %cst = arith.constant 0.000000e+00 : f32
    %8 = vector.broadcast %cst : f32 to vector<2x256xf32>
    %9 = arith.cmpf oge, %7, %8 : vector<2x256xf32>
    %cst_5 = arith.constant 5.000000e-02 : f32
    %10 = vector.broadcast %cst_5 : f32 to vector<2x256xf32>
    %11 = arith.mulf %10, %7 : vector<2x256xf32>
    %12 = arith.select %9, %7, %11 : vector<2x256xi1>, vector<2x256xf32>
    %13 = arith.truncf %12 : vector<2x256xf32> to vector<2x256xbf16>
    %c0_6 = arith.constant 0 : index
    %c0_7 = arith.constant 0 : index
    %14 = vector.load %arg1[%c0_6, %c0_7] : memref<256x512xbf16, #tpu.memory_space<vmem>>, vector<256x512xbf16>
    %cst_8 = arith.constant dense<0.000000e+00> : vector<2x512xf32>
    %15 = tpu.matmul %13, %14, %cst_8 {dimension_numbers = #tpu.dot_dimension_numbers<[1], [0], [0], [1], [0, 0, 1, 1], [], []>} : vector<2x256xbf16>, vector<256x512xbf16>, vector<2x512xf32> -> vector<2x512xf32>
    %16 = arith.truncf %15 : vector<2x512xf32> to vector<2x512xbf16>
    %c0_9 = arith.constant 0 : index
    %c0_10 = arith.constant 0 : index
    %17 = vector.load %arg4[%c0_9, %c0_10] : memref<2x512xbf16, #tpu.memory_space<vmem>>, vector<2x512xbf16>
    tpu.vector_store %arg4[%c0_9, %c0_10], %16 {strides = array<i32>} : memref<2x512xbf16, #tpu.memory_space<vmem>>, vector<2x512xbf16>,
    %18 = vector.extract_strided_slice %15 {offsets = [0, 0], sizes = [2, 32], strides = [1, 1]} : vector<2x512xf32> to vector<2x32xf32>
    %19 = vector.extract_strided_slice %15 {offsets = [0, 32], sizes = [2, 32], strides = [1, 1]} : vector<2x512xf32> to vector<2x32xf32>
    %20 = vector.extract_strided_slice %15 {offsets = [0, 64], sizes = [2, 32], strides = [1, 1]} : vector<2x512xf32> to vector<2x32xf32>
    %21 = vector.extract_strided_slice %15 {offsets = [0, 96], sizes = [2, 32], strides = [1, 1]} : vector<2x512xf32> to vector<2x32xf32>
    %22 = vector.extract_strided_slice %15 {offsets = [0, 128], sizes = [2, 32], strides = [1, 1]} : vector<2x512xf32> to vector<2x32xf32>
    %23 = vector.extract_strided_slice %15 {offsets = [0, 160], sizes = [2, 32], strides = [1, 1]} : vector<2x512xf32> to vector<2x32xf32>
    %24 = vector.extract_strided_slice %15 {offsets = [0, 192], sizes = [2, 32], strides = [1, 1]} : vector<2x512xf32> to vector<2x32xf32>
    %25 = vector.extract_strided_slice %15 {offsets = [0, 224], sizes = [2, 32], strides = [1, 1]} : vector<2x512xf32> to vector<2x32xf32>
    %26 = vector.extract_strided_slice %15 {offsets = [0, 256], sizes = [2, 32], strides = [1, 1]} : vector<2x512xf32> to vector<2x32xf32>
    %27 = vector.extract_strided_slice %15 {offsets = [0, 288], sizes = [2, 32], strides = [1, 1]} : vector<2x512xf32> to vector<2x32xf32>
    %28 = vector.extract_strided_slice %15 {offsets = [0, 320], sizes = [2, 32], strides = [1, 1]} : vector<2x512xf32> to vector<2x32xf32>
    %29 = vector.extract_strided_slice %15 {offsets = [0, 352], sizes = [2, 32], strides = [1, 1]} : vector<2x512xf32> to vector<2x32xf32>
    %30 = vector.extract_strided_slice %15 {offsets = [0, 384], sizes = [2, 32], strides = [1, 1]} : vector<2x512xf32> to vector<2x32xf32>
    %31 = vector.extract_strided_slice %15 {offsets = [0, 416], sizes = [2, 32], strides = [1, 1]} : vector<2x512xf32> to vector<2x32xf32>
    %32 = vector.extract_strided_slice %15 {offsets = [0, 448], sizes = [2, 32], strides = [1, 1]} : vector<2x512xf32> to vector<2x32xf32>
    %33 = vector.extract_strided_slice %15 {offsets = [0, 480], sizes = [2, 32], strides = [1, 1]} : vector<2x512xf32> to vector<2x32xf32>
    %cst_11 = arith.constant dense<0.000000e+00> : vector<32xf32>
    %34 = vector.multi_reduction <add>, %18, %cst_11 [0] : vector<2x32xf32> to vector<32xf32>
    %35 = vector.shape_cast %34 : vector<32xf32> to vector<1x32xf32>
    %cst_12 = arith.constant 2.000000e+00 : f32
    %36 = vector.broadcast %cst_12 : f32 to vector<1x32xf32>
    %37 = arith.divf %35, %36 : vector<1x32xf32>
    %cst_13 = arith.constant dense<0.000000e+00> : vector<32xf32>
    %38 = vector.multi_reduction <add>, %19, %cst_13 [0] : vector<2x32xf32> to vector<32xf32>
    %39 = vector.shape_cast %38 : vector<32xf32> to vector<1x32xf32>
    %cst_14 = arith.constant 2.000000e+00 : f32
    %40 = vector.broadcast %cst_14 : f32 to vector<1x32xf32>
    %41 = arith.divf %39, %40 : vector<1x32xf32>
    %cst_15 = arith.constant dense<0.000000e+00> : vector<32xf32>
    %42 = vector.multi_reduction <add>, %20, %cst_15 [0] : vector<2x32xf32> to vector<32xf32>
    %43 = vector.shape_cast %42 : vector<32xf32> to vector<1x32xf32>
    %cst_16 = arith.constant 2.000000e+00 : f32
    %44 = vector.broadcast %cst_16 : f32 to vector<1x32xf32>
    %45 = arith.divf %43, %44 : vector<1x32xf32>
    %cst_17 = arith.constant dense<0.000000e+00> : vector<32xf32>
    %46 = vector.multi_reduction <add>, %21, %cst_17 [0] : vector<2x32xf32> to vector<32xf32>
    %47 = vector.shape_cast %46 : vector<32xf32> to vector<1x32xf32>
    %cst_18 = arith.constant 2.000000e+00 : f32
    %48 = vector.broadcast %cst_18 : f32 to vector<1x32xf32>
    %49 = arith.divf %47, %48 : vector<1x32xf32>
    %cst_19 = arith.constant dense<0.000000e+00> : vector<32xf32>
    %50 = vector.multi_reduction <add>, %22, %cst_19 [0] : vector<2x32xf32> to vector<32xf32>
    %51 = vector.shape_cast %50 : vector<32xf32> to vector<1x32xf32>
    %cst_20 = arith.constant 2.000000e+00 : f32
    %52 = vector.broadcast %cst_20 : f32 to vector<1x32xf32>
    %53 = arith.divf %51, %52 : vector<1x32xf32>
    %cst_21 = arith.constant dense<0.000000e+00> : vector<32xf32>
    %54 = vector.multi_reduction <add>, %23, %cst_21 [0] : vector<2x32xf32> to vector<32xf32>
    %55 = vector.shape_cast %54 : vector<32xf32> to vector<1x32xf32>
    %cst_22 = arith.constant 2.000000e+00 : f32
    %56 = vector.broadcast %cst_22 : f32 to vector<1x32xf32>
    %57 = arith.divf %55, %56 : vector<1x32xf32>
    %cst_23 = arith.constant dense<0.000000e+00> : vector<32xf32>
    %58 = vector.multi_reduction <add>, %24, %cst_23 [0] : vector<2x32xf32> to vector<32xf32>
    %59 = vector.shape_cast %58 : vector<32xf32> to vector<1x32xf32>
    %cst_24 = arith.constant 2.000000e+00 : f32
    %60 = vector.broadcast %cst_24 : f32 to vector<1x32xf32>
    %61 = arith.divf %59, %60 : vector<1x32xf32>
    %cst_25 = arith.constant dense<0.000000e+00> : vector<32xf32>
    %62 = vector.multi_reduction <add>, %25, %cst_25 [0] : vector<2x32xf32> to vector<32xf32>
    %63 = vector.shape_cast %62 : vector<32xf32> to vector<1x32xf32>
    %cst_26 = arith.constant 2.000000e+00 : f32
    %64 = vector.broadcast %cst_26 : f32 to vector<1x32xf32>
    %65 = arith.divf %63, %64 : vector<1x32xf32>
    %cst_27 = arith.constant dense<0.000000e+00> : vector<32xf32>
    %66 = vector.multi_reduction <add>, %26, %cst_27 [0] : vector<2x32xf32> to vector<32xf32>
    %67 = vector.shape_cast %66 : vector<32xf32> to vector<1x32xf32>
    %cst_28 = arith.constant 2.000000e+00 : f32
    %68 = vector.broadcast %cst_28 : f32 to vector<1x32xf32>
    %69 = arith.divf %67, %68 : vector<1x32xf32>
    %cst_29 = arith.constant dense<0.000000e+00> : vector<32xf32>
    %70 = vector.multi_reduction <add>, %27, %cst_29 [0] : vector<2x32xf32> to vector<32xf32>
    %71 = vector.shape_cast %70 : vector<32xf32> to vector<1x32xf32>
    %cst_30 = arith.constant 2.000000e+00 : f32
    %72 = vector.broadcast %cst_30 : f32 to vector<1x32xf32>
    %73 = arith.divf %71, %72 : vector<1x32xf32>
    %cst_31 = arith.constant dense<0.000000e+00> : vector<32xf32>
    %74 = vector.multi_reduction <add>, %28, %cst_31 [0] : vector<2x32xf32> to vector<32xf32>
    %75 = vector.shape_cast %74 : vector<32xf32> to vector<1x32xf32>
    %cst_32 = arith.constant 2.000000e+00 : f32
    %76 = vector.broadcast %cst_32 : f32 to vector<1x32xf32>
    %77 = arith.divf %75, %76 : vector<1x32xf32>
    %cst_33 = arith.constant dense<0.000000e+00> : vector<32xf32>
    %78 = vector.multi_reduction <add>, %29, %cst_33 [0] : vector<2x32xf32> to vector<32xf32>
    %79 = vector.shape_cast %78 : vector<32xf32> to vector<1x32xf32>
    %cst_34 = arith.constant 2.000000e+00 : f32
    %80 = vector.broadcast %cst_34 : f32 to vector<1x32xf32>
    %81 = arith.divf %79, %80 : vector<1x32xf32>
    %cst_35 = arith.constant dense<0.000000e+00> : vector<32xf32>
    %82 = vector.multi_reduction <add>, %30, %cst_35 [0] : vector<2x32xf32> to vector<32xf32>
    %83 = vector.shape_cast %82 : vector<32xf32> to vector<1x32xf32>
    %cst_36 = arith.constant 2.000000e+00 : f32
    %84 = vector.broadcast %cst_36 : f32 to vector<1x32xf32>
    %85 = arith.divf %83, %84 : vector<1x32xf32>
    %cst_37 = arith.constant dense<0.000000e+00> : vector<32xf32>
    %86 = vector.multi_reduction <add>, %31, %cst_37 [0] : vector<2x32xf32> to vector<32xf32>
    %87 = vector.shape_cast %86 : vector<32xf32> to vector<1x32xf32>
    %cst_38 = arith.constant 2.000000e+00 : f32
    %88 = vector.broadcast %cst_38 : f32 to vector<1x32xf32>
    %89 = arith.divf %87, %88 : vector<1x32xf32>
    %cst_39 = arith.constant dense<0.000000e+00> : vector<32xf32>
    %90 = vector.multi_reduction <add>, %32, %cst_39 [0] : vector<2x32xf32> to vector<32xf32>
    %91 = vector.shape_cast %90 : vector<32xf32> to vector<1x32xf32>
    %cst_40 = arith.constant 2.000000e+00 : f32
    %92 = vector.broadcast %cst_40 : f32 to vector<1x32xf32>
    %93 = arith.divf %91, %92 : vector<1x32xf32>
    %cst_41 = arith.constant dense<0.000000e+00> : vector<32xf32>
    %94 = vector.multi_reduction <add>, %33, %cst_41 [0] : vector<2x32xf32> to vector<32xf32>
    %95 = vector.shape_cast %94 : vector<32xf32> to vector<1x32xf32>
    %cst_42 = arith.constant 2.000000e+00 : f32
    %96 = vector.broadcast %cst_42 : f32 to vector<1x32xf32>
    %97 = arith.divf %95, %96 : vector<1x32xf32>
    %98 = vector.broadcast %37 : vector<1x32xf32> to vector<2x32xf32>
    %99 = arith.subf %18, %98 : vector<2x32xf32>
    %100 = arith.mulf %99, %99 : vector<2x32xf32>
    %cst_43 = arith.constant dense<0.000000e+00> : vector<32xf32>
    %101 = vector.multi_reduction <add>, %100, %cst_43 [0] : vector<2x32xf32> to vector<32xf32>
    %102 = vector.shape_cast %101 : vector<32xf32> to vector<1x32xf32>
    %103 = vector.broadcast %41 : vector<1x32xf32> to vector<2x32xf32>
    %104 = arith.subf %19, %103 : vector<2x32xf32>
    %105 = arith.mulf %104, %104 : vector<2x32xf32>
    %cst_44 = arith.constant dense<0.000000e+00> : vector<32xf32>
    %106 = vector.multi_reduction <add>, %105, %cst_44 [0] : vector<2x32xf32> to vector<32xf32>
    %107 = vector.shape_cast %106 : vector<32xf32> to vector<1x32xf32>
    %108 = vector.broadcast %45 : vector<1x32xf32> to vector<2x32xf32>
    %109 = arith.subf %20, %108 : vector<2x32xf32>
    %110 = arith.mulf %109, %109 : vector<2x32xf32>
    %cst_45 = arith.constant dense<0.000000e+00> : vector<32xf32>
    %111 = vector.multi_reduction <add>, %110, %cst_45 [0] : vector<2x32xf32> to vector<32xf32>
    %112 = vector.shape_cast %111 : vector<32xf32> to vector<1x32xf32>
    %113 = vector.broadcast %49 : vector<1x32xf32> to vector<2x32xf32>
    %114 = arith.subf %21, %113 : vector<2x32xf32>
    %115 = arith.mulf %114, %114 : vector<2x32xf32>
    %cst_46 = arith.constant dense<0.000000e+00> : vector<32xf32>
    %116 = vector.multi_reduction <add>, %115, %cst_46 [0] : vector<2x32xf32> to vector<32xf32>
    %117 = vector.shape_cast %116 : vector<32xf32> to vector<1x32xf32>
    %118 = vector.broadcast %53 : vector<1x32xf32> to vector<2x32xf32>
    %119 = arith.subf %22, %118 : vector<2x32xf32>
    %120 = arith.mulf %119, %119 : vector<2x32xf32>
    %cst_47 = arith.constant dense<0.000000e+00> : vector<32xf32>
    %121 = vector.multi_reduction <add>, %120, %cst_47 [0] : vector<2x32xf32> to vector<32xf32>
    %122 = vector.shape_cast %121 : vector<32xf32> to vector<1x32xf32>
    %123 = vector.broadcast %57 : vector<1x32xf32> to vector<2x32xf32>
    %124 = arith.subf %23, %123 : vector<2x32xf32>
    %125 = arith.mulf %124, %124 : vector<2x32xf32>
    %cst_48 = arith.constant dense<0.000000e+00> : vector<32xf32>
    %126 = vector.multi_reduction <add>, %125, %cst_48 [0] : vector<2x32xf32> to vector<32xf32>
    %127 = vector.shape_cast %126 : vector<32xf32> to vector<1x32xf32>
    %128 = vector.broadcast %61 : vector<1x32xf32> to vector<2x32xf32>
    %129 = arith.subf %24, %128 : vector<2x32xf32>
    %130 = arith.mulf %129, %129 : vector<2x32xf32>
    %cst_49 = arith.constant dense<0.000000e+00> : vector<32xf32>
    %131 = vector.multi_reduction <add>, %130, %cst_49 [0] : vector<2x32xf32> to vector<32xf32>
    %132 = vector.shape_cast %131 : vector<32xf32> to vector<1x32xf32>
    %133 = vector.broadcast %65 : vector<1x32xf32> to vector<2x32xf32>
    %134 = arith.subf %25, %133 : vector<2x32xf32>
    %135 = arith.mulf %134, %134 : vector<2x32xf32>
    %cst_50 = arith.constant dense<0.000000e+00> : vector<32xf32>
    %136 = vector.multi_reduction <add>, %135, %cst_50 [0] : vector<2x32xf32> to vector<32xf32>
    %137 = vector.shape_cast %136 : vector<32xf32> to vector<1x32xf32>
    %138 = vector.broadcast %69 : vector<1x32xf32> to vector<2x32xf32>
    %139 = arith.subf %26, %138 : vector<2x32xf32>
    %140 = arith.mulf %139, %139 : vector<2x32xf32>
    %cst_51 = arith.constant dense<0.000000e+00> : vector<32xf32>
    %141 = vector.multi_reduction <add>, %140, %cst_51 [0] : vector<2x32xf32> to vector<32xf32>
    %142 = vector.shape_cast %141 : vector<32xf32> to vector<1x32xf32>
    %143 = vector.broadcast %73 : vector<1x32xf32> to vector<2x32xf32>
    %144 = arith.subf %27, %143 : vector<2x32xf32>
    %145 = arith.mulf %144, %144 : vector<2x32xf32>
    %cst_52 = arith.constant dense<0.000000e+00> : vector<32xf32>
    %146 = vector.multi_reduction <add>, %145, %cst_52 [0] : vector<2x32xf32> to vector<32xf32>
    %147 = vector.shape_cast %146 : vector<32xf32> to vector<1x32xf32>
    %148 = vector.broadcast %77 : vector<1x32xf32> to vector<2x32xf32>
    %149 = arith.subf %28, %148 : vector<2x32xf32>
    %150 = arith.mulf %149, %149 : vector<2x32xf32>
    %cst_53 = arith.constant dense<0.000000e+00> : vector<32xf32>
    %151 = vector.multi_reduction <add>, %150, %cst_53 [0] : vector<2x32xf32> to vector<32xf32>
    %152 = vector.shape_cast %151 : vector<32xf32> to vector<1x32xf32>
    %153 = vector.broadcast %81 : vector<1x32xf32> to vector<2x32xf32>
    %154 = arith.subf %29, %153 : vector<2x32xf32>
    %155 = arith.mulf %154, %154 : vector<2x32xf32>
    %cst_54 = arith.constant dense<0.000000e+00> : vector<32xf32>
    %156 = vector.multi_reduction <add>, %155, %cst_54 [0] : vector<2x32xf32> to vector<32xf32>
    %157 = vector.shape_cast %156 : vector<32xf32> to vector<1x32xf32>
    %158 = vector.broadcast %85 : vector<1x32xf32> to vector<2x32xf32>
    %159 = arith.subf %30, %158 : vector<2x32xf32>
    %160 = arith.mulf %159, %159 : vector<2x32xf32>
    %cst_55 = arith.constant dense<0.000000e+00> : vector<32xf32>
    %161 = vector.multi_reduction <add>, %160, %cst_55 [0] : vector<2x32xf32> to vector<32xf32>
    %162 = vector.shape_cast %161 : vector<32xf32> to vector<1x32xf32>
    %163 = vector.broadcast %89 : vector<1x32xf32> to vector<2x32xf32>
    %164 = arith.subf %31, %163 : vector<2x32xf32>
    %165 = arith.mulf %164, %164 : vector<2x32xf32>
    %cst_56 = arith.constant dense<0.000000e+00> : vector<32xf32>
    %166 = vector.multi_reduction <add>, %165, %cst_56 [0] : vector<2x32xf32> to vector<32xf32>
    %167 = vector.shape_cast %166 : vector<32xf32> to vector<1x32xf32>
    %168 = vector.broadcast %93 : vector<1x32xf32> to vector<2x32xf32>
    %169 = arith.subf %32, %168 : vector<2x32xf32>
    %170 = arith.mulf %169, %169 : vector<2x32xf32>
    %cst_57 = arith.constant dense<0.000000e+00> : vector<32xf32>
    %171 = vector.multi_reduction <add>, %170, %cst_57 [0] : vector<2x32xf32> to vector<32xf32>
    %172 = vector.shape_cast %171 : vector<32xf32> to vector<1x32xf32>
    %173 = vector.broadcast %97 : vector<1x32xf32> to vector<2x32xf32>
    %174 = arith.subf %33, %173 : vector<2x32xf32>
    %175 = arith.mulf %174, %174 : vector<2x32xf32>
    %cst_58 = arith.constant dense<0.000000e+00> : vector<32xf32>
    %176 = vector.multi_reduction <add>, %175, %cst_58 [0] : vector<2x32xf32> to vector<32xf32>
    %177 = vector.shape_cast %176 : vector<32xf32> to vector<1x32xf32>
    %178 = tpu.concatenate %37, %41, %45, %49, %53, %57, %61, %65, %69, %73, %77, %81, %85, %89, %93, %97 in 0 : vector<1x32xf32>, vector<1x32xf32>, vector<1x32xf32>, vector<1x32xf32>, vector<1x32xf32>, vector<1x32xf32>, vector<1x32xf32>, vector<1x32xf32>, vector<1x32xf32>, vector<1x32xf32>, vector<1x32xf32>, vector<1x32xf32>, vector<1x32xf32>, vector<1x32xf32>, vector<1x32xf32>, vector<1x32xf32> -> vector<16x32xf32>
    %cst_59 = arith.constant dense<0.000000e+00> : vector<32xf32>
    %179 = vector.multi_reduction <add>, %178, %cst_59 [0] : vector<16x32xf32> to vector<32xf32>
    %180 = vector.shape_cast %179 : vector<32xf32> to vector<1x32xf32>
    %cst_60 = arith.constant 1.600000e+01 : f32
    %181 = vector.broadcast %cst_60 : f32 to vector<1x32xf32>
    %182 = arith.divf %180, %181 : vector<1x32xf32>
    %183 = arith.addf %102, %107 : vector<1x32xf32>
    %184 = arith.addf %183, %112 : vector<1x32xf32>
    %185 = arith.addf %184, %117 : vector<1x32xf32>
    %186 = arith.addf %185, %122 : vector<1x32xf32>
    %187 = arith.addf %186, %127 : vector<1x32xf32>
    %188 = arith.addf %187, %132 : vector<1x32xf32>
    %189 = arith.addf %188, %137 : vector<1x32xf32>
    %190 = arith.addf %189, %142 : vector<1x32xf32>
    %191 = arith.addf %190, %147 : vector<1x32xf32>
    %192 = arith.addf %191, %152 : vector<1x32xf32>
    %193 = arith.addf %192, %157 : vector<1x32xf32>
    %194 = arith.addf %193, %162 : vector<1x32xf32>
    %195 = arith.addf %194, %167 : vector<1x32xf32>
    %196 = arith.addf %195, %172 : vector<1x32xf32>
    %197 = arith.addf %196, %177 : vector<1x32xf32>
    %198 = vector.broadcast %182 : vector<1x32xf32> to vector<16x32xf32>
    %199 = arith.subf %178, %198 : vector<16x32xf32>
    %200 = arith.mulf %199, %199 : vector<16x32xf32>
    %cst_61 = arith.constant dense<0.000000e+00> : vector<32xf32>
    %201 = vector.multi_reduction <add>, %200, %cst_61 [0] : vector<16x32xf32> to vector<32xf32>
    %202 = vector.shape_cast %201 : vector<32xf32> to vector<1x32xf32>
    %cst_62 = arith.constant 2.000000e+00 : f32
    %203 = vector.broadcast %cst_62 : f32 to vector<1x32xf32>
    %204 = arith.mulf %203, %202 : vector<1x32xf32>
    %205 = arith.addf %197, %204 : vector<1x32xf32>
    %cst_63 = arith.constant 3.200000e+01 : f32
    %206 = vector.broadcast %cst_63 : f32 to vector<1x32xf32>
    %207 = arith.divf %205, %206 : vector<1x32xf32>
    %208 = tpu.concatenate %182, %207 in 0 : vector<1x32xf32>, vector<1x32xf32> -> vector<2x32xf32>
    %c0_64 = arith.constant 0 : index
    %c0_65 = arith.constant 0 : index
    %209 = vector.load %arg5[%c0_64, %c0_65] : memref<2x32xf32, #tpu.memory_space<vmem>>, vector<2x32xf32>
    tpu.vector_store %arg5[%c0_64, %c0_65], %208 {strides = array<i32>} : memref<2x32xf32, #tpu.memory_space<vmem>>, vector<2x32xf32>,
    return
  }
}

module attributes {stable_mosaic.version = 11 : i64} {
  func.func @_deconv_sub_kernel(%arg0: i32, %arg1: memref<1x4x4x32xbf16, #tpu.memory_space<vmem>>, %arg2: memref<4x128x64xbf16, #tpu.memory_space<vmem>>, %arg3: memref<1x32xf32, #tpu.memory_space<vmem>>, %arg4: memref<1x32xf32, #tpu.memory_space<vmem>>, %arg5: memref<1x4x2x4x128xbf16, #tpu.memory_space<vmem>>, %arg6: memref<1x2x64xf32, #tpu.memory_space<vmem>>) attributes {dimension_semantics = [#tpu.dimension_semantics<parallel>], iteration_bounds = array<i64: 2>, scalar_prefetch = 0 : i64, scratch_operands = 0 : i64, tpu.core_type = #tpu.core_type<tc>, window_params = [{transform_indices = @transform_0, window_bounds = array<i64: 1, 4, 4, 32>}, {pipeline_mode = #tpu.pipeline_mode<synchronous>, transform_indices = @transform_1, window_bounds = array<i64: 4, 128, 64>}, {pipeline_mode = #tpu.pipeline_mode<synchronous>, transform_indices = @transform_2, window_bounds = array<i64: 1, 32>}, {pipeline_mode = #tpu.pipeline_mode<synchronous>, transform_indices = @transform_3, window_bounds = array<i64: 1, 32>}, {transform_indices = @transform_4, window_bounds = array<i64: 1, 4, 2, 4, 128>}, {transform_indices = @transform_5, window_bounds = array<i64: 1, 2, 64>}]} {
    %c0 = arith.constant 0 : index
    %c0_0 = arith.constant 0 : index
    %c0_1 = arith.constant 0 : index
    %c0_2 = arith.constant 0 : index
    %0 = vector.load %arg1[%c0, %c0_0, %c0_1, %c0_2] : memref<1x4x4x32xbf16, #tpu.memory_space<vmem>>, vector<1x4x4x32xbf16>
    %1 = arith.extf %0 : vector<1x4x4x32xbf16> to vector<1x4x4x32xf32>
    %c0_3 = arith.constant 0 : index
    %c0_4 = arith.constant 0 : index
    %2 = vector.load %arg3[%c0_3, %c0_4] : memref<1x32xf32, #tpu.memory_space<vmem>>, vector<1x32xf32>
    %3 = vector.shape_cast %2 : vector<1x32xf32> to vector<1x1x1x32xf32>
    %4 = vector.broadcast %3 : vector<1x1x1x32xf32> to vector<1x4x4x32xf32>
    %5 = arith.mulf %1, %4 : vector<1x4x4x32xf32>
    %c0_5 = arith.constant 0 : index
    %c0_6 = arith.constant 0 : index
    %6 = vector.load %arg4[%c0_5, %c0_6] : memref<1x32xf32, #tpu.memory_space<vmem>>, vector<1x32xf32>
    %7 = vector.shape_cast %6 : vector<1x32xf32> to vector<1x1x1x32xf32>
    %8 = vector.broadcast %7 : vector<1x1x1x32xf32> to vector<1x4x4x32xf32>
    %9 = arith.addf %5, %8 : vector<1x4x4x32xf32>
    %cst = arith.constant 0.000000e+00 : f32
    %10 = vector.broadcast %cst : f32 to vector<1x4x4x32xf32>
    %11 = arith.cmpf oge, %9, %10 : vector<1x4x4x32xf32>
    %cst_7 = arith.constant 5.000000e-02 : f32
    %12 = vector.broadcast %cst_7 : f32 to vector<1x4x4x32xf32>
    %13 = arith.mulf %12, %9 : vector<1x4x4x32xf32>
    %14 = arith.select %11, %9, %13 : vector<1x4x4x32xi1>, vector<1x4x4x32xf32>
    %15 = arith.truncf %14 : vector<1x4x4x32xf32> to vector<1x4x4x32xbf16>
    %cst_8 = arith.constant 0.000000e+00 : bf16
    %16 = vector.broadcast %cst_8 : bf16 to vector<1x1x4x32xbf16>
    %17 = tpu.concatenate %16, %15, %16 in 1 : vector<1x1x4x32xbf16>, vector<1x4x4x32xbf16>, vector<1x1x4x32xbf16> -> vector<1x6x4x32xbf16>
    %cst_9 = arith.constant 0.000000e+00 : bf16
    %18 = vector.broadcast %cst_9 : bf16 to vector<1x6x1x32xbf16>
    %19 = tpu.concatenate %18, %17, %18 in 2 : vector<1x6x1x32xbf16>, vector<1x6x4x32xbf16>, vector<1x6x1x32xbf16> -> vector<1x6x6x32xbf16>
    %20 = vector.extract_strided_slice %19 {offsets = [0, 0, 0, 0], sizes = [1, 4, 4, 32], strides = [1, 1, 1, 1]} : vector<1x6x6x32xbf16> to vector<1x4x4x32xbf16>
    %21 = vector.extract_strided_slice %19 {offsets = [0, 0, 1, 0], sizes = [1, 4, 4, 32], strides = [1, 1, 1, 1]} : vector<1x6x6x32xbf16> to vector<1x4x4x32xbf16>
    %22 = vector.extract_strided_slice %19 {offsets = [0, 1, 0, 0], sizes = [1, 4, 4, 32], strides = [1, 1, 1, 1]} : vector<1x6x6x32xbf16> to vector<1x4x4x32xbf16>
    %23 = vector.extract_strided_slice %19 {offsets = [0, 1, 1, 0], sizes = [1, 4, 4, 32], strides = [1, 1, 1, 1]} : vector<1x6x6x32xbf16> to vector<1x4x4x32xbf16>
    %24 = tpu.concatenate %20, %21, %22, %23 in 3 : vector<1x4x4x32xbf16>, vector<1x4x4x32xbf16>, vector<1x4x4x32xbf16>, vector<1x4x4x32xbf16> -> vector<1x4x4x128xbf16>
    %25 = vector.extract_strided_slice %24 {offsets = [0, 0, 0, 0], sizes = [1, 1, 4, 128], strides = [1, 1, 1, 1]} : vector<1x4x4x128xbf16> to vector<1x1x4x128xbf16>
    %26 = vector.shape_cast %25 : vector<1x1x4x128xbf16> to vector<1x4x128xbf16>
    %27 = vector.extract_strided_slice %24 {offsets = [0, 1, 0, 0], sizes = [1, 1, 4, 128], strides = [1, 1, 1, 1]} : vector<1x4x4x128xbf16> to vector<1x1x4x128xbf16>
    %28 = vector.shape_cast %27 : vector<1x1x4x128xbf16> to vector<1x4x128xbf16>
    %29 = vector.extract_strided_slice %24 {offsets = [0, 2, 0, 0], sizes = [1, 1, 4, 128], strides = [1, 1, 1, 1]} : vector<1x4x4x128xbf16> to vector<1x1x4x128xbf16>
    %30 = vector.shape_cast %29 : vector<1x1x4x128xbf16> to vector<1x4x128xbf16>
    %31 = vector.extract_strided_slice %24 {offsets = [0, 3, 0, 0], sizes = [1, 1, 4, 128], strides = [1, 1, 1, 1]} : vector<1x4x4x128xbf16> to vector<1x1x4x128xbf16>
    %32 = vector.shape_cast %31 : vector<1x1x4x128xbf16> to vector<1x4x128xbf16>
    %33 = tpu.concatenate %26, %28, %30, %32 in 1 : vector<1x4x128xbf16>, vector<1x4x128xbf16>, vector<1x4x128xbf16>, vector<1x4x128xbf16> -> vector<1x16x128xbf16>
    %34 = vector.shape_cast %33 : vector<1x16x128xbf16> to vector<16x128xbf16>
    %c0_10 = arith.constant 0 : index
    %c0_11 = arith.constant 0 : index
    %c0_12 = arith.constant 0 : index
    %35 = vector.load %arg2[%c0_10, %c0_11, %c0_12] : memref<4x128x64xbf16, #tpu.memory_space<vmem>>, vector<1x128x64xbf16>
    %36 = vector.shape_cast %35 : vector<1x128x64xbf16> to vector<128x64xbf16>
    %cst_13 = arith.constant dense<0.000000e+00> : vector<16x64xf32>
    %37 = tpu.matmul %34, %36, %cst_13 {dimension_numbers = #tpu.dot_dimension_numbers<[1], [0], [0], [1], [0, 0, 1, 1], [], []>} : vector<16x128xbf16>, vector<128x64xbf16>, vector<16x64xf32> -> vector<16x64xf32>
    %cst_14 = arith.constant dense<0.000000e+00> : vector<64xf32>
    %38 = vector.multi_reduction <add>, %37, %cst_14 [0] : vector<16x64xf32> to vector<64xf32>
    %39 = vector.shape_cast %38 : vector<64xf32> to vector<1x64xf32>
    %cst_15 = arith.constant 1.600000e+01 : f32
    %40 = vector.broadcast %cst_15 : f32 to vector<1x64xf32>
    %41 = arith.divf %39, %40 : vector<1x64xf32>
    %42 = vector.broadcast %41 : vector<1x64xf32> to vector<16x64xf32>
    %43 = arith.subf %37, %42 : vector<16x64xf32>
    %44 = arith.mulf %43, %43 : vector<16x64xf32>
    %cst_16 = arith.constant dense<0.000000e+00> : vector<64xf32>
    %45 = vector.multi_reduction <add>, %44, %cst_16 [0] : vector<16x64xf32> to vector<64xf32>
    %46 = vector.shape_cast %45 : vector<64xf32> to vector<1x64xf32>
    %47 = arith.truncf %37 : vector<16x64xf32> to vector<16x64xbf16>
    %48 = vector.extract_strided_slice %19 {offsets = [0, 0, 1, 0], sizes = [1, 4, 4, 32], strides = [1, 1, 1, 1]} : vector<1x6x6x32xbf16> to vector<1x4x4x32xbf16>
    %49 = vector.extract_strided_slice %19 {offsets = [0, 0, 2, 0], sizes = [1, 4, 4, 32], strides = [1, 1, 1, 1]} : vector<1x6x6x32xbf16> to vector<1x4x4x32xbf16>
    %50 = vector.extract_strided_slice %19 {offsets = [0, 1, 1, 0], sizes = [1, 4, 4, 32], strides = [1, 1, 1, 1]} : vector<1x6x6x32xbf16> to vector<1x4x4x32xbf16>
    %51 = vector.extract_strided_slice %19 {offsets = [0, 1, 2, 0], sizes = [1, 4, 4, 32], strides = [1, 1, 1, 1]} : vector<1x6x6x32xbf16> to vector<1x4x4x32xbf16>
    %52 = tpu.concatenate %48, %49, %50, %51 in 3 : vector<1x4x4x32xbf16>, vector<1x4x4x32xbf16>, vector<1x4x4x32xbf16>, vector<1x4x4x32xbf16> -> vector<1x4x4x128xbf16>
    %53 = vector.extract_strided_slice %52 {offsets = [0, 0, 0, 0], sizes = [1, 1, 4, 128], strides = [1, 1, 1, 1]} : vector<1x4x4x128xbf16> to vector<1x1x4x128xbf16>
    %54 = vector.shape_cast %53 : vector<1x1x4x128xbf16> to vector<1x4x128xbf16>
    %55 = vector.extract_strided_slice %52 {offsets = [0, 1, 0, 0], sizes = [1, 1, 4, 128], strides = [1, 1, 1, 1]} : vector<1x4x4x128xbf16> to vector<1x1x4x128xbf16>
    %56 = vector.shape_cast %55 : vector<1x1x4x128xbf16> to vector<1x4x128xbf16>
    %57 = vector.extract_strided_slice %52 {offsets = [0, 2, 0, 0], sizes = [1, 1, 4, 128], strides = [1, 1, 1, 1]} : vector<1x4x4x128xbf16> to vector<1x1x4x128xbf16>
    %58 = vector.shape_cast %57 : vector<1x1x4x128xbf16> to vector<1x4x128xbf16>
    %59 = vector.extract_strided_slice %52 {offsets = [0, 3, 0, 0], sizes = [1, 1, 4, 128], strides = [1, 1, 1, 1]} : vector<1x4x4x128xbf16> to vector<1x1x4x128xbf16>
    %60 = vector.shape_cast %59 : vector<1x1x4x128xbf16> to vector<1x4x128xbf16>
    %61 = tpu.concatenate %54, %56, %58, %60 in 1 : vector<1x4x128xbf16>, vector<1x4x128xbf16>, vector<1x4x128xbf16>, vector<1x4x128xbf16> -> vector<1x16x128xbf16>
    %62 = vector.shape_cast %61 : vector<1x16x128xbf16> to vector<16x128xbf16>
    %c1 = arith.constant 1 : index
    %c0_17 = arith.constant 0 : index
    %c0_18 = arith.constant 0 : index
    %63 = vector.load %arg2[%c1, %c0_17, %c0_18] : memref<4x128x64xbf16, #tpu.memory_space<vmem>>, vector<1x128x64xbf16>
    %64 = vector.shape_cast %63 : vector<1x128x64xbf16> to vector<128x64xbf16>
    %cst_19 = arith.constant dense<0.000000e+00> : vector<16x64xf32>
    %65 = tpu.matmul %62, %64, %cst_19 {dimension_numbers = #tpu.dot_dimension_numbers<[1], [0], [0], [1], [0, 0, 1, 1], [], []>} : vector<16x128xbf16>, vector<128x64xbf16>, vector<16x64xf32> -> vector<16x64xf32>
    %cst_20 = arith.constant dense<0.000000e+00> : vector<64xf32>
    %66 = vector.multi_reduction <add>, %65, %cst_20 [0] : vector<16x64xf32> to vector<64xf32>
    %67 = vector.shape_cast %66 : vector<64xf32> to vector<1x64xf32>
    %cst_21 = arith.constant 1.600000e+01 : f32
    %68 = vector.broadcast %cst_21 : f32 to vector<1x64xf32>
    %69 = arith.divf %67, %68 : vector<1x64xf32>
    %70 = vector.broadcast %69 : vector<1x64xf32> to vector<16x64xf32>
    %71 = arith.subf %65, %70 : vector<16x64xf32>
    %72 = arith.mulf %71, %71 : vector<16x64xf32>
    %cst_22 = arith.constant dense<0.000000e+00> : vector<64xf32>
    %73 = vector.multi_reduction <add>, %72, %cst_22 [0] : vector<16x64xf32> to vector<64xf32>
    %74 = vector.shape_cast %73 : vector<64xf32> to vector<1x64xf32>
    %75 = arith.truncf %65 : vector<16x64xf32> to vector<16x64xbf16>
    %76 = tpu.concatenate %47, %75 in 1 : vector<16x64xbf16>, vector<16x64xbf16> -> vector<16x128xbf16>
    %77 = vector.shape_cast %76 : vector<16x128xbf16> to vector<1x16x128xbf16>
    %78 = vector.extract_strided_slice %77 {offsets = [0, 0, 0], sizes = [1, 4, 128], strides = [1, 1, 1]} : vector<1x16x128xbf16> to vector<1x4x128xbf16>
    %c0_23 = arith.constant 0 : index
    %c0_24 = arith.constant 0 : index
    %c0_25 = arith.constant 0 : index
    %c0_26 = arith.constant 0 : index
    %c0_27 = arith.constant 0 : index
    %79 = vector.load %arg5[%c0_23, %c0_24, %c0_25, %c0_26, %c0_27] : memref<1x4x2x4x128xbf16, #tpu.memory_space<vmem>>, vector<1x1x1x4x128xbf16>
    %80 = vector.shape_cast %79 : vector<1x1x1x4x128xbf16> to vector<1x4x128xbf16>
    %81 = vector.shape_cast %78 : vector<1x4x128xbf16> to vector<1x1x1x4x128xbf16>
    tpu.vector_store %arg5[%c0_23, %c0_24, %c0_25, %c0_26, %c0_27], %81 {strides = array<i32>} : memref<1x4x2x4x128xbf16, #tpu.memory_space<vmem>>, vector<1x1x1x4x128xbf16>,
    %82 = vector.extract_strided_slice %77 {offsets = [0, 4, 0], sizes = [1, 4, 128], strides = [1, 1, 1]} : vector<1x16x128xbf16> to vector<1x4x128xbf16>
    %c0_28 = arith.constant 0 : index
    %c1_29 = arith.constant 1 : index
    %c0_30 = arith.constant 0 : index
    %c0_31 = arith.constant 0 : index
    %c0_32 = arith.constant 0 : index
    %83 = vector.load %arg5[%c0_28, %c1_29, %c0_30, %c0_31, %c0_32] : memref<1x4x2x4x128xbf16, #tpu.memory_space<vmem>>, vector<1x1x1x4x128xbf16>
    %84 = vector.shape_cast %83 : vector<1x1x1x4x128xbf16> to vector<1x4x128xbf16>
    %85 = vector.shape_cast %82 : vector<1x4x128xbf16> to vector<1x1x1x4x128xbf16>
    tpu.vector_store %arg5[%c0_28, %c1_29, %c0_30, %c0_31, %c0_32], %85 {strides = array<i32>} : memref<1x4x2x4x128xbf16, #tpu.memory_space<vmem>>, vector<1x1x1x4x128xbf16>,
    %86 = vector.extract_strided_slice %77 {offsets = [0, 8, 0], sizes = [1, 4, 128], strides = [1, 1, 1]} : vector<1x16x128xbf16> to vector<1x4x128xbf16>
    %c0_33 = arith.constant 0 : index
    %c2 = arith.constant 2 : index
    %c0_34 = arith.constant 0 : index
    %c0_35 = arith.constant 0 : index
    %c0_36 = arith.constant 0 : index
    %87 = vector.load %arg5[%c0_33, %c2, %c0_34, %c0_35, %c0_36] : memref<1x4x2x4x128xbf16, #tpu.memory_space<vmem>>, vector<1x1x1x4x128xbf16>
    %88 = vector.shape_cast %87 : vector<1x1x1x4x128xbf16> to vector<1x4x128xbf16>
    %89 = vector.shape_cast %86 : vector<1x4x128xbf16> to vector<1x1x1x4x128xbf16>
    tpu.vector_store %arg5[%c0_33, %c2, %c0_34, %c0_35, %c0_36], %89 {strides = array<i32>} : memref<1x4x2x4x128xbf16, #tpu.memory_space<vmem>>, vector<1x1x1x4x128xbf16>,
    %90 = vector.extract_strided_slice %77 {offsets = [0, 12, 0], sizes = [1, 4, 128], strides = [1, 1, 1]} : vector<1x16x128xbf16> to vector<1x4x128xbf16>
    %c0_37 = arith.constant 0 : index
    %c3 = arith.constant 3 : index
    %c0_38 = arith.constant 0 : index
    %c0_39 = arith.constant 0 : index
    %c0_40 = arith.constant 0 : index
    %91 = vector.load %arg5[%c0_37, %c3, %c0_38, %c0_39, %c0_40] : memref<1x4x2x4x128xbf16, #tpu.memory_space<vmem>>, vector<1x1x1x4x128xbf16>
    %92 = vector.shape_cast %91 : vector<1x1x1x4x128xbf16> to vector<1x4x128xbf16>
    %93 = vector.shape_cast %90 : vector<1x4x128xbf16> to vector<1x1x1x4x128xbf16>
    tpu.vector_store %arg5[%c0_37, %c3, %c0_38, %c0_39, %c0_40], %93 {strides = array<i32>} : memref<1x4x2x4x128xbf16, #tpu.memory_space<vmem>>, vector<1x1x1x4x128xbf16>,
    %94 = vector.extract_strided_slice %19 {offsets = [0, 1, 0, 0], sizes = [1, 4, 4, 32], strides = [1, 1, 1, 1]} : vector<1x6x6x32xbf16> to vector<1x4x4x32xbf16>
    %95 = vector.extract_strided_slice %19 {offsets = [0, 1, 1, 0], sizes = [1, 4, 4, 32], strides = [1, 1, 1, 1]} : vector<1x6x6x32xbf16> to vector<1x4x4x32xbf16>
    %96 = vector.extract_strided_slice %19 {offsets = [0, 2, 0, 0], sizes = [1, 4, 4, 32], strides = [1, 1, 1, 1]} : vector<1x6x6x32xbf16> to vector<1x4x4x32xbf16>
    %97 = vector.extract_strided_slice %19 {offsets = [0, 2, 1, 0], sizes = [1, 4, 4, 32], strides = [1, 1, 1, 1]} : vector<1x6x6x32xbf16> to vector<1x4x4x32xbf16>
    %98 = tpu.concatenate %94, %95, %96, %97 in 3 : vector<1x4x4x32xbf16>, vector<1x4x4x32xbf16>, vector<1x4x4x32xbf16>, vector<1x4x4x32xbf16> -> vector<1x4x4x128xbf16>
    %99 = vector.extract_strided_slice %98 {offsets = [0, 0, 0, 0], sizes = [1, 1, 4, 128], strides = [1, 1, 1, 1]} : vector<1x4x4x128xbf16> to vector<1x1x4x128xbf16>
    %100 = vector.shape_cast %99 : vector<1x1x4x128xbf16> to vector<1x4x128xbf16>
    %101 = vector.extract_strided_slice %98 {offsets = [0, 1, 0, 0], sizes = [1, 1, 4, 128], strides = [1, 1, 1, 1]} : vector<1x4x4x128xbf16> to vector<1x1x4x128xbf16>
    %102 = vector.shape_cast %101 : vector<1x1x4x128xbf16> to vector<1x4x128xbf16>
    %103 = vector.extract_strided_slice %98 {offsets = [0, 2, 0, 0], sizes = [1, 1, 4, 128], strides = [1, 1, 1, 1]} : vector<1x4x4x128xbf16> to vector<1x1x4x128xbf16>
    %104 = vector.shape_cast %103 : vector<1x1x4x128xbf16> to vector<1x4x128xbf16>
    %105 = vector.extract_strided_slice %98 {offsets = [0, 3, 0, 0], sizes = [1, 1, 4, 128], strides = [1, 1, 1, 1]} : vector<1x4x4x128xbf16> to vector<1x1x4x128xbf16>
    %106 = vector.shape_cast %105 : vector<1x1x4x128xbf16> to vector<1x4x128xbf16>
    %107 = tpu.concatenate %100, %102, %104, %106 in 1 : vector<1x4x128xbf16>, vector<1x4x128xbf16>, vector<1x4x128xbf16>, vector<1x4x128xbf16> -> vector<1x16x128xbf16>
    %108 = vector.shape_cast %107 : vector<1x16x128xbf16> to vector<16x128xbf16>
    %c2_41 = arith.constant 2 : index
    %c0_42 = arith.constant 0 : index
    %c0_43 = arith.constant 0 : index
    %109 = vector.load %arg2[%c2_41, %c0_42, %c0_43] : memref<4x128x64xbf16, #tpu.memory_space<vmem>>, vector<1x128x64xbf16>
    %110 = vector.shape_cast %109 : vector<1x128x64xbf16> to vector<128x64xbf16>
    %cst_44 = arith.constant dense<0.000000e+00> : vector<16x64xf32>
    %111 = tpu.matmul %108, %110, %cst_44 {dimension_numbers = #tpu.dot_dimension_numbers<[1], [0], [0], [1], [0, 0, 1, 1], [], []>} : vector<16x128xbf16>, vector<128x64xbf16>, vector<16x64xf32> -> vector<16x64xf32>
    %cst_45 = arith.constant dense<0.000000e+00> : vector<64xf32>
    %112 = vector.multi_reduction <add>, %111, %cst_45 [0] : vector<16x64xf32> to vector<64xf32>
    %113 = vector.shape_cast %112 : vector<64xf32> to vector<1x64xf32>
    %cst_46 = arith.constant 1.600000e+01 : f32
    %114 = vector.broadcast %cst_46 : f32 to vector<1x64xf32>
    %115 = arith.divf %113, %114 : vector<1x64xf32>
    %116 = vector.broadcast %115 : vector<1x64xf32> to vector<16x64xf32>
    %117 = arith.subf %111, %116 : vector<16x64xf32>
    %118 = arith.mulf %117, %117 : vector<16x64xf32>
    %cst_47 = arith.constant dense<0.000000e+00> : vector<64xf32>
    %119 = vector.multi_reduction <add>, %118, %cst_47 [0] : vector<16x64xf32> to vector<64xf32>
    %120 = vector.shape_cast %119 : vector<64xf32> to vector<1x64xf32>
    %121 = arith.truncf %111 : vector<16x64xf32> to vector<16x64xbf16>
    %122 = vector.extract_strided_slice %19 {offsets = [0, 1, 1, 0], sizes = [1, 4, 4, 32], strides = [1, 1, 1, 1]} : vector<1x6x6x32xbf16> to vector<1x4x4x32xbf16>
    %123 = vector.extract_strided_slice %19 {offsets = [0, 1, 2, 0], sizes = [1, 4, 4, 32], strides = [1, 1, 1, 1]} : vector<1x6x6x32xbf16> to vector<1x4x4x32xbf16>
    %124 = vector.extract_strided_slice %19 {offsets = [0, 2, 1, 0], sizes = [1, 4, 4, 32], strides = [1, 1, 1, 1]} : vector<1x6x6x32xbf16> to vector<1x4x4x32xbf16>
    %125 = vector.extract_strided_slice %19 {offsets = [0, 2, 2, 0], sizes = [1, 4, 4, 32], strides = [1, 1, 1, 1]} : vector<1x6x6x32xbf16> to vector<1x4x4x32xbf16>
    %126 = tpu.concatenate %122, %123, %124, %125 in 3 : vector<1x4x4x32xbf16>, vector<1x4x4x32xbf16>, vector<1x4x4x32xbf16>, vector<1x4x4x32xbf16> -> vector<1x4x4x128xbf16>
    %127 = vector.extract_strided_slice %126 {offsets = [0, 0, 0, 0], sizes = [1, 1, 4, 128], strides = [1, 1, 1, 1]} : vector<1x4x4x128xbf16> to vector<1x1x4x128xbf16>
    %128 = vector.shape_cast %127 : vector<1x1x4x128xbf16> to vector<1x4x128xbf16>
    %129 = vector.extract_strided_slice %126 {offsets = [0, 1, 0, 0], sizes = [1, 1, 4, 128], strides = [1, 1, 1, 1]} : vector<1x4x4x128xbf16> to vector<1x1x4x128xbf16>
    %130 = vector.shape_cast %129 : vector<1x1x4x128xbf16> to vector<1x4x128xbf16>
    %131 = vector.extract_strided_slice %126 {offsets = [0, 2, 0, 0], sizes = [1, 1, 4, 128], strides = [1, 1, 1, 1]} : vector<1x4x4x128xbf16> to vector<1x1x4x128xbf16>
    %132 = vector.shape_cast %131 : vector<1x1x4x128xbf16> to vector<1x4x128xbf16>
    %133 = vector.extract_strided_slice %126 {offsets = [0, 3, 0, 0], sizes = [1, 1, 4, 128], strides = [1, 1, 1, 1]} : vector<1x4x4x128xbf16> to vector<1x1x4x128xbf16>
    %134 = vector.shape_cast %133 : vector<1x1x4x128xbf16> to vector<1x4x128xbf16>
    %135 = tpu.concatenate %128, %130, %132, %134 in 1 : vector<1x4x128xbf16>, vector<1x4x128xbf16>, vector<1x4x128xbf16>, vector<1x4x128xbf16> -> vector<1x16x128xbf16>
    %136 = vector.shape_cast %135 : vector<1x16x128xbf16> to vector<16x128xbf16>
    %c3_48 = arith.constant 3 : index
    %c0_49 = arith.constant 0 : index
    %c0_50 = arith.constant 0 : index
    %137 = vector.load %arg2[%c3_48, %c0_49, %c0_50] : memref<4x128x64xbf16, #tpu.memory_space<vmem>>, vector<1x128x64xbf16>
    %138 = vector.shape_cast %137 : vector<1x128x64xbf16> to vector<128x64xbf16>
    %cst_51 = arith.constant dense<0.000000e+00> : vector<16x64xf32>
    %139 = tpu.matmul %136, %138, %cst_51 {dimension_numbers = #tpu.dot_dimension_numbers<[1], [0], [0], [1], [0, 0, 1, 1], [], []>} : vector<16x128xbf16>, vector<128x64xbf16>, vector<16x64xf32> -> vector<16x64xf32>
    %cst_52 = arith.constant dense<0.000000e+00> : vector<64xf32>
    %140 = vector.multi_reduction <add>, %139, %cst_52 [0] : vector<16x64xf32> to vector<64xf32>
    %141 = vector.shape_cast %140 : vector<64xf32> to vector<1x64xf32>
    %cst_53 = arith.constant 1.600000e+01 : f32
    %142 = vector.broadcast %cst_53 : f32 to vector<1x64xf32>
    %143 = arith.divf %141, %142 : vector<1x64xf32>
    %144 = vector.broadcast %143 : vector<1x64xf32> to vector<16x64xf32>
    %145 = arith.subf %139, %144 : vector<16x64xf32>
    %146 = arith.mulf %145, %145 : vector<16x64xf32>
    %cst_54 = arith.constant dense<0.000000e+00> : vector<64xf32>
    %147 = vector.multi_reduction <add>, %146, %cst_54 [0] : vector<16x64xf32> to vector<64xf32>
    %148 = vector.shape_cast %147 : vector<64xf32> to vector<1x64xf32>
    %149 = arith.truncf %139 : vector<16x64xf32> to vector<16x64xbf16>
    %150 = tpu.concatenate %121, %149 in 1 : vector<16x64xbf16>, vector<16x64xbf16> -> vector<16x128xbf16>
    %151 = vector.shape_cast %150 : vector<16x128xbf16> to vector<1x16x128xbf16>
    %152 = vector.extract_strided_slice %151 {offsets = [0, 0, 0], sizes = [1, 4, 128], strides = [1, 1, 1]} : vector<1x16x128xbf16> to vector<1x4x128xbf16>
    %c0_55 = arith.constant 0 : index
    %c0_56 = arith.constant 0 : index
    %c1_57 = arith.constant 1 : index
    %c0_58 = arith.constant 0 : index
    %c0_59 = arith.constant 0 : index
    %153 = vector.load %arg5[%c0_55, %c0_56, %c1_57, %c0_58, %c0_59] : memref<1x4x2x4x128xbf16, #tpu.memory_space<vmem>>, vector<1x1x1x4x128xbf16>
    %154 = vector.shape_cast %153 : vector<1x1x1x4x128xbf16> to vector<1x4x128xbf16>
    %155 = vector.shape_cast %152 : vector<1x4x128xbf16> to vector<1x1x1x4x128xbf16>
    tpu.vector_store %arg5[%c0_55, %c0_56, %c1_57, %c0_58, %c0_59], %155 {strides = array<i32>} : memref<1x4x2x4x128xbf16, #tpu.memory_space<vmem>>, vector<1x1x1x4x128xbf16>,
    %156 = vector.extract_strided_slice %151 {offsets = [0, 4, 0], sizes = [1, 4, 128], strides = [1, 1, 1]} : vector<1x16x128xbf16> to vector<1x4x128xbf16>
    %c0_60 = arith.constant 0 : index
    %c1_61 = arith.constant 1 : index
    %c1_62 = arith.constant 1 : index
    %c0_63 = arith.constant 0 : index
    %c0_64 = arith.constant 0 : index
    %157 = vector.load %arg5[%c0_60, %c1_61, %c1_62, %c0_63, %c0_64] : memref<1x4x2x4x128xbf16, #tpu.memory_space<vmem>>, vector<1x1x1x4x128xbf16>
    %158 = vector.shape_cast %157 : vector<1x1x1x4x128xbf16> to vector<1x4x128xbf16>
    %159 = vector.shape_cast %156 : vector<1x4x128xbf16> to vector<1x1x1x4x128xbf16>
    tpu.vector_store %arg5[%c0_60, %c1_61, %c1_62, %c0_63, %c0_64], %159 {strides = array<i32>} : memref<1x4x2x4x128xbf16, #tpu.memory_space<vmem>>, vector<1x1x1x4x128xbf16>,
    %160 = vector.extract_strided_slice %151 {offsets = [0, 8, 0], sizes = [1, 4, 128], strides = [1, 1, 1]} : vector<1x16x128xbf16> to vector<1x4x128xbf16>
    %c0_65 = arith.constant 0 : index
    %c2_66 = arith.constant 2 : index
    %c1_67 = arith.constant 1 : index
    %c0_68 = arith.constant 0 : index
    %c0_69 = arith.constant 0 : index
    %161 = vector.load %arg5[%c0_65, %c2_66, %c1_67, %c0_68, %c0_69] : memref<1x4x2x4x128xbf16, #tpu.memory_space<vmem>>, vector<1x1x1x4x128xbf16>
    %162 = vector.shape_cast %161 : vector<1x1x1x4x128xbf16> to vector<1x4x128xbf16>
    %163 = vector.shape_cast %160 : vector<1x4x128xbf16> to vector<1x1x1x4x128xbf16>
    tpu.vector_store %arg5[%c0_65, %c2_66, %c1_67, %c0_68, %c0_69], %163 {strides = array<i32>} : memref<1x4x2x4x128xbf16, #tpu.memory_space<vmem>>, vector<1x1x1x4x128xbf16>,
    %164 = vector.extract_strided_slice %151 {offsets = [0, 12, 0], sizes = [1, 4, 128], strides = [1, 1, 1]} : vector<1x16x128xbf16> to vector<1x4x128xbf16>
    %c0_70 = arith.constant 0 : index
    %c3_71 = arith.constant 3 : index
    %c1_72 = arith.constant 1 : index
    %c0_73 = arith.constant 0 : index
    %c0_74 = arith.constant 0 : index
    %165 = vector.load %arg5[%c0_70, %c3_71, %c1_72, %c0_73, %c0_74] : memref<1x4x2x4x128xbf16, #tpu.memory_space<vmem>>, vector<1x1x1x4x128xbf16>
    %166 = vector.shape_cast %165 : vector<1x1x1x4x128xbf16> to vector<1x4x128xbf16>
    %167 = vector.shape_cast %164 : vector<1x4x128xbf16> to vector<1x1x1x4x128xbf16>
    tpu.vector_store %arg5[%c0_70, %c3_71, %c1_72, %c0_73, %c0_74], %167 {strides = array<i32>} : memref<1x4x2x4x128xbf16, #tpu.memory_space<vmem>>, vector<1x1x1x4x128xbf16>,
    %168 = tpu.concatenate %41, %69, %115, %143 in 0 : vector<1x64xf32>, vector<1x64xf32>, vector<1x64xf32>, vector<1x64xf32> -> vector<4x64xf32>
    %cst_75 = arith.constant dense<0.000000e+00> : vector<64xf32>
    %169 = vector.multi_reduction <add>, %168, %cst_75 [0] : vector<4x64xf32> to vector<64xf32>
    %170 = vector.shape_cast %169 : vector<64xf32> to vector<1x64xf32>
    %cst_76 = arith.constant 4.000000e+00 : f32
    %171 = vector.broadcast %cst_76 : f32 to vector<1x64xf32>
    %172 = arith.divf %170, %171 : vector<1x64xf32>
    %173 = arith.addf %46, %74 : vector<1x64xf32>
    %174 = arith.addf %173, %120 : vector<1x64xf32>
    %175 = arith.addf %174, %148 : vector<1x64xf32>
    %176 = vector.broadcast %172 : vector<1x64xf32> to vector<4x64xf32>
    %177 = arith.subf %168, %176 : vector<4x64xf32>
    %178 = arith.mulf %177, %177 : vector<4x64xf32>
    %cst_77 = arith.constant dense<0.000000e+00> : vector<64xf32>
    %179 = vector.multi_reduction <add>, %178, %cst_77 [0] : vector<4x64xf32> to vector<64xf32>
    %180 = vector.shape_cast %179 : vector<64xf32> to vector<1x64xf32>
    %cst_78 = arith.constant 1.600000e+01 : f32
    %181 = vector.broadcast %cst_78 : f32 to vector<1x64xf32>
    %182 = arith.mulf %181, %180 : vector<1x64xf32>
    %183 = arith.addf %175, %182 : vector<1x64xf32>
    %184 = tpu.concatenate %172, %183 in 0 : vector<1x64xf32>, vector<1x64xf32> -> vector<2x64xf32>
    %c0_79 = arith.constant 0 : index
    %c0_80 = arith.constant 0 : index
    %c0_81 = arith.constant 0 : index
    %185 = vector.load %arg6[%c0_79, %c0_80, %c0_81] : memref<1x2x64xf32, #tpu.memory_space<vmem>>, vector<1x2x64xf32>
    %186 = vector.shape_cast %185 : vector<1x2x64xf32> to vector<2x64xf32>
    %187 = vector.shape_cast %184 : vector<2x64xf32> to vector<1x2x64xf32>
    tpu.vector_store %arg6[%c0_79, %c0_80, %c0_81], %187 {strides = array<i32>} : memref<1x2x64xf32, #tpu.memory_space<vmem>>, vector<1x2x64xf32>,
    return
  }
  func.func @transform_0(%arg0: i32) -> (i32, i32, i32, i32) {
    %c0_i32 = arith.constant 0 : i32
    %c0_i32_0 = arith.constant 0 : i32
    %c0_i32_1 = arith.constant 0 : i32
    %c0_i32_2 = arith.constant 0 : i32
    return %arg0, %c0_i32, %c0_i32_0, %c0_i32_1 : i32, i32, i32, i32
  }
  func.func @transform_1(%arg0: i32) -> (i32, i32, i32) {
    %c0_i32 = arith.constant 0 : i32
    %c0_i32_0 = arith.constant 0 : i32
    %c0_i32_1 = arith.constant 0 : i32
    %c0_i32_2 = arith.constant 0 : i32
    return %c0_i32, %c0_i32_0, %c0_i32_1 : i32, i32, i32
  }
  func.func @transform_2(%arg0: i32) -> (i32, i32) {
    %c0_i32 = arith.constant 0 : i32
    %c0_i32_0 = arith.constant 0 : i32
    %c0_i32_1 = arith.constant 0 : i32
    return %c0_i32, %c0_i32_0 : i32, i32
  }
  func.func @transform_3(%arg0: i32) -> (i32, i32) {
    %c0_i32 = arith.constant 0 : i32
    %c0_i32_0 = arith.constant 0 : i32
    %c0_i32_1 = arith.constant 0 : i32
    return %c0_i32, %c0_i32_0 : i32, i32
  }
  func.func @transform_4(%arg0: i32) -> (i32, i32, i32, i32, i32) {
    %c0_i32 = arith.constant 0 : i32
    %c0_i32_0 = arith.constant 0 : i32
    %c0_i32_1 = arith.constant 0 : i32
    %c0_i32_2 = arith.constant 0 : i32
    %c0_i32_3 = arith.constant 0 : i32
    return %arg0, %c0_i32, %c0_i32_0, %c0_i32_1, %c0_i32_2 : i32, i32, i32, i32, i32
  }
  func.func @transform_5(%arg0: i32) -> (i32, i32, i32) {
    %c0_i32 = arith.constant 0 : i32
    %c0_i32_0 = arith.constant 0 : i32
    %c0_i32_1 = arith.constant 0 : i32
    return %arg0, %c0_i32, %c0_i32_0 : i32, i32, i32
  }
}

module attributes {stable_mosaic.version = 11 : i64} {
  func.func @_deconv_sub_kernel(%arg0: i32, %arg1: memref<1x8x8x64xbf16, #tpu.memory_space<vmem>>, %arg2: memref<4x256x64xbf16, #tpu.memory_space<vmem>>, %arg3: memref<1x64xf32, #tpu.memory_space<vmem>>, %arg4: memref<1x64xf32, #tpu.memory_space<vmem>>, %arg5: memref<1x8x2x8x128xbf16, #tpu.memory_space<vmem>>, %arg6: memref<1x2x64xf32, #tpu.memory_space<vmem>>) attributes {dimension_semantics = [#tpu.dimension_semantics<parallel>], iteration_bounds = array<i64: 2>, scalar_prefetch = 0 : i64, scratch_operands = 0 : i64, tpu.core_type = #tpu.core_type<tc>, window_params = [{transform_indices = @transform_0, window_bounds = array<i64: 1, 8, 8, 64>}, {pipeline_mode = #tpu.pipeline_mode<synchronous>, transform_indices = @transform_1, window_bounds = array<i64: 4, 256, 64>}, {pipeline_mode = #tpu.pipeline_mode<synchronous>, transform_indices = @transform_2, window_bounds = array<i64: 1, 64>}, {pipeline_mode = #tpu.pipeline_mode<synchronous>, transform_indices = @transform_3, window_bounds = array<i64: 1, 64>}, {transform_indices = @transform_4, window_bounds = array<i64: 1, 8, 2, 8, 128>}, {transform_indices = @transform_5, window_bounds = array<i64: 1, 2, 64>}]} {
    %c0 = arith.constant 0 : index
    %c0_0 = arith.constant 0 : index
    %c0_1 = arith.constant 0 : index
    %c0_2 = arith.constant 0 : index
    %0 = vector.load %arg1[%c0, %c0_0, %c0_1, %c0_2] : memref<1x8x8x64xbf16, #tpu.memory_space<vmem>>, vector<1x8x8x64xbf16>
    %1 = arith.extf %0 : vector<1x8x8x64xbf16> to vector<1x8x8x64xf32>
    %c0_3 = arith.constant 0 : index
    %c0_4 = arith.constant 0 : index
    %2 = vector.load %arg3[%c0_3, %c0_4] : memref<1x64xf32, #tpu.memory_space<vmem>>, vector<1x64xf32>
    %3 = vector.shape_cast %2 : vector<1x64xf32> to vector<1x1x1x64xf32>
    %4 = vector.broadcast %3 : vector<1x1x1x64xf32> to vector<1x8x8x64xf32>
    %5 = arith.mulf %1, %4 : vector<1x8x8x64xf32>
    %c0_5 = arith.constant 0 : index
    %c0_6 = arith.constant 0 : index
    %6 = vector.load %arg4[%c0_5, %c0_6] : memref<1x64xf32, #tpu.memory_space<vmem>>, vector<1x64xf32>
    %7 = vector.shape_cast %6 : vector<1x64xf32> to vector<1x1x1x64xf32>
    %8 = vector.broadcast %7 : vector<1x1x1x64xf32> to vector<1x8x8x64xf32>
    %9 = arith.addf %5, %8 : vector<1x8x8x64xf32>
    %cst = arith.constant 0.000000e+00 : f32
    %10 = vector.broadcast %cst : f32 to vector<1x8x8x64xf32>
    %11 = arith.cmpf oge, %9, %10 : vector<1x8x8x64xf32>
    %cst_7 = arith.constant 5.000000e-02 : f32
    %12 = vector.broadcast %cst_7 : f32 to vector<1x8x8x64xf32>
    %13 = arith.mulf %12, %9 : vector<1x8x8x64xf32>
    %14 = arith.select %11, %9, %13 : vector<1x8x8x64xi1>, vector<1x8x8x64xf32>
    %15 = arith.truncf %14 : vector<1x8x8x64xf32> to vector<1x8x8x64xbf16>
    %cst_8 = arith.constant 0.000000e+00 : bf16
    %16 = vector.broadcast %cst_8 : bf16 to vector<1x1x8x64xbf16>
    %17 = tpu.concatenate %16, %15, %16 in 1 : vector<1x1x8x64xbf16>, vector<1x8x8x64xbf16>, vector<1x1x8x64xbf16> -> vector<1x10x8x64xbf16>
    %cst_9 = arith.constant 0.000000e+00 : bf16
    %18 = vector.broadcast %cst_9 : bf16 to vector<1x10x1x64xbf16>
    %19 = tpu.concatenate %18, %17, %18 in 2 : vector<1x10x1x64xbf16>, vector<1x10x8x64xbf16>, vector<1x10x1x64xbf16> -> vector<1x10x10x64xbf16>
    %20 = vector.extract_strided_slice %19 {offsets = [0, 0, 0, 0], sizes = [1, 8, 8, 64], strides = [1, 1, 1, 1]} : vector<1x10x10x64xbf16> to vector<1x8x8x64xbf16>
    %21 = vector.extract_strided_slice %19 {offsets = [0, 0, 1, 0], sizes = [1, 8, 8, 64], strides = [1, 1, 1, 1]} : vector<1x10x10x64xbf16> to vector<1x8x8x64xbf16>
    %22 = vector.extract_strided_slice %19 {offsets = [0, 1, 0, 0], sizes = [1, 8, 8, 64], strides = [1, 1, 1, 1]} : vector<1x10x10x64xbf16> to vector<1x8x8x64xbf16>
    %23 = vector.extract_strided_slice %19 {offsets = [0, 1, 1, 0], sizes = [1, 8, 8, 64], strides = [1, 1, 1, 1]} : vector<1x10x10x64xbf16> to vector<1x8x8x64xbf16>
    %24 = tpu.concatenate %20, %21, %22, %23 in 3 : vector<1x8x8x64xbf16>, vector<1x8x8x64xbf16>, vector<1x8x8x64xbf16>, vector<1x8x8x64xbf16> -> vector<1x8x8x256xbf16>
    %25 = vector.extract_strided_slice %24 {offsets = [0, 0, 0, 0], sizes = [1, 1, 8, 256], strides = [1, 1, 1, 1]} : vector<1x8x8x256xbf16> to vector<1x1x8x256xbf16>
    %26 = vector.shape_cast %25 : vector<1x1x8x256xbf16> to vector<1x8x256xbf16>
    %27 = vector.extract_strided_slice %24 {offsets = [0, 1, 0, 0], sizes = [1, 1, 8, 256], strides = [1, 1, 1, 1]} : vector<1x8x8x256xbf16> to vector<1x1x8x256xbf16>
    %28 = vector.shape_cast %27 : vector<1x1x8x256xbf16> to vector<1x8x256xbf16>
    %29 = vector.extract_strided_slice %24 {offsets = [0, 2, 0, 0], sizes = [1, 1, 8, 256], strides = [1, 1, 1, 1]} : vector<1x8x8x256xbf16> to vector<1x1x8x256xbf16>
    %30 = vector.shape_cast %29 : vector<1x1x8x256xbf16> to vector<1x8x256xbf16>
    %31 = vector.extract_strided_slice %24 {offsets = [0, 3, 0, 0], sizes = [1, 1, 8, 256], strides = [1, 1, 1, 1]} : vector<1x8x8x256xbf16> to vector<1x1x8x256xbf16>
    %32 = vector.shape_cast %31 : vector<1x1x8x256xbf16> to vector<1x8x256xbf16>
    %33 = vector.extract_strided_slice %24 {offsets = [0, 4, 0, 0], sizes = [1, 1, 8, 256], strides = [1, 1, 1, 1]} : vector<1x8x8x256xbf16> to vector<1x1x8x256xbf16>
    %34 = vector.shape_cast %33 : vector<1x1x8x256xbf16> to vector<1x8x256xbf16>
    %35 = vector.extract_strided_slice %24 {offsets = [0, 5, 0, 0], sizes = [1, 1, 8, 256], strides = [1, 1, 1, 1]} : vector<1x8x8x256xbf16> to vector<1x1x8x256xbf16>
    %36 = vector.shape_cast %35 : vector<1x1x8x256xbf16> to vector<1x8x256xbf16>
    %37 = vector.extract_strided_slice %24 {offsets = [0, 6, 0, 0], sizes = [1, 1, 8, 256], strides = [1, 1, 1, 1]} : vector<1x8x8x256xbf16> to vector<1x1x8x256xbf16>
    %38 = vector.shape_cast %37 : vector<1x1x8x256xbf16> to vector<1x8x256xbf16>
    %39 = vector.extract_strided_slice %24 {offsets = [0, 7, 0, 0], sizes = [1, 1, 8, 256], strides = [1, 1, 1, 1]} : vector<1x8x8x256xbf16> to vector<1x1x8x256xbf16>
    %40 = vector.shape_cast %39 : vector<1x1x8x256xbf16> to vector<1x8x256xbf16>
    %41 = tpu.concatenate %26, %28, %30, %32, %34, %36, %38, %40 in 1 : vector<1x8x256xbf16>, vector<1x8x256xbf16>, vector<1x8x256xbf16>, vector<1x8x256xbf16>, vector<1x8x256xbf16>, vector<1x8x256xbf16>, vector<1x8x256xbf16>, vector<1x8x256xbf16> -> vector<1x64x256xbf16>
    %42 = vector.shape_cast %41 : vector<1x64x256xbf16> to vector<64x256xbf16>
    %c0_10 = arith.constant 0 : index
    %c0_11 = arith.constant 0 : index
    %c0_12 = arith.constant 0 : index
    %43 = vector.load %arg2[%c0_10, %c0_11, %c0_12] : memref<4x256x64xbf16, #tpu.memory_space<vmem>>, vector<1x256x64xbf16>
    %44 = vector.shape_cast %43 : vector<1x256x64xbf16> to vector<256x64xbf16>
    %cst_13 = arith.constant dense<0.000000e+00> : vector<64x64xf32>
    %45 = tpu.matmul %42, %44, %cst_13 {dimension_numbers = #tpu.dot_dimension_numbers<[1], [0], [0], [1], [0, 0, 1, 1], [], []>} : vector<64x256xbf16>, vector<256x64xbf16>, vector<64x64xf32> -> vector<64x64xf32>
    %cst_14 = arith.constant dense<0.000000e+00> : vector<64xf32>
    %46 = vector.multi_reduction <add>, %45, %cst_14 [0] : vector<64x64xf32> to vector<64xf32>
    %47 = vector.shape_cast %46 : vector<64xf32> to vector<1x64xf32>
    %cst_15 = arith.constant 6.400000e+01 : f32
    %48 = vector.broadcast %cst_15 : f32 to vector<1x64xf32>
    %49 = arith.divf %47, %48 : vector<1x64xf32>
    %50 = vector.broadcast %49 : vector<1x64xf32> to vector<64x64xf32>
    %51 = arith.subf %45, %50 : vector<64x64xf32>
    %52 = arith.mulf %51, %51 : vector<64x64xf32>
    %cst_16 = arith.constant dense<0.000000e+00> : vector<64xf32>
    %53 = vector.multi_reduction <add>, %52, %cst_16 [0] : vector<64x64xf32> to vector<64xf32>
    %54 = vector.shape_cast %53 : vector<64xf32> to vector<1x64xf32>
    %55 = arith.truncf %45 : vector<64x64xf32> to vector<64x64xbf16>
    %56 = vector.extract_strided_slice %19 {offsets = [0, 0, 1, 0], sizes = [1, 8, 8, 64], strides = [1, 1, 1, 1]} : vector<1x10x10x64xbf16> to vector<1x8x8x64xbf16>
    %57 = vector.extract_strided_slice %19 {offsets = [0, 0, 2, 0], sizes = [1, 8, 8, 64], strides = [1, 1, 1, 1]} : vector<1x10x10x64xbf16> to vector<1x8x8x64xbf16>
    %58 = vector.extract_strided_slice %19 {offsets = [0, 1, 1, 0], sizes = [1, 8, 8, 64], strides = [1, 1, 1, 1]} : vector<1x10x10x64xbf16> to vector<1x8x8x64xbf16>
    %59 = vector.extract_strided_slice %19 {offsets = [0, 1, 2, 0], sizes = [1, 8, 8, 64], strides = [1, 1, 1, 1]} : vector<1x10x10x64xbf16> to vector<1x8x8x64xbf16>
    %60 = tpu.concatenate %56, %57, %58, %59 in 3 : vector<1x8x8x64xbf16>, vector<1x8x8x64xbf16>, vector<1x8x8x64xbf16>, vector<1x8x8x64xbf16> -> vector<1x8x8x256xbf16>
    %61 = vector.extract_strided_slice %60 {offsets = [0, 0, 0, 0], sizes = [1, 1, 8, 256], strides = [1, 1, 1, 1]} : vector<1x8x8x256xbf16> to vector<1x1x8x256xbf16>
    %62 = vector.shape_cast %61 : vector<1x1x8x256xbf16> to vector<1x8x256xbf16>
    %63 = vector.extract_strided_slice %60 {offsets = [0, 1, 0, 0], sizes = [1, 1, 8, 256], strides = [1, 1, 1, 1]} : vector<1x8x8x256xbf16> to vector<1x1x8x256xbf16>
    %64 = vector.shape_cast %63 : vector<1x1x8x256xbf16> to vector<1x8x256xbf16>
    %65 = vector.extract_strided_slice %60 {offsets = [0, 2, 0, 0], sizes = [1, 1, 8, 256], strides = [1, 1, 1, 1]} : vector<1x8x8x256xbf16> to vector<1x1x8x256xbf16>
    %66 = vector.shape_cast %65 : vector<1x1x8x256xbf16> to vector<1x8x256xbf16>
    %67 = vector.extract_strided_slice %60 {offsets = [0, 3, 0, 0], sizes = [1, 1, 8, 256], strides = [1, 1, 1, 1]} : vector<1x8x8x256xbf16> to vector<1x1x8x256xbf16>
    %68 = vector.shape_cast %67 : vector<1x1x8x256xbf16> to vector<1x8x256xbf16>
    %69 = vector.extract_strided_slice %60 {offsets = [0, 4, 0, 0], sizes = [1, 1, 8, 256], strides = [1, 1, 1, 1]} : vector<1x8x8x256xbf16> to vector<1x1x8x256xbf16>
    %70 = vector.shape_cast %69 : vector<1x1x8x256xbf16> to vector<1x8x256xbf16>
    %71 = vector.extract_strided_slice %60 {offsets = [0, 5, 0, 0], sizes = [1, 1, 8, 256], strides = [1, 1, 1, 1]} : vector<1x8x8x256xbf16> to vector<1x1x8x256xbf16>
    %72 = vector.shape_cast %71 : vector<1x1x8x256xbf16> to vector<1x8x256xbf16>
    %73 = vector.extract_strided_slice %60 {offsets = [0, 6, 0, 0], sizes = [1, 1, 8, 256], strides = [1, 1, 1, 1]} : vector<1x8x8x256xbf16> to vector<1x1x8x256xbf16>
    %74 = vector.shape_cast %73 : vector<1x1x8x256xbf16> to vector<1x8x256xbf16>
    %75 = vector.extract_strided_slice %60 {offsets = [0, 7, 0, 0], sizes = [1, 1, 8, 256], strides = [1, 1, 1, 1]} : vector<1x8x8x256xbf16> to vector<1x1x8x256xbf16>
    %76 = vector.shape_cast %75 : vector<1x1x8x256xbf16> to vector<1x8x256xbf16>
    %77 = tpu.concatenate %62, %64, %66, %68, %70, %72, %74, %76 in 1 : vector<1x8x256xbf16>, vector<1x8x256xbf16>, vector<1x8x256xbf16>, vector<1x8x256xbf16>, vector<1x8x256xbf16>, vector<1x8x256xbf16>, vector<1x8x256xbf16>, vector<1x8x256xbf16> -> vector<1x64x256xbf16>
    %78 = vector.shape_cast %77 : vector<1x64x256xbf16> to vector<64x256xbf16>
    %c1 = arith.constant 1 : index
    %c0_17 = arith.constant 0 : index
    %c0_18 = arith.constant 0 : index
    %79 = vector.load %arg2[%c1, %c0_17, %c0_18] : memref<4x256x64xbf16, #tpu.memory_space<vmem>>, vector<1x256x64xbf16>
    %80 = vector.shape_cast %79 : vector<1x256x64xbf16> to vector<256x64xbf16>
    %cst_19 = arith.constant dense<0.000000e+00> : vector<64x64xf32>
    %81 = tpu.matmul %78, %80, %cst_19 {dimension_numbers = #tpu.dot_dimension_numbers<[1], [0], [0], [1], [0, 0, 1, 1], [], []>} : vector<64x256xbf16>, vector<256x64xbf16>, vector<64x64xf32> -> vector<64x64xf32>
    %cst_20 = arith.constant dense<0.000000e+00> : vector<64xf32>
    %82 = vector.multi_reduction <add>, %81, %cst_20 [0] : vector<64x64xf32> to vector<64xf32>
    %83 = vector.shape_cast %82 : vector<64xf32> to vector<1x64xf32>
    %cst_21 = arith.constant 6.400000e+01 : f32
    %84 = vector.broadcast %cst_21 : f32 to vector<1x64xf32>
    %85 = arith.divf %83, %84 : vector<1x64xf32>
    %86 = vector.broadcast %85 : vector<1x64xf32> to vector<64x64xf32>
    %87 = arith.subf %81, %86 : vector<64x64xf32>
    %88 = arith.mulf %87, %87 : vector<64x64xf32>
    %cst_22 = arith.constant dense<0.000000e+00> : vector<64xf32>
    %89 = vector.multi_reduction <add>, %88, %cst_22 [0] : vector<64x64xf32> to vector<64xf32>
    %90 = vector.shape_cast %89 : vector<64xf32> to vector<1x64xf32>
    %91 = arith.truncf %81 : vector<64x64xf32> to vector<64x64xbf16>
    %92 = tpu.concatenate %55, %91 in 1 : vector<64x64xbf16>, vector<64x64xbf16> -> vector<64x128xbf16>
    %93 = vector.shape_cast %92 : vector<64x128xbf16> to vector<1x64x128xbf16>
    %94 = vector.extract_strided_slice %93 {offsets = [0, 0, 0], sizes = [1, 8, 128], strides = [1, 1, 1]} : vector<1x64x128xbf16> to vector<1x8x128xbf16>
    %c0_23 = arith.constant 0 : index
    %c0_24 = arith.constant 0 : index
    %c0_25 = arith.constant 0 : index
    %c0_26 = arith.constant 0 : index
    %c0_27 = arith.constant 0 : index
    %95 = vector.load %arg5[%c0_23, %c0_24, %c0_25, %c0_26, %c0_27] : memref<1x8x2x8x128xbf16, #tpu.memory_space<vmem>>, vector<1x1x1x8x128xbf16>
    %96 = vector.shape_cast %95 : vector<1x1x1x8x128xbf16> to vector<1x8x128xbf16>
    %97 = vector.shape_cast %94 : vector<1x8x128xbf16> to vector<1x1x1x8x128xbf16>
    tpu.vector_store %arg5[%c0_23, %c0_24, %c0_25, %c0_26, %c0_27], %97 {strides = array<i32>} : memref<1x8x2x8x128xbf16, #tpu.memory_space<vmem>>, vector<1x1x1x8x128xbf16>,
    %98 = vector.extract_strided_slice %93 {offsets = [0, 8, 0], sizes = [1, 8, 128], strides = [1, 1, 1]} : vector<1x64x128xbf16> to vector<1x8x128xbf16>
    %c0_28 = arith.constant 0 : index
    %c1_29 = arith.constant 1 : index
    %c0_30 = arith.constant 0 : index
    %c0_31 = arith.constant 0 : index
    %c0_32 = arith.constant 0 : index
    %99 = vector.load %arg5[%c0_28, %c1_29, %c0_30, %c0_31, %c0_32] : memref<1x8x2x8x128xbf16, #tpu.memory_space<vmem>>, vector<1x1x1x8x128xbf16>
    %100 = vector.shape_cast %99 : vector<1x1x1x8x128xbf16> to vector<1x8x128xbf16>
    %101 = vector.shape_cast %98 : vector<1x8x128xbf16> to vector<1x1x1x8x128xbf16>
    tpu.vector_store %arg5[%c0_28, %c1_29, %c0_30, %c0_31, %c0_32], %101 {strides = array<i32>} : memref<1x8x2x8x128xbf16, #tpu.memory_space<vmem>>, vector<1x1x1x8x128xbf16>,
    %102 = vector.extract_strided_slice %93 {offsets = [0, 16, 0], sizes = [1, 8, 128], strides = [1, 1, 1]} : vector<1x64x128xbf16> to vector<1x8x128xbf16>
    %c0_33 = arith.constant 0 : index
    %c2 = arith.constant 2 : index
    %c0_34 = arith.constant 0 : index
    %c0_35 = arith.constant 0 : index
    %c0_36 = arith.constant 0 : index
    %103 = vector.load %arg5[%c0_33, %c2, %c0_34, %c0_35, %c0_36] : memref<1x8x2x8x128xbf16, #tpu.memory_space<vmem>>, vector<1x1x1x8x128xbf16>
    %104 = vector.shape_cast %103 : vector<1x1x1x8x128xbf16> to vector<1x8x128xbf16>
    %105 = vector.shape_cast %102 : vector<1x8x128xbf16> to vector<1x1x1x8x128xbf16>
    tpu.vector_store %arg5[%c0_33, %c2, %c0_34, %c0_35, %c0_36], %105 {strides = array<i32>} : memref<1x8x2x8x128xbf16, #tpu.memory_space<vmem>>, vector<1x1x1x8x128xbf16>,
    %106 = vector.extract_strided_slice %93 {offsets = [0, 24, 0], sizes = [1, 8, 128], strides = [1, 1, 1]} : vector<1x64x128xbf16> to vector<1x8x128xbf16>
    %c0_37 = arith.constant 0 : index
    %c3 = arith.constant 3 : index
    %c0_38 = arith.constant 0 : index
    %c0_39 = arith.constant 0 : index
    %c0_40 = arith.constant 0 : index
    %107 = vector.load %arg5[%c0_37, %c3, %c0_38, %c0_39, %c0_40] : memref<1x8x2x8x128xbf16, #tpu.memory_space<vmem>>, vector<1x1x1x8x128xbf16>
    %108 = vector.shape_cast %107 : vector<1x1x1x8x128xbf16> to vector<1x8x128xbf16>
    %109 = vector.shape_cast %106 : vector<1x8x128xbf16> to vector<1x1x1x8x128xbf16>
    tpu.vector_store %arg5[%c0_37, %c3, %c0_38, %c0_39, %c0_40], %109 {strides = array<i32>} : memref<1x8x2x8x128xbf16, #tpu.memory_space<vmem>>, vector<1x1x1x8x128xbf16>,
    %110 = vector.extract_strided_slice %93 {offsets = [0, 32, 0], sizes = [1, 8, 128], strides = [1, 1, 1]} : vector<1x64x128xbf16> to vector<1x8x128xbf16>
    %c0_41 = arith.constant 0 : index
    %c4 = arith.constant 4 : index
    %c0_42 = arith.constant 0 : index
    %c0_43 = arith.constant 0 : index
    %c0_44 = arith.constant 0 : index
    %111 = vector.load %arg5[%c0_41, %c4, %c0_42, %c0_43, %c0_44] : memref<1x8x2x8x128xbf16, #tpu.memory_space<vmem>>, vector<1x1x1x8x128xbf16>
    %112 = vector.shape_cast %111 : vector<1x1x1x8x128xbf16> to vector<1x8x128xbf16>
    %113 = vector.shape_cast %110 : vector<1x8x128xbf16> to vector<1x1x1x8x128xbf16>
    tpu.vector_store %arg5[%c0_41, %c4, %c0_42, %c0_43, %c0_44], %113 {strides = array<i32>} : memref<1x8x2x8x128xbf16, #tpu.memory_space<vmem>>, vector<1x1x1x8x128xbf16>,
    %114 = vector.extract_strided_slice %93 {offsets = [0, 40, 0], sizes = [1, 8, 128], strides = [1, 1, 1]} : vector<1x64x128xbf16> to vector<1x8x128xbf16>
    %c0_45 = arith.constant 0 : index
    %c5 = arith.constant 5 : index
    %c0_46 = arith.constant 0 : index
    %c0_47 = arith.constant 0 : index
    %c0_48 = arith.constant 0 : index
    %115 = vector.load %arg5[%c0_45, %c5, %c0_46, %c0_47, %c0_48] : memref<1x8x2x8x128xbf16, #tpu.memory_space<vmem>>, vector<1x1x1x8x128xbf16>
    %116 = vector.shape_cast %115 : vector<1x1x1x8x128xbf16> to vector<1x8x128xbf16>
    %117 = vector.shape_cast %114 : vector<1x8x128xbf16> to vector<1x1x1x8x128xbf16>
    tpu.vector_store %arg5[%c0_45, %c5, %c0_46, %c0_47, %c0_48], %117 {strides = array<i32>} : memref<1x8x2x8x128xbf16, #tpu.memory_space<vmem>>, vector<1x1x1x8x128xbf16>,
    %118 = vector.extract_strided_slice %93 {offsets = [0, 48, 0], sizes = [1, 8, 128], strides = [1, 1, 1]} : vector<1x64x128xbf16> to vector<1x8x128xbf16>
    %c0_49 = arith.constant 0 : index
    %c6 = arith.constant 6 : index
    %c0_50 = arith.constant 0 : index
    %c0_51 = arith.constant 0 : index
    %c0_52 = arith.constant 0 : index
    %119 = vector.load %arg5[%c0_49, %c6, %c0_50, %c0_51, %c0_52] : memref<1x8x2x8x128xbf16, #tpu.memory_space<vmem>>, vector<1x1x1x8x128xbf16>
    %120 = vector.shape_cast %119 : vector<1x1x1x8x128xbf16> to vector<1x8x128xbf16>
    %121 = vector.shape_cast %118 : vector<1x8x128xbf16> to vector<1x1x1x8x128xbf16>
    tpu.vector_store %arg5[%c0_49, %c6, %c0_50, %c0_51, %c0_52], %121 {strides = array<i32>} : memref<1x8x2x8x128xbf16, #tpu.memory_space<vmem>>, vector<1x1x1x8x128xbf16>,
    %122 = vector.extract_strided_slice %93 {offsets = [0, 56, 0], sizes = [1, 8, 128], strides = [1, 1, 1]} : vector<1x64x128xbf16> to vector<1x8x128xbf16>
    %c0_53 = arith.constant 0 : index
    %c7 = arith.constant 7 : index
    %c0_54 = arith.constant 0 : index
    %c0_55 = arith.constant 0 : index
    %c0_56 = arith.constant 0 : index
    %123 = vector.load %arg5[%c0_53, %c7, %c0_54, %c0_55, %c0_56] : memref<1x8x2x8x128xbf16, #tpu.memory_space<vmem>>, vector<1x1x1x8x128xbf16>
    %124 = vector.shape_cast %123 : vector<1x1x1x8x128xbf16> to vector<1x8x128xbf16>
    %125 = vector.shape_cast %122 : vector<1x8x128xbf16> to vector<1x1x1x8x128xbf16>
    tpu.vector_store %arg5[%c0_53, %c7, %c0_54, %c0_55, %c0_56], %125 {strides = array<i32>} : memref<1x8x2x8x128xbf16, #tpu.memory_space<vmem>>, vector<1x1x1x8x128xbf16>,
    %126 = vector.extract_strided_slice %19 {offsets = [0, 1, 0, 0], sizes = [1, 8, 8, 64], strides = [1, 1, 1, 1]} : vector<1x10x10x64xbf16> to vector<1x8x8x64xbf16>
    %127 = vector.extract_strided_slice %19 {offsets = [0, 1, 1, 0], sizes = [1, 8, 8, 64], strides = [1, 1, 1, 1]} : vector<1x10x10x64xbf16> to vector<1x8x8x64xbf16>
    %128 = vector.extract_strided_slice %19 {offsets = [0, 2, 0, 0], sizes = [1, 8, 8, 64], strides = [1, 1, 1, 1]} : vector<1x10x10x64xbf16> to vector<1x8x8x64xbf16>
    %129 = vector.extract_strided_slice %19 {offsets = [0, 2, 1, 0], sizes = [1, 8, 8, 64], strides = [1, 1, 1, 1]} : vector<1x10x10x64xbf16> to vector<1x8x8x64xbf16>
    %130 = tpu.concatenate %126, %127, %128, %129 in 3 : vector<1x8x8x64xbf16>, vector<1x8x8x64xbf16>, vector<1x8x8x64xbf16>, vector<1x8x8x64xbf16> -> vector<1x8x8x256xbf16>
    %131 = vector.extract_strided_slice %130 {offsets = [0, 0, 0, 0], sizes = [1, 1, 8, 256], strides = [1, 1, 1, 1]} : vector<1x8x8x256xbf16> to vector<1x1x8x256xbf16>
    %132 = vector.shape_cast %131 : vector<1x1x8x256xbf16> to vector<1x8x256xbf16>
    %133 = vector.extract_strided_slice %130 {offsets = [0, 1, 0, 0], sizes = [1, 1, 8, 256], strides = [1, 1, 1, 1]} : vector<1x8x8x256xbf16> to vector<1x1x8x256xbf16>
    %134 = vector.shape_cast %133 : vector<1x1x8x256xbf16> to vector<1x8x256xbf16>
    %135 = vector.extract_strided_slice %130 {offsets = [0, 2, 0, 0], sizes = [1, 1, 8, 256], strides = [1, 1, 1, 1]} : vector<1x8x8x256xbf16> to vector<1x1x8x256xbf16>
    %136 = vector.shape_cast %135 : vector<1x1x8x256xbf16> to vector<1x8x256xbf16>
    %137 = vector.extract_strided_slice %130 {offsets = [0, 3, 0, 0], sizes = [1, 1, 8, 256], strides = [1, 1, 1, 1]} : vector<1x8x8x256xbf16> to vector<1x1x8x256xbf16>
    %138 = vector.shape_cast %137 : vector<1x1x8x256xbf16> to vector<1x8x256xbf16>
    %139 = vector.extract_strided_slice %130 {offsets = [0, 4, 0, 0], sizes = [1, 1, 8, 256], strides = [1, 1, 1, 1]} : vector<1x8x8x256xbf16> to vector<1x1x8x256xbf16>
    %140 = vector.shape_cast %139 : vector<1x1x8x256xbf16> to vector<1x8x256xbf16>
    %141 = vector.extract_strided_slice %130 {offsets = [0, 5, 0, 0], sizes = [1, 1, 8, 256], strides = [1, 1, 1, 1]} : vector<1x8x8x256xbf16> to vector<1x1x8x256xbf16>
    %142 = vector.shape_cast %141 : vector<1x1x8x256xbf16> to vector<1x8x256xbf16>
    %143 = vector.extract_strided_slice %130 {offsets = [0, 6, 0, 0], sizes = [1, 1, 8, 256], strides = [1, 1, 1, 1]} : vector<1x8x8x256xbf16> to vector<1x1x8x256xbf16>
    %144 = vector.shape_cast %143 : vector<1x1x8x256xbf16> to vector<1x8x256xbf16>
    %145 = vector.extract_strided_slice %130 {offsets = [0, 7, 0, 0], sizes = [1, 1, 8, 256], strides = [1, 1, 1, 1]} : vector<1x8x8x256xbf16> to vector<1x1x8x256xbf16>
    %146 = vector.shape_cast %145 : vector<1x1x8x256xbf16> to vector<1x8x256xbf16>
    %147 = tpu.concatenate %132, %134, %136, %138, %140, %142, %144, %146 in 1 : vector<1x8x256xbf16>, vector<1x8x256xbf16>, vector<1x8x256xbf16>, vector<1x8x256xbf16>, vector<1x8x256xbf16>, vector<1x8x256xbf16>, vector<1x8x256xbf16>, vector<1x8x256xbf16> -> vector<1x64x256xbf16>
    %148 = vector.shape_cast %147 : vector<1x64x256xbf16> to vector<64x256xbf16>
    %c2_57 = arith.constant 2 : index
    %c0_58 = arith.constant 0 : index
    %c0_59 = arith.constant 0 : index
    %149 = vector.load %arg2[%c2_57, %c0_58, %c0_59] : memref<4x256x64xbf16, #tpu.memory_space<vmem>>, vector<1x256x64xbf16>
    %150 = vector.shape_cast %149 : vector<1x256x64xbf16> to vector<256x64xbf16>
    %cst_60 = arith.constant dense<0.000000e+00> : vector<64x64xf32>
    %151 = tpu.matmul %148, %150, %cst_60 {dimension_numbers = #tpu.dot_dimension_numbers<[1], [0], [0], [1], [0, 0, 1, 1], [], []>} : vector<64x256xbf16>, vector<256x64xbf16>, vector<64x64xf32> -> vector<64x64xf32>
    %cst_61 = arith.constant dense<0.000000e+00> : vector<64xf32>
    %152 = vector.multi_reduction <add>, %151, %cst_61 [0] : vector<64x64xf32> to vector<64xf32>
    %153 = vector.shape_cast %152 : vector<64xf32> to vector<1x64xf32>
    %cst_62 = arith.constant 6.400000e+01 : f32
    %154 = vector.broadcast %cst_62 : f32 to vector<1x64xf32>
    %155 = arith.divf %153, %154 : vector<1x64xf32>
    %156 = vector.broadcast %155 : vector<1x64xf32> to vector<64x64xf32>
    %157 = arith.subf %151, %156 : vector<64x64xf32>
    %158 = arith.mulf %157, %157 : vector<64x64xf32>
    %cst_63 = arith.constant dense<0.000000e+00> : vector<64xf32>
    %159 = vector.multi_reduction <add>, %158, %cst_63 [0] : vector<64x64xf32> to vector<64xf32>
    %160 = vector.shape_cast %159 : vector<64xf32> to vector<1x64xf32>
    %161 = arith.truncf %151 : vector<64x64xf32> to vector<64x64xbf16>
    %162 = vector.extract_strided_slice %19 {offsets = [0, 1, 1, 0], sizes = [1, 8, 8, 64], strides = [1, 1, 1, 1]} : vector<1x10x10x64xbf16> to vector<1x8x8x64xbf16>
    %163 = vector.extract_strided_slice %19 {offsets = [0, 1, 2, 0], sizes = [1, 8, 8, 64], strides = [1, 1, 1, 1]} : vector<1x10x10x64xbf16> to vector<1x8x8x64xbf16>
    %164 = vector.extract_strided_slice %19 {offsets = [0, 2, 1, 0], sizes = [1, 8, 8, 64], strides = [1, 1, 1, 1]} : vector<1x10x10x64xbf16> to vector<1x8x8x64xbf16>
    %165 = vector.extract_strided_slice %19 {offsets = [0, 2, 2, 0], sizes = [1, 8, 8, 64], strides = [1, 1, 1, 1]} : vector<1x10x10x64xbf16> to vector<1x8x8x64xbf16>
    %166 = tpu.concatenate %162, %163, %164, %165 in 3 : vector<1x8x8x64xbf16>, vector<1x8x8x64xbf16>, vector<1x8x8x64xbf16>, vector<1x8x8x64xbf16> -> vector<1x8x8x256xbf16>
    %167 = vector.extract_strided_slice %166 {offsets = [0, 0, 0, 0], sizes = [1, 1, 8, 256], strides = [1, 1, 1, 1]} : vector<1x8x8x256xbf16> to vector<1x1x8x256xbf16>
    %168 = vector.shape_cast %167 : vector<1x1x8x256xbf16> to vector<1x8x256xbf16>
    %169 = vector.extract_strided_slice %166 {offsets = [0, 1, 0, 0], sizes = [1, 1, 8, 256], strides = [1, 1, 1, 1]} : vector<1x8x8x256xbf16> to vector<1x1x8x256xbf16>
    %170 = vector.shape_cast %169 : vector<1x1x8x256xbf16> to vector<1x8x256xbf16>
    %171 = vector.extract_strided_slice %166 {offsets = [0, 2, 0, 0], sizes = [1, 1, 8, 256], strides = [1, 1, 1, 1]} : vector<1x8x8x256xbf16> to vector<1x1x8x256xbf16>
    %172 = vector.shape_cast %171 : vector<1x1x8x256xbf16> to vector<1x8x256xbf16>
    %173 = vector.extract_strided_slice %166 {offsets = [0, 3, 0, 0], sizes = [1, 1, 8, 256], strides = [1, 1, 1, 1]} : vector<1x8x8x256xbf16> to vector<1x1x8x256xbf16>
    %174 = vector.shape_cast %173 : vector<1x1x8x256xbf16> to vector<1x8x256xbf16>
    %175 = vector.extract_strided_slice %166 {offsets = [0, 4, 0, 0], sizes = [1, 1, 8, 256], strides = [1, 1, 1, 1]} : vector<1x8x8x256xbf16> to vector<1x1x8x256xbf16>
    %176 = vector.shape_cast %175 : vector<1x1x8x256xbf16> to vector<1x8x256xbf16>
    %177 = vector.extract_strided_slice %166 {offsets = [0, 5, 0, 0], sizes = [1, 1, 8, 256], strides = [1, 1, 1, 1]} : vector<1x8x8x256xbf16> to vector<1x1x8x256xbf16>
    %178 = vector.shape_cast %177 : vector<1x1x8x256xbf16> to vector<1x8x256xbf16>
    %179 = vector.extract_strided_slice %166 {offsets = [0, 6, 0, 0], sizes = [1, 1, 8, 256], strides = [1, 1, 1, 1]} : vector<1x8x8x256xbf16> to vector<1x1x8x256xbf16>
    %180 = vector.shape_cast %179 : vector<1x1x8x256xbf16> to vector<1x8x256xbf16>
    %181 = vector.extract_strided_slice %166 {offsets = [0, 7, 0, 0], sizes = [1, 1, 8, 256], strides = [1, 1, 1, 1]} : vector<1x8x8x256xbf16> to vector<1x1x8x256xbf16>
    %182 = vector.shape_cast %181 : vector<1x1x8x256xbf16> to vector<1x8x256xbf16>
    %183 = tpu.concatenate %168, %170, %172, %174, %176, %178, %180, %182 in 1 : vector<1x8x256xbf16>, vector<1x8x256xbf16>, vector<1x8x256xbf16>, vector<1x8x256xbf16>, vector<1x8x256xbf16>, vector<1x8x256xbf16>, vector<1x8x256xbf16>, vector<1x8x256xbf16> -> vector<1x64x256xbf16>
    %184 = vector.shape_cast %183 : vector<1x64x256xbf16> to vector<64x256xbf16>
    %c3_64 = arith.constant 3 : index
    %c0_65 = arith.constant 0 : index
    %c0_66 = arith.constant 0 : index
    %185 = vector.load %arg2[%c3_64, %c0_65, %c0_66] : memref<4x256x64xbf16, #tpu.memory_space<vmem>>, vector<1x256x64xbf16>
    %186 = vector.shape_cast %185 : vector<1x256x64xbf16> to vector<256x64xbf16>
    %cst_67 = arith.constant dense<0.000000e+00> : vector<64x64xf32>
    %187 = tpu.matmul %184, %186, %cst_67 {dimension_numbers = #tpu.dot_dimension_numbers<[1], [0], [0], [1], [0, 0, 1, 1], [], []>} : vector<64x256xbf16>, vector<256x64xbf16>, vector<64x64xf32> -> vector<64x64xf32>
    %cst_68 = arith.constant dense<0.000000e+00> : vector<64xf32>
    %188 = vector.multi_reduction <add>, %187, %cst_68 [0] : vector<64x64xf32> to vector<64xf32>
    %189 = vector.shape_cast %188 : vector<64xf32> to vector<1x64xf32>
    %cst_69 = arith.constant 6.400000e+01 : f32
    %190 = vector.broadcast %cst_69 : f32 to vector<1x64xf32>
    %191 = arith.divf %189, %190 : vector<1x64xf32>
    %192 = vector.broadcast %191 : vector<1x64xf32> to vector<64x64xf32>
    %193 = arith.subf %187, %192 : vector<64x64xf32>
    %194 = arith.mulf %193, %193 : vector<64x64xf32>
    %cst_70 = arith.constant dense<0.000000e+00> : vector<64xf32>
    %195 = vector.multi_reduction <add>, %194, %cst_70 [0] : vector<64x64xf32> to vector<64xf32>
    %196 = vector.shape_cast %195 : vector<64xf32> to vector<1x64xf32>
    %197 = arith.truncf %187 : vector<64x64xf32> to vector<64x64xbf16>
    %198 = tpu.concatenate %161, %197 in 1 : vector<64x64xbf16>, vector<64x64xbf16> -> vector<64x128xbf16>
    %199 = vector.shape_cast %198 : vector<64x128xbf16> to vector<1x64x128xbf16>
    %200 = vector.extract_strided_slice %199 {offsets = [0, 0, 0], sizes = [1, 8, 128], strides = [1, 1, 1]} : vector<1x64x128xbf16> to vector<1x8x128xbf16>
    %c0_71 = arith.constant 0 : index
    %c0_72 = arith.constant 0 : index
    %c1_73 = arith.constant 1 : index
    %c0_74 = arith.constant 0 : index
    %c0_75 = arith.constant 0 : index
    %201 = vector.load %arg5[%c0_71, %c0_72, %c1_73, %c0_74, %c0_75] : memref<1x8x2x8x128xbf16, #tpu.memory_space<vmem>>, vector<1x1x1x8x128xbf16>
    %202 = vector.shape_cast %201 : vector<1x1x1x8x128xbf16> to vector<1x8x128xbf16>
    %203 = vector.shape_cast %200 : vector<1x8x128xbf16> to vector<1x1x1x8x128xbf16>
    tpu.vector_store %arg5[%c0_71, %c0_72, %c1_73, %c0_74, %c0_75], %203 {strides = array<i32>} : memref<1x8x2x8x128xbf16, #tpu.memory_space<vmem>>, vector<1x1x1x8x128xbf16>,
    %204 = vector.extract_strided_slice %199 {offsets = [0, 8, 0], sizes = [1, 8, 128], strides = [1, 1, 1]} : vector<1x64x128xbf16> to vector<1x8x128xbf16>
    %c0_76 = arith.constant 0 : index
    %c1_77 = arith.constant 1 : index
    %c1_78 = arith.constant 1 : index
    %c0_79 = arith.constant 0 : index
    %c0_80 = arith.constant 0 : index
    %205 = vector.load %arg5[%c0_76, %c1_77, %c1_78, %c0_79, %c0_80] : memref<1x8x2x8x128xbf16, #tpu.memory_space<vmem>>, vector<1x1x1x8x128xbf16>
    %206 = vector.shape_cast %205 : vector<1x1x1x8x128xbf16> to vector<1x8x128xbf16>
    %207 = vector.shape_cast %204 : vector<1x8x128xbf16> to vector<1x1x1x8x128xbf16>
    tpu.vector_store %arg5[%c0_76, %c1_77, %c1_78, %c0_79, %c0_80], %207 {strides = array<i32>} : memref<1x8x2x8x128xbf16, #tpu.memory_space<vmem>>, vector<1x1x1x8x128xbf16>,
    %208 = vector.extract_strided_slice %199 {offsets = [0, 16, 0], sizes = [1, 8, 128], strides = [1, 1, 1]} : vector<1x64x128xbf16> to vector<1x8x128xbf16>
    %c0_81 = arith.constant 0 : index
    %c2_82 = arith.constant 2 : index
    %c1_83 = arith.constant 1 : index
    %c0_84 = arith.constant 0 : index
    %c0_85 = arith.constant 0 : index
    %209 = vector.load %arg5[%c0_81, %c2_82, %c1_83, %c0_84, %c0_85] : memref<1x8x2x8x128xbf16, #tpu.memory_space<vmem>>, vector<1x1x1x8x128xbf16>
    %210 = vector.shape_cast %209 : vector<1x1x1x8x128xbf16> to vector<1x8x128xbf16>
    %211 = vector.shape_cast %208 : vector<1x8x128xbf16> to vector<1x1x1x8x128xbf16>
    tpu.vector_store %arg5[%c0_81, %c2_82, %c1_83, %c0_84, %c0_85], %211 {strides = array<i32>} : memref<1x8x2x8x128xbf16, #tpu.memory_space<vmem>>, vector<1x1x1x8x128xbf16>,
    %212 = vector.extract_strided_slice %199 {offsets = [0, 24, 0], sizes = [1, 8, 128], strides = [1, 1, 1]} : vector<1x64x128xbf16> to vector<1x8x128xbf16>
    %c0_86 = arith.constant 0 : index
    %c3_87 = arith.constant 3 : index
    %c1_88 = arith.constant 1 : index
    %c0_89 = arith.constant 0 : index
    %c0_90 = arith.constant 0 : index
    %213 = vector.load %arg5[%c0_86, %c3_87, %c1_88, %c0_89, %c0_90] : memref<1x8x2x8x128xbf16, #tpu.memory_space<vmem>>, vector<1x1x1x8x128xbf16>
    %214 = vector.shape_cast %213 : vector<1x1x1x8x128xbf16> to vector<1x8x128xbf16>
    %215 = vector.shape_cast %212 : vector<1x8x128xbf16> to vector<1x1x1x8x128xbf16>
    tpu.vector_store %arg5[%c0_86, %c3_87, %c1_88, %c0_89, %c0_90], %215 {strides = array<i32>} : memref<1x8x2x8x128xbf16, #tpu.memory_space<vmem>>, vector<1x1x1x8x128xbf16>,
    %216 = vector.extract_strided_slice %199 {offsets = [0, 32, 0], sizes = [1, 8, 128], strides = [1, 1, 1]} : vector<1x64x128xbf16> to vector<1x8x128xbf16>
    %c0_91 = arith.constant 0 : index
    %c4_92 = arith.constant 4 : index
    %c1_93 = arith.constant 1 : index
    %c0_94 = arith.constant 0 : index
    %c0_95 = arith.constant 0 : index
    %217 = vector.load %arg5[%c0_91, %c4_92, %c1_93, %c0_94, %c0_95] : memref<1x8x2x8x128xbf16, #tpu.memory_space<vmem>>, vector<1x1x1x8x128xbf16>
    %218 = vector.shape_cast %217 : vector<1x1x1x8x128xbf16> to vector<1x8x128xbf16>
    %219 = vector.shape_cast %216 : vector<1x8x128xbf16> to vector<1x1x1x8x128xbf16>
    tpu.vector_store %arg5[%c0_91, %c4_92, %c1_93, %c0_94, %c0_95], %219 {strides = array<i32>} : memref<1x8x2x8x128xbf16, #tpu.memory_space<vmem>>, vector<1x1x1x8x128xbf16>,
    %220 = vector.extract_strided_slice %199 {offsets = [0, 40, 0], sizes = [1, 8, 128], strides = [1, 1, 1]} : vector<1x64x128xbf16> to vector<1x8x128xbf16>
    %c0_96 = arith.constant 0 : index
    %c5_97 = arith.constant 5 : index
    %c1_98 = arith.constant 1 : index
    %c0_99 = arith.constant 0 : index
    %c0_100 = arith.constant 0 : index
    %221 = vector.load %arg5[%c0_96, %c5_97, %c1_98, %c0_99, %c0_100] : memref<1x8x2x8x128xbf16, #tpu.memory_space<vmem>>, vector<1x1x1x8x128xbf16>
    %222 = vector.shape_cast %221 : vector<1x1x1x8x128xbf16> to vector<1x8x128xbf16>
    %223 = vector.shape_cast %220 : vector<1x8x128xbf16> to vector<1x1x1x8x128xbf16>
    tpu.vector_store %arg5[%c0_96, %c5_97, %c1_98, %c0_99, %c0_100], %223 {strides = array<i32>} : memref<1x8x2x8x128xbf16, #tpu.memory_space<vmem>>, vector<1x1x1x8x128xbf16>,
    %224 = vector.extract_strided_slice %199 {offsets = [0, 48, 0], sizes = [1, 8, 128], strides = [1, 1, 1]} : vector<1x64x128xbf16> to vector<1x8x128xbf16>
    %c0_101 = arith.constant 0 : index
    %c6_102 = arith.constant 6 : index
    %c1_103 = arith.constant 1 : index
    %c0_104 = arith.constant 0 : index
    %c0_105 = arith.constant 0 : index
    %225 = vector.load %arg5[%c0_101, %c6_102, %c1_103, %c0_104, %c0_105] : memref<1x8x2x8x128xbf16, #tpu.memory_space<vmem>>, vector<1x1x1x8x128xbf16>
    %226 = vector.shape_cast %225 : vector<1x1x1x8x128xbf16> to vector<1x8x128xbf16>
    %227 = vector.shape_cast %224 : vector<1x8x128xbf16> to vector<1x1x1x8x128xbf16>
    tpu.vector_store %arg5[%c0_101, %c6_102, %c1_103, %c0_104, %c0_105], %227 {strides = array<i32>} : memref<1x8x2x8x128xbf16, #tpu.memory_space<vmem>>, vector<1x1x1x8x128xbf16>,
    %228 = vector.extract_strided_slice %199 {offsets = [0, 56, 0], sizes = [1, 8, 128], strides = [1, 1, 1]} : vector<1x64x128xbf16> to vector<1x8x128xbf16>
    %c0_106 = arith.constant 0 : index
    %c7_107 = arith.constant 7 : index
    %c1_108 = arith.constant 1 : index
    %c0_109 = arith.constant 0 : index
    %c0_110 = arith.constant 0 : index
    %229 = vector.load %arg5[%c0_106, %c7_107, %c1_108, %c0_109, %c0_110] : memref<1x8x2x8x128xbf16, #tpu.memory_space<vmem>>, vector<1x1x1x8x128xbf16>
    %230 = vector.shape_cast %229 : vector<1x1x1x8x128xbf16> to vector<1x8x128xbf16>
    %231 = vector.shape_cast %228 : vector<1x8x128xbf16> to vector<1x1x1x8x128xbf16>
    tpu.vector_store %arg5[%c0_106, %c7_107, %c1_108, %c0_109, %c0_110], %231 {strides = array<i32>} : memref<1x8x2x8x128xbf16, #tpu.memory_space<vmem>>, vector<1x1x1x8x128xbf16>,
    %232 = tpu.concatenate %49, %85, %155, %191 in 0 : vector<1x64xf32>, vector<1x64xf32>, vector<1x64xf32>, vector<1x64xf32> -> vector<4x64xf32>
    %cst_111 = arith.constant dense<0.000000e+00> : vector<64xf32>
    %233 = vector.multi_reduction <add>, %232, %cst_111 [0] : vector<4x64xf32> to vector<64xf32>
    %234 = vector.shape_cast %233 : vector<64xf32> to vector<1x64xf32>
    %cst_112 = arith.constant 4.000000e+00 : f32
    %235 = vector.broadcast %cst_112 : f32 to vector<1x64xf32>
    %236 = arith.divf %234, %235 : vector<1x64xf32>
    %237 = arith.addf %54, %90 : vector<1x64xf32>
    %238 = arith.addf %237, %160 : vector<1x64xf32>
    %239 = arith.addf %238, %196 : vector<1x64xf32>
    %240 = vector.broadcast %236 : vector<1x64xf32> to vector<4x64xf32>
    %241 = arith.subf %232, %240 : vector<4x64xf32>
    %242 = arith.mulf %241, %241 : vector<4x64xf32>
    %cst_113 = arith.constant dense<0.000000e+00> : vector<64xf32>
    %243 = vector.multi_reduction <add>, %242, %cst_113 [0] : vector<4x64xf32> to vector<64xf32>
    %244 = vector.shape_cast %243 : vector<64xf32> to vector<1x64xf32>
    %cst_114 = arith.constant 6.400000e+01 : f32
    %245 = vector.broadcast %cst_114 : f32 to vector<1x64xf32>
    %246 = arith.mulf %245, %244 : vector<1x64xf32>
    %247 = arith.addf %239, %246 : vector<1x64xf32>
    %248 = tpu.concatenate %236, %247 in 0 : vector<1x64xf32>, vector<1x64xf32> -> vector<2x64xf32>
    %c0_115 = arith.constant 0 : index
    %c0_116 = arith.constant 0 : index
    %c0_117 = arith.constant 0 : index
    %249 = vector.load %arg6[%c0_115, %c0_116, %c0_117] : memref<1x2x64xf32, #tpu.memory_space<vmem>>, vector<1x2x64xf32>
    %250 = vector.shape_cast %249 : vector<1x2x64xf32> to vector<2x64xf32>
    %251 = vector.shape_cast %248 : vector<2x64xf32> to vector<1x2x64xf32>
    tpu.vector_store %arg6[%c0_115, %c0_116, %c0_117], %251 {strides = array<i32>} : memref<1x2x64xf32, #tpu.memory_space<vmem>>, vector<1x2x64xf32>,
    return
  }
  func.func @transform_0(%arg0: i32) -> (i32, i32, i32, i32) {
    %c0_i32 = arith.constant 0 : i32
    %c0_i32_0 = arith.constant 0 : i32
    %c0_i32_1 = arith.constant 0 : i32
    %c0_i32_2 = arith.constant 0 : i32
    return %arg0, %c0_i32, %c0_i32_0, %c0_i32_1 : i32, i32, i32, i32
  }
  func.func @transform_1(%arg0: i32) -> (i32, i32, i32) {
    %c0_i32 = arith.constant 0 : i32
    %c0_i32_0 = arith.constant 0 : i32
    %c0_i32_1 = arith.constant 0 : i32
    %c0_i32_2 = arith.constant 0 : i32
    return %c0_i32, %c0_i32_0, %c0_i32_1 : i32, i32, i32
  }
  func.func @transform_2(%arg0: i32) -> (i32, i32) {
    %c0_i32 = arith.constant 0 : i32
    %c0_i32_0 = arith.constant 0 : i32
    %c0_i32_1 = arith.constant 0 : i32
    return %c0_i32, %c0_i32_0 : i32, i32
  }
  func.func @transform_3(%arg0: i32) -> (i32, i32) {
    %c0_i32 = arith.constant 0 : i32
    %c0_i32_0 = arith.constant 0 : i32
    %c0_i32_1 = arith.constant 0 : i32
    return %c0_i32, %c0_i32_0 : i32, i32
  }
  func.func @transform_4(%arg0: i32) -> (i32, i32, i32, i32, i32) {
    %c0_i32 = arith.constant 0 : i32
    %c0_i32_0 = arith.constant 0 : i32
    %c0_i32_1 = arith.constant 0 : i32
    %c0_i32_2 = arith.constant 0 : i32
    %c0_i32_3 = arith.constant 0 : i32
    return %arg0, %c0_i32, %c0_i32_0, %c0_i32_1, %c0_i32_2 : i32, i32, i32, i32, i32
  }
  func.func @transform_5(%arg0: i32) -> (i32, i32, i32) {
    %c0_i32 = arith.constant 0 : i32
    %c0_i32_0 = arith.constant 0 : i32
    %c0_i32_1 = arith.constant 0 : i32
    return %arg0, %c0_i32, %c0_i32_0 : i32, i32, i32
  }
}

module attributes {stable_mosaic.version = 11 : i64} {
  func.func @_deconv_final_kernel(%arg0: i32, %arg1: memref<1x16x16x64xbf16, #tpu.memory_space<vmem>>, %arg2: memref<4x256x128xbf16, #tpu.memory_space<vmem>>, %arg3: memref<1x64xf32, #tpu.memory_space<vmem>>, %arg4: memref<1x64xf32, #tpu.memory_space<vmem>>, %arg5: memref<1x16x2x16x6xbf16, #tpu.memory_space<vmem>>) attributes {dimension_semantics = [#tpu.dimension_semantics<parallel>], iteration_bounds = array<i64: 2>, scalar_prefetch = 0 : i64, scratch_operands = 0 : i64, tpu.core_type = #tpu.core_type<tc>, window_params = [{transform_indices = @transform_0, window_bounds = array<i64: 1, 16, 16, 64>}, {pipeline_mode = #tpu.pipeline_mode<synchronous>, transform_indices = @transform_1, window_bounds = array<i64: 4, 256, 128>}, {pipeline_mode = #tpu.pipeline_mode<synchronous>, transform_indices = @transform_2, window_bounds = array<i64: 1, 64>}, {pipeline_mode = #tpu.pipeline_mode<synchronous>, transform_indices = @transform_3, window_bounds = array<i64: 1, 64>}, {transform_indices = @transform_4, window_bounds = array<i64: 1, 16, 2, 16, 6>}]} {
    %c0 = arith.constant 0 : index
    %c0_0 = arith.constant 0 : index
    %c0_1 = arith.constant 0 : index
    %c0_2 = arith.constant 0 : index
    %0 = vector.load %arg1[%c0, %c0_0, %c0_1, %c0_2] : memref<1x16x16x64xbf16, #tpu.memory_space<vmem>>, vector<1x16x16x64xbf16>
    %1 = arith.extf %0 : vector<1x16x16x64xbf16> to vector<1x16x16x64xf32>
    %c0_3 = arith.constant 0 : index
    %c0_4 = arith.constant 0 : index
    %2 = vector.load %arg3[%c0_3, %c0_4] : memref<1x64xf32, #tpu.memory_space<vmem>>, vector<1x64xf32>
    %3 = vector.shape_cast %2 : vector<1x64xf32> to vector<1x1x1x64xf32>
    %4 = vector.broadcast %3 : vector<1x1x1x64xf32> to vector<1x16x16x64xf32>
    %5 = arith.mulf %1, %4 : vector<1x16x16x64xf32>
    %c0_5 = arith.constant 0 : index
    %c0_6 = arith.constant 0 : index
    %6 = vector.load %arg4[%c0_5, %c0_6] : memref<1x64xf32, #tpu.memory_space<vmem>>, vector<1x64xf32>
    %7 = vector.shape_cast %6 : vector<1x64xf32> to vector<1x1x1x64xf32>
    %8 = vector.broadcast %7 : vector<1x1x1x64xf32> to vector<1x16x16x64xf32>
    %9 = arith.addf %5, %8 : vector<1x16x16x64xf32>
    %cst = arith.constant 0.000000e+00 : f32
    %10 = vector.broadcast %cst : f32 to vector<1x16x16x64xf32>
    %11 = arith.cmpf oge, %9, %10 : vector<1x16x16x64xf32>
    %cst_7 = arith.constant 5.000000e-02 : f32
    %12 = vector.broadcast %cst_7 : f32 to vector<1x16x16x64xf32>
    %13 = arith.mulf %12, %9 : vector<1x16x16x64xf32>
    %14 = arith.select %11, %9, %13 : vector<1x16x16x64xi1>, vector<1x16x16x64xf32>
    %15 = arith.truncf %14 : vector<1x16x16x64xf32> to vector<1x16x16x64xbf16>
    %cst_8 = arith.constant 0.000000e+00 : bf16
    %16 = vector.broadcast %cst_8 : bf16 to vector<1x1x16x64xbf16>
    %17 = tpu.concatenate %16, %15, %16 in 1 : vector<1x1x16x64xbf16>, vector<1x16x16x64xbf16>, vector<1x1x16x64xbf16> -> vector<1x18x16x64xbf16>
    %cst_9 = arith.constant 0.000000e+00 : bf16
    %18 = vector.broadcast %cst_9 : bf16 to vector<1x18x1x64xbf16>
    %19 = tpu.concatenate %18, %17, %18 in 2 : vector<1x18x1x64xbf16>, vector<1x18x16x64xbf16>, vector<1x18x1x64xbf16> -> vector<1x18x18x64xbf16>
    %20 = vector.extract_strided_slice %19 {offsets = [0, 0, 0, 0], sizes = [1, 16, 16, 64], strides = [1, 1, 1, 1]} : vector<1x18x18x64xbf16> to vector<1x16x16x64xbf16>
    %21 = vector.extract_strided_slice %19 {offsets = [0, 0, 1, 0], sizes = [1, 16, 16, 64], strides = [1, 1, 1, 1]} : vector<1x18x18x64xbf16> to vector<1x16x16x64xbf16>
    %22 = vector.extract_strided_slice %19 {offsets = [0, 1, 0, 0], sizes = [1, 16, 16, 64], strides = [1, 1, 1, 1]} : vector<1x18x18x64xbf16> to vector<1x16x16x64xbf16>
    %23 = vector.extract_strided_slice %19 {offsets = [0, 1, 1, 0], sizes = [1, 16, 16, 64], strides = [1, 1, 1, 1]} : vector<1x18x18x64xbf16> to vector<1x16x16x64xbf16>
    %24 = tpu.concatenate %20, %21, %22, %23 in 3 : vector<1x16x16x64xbf16>, vector<1x16x16x64xbf16>, vector<1x16x16x64xbf16>, vector<1x16x16x64xbf16> -> vector<1x16x16x256xbf16>
    %25 = vector.extract_strided_slice %24 {offsets = [0, 0, 0, 0], sizes = [1, 1, 16, 256], strides = [1, 1, 1, 1]} : vector<1x16x16x256xbf16> to vector<1x1x16x256xbf16>
    %26 = vector.shape_cast %25 : vector<1x1x16x256xbf16> to vector<1x16x256xbf16>
    %27 = vector.extract_strided_slice %24 {offsets = [0, 1, 0, 0], sizes = [1, 1, 16, 256], strides = [1, 1, 1, 1]} : vector<1x16x16x256xbf16> to vector<1x1x16x256xbf16>
    %28 = vector.shape_cast %27 : vector<1x1x16x256xbf16> to vector<1x16x256xbf16>
    %29 = vector.extract_strided_slice %24 {offsets = [0, 2, 0, 0], sizes = [1, 1, 16, 256], strides = [1, 1, 1, 1]} : vector<1x16x16x256xbf16> to vector<1x1x16x256xbf16>
    %30 = vector.shape_cast %29 : vector<1x1x16x256xbf16> to vector<1x16x256xbf16>
    %31 = vector.extract_strided_slice %24 {offsets = [0, 3, 0, 0], sizes = [1, 1, 16, 256], strides = [1, 1, 1, 1]} : vector<1x16x16x256xbf16> to vector<1x1x16x256xbf16>
    %32 = vector.shape_cast %31 : vector<1x1x16x256xbf16> to vector<1x16x256xbf16>
    %33 = vector.extract_strided_slice %24 {offsets = [0, 4, 0, 0], sizes = [1, 1, 16, 256], strides = [1, 1, 1, 1]} : vector<1x16x16x256xbf16> to vector<1x1x16x256xbf16>
    %34 = vector.shape_cast %33 : vector<1x1x16x256xbf16> to vector<1x16x256xbf16>
    %35 = vector.extract_strided_slice %24 {offsets = [0, 5, 0, 0], sizes = [1, 1, 16, 256], strides = [1, 1, 1, 1]} : vector<1x16x16x256xbf16> to vector<1x1x16x256xbf16>
    %36 = vector.shape_cast %35 : vector<1x1x16x256xbf16> to vector<1x16x256xbf16>
    %37 = vector.extract_strided_slice %24 {offsets = [0, 6, 0, 0], sizes = [1, 1, 16, 256], strides = [1, 1, 1, 1]} : vector<1x16x16x256xbf16> to vector<1x1x16x256xbf16>
    %38 = vector.shape_cast %37 : vector<1x1x16x256xbf16> to vector<1x16x256xbf16>
    %39 = vector.extract_strided_slice %24 {offsets = [0, 7, 0, 0], sizes = [1, 1, 16, 256], strides = [1, 1, 1, 1]} : vector<1x16x16x256xbf16> to vector<1x1x16x256xbf16>
    %40 = vector.shape_cast %39 : vector<1x1x16x256xbf16> to vector<1x16x256xbf16>
    %41 = vector.extract_strided_slice %24 {offsets = [0, 8, 0, 0], sizes = [1, 1, 16, 256], strides = [1, 1, 1, 1]} : vector<1x16x16x256xbf16> to vector<1x1x16x256xbf16>
    %42 = vector.shape_cast %41 : vector<1x1x16x256xbf16> to vector<1x16x256xbf16>
    %43 = vector.extract_strided_slice %24 {offsets = [0, 9, 0, 0], sizes = [1, 1, 16, 256], strides = [1, 1, 1, 1]} : vector<1x16x16x256xbf16> to vector<1x1x16x256xbf16>
    %44 = vector.shape_cast %43 : vector<1x1x16x256xbf16> to vector<1x16x256xbf16>
    %45 = vector.extract_strided_slice %24 {offsets = [0, 10, 0, 0], sizes = [1, 1, 16, 256], strides = [1, 1, 1, 1]} : vector<1x16x16x256xbf16> to vector<1x1x16x256xbf16>
    %46 = vector.shape_cast %45 : vector<1x1x16x256xbf16> to vector<1x16x256xbf16>
    %47 = vector.extract_strided_slice %24 {offsets = [0, 11, 0, 0], sizes = [1, 1, 16, 256], strides = [1, 1, 1, 1]} : vector<1x16x16x256xbf16> to vector<1x1x16x256xbf16>
    %48 = vector.shape_cast %47 : vector<1x1x16x256xbf16> to vector<1x16x256xbf16>
    %49 = vector.extract_strided_slice %24 {offsets = [0, 12, 0, 0], sizes = [1, 1, 16, 256], strides = [1, 1, 1, 1]} : vector<1x16x16x256xbf16> to vector<1x1x16x256xbf16>
    %50 = vector.shape_cast %49 : vector<1x1x16x256xbf16> to vector<1x16x256xbf16>
    %51 = vector.extract_strided_slice %24 {offsets = [0, 13, 0, 0], sizes = [1, 1, 16, 256], strides = [1, 1, 1, 1]} : vector<1x16x16x256xbf16> to vector<1x1x16x256xbf16>
    %52 = vector.shape_cast %51 : vector<1x1x16x256xbf16> to vector<1x16x256xbf16>
    %53 = vector.extract_strided_slice %24 {offsets = [0, 14, 0, 0], sizes = [1, 1, 16, 256], strides = [1, 1, 1, 1]} : vector<1x16x16x256xbf16> to vector<1x1x16x256xbf16>
    %54 = vector.shape_cast %53 : vector<1x1x16x256xbf16> to vector<1x16x256xbf16>
    %55 = vector.extract_strided_slice %24 {offsets = [0, 15, 0, 0], sizes = [1, 1, 16, 256], strides = [1, 1, 1, 1]} : vector<1x16x16x256xbf16> to vector<1x1x16x256xbf16>
    %56 = vector.shape_cast %55 : vector<1x1x16x256xbf16> to vector<1x16x256xbf16>
    %57 = tpu.concatenate %26, %28, %30, %32, %34, %36, %38, %40, %42, %44, %46, %48, %50, %52, %54, %56 in 1 : vector<1x16x256xbf16>, vector<1x16x256xbf16>, vector<1x16x256xbf16>, vector<1x16x256xbf16>, vector<1x16x256xbf16>, vector<1x16x256xbf16>, vector<1x16x256xbf16>, vector<1x16x256xbf16>, vector<1x16x256xbf16>, vector<1x16x256xbf16>, vector<1x16x256xbf16>, vector<1x16x256xbf16>, vector<1x16x256xbf16>, vector<1x16x256xbf16>, vector<1x16x256xbf16>, vector<1x16x256xbf16> -> vector<1x256x256xbf16>
    %58 = vector.shape_cast %57 : vector<1x256x256xbf16> to vector<256x256xbf16>
    %c0_10 = arith.constant 0 : index
    %c0_11 = arith.constant 0 : index
    %c0_12 = arith.constant 0 : index
    %59 = vector.load %arg2[%c0_10, %c0_11, %c0_12] : memref<4x256x128xbf16, #tpu.memory_space<vmem>>, vector<1x256x128xbf16>
    %60 = vector.shape_cast %59 : vector<1x256x128xbf16> to vector<256x128xbf16>
    %cst_13 = arith.constant dense<0.000000e+00> : vector<256x128xf32>
    %61 = tpu.matmul %58, %60, %cst_13 {dimension_numbers = #tpu.dot_dimension_numbers<[1], [0], [0], [1], [0, 0, 1, 1], [], []>} : vector<256x256xbf16>, vector<256x128xbf16>, vector<256x128xf32> -> vector<256x128xf32>
    %62 = vector.extract_strided_slice %61 {offsets = [0, 0], sizes = [256, 3], strides = [1, 1]} : vector<256x128xf32> to vector<256x3xf32>
    %63 = math.tanh %62 : vector<256x3xf32>
    %64 = arith.truncf %63 : vector<256x3xf32> to vector<256x3xbf16>
    %65 = vector.extract_strided_slice %19 {offsets = [0, 0, 1, 0], sizes = [1, 16, 16, 64], strides = [1, 1, 1, 1]} : vector<1x18x18x64xbf16> to vector<1x16x16x64xbf16>
    %66 = vector.extract_strided_slice %19 {offsets = [0, 0, 2, 0], sizes = [1, 16, 16, 64], strides = [1, 1, 1, 1]} : vector<1x18x18x64xbf16> to vector<1x16x16x64xbf16>
    %67 = vector.extract_strided_slice %19 {offsets = [0, 1, 1, 0], sizes = [1, 16, 16, 64], strides = [1, 1, 1, 1]} : vector<1x18x18x64xbf16> to vector<1x16x16x64xbf16>
    %68 = vector.extract_strided_slice %19 {offsets = [0, 1, 2, 0], sizes = [1, 16, 16, 64], strides = [1, 1, 1, 1]} : vector<1x18x18x64xbf16> to vector<1x16x16x64xbf16>
    %69 = tpu.concatenate %65, %66, %67, %68 in 3 : vector<1x16x16x64xbf16>, vector<1x16x16x64xbf16>, vector<1x16x16x64xbf16>, vector<1x16x16x64xbf16> -> vector<1x16x16x256xbf16>
    %70 = vector.extract_strided_slice %69 {offsets = [0, 0, 0, 0], sizes = [1, 1, 16, 256], strides = [1, 1, 1, 1]} : vector<1x16x16x256xbf16> to vector<1x1x16x256xbf16>
    %71 = vector.shape_cast %70 : vector<1x1x16x256xbf16> to vector<1x16x256xbf16>
    %72 = vector.extract_strided_slice %69 {offsets = [0, 1, 0, 0], sizes = [1, 1, 16, 256], strides = [1, 1, 1, 1]} : vector<1x16x16x256xbf16> to vector<1x1x16x256xbf16>
    %73 = vector.shape_cast %72 : vector<1x1x16x256xbf16> to vector<1x16x256xbf16>
    %74 = vector.extract_strided_slice %69 {offsets = [0, 2, 0, 0], sizes = [1, 1, 16, 256], strides = [1, 1, 1, 1]} : vector<1x16x16x256xbf16> to vector<1x1x16x256xbf16>
    %75 = vector.shape_cast %74 : vector<1x1x16x256xbf16> to vector<1x16x256xbf16>
    %76 = vector.extract_strided_slice %69 {offsets = [0, 3, 0, 0], sizes = [1, 1, 16, 256], strides = [1, 1, 1, 1]} : vector<1x16x16x256xbf16> to vector<1x1x16x256xbf16>
    %77 = vector.shape_cast %76 : vector<1x1x16x256xbf16> to vector<1x16x256xbf16>
    %78 = vector.extract_strided_slice %69 {offsets = [0, 4, 0, 0], sizes = [1, 1, 16, 256], strides = [1, 1, 1, 1]} : vector<1x16x16x256xbf16> to vector<1x1x16x256xbf16>
    %79 = vector.shape_cast %78 : vector<1x1x16x256xbf16> to vector<1x16x256xbf16>
    %80 = vector.extract_strided_slice %69 {offsets = [0, 5, 0, 0], sizes = [1, 1, 16, 256], strides = [1, 1, 1, 1]} : vector<1x16x16x256xbf16> to vector<1x1x16x256xbf16>
    %81 = vector.shape_cast %80 : vector<1x1x16x256xbf16> to vector<1x16x256xbf16>
    %82 = vector.extract_strided_slice %69 {offsets = [0, 6, 0, 0], sizes = [1, 1, 16, 256], strides = [1, 1, 1, 1]} : vector<1x16x16x256xbf16> to vector<1x1x16x256xbf16>
    %83 = vector.shape_cast %82 : vector<1x1x16x256xbf16> to vector<1x16x256xbf16>
    %84 = vector.extract_strided_slice %69 {offsets = [0, 7, 0, 0], sizes = [1, 1, 16, 256], strides = [1, 1, 1, 1]} : vector<1x16x16x256xbf16> to vector<1x1x16x256xbf16>
    %85 = vector.shape_cast %84 : vector<1x1x16x256xbf16> to vector<1x16x256xbf16>
    %86 = vector.extract_strided_slice %69 {offsets = [0, 8, 0, 0], sizes = [1, 1, 16, 256], strides = [1, 1, 1, 1]} : vector<1x16x16x256xbf16> to vector<1x1x16x256xbf16>
    %87 = vector.shape_cast %86 : vector<1x1x16x256xbf16> to vector<1x16x256xbf16>
    %88 = vector.extract_strided_slice %69 {offsets = [0, 9, 0, 0], sizes = [1, 1, 16, 256], strides = [1, 1, 1, 1]} : vector<1x16x16x256xbf16> to vector<1x1x16x256xbf16>
    %89 = vector.shape_cast %88 : vector<1x1x16x256xbf16> to vector<1x16x256xbf16>
    %90 = vector.extract_strided_slice %69 {offsets = [0, 10, 0, 0], sizes = [1, 1, 16, 256], strides = [1, 1, 1, 1]} : vector<1x16x16x256xbf16> to vector<1x1x16x256xbf16>
    %91 = vector.shape_cast %90 : vector<1x1x16x256xbf16> to vector<1x16x256xbf16>
    %92 = vector.extract_strided_slice %69 {offsets = [0, 11, 0, 0], sizes = [1, 1, 16, 256], strides = [1, 1, 1, 1]} : vector<1x16x16x256xbf16> to vector<1x1x16x256xbf16>
    %93 = vector.shape_cast %92 : vector<1x1x16x256xbf16> to vector<1x16x256xbf16>
    %94 = vector.extract_strided_slice %69 {offsets = [0, 12, 0, 0], sizes = [1, 1, 16, 256], strides = [1, 1, 1, 1]} : vector<1x16x16x256xbf16> to vector<1x1x16x256xbf16>
    %95 = vector.shape_cast %94 : vector<1x1x16x256xbf16> to vector<1x16x256xbf16>
    %96 = vector.extract_strided_slice %69 {offsets = [0, 13, 0, 0], sizes = [1, 1, 16, 256], strides = [1, 1, 1, 1]} : vector<1x16x16x256xbf16> to vector<1x1x16x256xbf16>
    %97 = vector.shape_cast %96 : vector<1x1x16x256xbf16> to vector<1x16x256xbf16>
    %98 = vector.extract_strided_slice %69 {offsets = [0, 14, 0, 0], sizes = [1, 1, 16, 256], strides = [1, 1, 1, 1]} : vector<1x16x16x256xbf16> to vector<1x1x16x256xbf16>
    %99 = vector.shape_cast %98 : vector<1x1x16x256xbf16> to vector<1x16x256xbf16>
    %100 = vector.extract_strided_slice %69 {offsets = [0, 15, 0, 0], sizes = [1, 1, 16, 256], strides = [1, 1, 1, 1]} : vector<1x16x16x256xbf16> to vector<1x1x16x256xbf16>
    %101 = vector.shape_cast %100 : vector<1x1x16x256xbf16> to vector<1x16x256xbf16>
    %102 = tpu.concatenate %71, %73, %75, %77, %79, %81, %83, %85, %87, %89, %91, %93, %95, %97, %99, %101 in 1 : vector<1x16x256xbf16>, vector<1x16x256xbf16>, vector<1x16x256xbf16>, vector<1x16x256xbf16>, vector<1x16x256xbf16>, vector<1x16x256xbf16>, vector<1x16x256xbf16>, vector<1x16x256xbf16>, vector<1x16x256xbf16>, vector<1x16x256xbf16>, vector<1x16x256xbf16>, vector<1x16x256xbf16>, vector<1x16x256xbf16>, vector<1x16x256xbf16>, vector<1x16x256xbf16>, vector<1x16x256xbf16> -> vector<1x256x256xbf16>
    %103 = vector.shape_cast %102 : vector<1x256x256xbf16> to vector<256x256xbf16>
    %c1 = arith.constant 1 : index
    %c0_14 = arith.constant 0 : index
    %c0_15 = arith.constant 0 : index
    %104 = vector.load %arg2[%c1, %c0_14, %c0_15] : memref<4x256x128xbf16, #tpu.memory_space<vmem>>, vector<1x256x128xbf16>
    %105 = vector.shape_cast %104 : vector<1x256x128xbf16> to vector<256x128xbf16>
    %cst_16 = arith.constant dense<0.000000e+00> : vector<256x128xf32>
    %106 = tpu.matmul %103, %105, %cst_16 {dimension_numbers = #tpu.dot_dimension_numbers<[1], [0], [0], [1], [0, 0, 1, 1], [], []>} : vector<256x256xbf16>, vector<256x128xbf16>, vector<256x128xf32> -> vector<256x128xf32>
    %107 = vector.extract_strided_slice %106 {offsets = [0, 0], sizes = [256, 3], strides = [1, 1]} : vector<256x128xf32> to vector<256x3xf32>
    %108 = math.tanh %107 : vector<256x3xf32>
    %109 = arith.truncf %108 : vector<256x3xf32> to vector<256x3xbf16>
    %110 = tpu.concatenate %64, %109 in 1 : vector<256x3xbf16>, vector<256x3xbf16> -> vector<256x6xbf16>
    %111 = vector.shape_cast %110 : vector<256x6xbf16> to vector<1x256x6xbf16>
    %112 = vector.extract_strided_slice %111 {offsets = [0, 0, 0], sizes = [1, 16, 6], strides = [1, 1, 1]} : vector<1x256x6xbf16> to vector<1x16x6xbf16>
    %c0_17 = arith.constant 0 : index
    %c0_18 = arith.constant 0 : index
    %c0_19 = arith.constant 0 : index
    %c0_20 = arith.constant 0 : index
    %c0_21 = arith.constant 0 : index
    %113 = vector.load %arg5[%c0_17, %c0_18, %c0_19, %c0_20, %c0_21] : memref<1x16x2x16x6xbf16, #tpu.memory_space<vmem>>, vector<1x1x1x16x6xbf16>
    %114 = vector.shape_cast %113 : vector<1x1x1x16x6xbf16> to vector<1x16x6xbf16>
    %115 = vector.shape_cast %112 : vector<1x16x6xbf16> to vector<1x1x1x16x6xbf16>
    tpu.vector_store %arg5[%c0_17, %c0_18, %c0_19, %c0_20, %c0_21], %115 {strides = array<i32>} : memref<1x16x2x16x6xbf16, #tpu.memory_space<vmem>>, vector<1x1x1x16x6xbf16>,
    %116 = vector.extract_strided_slice %111 {offsets = [0, 16, 0], sizes = [1, 16, 6], strides = [1, 1, 1]} : vector<1x256x6xbf16> to vector<1x16x6xbf16>
    %c0_22 = arith.constant 0 : index
    %c1_23 = arith.constant 1 : index
    %c0_24 = arith.constant 0 : index
    %c0_25 = arith.constant 0 : index
    %c0_26 = arith.constant 0 : index
    %117 = vector.load %arg5[%c0_22, %c1_23, %c0_24, %c0_25, %c0_26] : memref<1x16x2x16x6xbf16, #tpu.memory_space<vmem>>, vector<1x1x1x16x6xbf16>
    %118 = vector.shape_cast %117 : vector<1x1x1x16x6xbf16> to vector<1x16x6xbf16>
    %119 = vector.shape_cast %116 : vector<1x16x6xbf16> to vector<1x1x1x16x6xbf16>
    tpu.vector_store %arg5[%c0_22, %c1_23, %c0_24, %c0_25, %c0_26], %119 {strides = array<i32>} : memref<1x16x2x16x6xbf16, #tpu.memory_space<vmem>>, vector<1x1x1x16x6xbf16>,
    %120 = vector.extract_strided_slice %111 {offsets = [0, 32, 0], sizes = [1, 16, 6], strides = [1, 1, 1]} : vector<1x256x6xbf16> to vector<1x16x6xbf16>
    %c0_27 = arith.constant 0 : index
    %c2 = arith.constant 2 : index
    %c0_28 = arith.constant 0 : index
    %c0_29 = arith.constant 0 : index
    %c0_30 = arith.constant 0 : index
    %121 = vector.load %arg5[%c0_27, %c2, %c0_28, %c0_29, %c0_30] : memref<1x16x2x16x6xbf16, #tpu.memory_space<vmem>>, vector<1x1x1x16x6xbf16>
    %122 = vector.shape_cast %121 : vector<1x1x1x16x6xbf16> to vector<1x16x6xbf16>
    %123 = vector.shape_cast %120 : vector<1x16x6xbf16> to vector<1x1x1x16x6xbf16>
    tpu.vector_store %arg5[%c0_27, %c2, %c0_28, %c0_29, %c0_30], %123 {strides = array<i32>} : memref<1x16x2x16x6xbf16, #tpu.memory_space<vmem>>, vector<1x1x1x16x6xbf16>,
    %124 = vector.extract_strided_slice %111 {offsets = [0, 48, 0], sizes = [1, 16, 6], strides = [1, 1, 1]} : vector<1x256x6xbf16> to vector<1x16x6xbf16>
    %c0_31 = arith.constant 0 : index
    %c3 = arith.constant 3 : index
    %c0_32 = arith.constant 0 : index
    %c0_33 = arith.constant 0 : index
    %c0_34 = arith.constant 0 : index
    %125 = vector.load %arg5[%c0_31, %c3, %c0_32, %c0_33, %c0_34] : memref<1x16x2x16x6xbf16, #tpu.memory_space<vmem>>, vector<1x1x1x16x6xbf16>
    %126 = vector.shape_cast %125 : vector<1x1x1x16x6xbf16> to vector<1x16x6xbf16>
    %127 = vector.shape_cast %124 : vector<1x16x6xbf16> to vector<1x1x1x16x6xbf16>
    tpu.vector_store %arg5[%c0_31, %c3, %c0_32, %c0_33, %c0_34], %127 {strides = array<i32>} : memref<1x16x2x16x6xbf16, #tpu.memory_space<vmem>>, vector<1x1x1x16x6xbf16>,
    %128 = vector.extract_strided_slice %111 {offsets = [0, 64, 0], sizes = [1, 16, 6], strides = [1, 1, 1]} : vector<1x256x6xbf16> to vector<1x16x6xbf16>
    %c0_35 = arith.constant 0 : index
    %c4 = arith.constant 4 : index
    %c0_36 = arith.constant 0 : index
    %c0_37 = arith.constant 0 : index
    %c0_38 = arith.constant 0 : index
    %129 = vector.load %arg5[%c0_35, %c4, %c0_36, %c0_37, %c0_38] : memref<1x16x2x16x6xbf16, #tpu.memory_space<vmem>>, vector<1x1x1x16x6xbf16>
    %130 = vector.shape_cast %129 : vector<1x1x1x16x6xbf16> to vector<1x16x6xbf16>
    %131 = vector.shape_cast %128 : vector<1x16x6xbf16> to vector<1x1x1x16x6xbf16>
    tpu.vector_store %arg5[%c0_35, %c4, %c0_36, %c0_37, %c0_38], %131 {strides = array<i32>} : memref<1x16x2x16x6xbf16, #tpu.memory_space<vmem>>, vector<1x1x1x16x6xbf16>,
    %132 = vector.extract_strided_slice %111 {offsets = [0, 80, 0], sizes = [1, 16, 6], strides = [1, 1, 1]} : vector<1x256x6xbf16> to vector<1x16x6xbf16>
    %c0_39 = arith.constant 0 : index
    %c5 = arith.constant 5 : index
    %c0_40 = arith.constant 0 : index
    %c0_41 = arith.constant 0 : index
    %c0_42 = arith.constant 0 : index
    %133 = vector.load %arg5[%c0_39, %c5, %c0_40, %c0_41, %c0_42] : memref<1x16x2x16x6xbf16, #tpu.memory_space<vmem>>, vector<1x1x1x16x6xbf16>
    %134 = vector.shape_cast %133 : vector<1x1x1x16x6xbf16> to vector<1x16x6xbf16>
    %135 = vector.shape_cast %132 : vector<1x16x6xbf16> to vector<1x1x1x16x6xbf16>
    tpu.vector_store %arg5[%c0_39, %c5, %c0_40, %c0_41, %c0_42], %135 {strides = array<i32>} : memref<1x16x2x16x6xbf16, #tpu.memory_space<vmem>>, vector<1x1x1x16x6xbf16>,
    %136 = vector.extract_strided_slice %111 {offsets = [0, 96, 0], sizes = [1, 16, 6], strides = [1, 1, 1]} : vector<1x256x6xbf16> to vector<1x16x6xbf16>
    %c0_43 = arith.constant 0 : index
    %c6 = arith.constant 6 : index
    %c0_44 = arith.constant 0 : index
    %c0_45 = arith.constant 0 : index
    %c0_46 = arith.constant 0 : index
    %137 = vector.load %arg5[%c0_43, %c6, %c0_44, %c0_45, %c0_46] : memref<1x16x2x16x6xbf16, #tpu.memory_space<vmem>>, vector<1x1x1x16x6xbf16>
    %138 = vector.shape_cast %137 : vector<1x1x1x16x6xbf16> to vector<1x16x6xbf16>
    %139 = vector.shape_cast %136 : vector<1x16x6xbf16> to vector<1x1x1x16x6xbf16>
    tpu.vector_store %arg5[%c0_43, %c6, %c0_44, %c0_45, %c0_46], %139 {strides = array<i32>} : memref<1x16x2x16x6xbf16, #tpu.memory_space<vmem>>, vector<1x1x1x16x6xbf16>,
    %140 = vector.extract_strided_slice %111 {offsets = [0, 112, 0], sizes = [1, 16, 6], strides = [1, 1, 1]} : vector<1x256x6xbf16> to vector<1x16x6xbf16>
    %c0_47 = arith.constant 0 : index
    %c7 = arith.constant 7 : index
    %c0_48 = arith.constant 0 : index
    %c0_49 = arith.constant 0 : index
    %c0_50 = arith.constant 0 : index
    %141 = vector.load %arg5[%c0_47, %c7, %c0_48, %c0_49, %c0_50] : memref<1x16x2x16x6xbf16, #tpu.memory_space<vmem>>, vector<1x1x1x16x6xbf16>
    %142 = vector.shape_cast %141 : vector<1x1x1x16x6xbf16> to vector<1x16x6xbf16>
    %143 = vector.shape_cast %140 : vector<1x16x6xbf16> to vector<1x1x1x16x6xbf16>
    tpu.vector_store %arg5[%c0_47, %c7, %c0_48, %c0_49, %c0_50], %143 {strides = array<i32>} : memref<1x16x2x16x6xbf16, #tpu.memory_space<vmem>>, vector<1x1x1x16x6xbf16>,
    %144 = vector.extract_strided_slice %111 {offsets = [0, 128, 0], sizes = [1, 16, 6], strides = [1, 1, 1]} : vector<1x256x6xbf16> to vector<1x16x6xbf16>
    %c0_51 = arith.constant 0 : index
    %c8 = arith.constant 8 : index
    %c0_52 = arith.constant 0 : index
    %c0_53 = arith.constant 0 : index
    %c0_54 = arith.constant 0 : index
    %145 = vector.load %arg5[%c0_51, %c8, %c0_52, %c0_53, %c0_54] : memref<1x16x2x16x6xbf16, #tpu.memory_space<vmem>>, vector<1x1x1x16x6xbf16>
    %146 = vector.shape_cast %145 : vector<1x1x1x16x6xbf16> to vector<1x16x6xbf16>
    %147 = vector.shape_cast %144 : vector<1x16x6xbf16> to vector<1x1x1x16x6xbf16>
    tpu.vector_store %arg5[%c0_51, %c8, %c0_52, %c0_53, %c0_54], %147 {strides = array<i32>} : memref<1x16x2x16x6xbf16, #tpu.memory_space<vmem>>, vector<1x1x1x16x6xbf16>,
    %148 = vector.extract_strided_slice %111 {offsets = [0, 144, 0], sizes = [1, 16, 6], strides = [1, 1, 1]} : vector<1x256x6xbf16> to vector<1x16x6xbf16>
    %c0_55 = arith.constant 0 : index
    %c9 = arith.constant 9 : index
    %c0_56 = arith.constant 0 : index
    %c0_57 = arith.constant 0 : index
    %c0_58 = arith.constant 0 : index
    %149 = vector.load %arg5[%c0_55, %c9, %c0_56, %c0_57, %c0_58] : memref<1x16x2x16x6xbf16, #tpu.memory_space<vmem>>, vector<1x1x1x16x6xbf16>
    %150 = vector.shape_cast %149 : vector<1x1x1x16x6xbf16> to vector<1x16x6xbf16>
    %151 = vector.shape_cast %148 : vector<1x16x6xbf16> to vector<1x1x1x16x6xbf16>
    tpu.vector_store %arg5[%c0_55, %c9, %c0_56, %c0_57, %c0_58], %151 {strides = array<i32>} : memref<1x16x2x16x6xbf16, #tpu.memory_space<vmem>>, vector<1x1x1x16x6xbf16>,
    %152 = vector.extract_strided_slice %111 {offsets = [0, 160, 0], sizes = [1, 16, 6], strides = [1, 1, 1]} : vector<1x256x6xbf16> to vector<1x16x6xbf16>
    %c0_59 = arith.constant 0 : index
    %c10 = arith.constant 10 : index
    %c0_60 = arith.constant 0 : index
    %c0_61 = arith.constant 0 : index
    %c0_62 = arith.constant 0 : index
    %153 = vector.load %arg5[%c0_59, %c10, %c0_60, %c0_61, %c0_62] : memref<1x16x2x16x6xbf16, #tpu.memory_space<vmem>>, vector<1x1x1x16x6xbf16>
    %154 = vector.shape_cast %153 : vector<1x1x1x16x6xbf16> to vector<1x16x6xbf16>
    %155 = vector.shape_cast %152 : vector<1x16x6xbf16> to vector<1x1x1x16x6xbf16>
    tpu.vector_store %arg5[%c0_59, %c10, %c0_60, %c0_61, %c0_62], %155 {strides = array<i32>} : memref<1x16x2x16x6xbf16, #tpu.memory_space<vmem>>, vector<1x1x1x16x6xbf16>,
    %156 = vector.extract_strided_slice %111 {offsets = [0, 176, 0], sizes = [1, 16, 6], strides = [1, 1, 1]} : vector<1x256x6xbf16> to vector<1x16x6xbf16>
    %c0_63 = arith.constant 0 : index
    %c11 = arith.constant 11 : index
    %c0_64 = arith.constant 0 : index
    %c0_65 = arith.constant 0 : index
    %c0_66 = arith.constant 0 : index
    %157 = vector.load %arg5[%c0_63, %c11, %c0_64, %c0_65, %c0_66] : memref<1x16x2x16x6xbf16, #tpu.memory_space<vmem>>, vector<1x1x1x16x6xbf16>
    %158 = vector.shape_cast %157 : vector<1x1x1x16x6xbf16> to vector<1x16x6xbf16>
    %159 = vector.shape_cast %156 : vector<1x16x6xbf16> to vector<1x1x1x16x6xbf16>
    tpu.vector_store %arg5[%c0_63, %c11, %c0_64, %c0_65, %c0_66], %159 {strides = array<i32>} : memref<1x16x2x16x6xbf16, #tpu.memory_space<vmem>>, vector<1x1x1x16x6xbf16>,
    %160 = vector.extract_strided_slice %111 {offsets = [0, 192, 0], sizes = [1, 16, 6], strides = [1, 1, 1]} : vector<1x256x6xbf16> to vector<1x16x6xbf16>
    %c0_67 = arith.constant 0 : index
    %c12 = arith.constant 12 : index
    %c0_68 = arith.constant 0 : index
    %c0_69 = arith.constant 0 : index
    %c0_70 = arith.constant 0 : index
    %161 = vector.load %arg5[%c0_67, %c12, %c0_68, %c0_69, %c0_70] : memref<1x16x2x16x6xbf16, #tpu.memory_space<vmem>>, vector<1x1x1x16x6xbf16>
    %162 = vector.shape_cast %161 : vector<1x1x1x16x6xbf16> to vector<1x16x6xbf16>
    %163 = vector.shape_cast %160 : vector<1x16x6xbf16> to vector<1x1x1x16x6xbf16>
    tpu.vector_store %arg5[%c0_67, %c12, %c0_68, %c0_69, %c0_70], %163 {strides = array<i32>} : memref<1x16x2x16x6xbf16, #tpu.memory_space<vmem>>, vector<1x1x1x16x6xbf16>,
    %164 = vector.extract_strided_slice %111 {offsets = [0, 208, 0], sizes = [1, 16, 6], strides = [1, 1, 1]} : vector<1x256x6xbf16> to vector<1x16x6xbf16>
    %c0_71 = arith.constant 0 : index
    %c13 = arith.constant 13 : index
    %c0_72 = arith.constant 0 : index
    %c0_73 = arith.constant 0 : index
    %c0_74 = arith.constant 0 : index
    %165 = vector.load %arg5[%c0_71, %c13, %c0_72, %c0_73, %c0_74] : memref<1x16x2x16x6xbf16, #tpu.memory_space<vmem>>, vector<1x1x1x16x6xbf16>
    %166 = vector.shape_cast %165 : vector<1x1x1x16x6xbf16> to vector<1x16x6xbf16>
    %167 = vector.shape_cast %164 : vector<1x16x6xbf16> to vector<1x1x1x16x6xbf16>
    tpu.vector_store %arg5[%c0_71, %c13, %c0_72, %c0_73, %c0_74], %167 {strides = array<i32>} : memref<1x16x2x16x6xbf16, #tpu.memory_space<vmem>>, vector<1x1x1x16x6xbf16>,
    %168 = vector.extract_strided_slice %111 {offsets = [0, 224, 0], sizes = [1, 16, 6], strides = [1, 1, 1]} : vector<1x256x6xbf16> to vector<1x16x6xbf16>
    %c0_75 = arith.constant 0 : index
    %c14 = arith.constant 14 : index
    %c0_76 = arith.constant 0 : index
    %c0_77 = arith.constant 0 : index
    %c0_78 = arith.constant 0 : index
    %169 = vector.load %arg5[%c0_75, %c14, %c0_76, %c0_77, %c0_78] : memref<1x16x2x16x6xbf16, #tpu.memory_space<vmem>>, vector<1x1x1x16x6xbf16>
    %170 = vector.shape_cast %169 : vector<1x1x1x16x6xbf16> to vector<1x16x6xbf16>
    %171 = vector.shape_cast %168 : vector<1x16x6xbf16> to vector<1x1x1x16x6xbf16>
    tpu.vector_store %arg5[%c0_75, %c14, %c0_76, %c0_77, %c0_78], %171 {strides = array<i32>} : memref<1x16x2x16x6xbf16, #tpu.memory_space<vmem>>, vector<1x1x1x16x6xbf16>,
    %172 = vector.extract_strided_slice %111 {offsets = [0, 240, 0], sizes = [1, 16, 6], strides = [1, 1, 1]} : vector<1x256x6xbf16> to vector<1x16x6xbf16>
    %c0_79 = arith.constant 0 : index
    %c15 = arith.constant 15 : index
    %c0_80 = arith.constant 0 : index
    %c0_81 = arith.constant 0 : index
    %c0_82 = arith.constant 0 : index
    %173 = vector.load %arg5[%c0_79, %c15, %c0_80, %c0_81, %c0_82] : memref<1x16x2x16x6xbf16, #tpu.memory_space<vmem>>, vector<1x1x1x16x6xbf16>
    %174 = vector.shape_cast %173 : vector<1x1x1x16x6xbf16> to vector<1x16x6xbf16>
    %175 = vector.shape_cast %172 : vector<1x16x6xbf16> to vector<1x1x1x16x6xbf16>
    tpu.vector_store %arg5[%c0_79, %c15, %c0_80, %c0_81, %c0_82], %175 {strides = array<i32>} : memref<1x16x2x16x6xbf16, #tpu.memory_space<vmem>>, vector<1x1x1x16x6xbf16>,
    %176 = vector.extract_strided_slice %19 {offsets = [0, 1, 0, 0], sizes = [1, 16, 16, 64], strides = [1, 1, 1, 1]} : vector<1x18x18x64xbf16> to vector<1x16x16x64xbf16>
    %177 = vector.extract_strided_slice %19 {offsets = [0, 1, 1, 0], sizes = [1, 16, 16, 64], strides = [1, 1, 1, 1]} : vector<1x18x18x64xbf16> to vector<1x16x16x64xbf16>
    %178 = vector.extract_strided_slice %19 {offsets = [0, 2, 0, 0], sizes = [1, 16, 16, 64], strides = [1, 1, 1, 1]} : vector<1x18x18x64xbf16> to vector<1x16x16x64xbf16>
    %179 = vector.extract_strided_slice %19 {offsets = [0, 2, 1, 0], sizes = [1, 16, 16, 64], strides = [1, 1, 1, 1]} : vector<1x18x18x64xbf16> to vector<1x16x16x64xbf16>
    %180 = tpu.concatenate %176, %177, %178, %179 in 3 : vector<1x16x16x64xbf16>, vector<1x16x16x64xbf16>, vector<1x16x16x64xbf16>, vector<1x16x16x64xbf16> -> vector<1x16x16x256xbf16>
    %181 = vector.extract_strided_slice %180 {offsets = [0, 0, 0, 0], sizes = [1, 1, 16, 256], strides = [1, 1, 1, 1]} : vector<1x16x16x256xbf16> to vector<1x1x16x256xbf16>
    %182 = vector.shape_cast %181 : vector<1x1x16x256xbf16> to vector<1x16x256xbf16>
    %183 = vector.extract_strided_slice %180 {offsets = [0, 1, 0, 0], sizes = [1, 1, 16, 256], strides = [1, 1, 1, 1]} : vector<1x16x16x256xbf16> to vector<1x1x16x256xbf16>
    %184 = vector.shape_cast %183 : vector<1x1x16x256xbf16> to vector<1x16x256xbf16>
    %185 = vector.extract_strided_slice %180 {offsets = [0, 2, 0, 0], sizes = [1, 1, 16, 256], strides = [1, 1, 1, 1]} : vector<1x16x16x256xbf16> to vector<1x1x16x256xbf16>
    %186 = vector.shape_cast %185 : vector<1x1x16x256xbf16> to vector<1x16x256xbf16>
    %187 = vector.extract_strided_slice %180 {offsets = [0, 3, 0, 0], sizes = [1, 1, 16, 256], strides = [1, 1, 1, 1]} : vector<1x16x16x256xbf16> to vector<1x1x16x256xbf16>
    %188 = vector.shape_cast %187 : vector<1x1x16x256xbf16> to vector<1x16x256xbf16>
    %189 = vector.extract_strided_slice %180 {offsets = [0, 4, 0, 0], sizes = [1, 1, 16, 256], strides = [1, 1, 1, 1]} : vector<1x16x16x256xbf16> to vector<1x1x16x256xbf16>
    %190 = vector.shape_cast %189 : vector<1x1x16x256xbf16> to vector<1x16x256xbf16>
    %191 = vector.extract_strided_slice %180 {offsets = [0, 5, 0, 0], sizes = [1, 1, 16, 256], strides = [1, 1, 1, 1]} : vector<1x16x16x256xbf16> to vector<1x1x16x256xbf16>
    %192 = vector.shape_cast %191 : vector<1x1x16x256xbf16> to vector<1x16x256xbf16>
    %193 = vector.extract_strided_slice %180 {offsets = [0, 6, 0, 0], sizes = [1, 1, 16, 256], strides = [1, 1, 1, 1]} : vector<1x16x16x256xbf16> to vector<1x1x16x256xbf16>
    %194 = vector.shape_cast %193 : vector<1x1x16x256xbf16> to vector<1x16x256xbf16>
    %195 = vector.extract_strided_slice %180 {offsets = [0, 7, 0, 0], sizes = [1, 1, 16, 256], strides = [1, 1, 1, 1]} : vector<1x16x16x256xbf16> to vector<1x1x16x256xbf16>
    %196 = vector.shape_cast %195 : vector<1x1x16x256xbf16> to vector<1x16x256xbf16>
    %197 = vector.extract_strided_slice %180 {offsets = [0, 8, 0, 0], sizes = [1, 1, 16, 256], strides = [1, 1, 1, 1]} : vector<1x16x16x256xbf16> to vector<1x1x16x256xbf16>
    %198 = vector.shape_cast %197 : vector<1x1x16x256xbf16> to vector<1x16x256xbf16>
    %199 = vector.extract_strided_slice %180 {offsets = [0, 9, 0, 0], sizes = [1, 1, 16, 256], strides = [1, 1, 1, 1]} : vector<1x16x16x256xbf16> to vector<1x1x16x256xbf16>
    %200 = vector.shape_cast %199 : vector<1x1x16x256xbf16> to vector<1x16x256xbf16>
    %201 = vector.extract_strided_slice %180 {offsets = [0, 10, 0, 0], sizes = [1, 1, 16, 256], strides = [1, 1, 1, 1]} : vector<1x16x16x256xbf16> to vector<1x1x16x256xbf16>
    %202 = vector.shape_cast %201 : vector<1x1x16x256xbf16> to vector<1x16x256xbf16>
    %203 = vector.extract_strided_slice %180 {offsets = [0, 11, 0, 0], sizes = [1, 1, 16, 256], strides = [1, 1, 1, 1]} : vector<1x16x16x256xbf16> to vector<1x1x16x256xbf16>
    %204 = vector.shape_cast %203 : vector<1x1x16x256xbf16> to vector<1x16x256xbf16>
    %205 = vector.extract_strided_slice %180 {offsets = [0, 12, 0, 0], sizes = [1, 1, 16, 256], strides = [1, 1, 1, 1]} : vector<1x16x16x256xbf16> to vector<1x1x16x256xbf16>
    %206 = vector.shape_cast %205 : vector<1x1x16x256xbf16> to vector<1x16x256xbf16>
    %207 = vector.extract_strided_slice %180 {offsets = [0, 13, 0, 0], sizes = [1, 1, 16, 256], strides = [1, 1, 1, 1]} : vector<1x16x16x256xbf16> to vector<1x1x16x256xbf16>
    %208 = vector.shape_cast %207 : vector<1x1x16x256xbf16> to vector<1x16x256xbf16>
    %209 = vector.extract_strided_slice %180 {offsets = [0, 14, 0, 0], sizes = [1, 1, 16, 256], strides = [1, 1, 1, 1]} : vector<1x16x16x256xbf16> to vector<1x1x16x256xbf16>
    %210 = vector.shape_cast %209 : vector<1x1x16x256xbf16> to vector<1x16x256xbf16>
    %211 = vector.extract_strided_slice %180 {offsets = [0, 15, 0, 0], sizes = [1, 1, 16, 256], strides = [1, 1, 1, 1]} : vector<1x16x16x256xbf16> to vector<1x1x16x256xbf16>
    %212 = vector.shape_cast %211 : vector<1x1x16x256xbf16> to vector<1x16x256xbf16>
    %213 = tpu.concatenate %182, %184, %186, %188, %190, %192, %194, %196, %198, %200, %202, %204, %206, %208, %210, %212 in 1 : vector<1x16x256xbf16>, vector<1x16x256xbf16>, vector<1x16x256xbf16>, vector<1x16x256xbf16>, vector<1x16x256xbf16>, vector<1x16x256xbf16>, vector<1x16x256xbf16>, vector<1x16x256xbf16>, vector<1x16x256xbf16>, vector<1x16x256xbf16>, vector<1x16x256xbf16>, vector<1x16x256xbf16>, vector<1x16x256xbf16>, vector<1x16x256xbf16>, vector<1x16x256xbf16>, vector<1x16x256xbf16> -> vector<1x256x256xbf16>
    %214 = vector.shape_cast %213 : vector<1x256x256xbf16> to vector<256x256xbf16>
    %c2_83 = arith.constant 2 : index
    %c0_84 = arith.constant 0 : index
    %c0_85 = arith.constant 0 : index
    %215 = vector.load %arg2[%c2_83, %c0_84, %c0_85] : memref<4x256x128xbf16, #tpu.memory_space<vmem>>, vector<1x256x128xbf16>
    %216 = vector.shape_cast %215 : vector<1x256x128xbf16> to vector<256x128xbf16>
    %cst_86 = arith.constant dense<0.000000e+00> : vector<256x128xf32>
    %217 = tpu.matmul %214, %216, %cst_86 {dimension_numbers = #tpu.dot_dimension_numbers<[1], [0], [0], [1], [0, 0, 1, 1], [], []>} : vector<256x256xbf16>, vector<256x128xbf16>, vector<256x128xf32> -> vector<256x128xf32>
    %218 = vector.extract_strided_slice %217 {offsets = [0, 0], sizes = [256, 3], strides = [1, 1]} : vector<256x128xf32> to vector<256x3xf32>
    %219 = math.tanh %218 : vector<256x3xf32>
    %220 = arith.truncf %219 : vector<256x3xf32> to vector<256x3xbf16>
    %221 = vector.extract_strided_slice %19 {offsets = [0, 1, 1, 0], sizes = [1, 16, 16, 64], strides = [1, 1, 1, 1]} : vector<1x18x18x64xbf16> to vector<1x16x16x64xbf16>
    %222 = vector.extract_strided_slice %19 {offsets = [0, 1, 2, 0], sizes = [1, 16, 16, 64], strides = [1, 1, 1, 1]} : vector<1x18x18x64xbf16> to vector<1x16x16x64xbf16>
    %223 = vector.extract_strided_slice %19 {offsets = [0, 2, 1, 0], sizes = [1, 16, 16, 64], strides = [1, 1, 1, 1]} : vector<1x18x18x64xbf16> to vector<1x16x16x64xbf16>
    %224 = vector.extract_strided_slice %19 {offsets = [0, 2, 2, 0], sizes = [1, 16, 16, 64], strides = [1, 1, 1, 1]} : vector<1x18x18x64xbf16> to vector<1x16x16x64xbf16>
    %225 = tpu.concatenate %221, %222, %223, %224 in 3 : vector<1x16x16x64xbf16>, vector<1x16x16x64xbf16>, vector<1x16x16x64xbf16>, vector<1x16x16x64xbf16> -> vector<1x16x16x256xbf16>
    %226 = vector.extract_strided_slice %225 {offsets = [0, 0, 0, 0], sizes = [1, 1, 16, 256], strides = [1, 1, 1, 1]} : vector<1x16x16x256xbf16> to vector<1x1x16x256xbf16>
    %227 = vector.shape_cast %226 : vector<1x1x16x256xbf16> to vector<1x16x256xbf16>
    %228 = vector.extract_strided_slice %225 {offsets = [0, 1, 0, 0], sizes = [1, 1, 16, 256], strides = [1, 1, 1, 1]} : vector<1x16x16x256xbf16> to vector<1x1x16x256xbf16>
    %229 = vector.shape_cast %228 : vector<1x1x16x256xbf16> to vector<1x16x256xbf16>
    %230 = vector.extract_strided_slice %225 {offsets = [0, 2, 0, 0], sizes = [1, 1, 16, 256], strides = [1, 1, 1, 1]} : vector<1x16x16x256xbf16> to vector<1x1x16x256xbf16>
    %231 = vector.shape_cast %230 : vector<1x1x16x256xbf16> to vector<1x16x256xbf16>
    %232 = vector.extract_strided_slice %225 {offsets = [0, 3, 0, 0], sizes = [1, 1, 16, 256], strides = [1, 1, 1, 1]} : vector<1x16x16x256xbf16> to vector<1x1x16x256xbf16>
    %233 = vector.shape_cast %232 : vector<1x1x16x256xbf16> to vector<1x16x256xbf16>
    %234 = vector.extract_strided_slice %225 {offsets = [0, 4, 0, 0], sizes = [1, 1, 16, 256], strides = [1, 1, 1, 1]} : vector<1x16x16x256xbf16> to vector<1x1x16x256xbf16>
    %235 = vector.shape_cast %234 : vector<1x1x16x256xbf16> to vector<1x16x256xbf16>
    %236 = vector.extract_strided_slice %225 {offsets = [0, 5, 0, 0], sizes = [1, 1, 16, 256], strides = [1, 1, 1, 1]} : vector<1x16x16x256xbf16> to vector<1x1x16x256xbf16>
    %237 = vector.shape_cast %236 : vector<1x1x16x256xbf16> to vector<1x16x256xbf16>
    %238 = vector.extract_strided_slice %225 {offsets = [0, 6, 0, 0], sizes = [1, 1, 16, 256], strides = [1, 1, 1, 1]} : vector<1x16x16x256xbf16> to vector<1x1x16x256xbf16>
    %239 = vector.shape_cast %238 : vector<1x1x16x256xbf16> to vector<1x16x256xbf16>
    %240 = vector.extract_strided_slice %225 {offsets = [0, 7, 0, 0], sizes = [1, 1, 16, 256], strides = [1, 1, 1, 1]} : vector<1x16x16x256xbf16> to vector<1x1x16x256xbf16>
    %241 = vector.shape_cast %240 : vector<1x1x16x256xbf16> to vector<1x16x256xbf16>
    %242 = vector.extract_strided_slice %225 {offsets = [0, 8, 0, 0], sizes = [1, 1, 16, 256], strides = [1, 1, 1, 1]} : vector<1x16x16x256xbf16> to vector<1x1x16x256xbf16>
    %243 = vector.shape_cast %242 : vector<1x1x16x256xbf16> to vector<1x16x256xbf16>
    %244 = vector.extract_strided_slice %225 {offsets = [0, 9, 0, 0], sizes = [1, 1, 16, 256], strides = [1, 1, 1, 1]} : vector<1x16x16x256xbf16> to vector<1x1x16x256xbf16>
    %245 = vector.shape_cast %244 : vector<1x1x16x256xbf16> to vector<1x16x256xbf16>
    %246 = vector.extract_strided_slice %225 {offsets = [0, 10, 0, 0], sizes = [1, 1, 16, 256], strides = [1, 1, 1, 1]} : vector<1x16x16x256xbf16> to vector<1x1x16x256xbf16>
    %247 = vector.shape_cast %246 : vector<1x1x16x256xbf16> to vector<1x16x256xbf16>
    %248 = vector.extract_strided_slice %225 {offsets = [0, 11, 0, 0], sizes = [1, 1, 16, 256], strides = [1, 1, 1, 1]} : vector<1x16x16x256xbf16> to vector<1x1x16x256xbf16>
    %249 = vector.shape_cast %248 : vector<1x1x16x256xbf16> to vector<1x16x256xbf16>
    %250 = vector.extract_strided_slice %225 {offsets = [0, 12, 0, 0], sizes = [1, 1, 16, 256], strides = [1, 1, 1, 1]} : vector<1x16x16x256xbf16> to vector<1x1x16x256xbf16>
    %251 = vector.shape_cast %250 : vector<1x1x16x256xbf16> to vector<1x16x256xbf16>
    %252 = vector.extract_strided_slice %225 {offsets = [0, 13, 0, 0], sizes = [1, 1, 16, 256], strides = [1, 1, 1, 1]} : vector<1x16x16x256xbf16> to vector<1x1x16x256xbf16>
    %253 = vector.shape_cast %252 : vector<1x1x16x256xbf16> to vector<1x16x256xbf16>
    %254 = vector.extract_strided_slice %225 {offsets = [0, 14, 0, 0], sizes = [1, 1, 16, 256], strides = [1, 1, 1, 1]} : vector<1x16x16x256xbf16> to vector<1x1x16x256xbf16>
    %255 = vector.shape_cast %254 : vector<1x1x16x256xbf16> to vector<1x16x256xbf16>
    %256 = vector.extract_strided_slice %225 {offsets = [0, 15, 0, 0], sizes = [1, 1, 16, 256], strides = [1, 1, 1, 1]} : vector<1x16x16x256xbf16> to vector<1x1x16x256xbf16>
    %257 = vector.shape_cast %256 : vector<1x1x16x256xbf16> to vector<1x16x256xbf16>
    %258 = tpu.concatenate %227, %229, %231, %233, %235, %237, %239, %241, %243, %245, %247, %249, %251, %253, %255, %257 in 1 : vector<1x16x256xbf16>, vector<1x16x256xbf16>, vector<1x16x256xbf16>, vector<1x16x256xbf16>, vector<1x16x256xbf16>, vector<1x16x256xbf16>, vector<1x16x256xbf16>, vector<1x16x256xbf16>, vector<1x16x256xbf16>, vector<1x16x256xbf16>, vector<1x16x256xbf16>, vector<1x16x256xbf16>, vector<1x16x256xbf16>, vector<1x16x256xbf16>, vector<1x16x256xbf16>, vector<1x16x256xbf16> -> vector<1x256x256xbf16>
    %259 = vector.shape_cast %258 : vector<1x256x256xbf16> to vector<256x256xbf16>
    %c3_87 = arith.constant 3 : index
    %c0_88 = arith.constant 0 : index
    %c0_89 = arith.constant 0 : index
    %260 = vector.load %arg2[%c3_87, %c0_88, %c0_89] : memref<4x256x128xbf16, #tpu.memory_space<vmem>>, vector<1x256x128xbf16>
    %261 = vector.shape_cast %260 : vector<1x256x128xbf16> to vector<256x128xbf16>
    %cst_90 = arith.constant dense<0.000000e+00> : vector<256x128xf32>
    %262 = tpu.matmul %259, %261, %cst_90 {dimension_numbers = #tpu.dot_dimension_numbers<[1], [0], [0], [1], [0, 0, 1, 1], [], []>} : vector<256x256xbf16>, vector<256x128xbf16>, vector<256x128xf32> -> vector<256x128xf32>
    %263 = vector.extract_strided_slice %262 {offsets = [0, 0], sizes = [256, 3], strides = [1, 1]} : vector<256x128xf32> to vector<256x3xf32>
    %264 = math.tanh %263 : vector<256x3xf32>
    %265 = arith.truncf %264 : vector<256x3xf32> to vector<256x3xbf16>
    %266 = tpu.concatenate %220, %265 in 1 : vector<256x3xbf16>, vector<256x3xbf16> -> vector<256x6xbf16>
    %267 = vector.shape_cast %266 : vector<256x6xbf16> to vector<1x256x6xbf16>
    %268 = vector.extract_strided_slice %267 {offsets = [0, 0, 0], sizes = [1, 16, 6], strides = [1, 1, 1]} : vector<1x256x6xbf16> to vector<1x16x6xbf16>
    %c0_91 = arith.constant 0 : index
    %c0_92 = arith.constant 0 : index
    %c1_93 = arith.constant 1 : index
    %c0_94 = arith.constant 0 : index
    %c0_95 = arith.constant 0 : index
    %269 = vector.load %arg5[%c0_91, %c0_92, %c1_93, %c0_94, %c0_95] : memref<1x16x2x16x6xbf16, #tpu.memory_space<vmem>>, vector<1x1x1x16x6xbf16>
    %270 = vector.shape_cast %269 : vector<1x1x1x16x6xbf16> to vector<1x16x6xbf16>
    %271 = vector.shape_cast %268 : vector<1x16x6xbf16> to vector<1x1x1x16x6xbf16>
    tpu.vector_store %arg5[%c0_91, %c0_92, %c1_93, %c0_94, %c0_95], %271 {strides = array<i32>} : memref<1x16x2x16x6xbf16, #tpu.memory_space<vmem>>, vector<1x1x1x16x6xbf16>,
    %272 = vector.extract_strided_slice %267 {offsets = [0, 16, 0], sizes = [1, 16, 6], strides = [1, 1, 1]} : vector<1x256x6xbf16> to vector<1x16x6xbf16>
    %c0_96 = arith.constant 0 : index
    %c1_97 = arith.constant 1 : index
    %c1_98 = arith.constant 1 : index
    %c0_99 = arith.constant 0 : index
    %c0_100 = arith.constant 0 : index
    %273 = vector.load %arg5[%c0_96, %c1_97, %c1_98, %c0_99, %c0_100] : memref<1x16x2x16x6xbf16, #tpu.memory_space<vmem>>, vector<1x1x1x16x6xbf16>
    %274 = vector.shape_cast %273 : vector<1x1x1x16x6xbf16> to vector<1x16x6xbf16>
    %275 = vector.shape_cast %272 : vector<1x16x6xbf16> to vector<1x1x1x16x6xbf16>
    tpu.vector_store %arg5[%c0_96, %c1_97, %c1_98, %c0_99, %c0_100], %275 {strides = array<i32>} : memref<1x16x2x16x6xbf16, #tpu.memory_space<vmem>>, vector<1x1x1x16x6xbf16>,
    %276 = vector.extract_strided_slice %267 {offsets = [0, 32, 0], sizes = [1, 16, 6], strides = [1, 1, 1]} : vector<1x256x6xbf16> to vector<1x16x6xbf16>
    %c0_101 = arith.constant 0 : index
    %c2_102 = arith.constant 2 : index
    %c1_103 = arith.constant 1 : index
    %c0_104 = arith.constant 0 : index
    %c0_105 = arith.constant 0 : index
    %277 = vector.load %arg5[%c0_101, %c2_102, %c1_103, %c0_104, %c0_105] : memref<1x16x2x16x6xbf16, #tpu.memory_space<vmem>>, vector<1x1x1x16x6xbf16>
    %278 = vector.shape_cast %277 : vector<1x1x1x16x6xbf16> to vector<1x16x6xbf16>
    %279 = vector.shape_cast %276 : vector<1x16x6xbf16> to vector<1x1x1x16x6xbf16>
    tpu.vector_store %arg5[%c0_101, %c2_102, %c1_103, %c0_104, %c0_105], %279 {strides = array<i32>} : memref<1x16x2x16x6xbf16, #tpu.memory_space<vmem>>, vector<1x1x1x16x6xbf16>,
    %280 = vector.extract_strided_slice %267 {offsets = [0, 48, 0], sizes = [1, 16, 6], strides = [1, 1, 1]} : vector<1x256x6xbf16> to vector<1x16x6xbf16>
    %c0_106 = arith.constant 0 : index
    %c3_107 = arith.constant 3 : index
    %c1_108 = arith.constant 1 : index
    %c0_109 = arith.constant 0 : index
    %c0_110 = arith.constant 0 : index
    %281 = vector.load %arg5[%c0_106, %c3_107, %c1_108, %c0_109, %c0_110] : memref<1x16x2x16x6xbf16, #tpu.memory_space<vmem>>, vector<1x1x1x16x6xbf16>
    %282 = vector.shape_cast %281 : vector<1x1x1x16x6xbf16> to vector<1x16x6xbf16>
    %283 = vector.shape_cast %280 : vector<1x16x6xbf16> to vector<1x1x1x16x6xbf16>
    tpu.vector_store %arg5[%c0_106, %c3_107, %c1_108, %c0_109, %c0_110], %283 {strides = array<i32>} : memref<1x16x2x16x6xbf16, #tpu.memory_space<vmem>>, vector<1x1x1x16x6xbf16>,
    %284 = vector.extract_strided_slice %267 {offsets = [0, 64, 0], sizes = [1, 16, 6], strides = [1, 1, 1]} : vector<1x256x6xbf16> to vector<1x16x6xbf16>
    %c0_111 = arith.constant 0 : index
    %c4_112 = arith.constant 4 : index
    %c1_113 = arith.constant 1 : index
    %c0_114 = arith.constant 0 : index
    %c0_115 = arith.constant 0 : index
    %285 = vector.load %arg5[%c0_111, %c4_112, %c1_113, %c0_114, %c0_115] : memref<1x16x2x16x6xbf16, #tpu.memory_space<vmem>>, vector<1x1x1x16x6xbf16>
    %286 = vector.shape_cast %285 : vector<1x1x1x16x6xbf16> to vector<1x16x6xbf16>
    %287 = vector.shape_cast %284 : vector<1x16x6xbf16> to vector<1x1x1x16x6xbf16>
    tpu.vector_store %arg5[%c0_111, %c4_112, %c1_113, %c0_114, %c0_115], %287 {strides = array<i32>} : memref<1x16x2x16x6xbf16, #tpu.memory_space<vmem>>, vector<1x1x1x16x6xbf16>,
    %288 = vector.extract_strided_slice %267 {offsets = [0, 80, 0], sizes = [1, 16, 6], strides = [1, 1, 1]} : vector<1x256x6xbf16> to vector<1x16x6xbf16>
    %c0_116 = arith.constant 0 : index
    %c5_117 = arith.constant 5 : index
    %c1_118 = arith.constant 1 : index
    %c0_119 = arith.constant 0 : index
    %c0_120 = arith.constant 0 : index
    %289 = vector.load %arg5[%c0_116, %c5_117, %c1_118, %c0_119, %c0_120] : memref<1x16x2x16x6xbf16, #tpu.memory_space<vmem>>, vector<1x1x1x16x6xbf16>
    %290 = vector.shape_cast %289 : vector<1x1x1x16x6xbf16> to vector<1x16x6xbf16>
    %291 = vector.shape_cast %288 : vector<1x16x6xbf16> to vector<1x1x1x16x6xbf16>
    tpu.vector_store %arg5[%c0_116, %c5_117, %c1_118, %c0_119, %c0_120], %291 {strides = array<i32>} : memref<1x16x2x16x6xbf16, #tpu.memory_space<vmem>>, vector<1x1x1x16x6xbf16>,
    %292 = vector.extract_strided_slice %267 {offsets = [0, 96, 0], sizes = [1, 16, 6], strides = [1, 1, 1]} : vector<1x256x6xbf16> to vector<1x16x6xbf16>
    %c0_121 = arith.constant 0 : index
    %c6_122 = arith.constant 6 : index
    %c1_123 = arith.constant 1 : index
    %c0_124 = arith.constant 0 : index
    %c0_125 = arith.constant 0 : index
    %293 = vector.load %arg5[%c0_121, %c6_122, %c1_123, %c0_124, %c0_125] : memref<1x16x2x16x6xbf16, #tpu.memory_space<vmem>>, vector<1x1x1x16x6xbf16>
    %294 = vector.shape_cast %293 : vector<1x1x1x16x6xbf16> to vector<1x16x6xbf16>
    %295 = vector.shape_cast %292 : vector<1x16x6xbf16> to vector<1x1x1x16x6xbf16>
    tpu.vector_store %arg5[%c0_121, %c6_122, %c1_123, %c0_124, %c0_125], %295 {strides = array<i32>} : memref<1x16x2x16x6xbf16, #tpu.memory_space<vmem>>, vector<1x1x1x16x6xbf16>,
    %296 = vector.extract_strided_slice %267 {offsets = [0, 112, 0], sizes = [1, 16, 6], strides = [1, 1, 1]} : vector<1x256x6xbf16> to vector<1x16x6xbf16>
    %c0_126 = arith.constant 0 : index
    %c7_127 = arith.constant 7 : index
    %c1_128 = arith.constant 1 : index
    %c0_129 = arith.constant 0 : index
    %c0_130 = arith.constant 0 : index
    %297 = vector.load %arg5[%c0_126, %c7_127, %c1_128, %c0_129, %c0_130] : memref<1x16x2x16x6xbf16, #tpu.memory_space<vmem>>, vector<1x1x1x16x6xbf16>
    %298 = vector.shape_cast %297 : vector<1x1x1x16x6xbf16> to vector<1x16x6xbf16>
    %299 = vector.shape_cast %296 : vector<1x16x6xbf16> to vector<1x1x1x16x6xbf16>
    tpu.vector_store %arg5[%c0_126, %c7_127, %c1_128, %c0_129, %c0_130], %299 {strides = array<i32>} : memref<1x16x2x16x6xbf16, #tpu.memory_space<vmem>>, vector<1x1x1x16x6xbf16>,
    %300 = vector.extract_strided_slice %267 {offsets = [0, 128, 0], sizes = [1, 16, 6], strides = [1, 1, 1]} : vector<1x256x6xbf16> to vector<1x16x6xbf16>
    %c0_131 = arith.constant 0 : index
    %c8_132 = arith.constant 8 : index
    %c1_133 = arith.constant 1 : index
    %c0_134 = arith.constant 0 : index
    %c0_135 = arith.constant 0 : index
    %301 = vector.load %arg5[%c0_131, %c8_132, %c1_133, %c0_134, %c0_135] : memref<1x16x2x16x6xbf16, #tpu.memory_space<vmem>>, vector<1x1x1x16x6xbf16>
    %302 = vector.shape_cast %301 : vector<1x1x1x16x6xbf16> to vector<1x16x6xbf16>
    %303 = vector.shape_cast %300 : vector<1x16x6xbf16> to vector<1x1x1x16x6xbf16>
    tpu.vector_store %arg5[%c0_131, %c8_132, %c1_133, %c0_134, %c0_135], %303 {strides = array<i32>} : memref<1x16x2x16x6xbf16, #tpu.memory_space<vmem>>, vector<1x1x1x16x6xbf16>,
    %304 = vector.extract_strided_slice %267 {offsets = [0, 144, 0], sizes = [1, 16, 6], strides = [1, 1, 1]} : vector<1x256x6xbf16> to vector<1x16x6xbf16>
    %c0_136 = arith.constant 0 : index
    %c9_137 = arith.constant 9 : index
    %c1_138 = arith.constant 1 : index
    %c0_139 = arith.constant 0 : index
    %c0_140 = arith.constant 0 : index
    %305 = vector.load %arg5[%c0_136, %c9_137, %c1_138, %c0_139, %c0_140] : memref<1x16x2x16x6xbf16, #tpu.memory_space<vmem>>, vector<1x1x1x16x6xbf16>
    %306 = vector.shape_cast %305 : vector<1x1x1x16x6xbf16> to vector<1x16x6xbf16>
    %307 = vector.shape_cast %304 : vector<1x16x6xbf16> to vector<1x1x1x16x6xbf16>
    tpu.vector_store %arg5[%c0_136, %c9_137, %c1_138, %c0_139, %c0_140], %307 {strides = array<i32>} : memref<1x16x2x16x6xbf16, #tpu.memory_space<vmem>>, vector<1x1x1x16x6xbf16>,
    %308 = vector.extract_strided_slice %267 {offsets = [0, 160, 0], sizes = [1, 16, 6], strides = [1, 1, 1]} : vector<1x256x6xbf16> to vector<1x16x6xbf16>
    %c0_141 = arith.constant 0 : index
    %c10_142 = arith.constant 10 : index
    %c1_143 = arith.constant 1 : index
    %c0_144 = arith.constant 0 : index
    %c0_145 = arith.constant 0 : index
    %309 = vector.load %arg5[%c0_141, %c10_142, %c1_143, %c0_144, %c0_145] : memref<1x16x2x16x6xbf16, #tpu.memory_space<vmem>>, vector<1x1x1x16x6xbf16>
    %310 = vector.shape_cast %309 : vector<1x1x1x16x6xbf16> to vector<1x16x6xbf16>
    %311 = vector.shape_cast %308 : vector<1x16x6xbf16> to vector<1x1x1x16x6xbf16>
    tpu.vector_store %arg5[%c0_141, %c10_142, %c1_143, %c0_144, %c0_145], %311 {strides = array<i32>} : memref<1x16x2x16x6xbf16, #tpu.memory_space<vmem>>, vector<1x1x1x16x6xbf16>,
    %312 = vector.extract_strided_slice %267 {offsets = [0, 176, 0], sizes = [1, 16, 6], strides = [1, 1, 1]} : vector<1x256x6xbf16> to vector<1x16x6xbf16>
    %c0_146 = arith.constant 0 : index
    %c11_147 = arith.constant 11 : index
    %c1_148 = arith.constant 1 : index
    %c0_149 = arith.constant 0 : index
    %c0_150 = arith.constant 0 : index
    %313 = vector.load %arg5[%c0_146, %c11_147, %c1_148, %c0_149, %c0_150] : memref<1x16x2x16x6xbf16, #tpu.memory_space<vmem>>, vector<1x1x1x16x6xbf16>
    %314 = vector.shape_cast %313 : vector<1x1x1x16x6xbf16> to vector<1x16x6xbf16>
    %315 = vector.shape_cast %312 : vector<1x16x6xbf16> to vector<1x1x1x16x6xbf16>
    tpu.vector_store %arg5[%c0_146, %c11_147, %c1_148, %c0_149, %c0_150], %315 {strides = array<i32>} : memref<1x16x2x16x6xbf16, #tpu.memory_space<vmem>>, vector<1x1x1x16x6xbf16>,
    %316 = vector.extract_strided_slice %267 {offsets = [0, 192, 0], sizes = [1, 16, 6], strides = [1, 1, 1]} : vector<1x256x6xbf16> to vector<1x16x6xbf16>
    %c0_151 = arith.constant 0 : index
    %c12_152 = arith.constant 12 : index
    %c1_153 = arith.constant 1 : index
    %c0_154 = arith.constant 0 : index
    %c0_155 = arith.constant 0 : index
    %317 = vector.load %arg5[%c0_151, %c12_152, %c1_153, %c0_154, %c0_155] : memref<1x16x2x16x6xbf16, #tpu.memory_space<vmem>>, vector<1x1x1x16x6xbf16>
    %318 = vector.shape_cast %317 : vector<1x1x1x16x6xbf16> to vector<1x16x6xbf16>
    %319 = vector.shape_cast %316 : vector<1x16x6xbf16> to vector<1x1x1x16x6xbf16>
    tpu.vector_store %arg5[%c0_151, %c12_152, %c1_153, %c0_154, %c0_155], %319 {strides = array<i32>} : memref<1x16x2x16x6xbf16, #tpu.memory_space<vmem>>, vector<1x1x1x16x6xbf16>,
    %320 = vector.extract_strided_slice %267 {offsets = [0, 208, 0], sizes = [1, 16, 6], strides = [1, 1, 1]} : vector<1x256x6xbf16> to vector<1x16x6xbf16>
    %c0_156 = arith.constant 0 : index
    %c13_157 = arith.constant 13 : index
    %c1_158 = arith.constant 1 : index
    %c0_159 = arith.constant 0 : index
    %c0_160 = arith.constant 0 : index
    %321 = vector.load %arg5[%c0_156, %c13_157, %c1_158, %c0_159, %c0_160] : memref<1x16x2x16x6xbf16, #tpu.memory_space<vmem>>, vector<1x1x1x16x6xbf16>
    %322 = vector.shape_cast %321 : vector<1x1x1x16x6xbf16> to vector<1x16x6xbf16>
    %323 = vector.shape_cast %320 : vector<1x16x6xbf16> to vector<1x1x1x16x6xbf16>
    tpu.vector_store %arg5[%c0_156, %c13_157, %c1_158, %c0_159, %c0_160], %323 {strides = array<i32>} : memref<1x16x2x16x6xbf16, #tpu.memory_space<vmem>>, vector<1x1x1x16x6xbf16>,
    %324 = vector.extract_strided_slice %267 {offsets = [0, 224, 0], sizes = [1, 16, 6], strides = [1, 1, 1]} : vector<1x256x6xbf16> to vector<1x16x6xbf16>
    %c0_161 = arith.constant 0 : index
    %c14_162 = arith.constant 14 : index
    %c1_163 = arith.constant 1 : index
    %c0_164 = arith.constant 0 : index
    %c0_165 = arith.constant 0 : index
    %325 = vector.load %arg5[%c0_161, %c14_162, %c1_163, %c0_164, %c0_165] : memref<1x16x2x16x6xbf16, #tpu.memory_space<vmem>>, vector<1x1x1x16x6xbf16>
    %326 = vector.shape_cast %325 : vector<1x1x1x16x6xbf16> to vector<1x16x6xbf16>
    %327 = vector.shape_cast %324 : vector<1x16x6xbf16> to vector<1x1x1x16x6xbf16>
    tpu.vector_store %arg5[%c0_161, %c14_162, %c1_163, %c0_164, %c0_165], %327 {strides = array<i32>} : memref<1x16x2x16x6xbf16, #tpu.memory_space<vmem>>, vector<1x1x1x16x6xbf16>,
    %328 = vector.extract_strided_slice %267 {offsets = [0, 240, 0], sizes = [1, 16, 6], strides = [1, 1, 1]} : vector<1x256x6xbf16> to vector<1x16x6xbf16>
    %c0_166 = arith.constant 0 : index
    %c15_167 = arith.constant 15 : index
    %c1_168 = arith.constant 1 : index
    %c0_169 = arith.constant 0 : index
    %c0_170 = arith.constant 0 : index
    %329 = vector.load %arg5[%c0_166, %c15_167, %c1_168, %c0_169, %c0_170] : memref<1x16x2x16x6xbf16, #tpu.memory_space<vmem>>, vector<1x1x1x16x6xbf16>
    %330 = vector.shape_cast %329 : vector<1x1x1x16x6xbf16> to vector<1x16x6xbf16>
    %331 = vector.shape_cast %328 : vector<1x16x6xbf16> to vector<1x1x1x16x6xbf16>
    tpu.vector_store %arg5[%c0_166, %c15_167, %c1_168, %c0_169, %c0_170], %331 {strides = array<i32>} : memref<1x16x2x16x6xbf16, #tpu.memory_space<vmem>>, vector<1x1x1x16x6xbf16>,
    return
  }
  func.func @transform_0(%arg0: i32) -> (i32, i32, i32, i32) {
    %c0_i32 = arith.constant 0 : i32
    %c0_i32_0 = arith.constant 0 : i32
    %c0_i32_1 = arith.constant 0 : i32
    %c0_i32_2 = arith.constant 0 : i32
    return %arg0, %c0_i32, %c0_i32_0, %c0_i32_1 : i32, i32, i32, i32
  }
  func.func @transform_1(%arg0: i32) -> (i32, i32, i32) {
    %c0_i32 = arith.constant 0 : i32
    %c0_i32_0 = arith.constant 0 : i32
    %c0_i32_1 = arith.constant 0 : i32
    %c0_i32_2 = arith.constant 0 : i32
    return %c0_i32, %c0_i32_0, %c0_i32_1 : i32, i32, i32
  }
  func.func @transform_2(%arg0: i32) -> (i32, i32) {
    %c0_i32 = arith.constant 0 : i32
    %c0_i32_0 = arith.constant 0 : i32
    %c0_i32_1 = arith.constant 0 : i32
    return %c0_i32, %c0_i32_0 : i32, i32
  }
  func.func @transform_3(%arg0: i32) -> (i32, i32) {
    %c0_i32 = arith.constant 0 : i32
    %c0_i32_0 = arith.constant 0 : i32
    %c0_i32_1 = arith.constant 0 : i32
    return %c0_i32, %c0_i32_0 : i32, i32
  }
  func.func @transform_4(%arg0: i32) -> (i32, i32, i32, i32, i32) {
    %c0_i32 = arith.constant 0 : i32
    %c0_i32_0 = arith.constant 0 : i32
    %c0_i32_1 = arith.constant 0 : i32
    %c0_i32_2 = arith.constant 0 : i32
    %c0_i32_3 = arith.constant 0 : i32
    return %arg0, %c0_i32, %c0_i32_0, %c0_i32_1, %c0_i32_2 : i32, i32, i32, i32, i32
  }
}

</mosaic_0001>

<bundles_post_ra>
// kernel: tile.19
= control target key start
LH: loop header
LB: loop body
LE: loop exit
PB: predicated region body
PF: predicated region fallthrough
CT: control target
= control target key end

     0   :  { %s6_s8 = smov 3  ;;  %vm8_vm0 = vcmask 523264   ;;  %s31_s9 = smov 64   ;;  %vm15_vm1 = vcmask 1048064   ;;  %s51_s0 = inlined_call_operand.vmem [shape: f32[4,64], index: 0, kind: input, shape index: {}]   ;;  %s52_s1 = inlined_call_operand.vmem [shape: f32[1,256], index: 1, kind: output, shape index: {}]  }
   0x1   :  { %v4_v0 = vld [vmem:[%s51_s0] sm:$0xf]  ;;  %s11_s0 = smov 3 }
   0x2   :  { %5 = vst [vmem:[#allocation1] sm:$0xf] %v4_v0 }
   0x9   :  { %v12_v1 = vld [vmem:[#allocation1 + $0x1] ss:$2 sm:%s11_s0]   ;;  %v7_v2 = vld [vmem:[#allocation1] ss:$2 sm:%s6_s8]  }
   0xa   :  { %13 = vrot.lane.b32.xlu0 %v12_v1, %s31_s9  ;;  %9 = vst.msk [vmem:[#allocation0] ss:$8 sm:$0x3] %vm8_vm0, %v7_v2  }
  0x7c   :  { %v14_v3 = vpop.permute.xlu0 %13  }
  0x7d   :  { %16 = vst.msk [vmem:[#allocation0] ss:$8 sm:$0x3] %vm15_vm1, %v14_v3  }
  0x84   :  { %v19_v4 = vld [vmem:[#allocation0] sm:$0x1]  ;;  %v24_v5 = vld [vmem:[#allocation0 + $0x8] sm:$0x1] }
  0x85   :  { %22 = vst [vmem:[%s52_s1] sm:$0x1] %v19_v4 }
  0x86   :  { %29 = vst [vmem:[%s52_s1 + $0x1] sm:$0x1] %v24_v5 }

// kernel: tile.18
= control target key start
LH: loop header
LB: loop body
LE: loop exit
PB: predicated region body
PF: predicated region fallthrough
CT: control target
= control target key end

     0   :  { %s22_s0 = inlined_call_operand.vmem [shape: f32[64], index: 0, kind: input, shape index: {}]   ;;  %s23_s1 = inlined_call_operand.vmem [shape: f32[4,64], index: 1, kind: output, shape index: {}]  }
   0x1   :  { %v4_v0 = vld [vmem:[%s22_s0] ss:$0 sm:$0xff] }
   0x2   :  { %5 = vst [vmem:[%s23_s1] sm:$0xf] %v4_v0 }

// kernel: cnn_decoder_forward.6
= control target key start
LH: loop header
LB: loop body
LE: loop exit
PB: predicated region body
PF: predicated region fallthrough
CT: control target
= control target key end

     0   :  { %11 = vsyncpa [#allocation3], 0  ;;  %s1400_s21 = smov [#allocation2]   ;;  %s1401_s23 = smov 256   ;;  %s1621_s0 = inlined_call_operand.vmem [shape: bf16[2,256], index: 0, kind: input, shape index: {}]   ;;  %s1622_s1 = inlined_call_operand.hbm [shape: bf16[256,512], index: 1, kind: input, shape index: {}]   ;;  %s1623_s2 = inlined_call_operand.vmem [shape: f32[1,256], index: 2, kind: input, shape index: {}]   ;;  %s1624_s3 = inlined_call_operand.vmem [shape: f32[1,256], index: 3, kind: input, shape index: {}]   ;;  %s1625_s4 = inlined_call_operand.vmem [shape: bf16[2,512], index: 4, kind: output, shape index: {0}]   ;;  %s1626_s5 = inlined_call_operand.vmem [shape: f32[2,32], index: 5, kind: output, shape index: {1}]  }
   0x1   :  { %s18_s20 = sshll.u32 %s1622_s1, 4  ;;  %s20_s22 = sshll.u32 %s1400_s21, 4  ;;  %s19_s20 = int_to_ptr.hbm [resolvable:$true] %s18_s20  ;;  %s21_s22 = int_to_ptr.vmem [resolvable:$true] %s20_s22 }
   0x2   :  { %s1402_s24 = smov 16  }
   0x3   :  { %26 = dma.hbm_to_vmem [thread:$0]  %s19_s20, 8192, %s21_s22, [#allocation3], %s1401_s23, %s1401_s23, %s1402_s24  }
   0x4   :  { %1398 = dma.done.wait [#allocation3], 8192  }
   0x5   :  { %1399 = vsyncadd [#allocation3], 4294959104  ;;  %v1153_v0 = vld [vmem:[#allocation2 + $0xe0] sm:$0xf]  ;;  %v1325_v1 = vld [vmem:[#allocation2 + $0xec] sm:$0xf0] }
   0x6   :  { %v1281_v2 = vld [vmem:[#allocation2 + $0x1e0] sm:$0xf]  ;;  %v1154_v3 = vor.u32 %v1325_v1, %v1153_v0  ;;  %v1357_v4 = vld [vmem:[#allocation2 + $0x1ec] sm:$0xf0]  ;;  %v1323_v5 = vld [vmem:[#allocation2 + $0xe4] sm:$0xf] }
   0x7   :  { %v1155_v6 = vld [vmem:[#allocation2 + $0xf0] sm:$0xf0]  ;;  %v1282_v7 = vor.u32 %v1357_v4, %v1281_v2  ;;  %v1355_v9 = vld [vmem:[#allocation2 + $0x1e4] sm:$0xf]  ;;  %v1137_v11 = vld [vmem:[#allocation2 + $0xc0] sm:$0xf] }
   0x8   :  { %v1158_v8 = vor.u32 %v1323_v5, %v1155_v6  ;;  %v1283_v10 = vld [vmem:[#allocation2 + $0x1f0] sm:$0xf0]  ;;  %449 = vmatpush.bf16.msra.mxu0 %v1154_v3  ;;  %v1321_v13 = vld [vmem:[#allocation2 + $0xcc] sm:$0xf0]  ;;  %v1265_v14 = vld [vmem:[#allocation2 + $0x1c0] sm:$0xf] }
   0x9   :  { %v1286_v12 = vor.u32 %v1355_v9, %v1283_v10  ;;  %v1353_v15 = vld [vmem:[#allocation2 + $0x1cc] sm:$0xf0]  ;;  %462 = vmatpush.bf16.msra.mxu1 %v1282_v7  ;;  %v1138_v16 = vor.u32 %v1321_v13, %v1137_v11  ;;  %v1319_v18 = vld [vmem:[#allocation2 + $0xc4] sm:$0xf]  ;;  %v1139_v19 = vld [vmem:[#allocation2 + $0xd0] sm:$0xf0] }
   0xa   :  { %475 = vmatpush.bf16.msra.mxu2 %v1158_v8  ;;  %v1266_v17 = vor.u32 %v1353_v15, %v1265_v14  ;;  %v1351_v20 = vld [vmem:[#allocation2 + $0x1c4] sm:$0xf]  ;;  %v1142_v21 = vor.u32 %v1319_v18, %v1139_v19  ;;  %v1267_v22 = vld [vmem:[#allocation2 + $0x1d0] sm:$0xf0]  ;;  %v1121_v23 = vld [vmem:[#allocation2 + $0xa0] sm:$0xf] }
   0xb   :  { %488 = vmatpush.bf16.msra.mxu3 %v1286_v12  ;;  %v1317_v24 = vld [vmem:[#allocation2 + $0xac] sm:$0xf0]  ;;  %v1270_v25 = vor.u32 %v1351_v20, %v1267_v22  ;;  %v1249_v26 = vld [vmem:[#allocation2 + $0x1a0] sm:$0xf]  ;;  %v1315_v28 = vld [vmem:[#allocation2 + $0xa4] sm:$0xf] }
   0xc   :  { %v1349_v27 = vld [vmem:[#allocation2 + $0x1ac] sm:$0xf0]  ;;  %450 = vmatpush.bf16.msra.mxu0 %v1138_v16  ;;  %v1122_v29 = vor.u32 %v1317_v24, %v1121_v23  ;;  %v1123_v30 = vld [vmem:[#allocation2 + $0xb0] sm:$0xf0]  ;;  %v1347_v31 = vld [vmem:[#allocation2 + $0x1a4] sm:$0xf] }
   0xd   :  { %v1251_v32 = vld [vmem:[#allocation2 + $0x1b0] sm:$0xf0]  ;;  %463 = vmatpush.bf16.msra.mxu1 %v1266_v17  ;;  %v1250_v33 = vor.u32 %v1349_v27, %v1249_v26  ;;  %v1126_v34 = vor.u32 %v1315_v28, %v1123_v30  ;;  %v1105_v35 = vld [vmem:[#allocation2 + $0x80] sm:$0xf]  ;;  %v1313_v36 = vld [vmem:[#allocation2 + $0x8c] sm:$0xf0] }
   0xe   :  { %476 = vmatpush.bf16.msra.mxu2 %v1142_v21  ;;  %v1233_v37 = vld [vmem:[#allocation2 + $0x180] sm:$0xf]  ;;  %v1254_v38 = vor.u32 %v1347_v31, %v1251_v32  ;;  %v1345_v39 = vld [vmem:[#allocation2 + $0x18c] sm:$0xf0]  ;;  %v1311_v40 = vld [vmem:[#allocation2 + $0x84] sm:$0xf]  ;;  %v1106_v44 = vor.u32 %v1313_v36, %v1105_v35 }
   0xf   :  { %489 = vmatpush.bf16.msra.mxu3 %v1270_v25  ;;  %v1107_v41 = vld [vmem:[#allocation2 + $0x90] sm:$0xf0]  ;;  %v1343_v42 = vld [vmem:[#allocation2 + $0x184] sm:$0xf]  ;;  %v1234_v45 = vor.u32 %v1345_v39, %v1233_v37  ;;  %v1089_v47 = vld [vmem:[#allocation2 + $0x60] sm:$0xf] }
  0x10   :  { %v1235_v43 = vld [vmem:[#allocation2 + $0x190] sm:$0xf0]  ;;  %451 = vmatpush.bf16.msra.mxu0 %v1122_v29  ;;  %v1110_v46 = vor.u32 %v1311_v40, %v1107_v41  ;;  %v1309_v48 = vld [vmem:[#allocation2 + $0x6c] sm:$0xf0]  ;;  %v1217_v49 = vld [vmem:[#allocation2 + $0x160] sm:$0xf] }
  0x11   :  { %464 = vmatpush.bf16.msra.mxu1 %v1250_v33  ;;  %v1238_v50 = vor.u32 %v1343_v42, %v1235_v43  ;;  %v1341_v51 = vld [vmem:[#allocation2 + $0x16c] sm:$0xf0]  ;;  %v1307_v52 = vld [vmem:[#allocation2 + $0x64] sm:$0xf]  ;;  %v1091_v53 = vld [vmem:[#allocation2 + $0x70] sm:$0xf0]  ;;  %v1090_v56 = vor.u32 %v1309_v48, %v1089_v47 }
  0x12   :  { %477 = vmatpush.bf16.msra.mxu2 %v1126_v34  ;;  %v1339_v54 = vld [vmem:[#allocation2 + $0x164] sm:$0xf]  ;;  %v1219_v55 = vld [vmem:[#allocation2 + $0x170] sm:$0xf0]  ;;  %v1218_v57 = vor.u32 %v1341_v51, %v1217_v49  ;;  %v1094_v58 = vor.u32 %v1307_v52, %v1091_v53  ;;  %v1073_v59 = vld [vmem:[#allocation2 + $0x40] sm:$0xf] }
  0x13   :  { %490 = vmatpush.bf16.msra.mxu3 %v1254_v38  ;;  %v1305_v60 = vld [vmem:[#allocation2 + $0x4c] sm:$0xf0]  ;;  %v1201_v61 = vld [vmem:[#allocation2 + $0x140] sm:$0xf]  ;;  %v1222_v62 = vor.u32 %v1339_v54, %v1219_v55  ;;  %v1303_v0 = vld [vmem:[#allocation2 + $0x44] sm:$0xf] }
  0x14   :  { %452 = vmatpush.bf16.msra.mxu0 %v1106_v44  ;;  %v1337_v63 = vld [vmem:[#allocation2 + $0x14c] sm:$0xf0]  ;;  %v1075_v1 = vld [vmem:[#allocation2 + $0x50] sm:$0xf0]  ;;  %v1335_v2 = vld [vmem:[#allocation2 + $0x144] sm:$0xf]  ;;  %v1074_v4 = vor.u32 %v1305_v60, %v1073_v59 }
  0x15   :  { %465 = vmatpush.bf16.msra.mxu1 %v1234_v45  ;;  %v1203_v3 = vld [vmem:[#allocation2 + $0x150] sm:$0xf0]  ;;  %v1057_v5 = vld [vmem:[#allocation2 + $0x20] sm:$0xf]  ;;  %vm42_vm0 = vcmask 1041408   ;;  %v1202_v6 = vor.u32 %v1337_v63, %v1201_v61  ;;  %v1078_v7 = vor.u32 %v1303_v0, %v1075_v1  ;;  %vm587_vm2 = vcmask 517376  }
  0x16   :  { %478 = vmatpush.bf16.msra.mxu2 %v1110_v46  ;;  %v1301_v8 = vld [vmem:[#allocation2 + $0x2c] sm:$0xf0]  ;;  %v1185_v9 = vld [vmem:[#allocation2 + $0x120] sm:$0xf]  ;;  %v1206_v11 = vor.u32 %v1335_v2, %v1203_v3  ;;  %v1299_v12 = vld [vmem:[#allocation2 + $0x24] sm:$0xf] }
  0x17   :  { %491 = vmatpush.bf16.msra.mxu3 %v1238_v50  ;;  %v1333_v10 = vld [vmem:[#allocation2 + $0x12c] sm:$0xf0]  ;;  %v1059_v13 = vld [vmem:[#allocation2 + $0x30] sm:$0xf0]  ;;  %v1331_v14 = vld [vmem:[#allocation2 + $0x124] sm:$0xf]  ;;  %v1058_v18 = vor.u32 %v1301_v8, %v1057_v5 }
  0x18   :  { %453 = vmatpush.bf16.msra.mxu0 %v1090_v56  ;;  %v1187_v15 = vld [vmem:[#allocation2 + $0x130] sm:$0xf0]  ;;  %v1041_v16 = vld [vmem:[#allocation2] sm:$0xf]  ;;  %v1297_v17 = vld [vmem:[#allocation2 + $0xc] sm:$0xf0]  ;;  %v1186_v23 = vor.u32 %v1333_v10, %v1185_v9  ;;  %v1062_v24 = vor.u32 %v1299_v12, %v1059_v13 }
  0x19   :  { %466 = vmatpush.bf16.msra.mxu1 %v1218_v57  ;;  %v1169_v19 = vld [vmem:[#allocation2 + $0x100] sm:$0xf]  ;;  %v1329_v20 = vld [vmem:[#allocation2 + $0x10c] sm:$0xf0]  ;;  %v1295_v21 = vld [vmem:[#allocation2 + $0x4] sm:$0xf]  ;;  %v1190_v30 = vor.u32 %v1331_v14, %v1187_v15  ;;  %v1042_v40 = vor.u32 %v1297_v17, %v1041_v16 }
  0x1a   :  { %479 = vmatpush.bf16.msra.mxu2 %v1094_v58  ;;  %v1043_v22 = vld [vmem:[#allocation2 + $0x10] sm:$0xf0]  ;;  %v1327_v25 = vld [vmem:[#allocation2 + $0x104] sm:$0xf]  ;;  %v35_v27 = vld [vmem:[%s1621_s0] sm:$0x3]  ;;  %v1170_v44 = vor.u32 %v1329_v20, %v1169_v19 }
  0x1b   :  { %492 = vmatpush.bf16.msra.mxu3 %v1222_v62  ;;  %v1171_v26 = vld [vmem:[#allocation2 + $0x110] sm:$0xf0]  ;;  %v37_v28 = vld [vmem:[%s1623_s2] sm:$0x3]  ;;  %v1161_v31 = vld [vmem:[#allocation2 + $0xe8] sm:$0xf]  ;;  %v36_v37 = vunpack.c.l.bf16 %v35_v27  ;;  %v1046_v45 = vor.u32 %v1295_v21, %v1043_v22 }
  0x1c   :  { %454 = vmatpush.bf16.msra.mxu0 %v1074_v4  ;;  %v46_v29 = vld [vmem:[%s1624_s3] sm:$0x3]  ;;  %v39_v33 = vperm.slane %v37_v28, 0  ;;  %v40_v34 = vperm.slane %v37_v28, 1  ;;  %v1289_v35 = vld [vmem:[#allocation2 + $0x1e8] sm:$0xf]  ;;  %v1174_v49 = vor.u32 %v1327_v25, %v1171_v26 }
  0x1d   :  { %467 = vmatpush.bf16.msra.mxu1 %v1202_v6  ;;  %v1326_v32 = vld [vmem:[#allocation2 + $0xf4] sm:$0xf0]  ;;  %v48_v38 = vperm.slane %v46_v29, 0  ;;  %v49_v39 = vperm.slane %v46_v29, 1  ;;  %v1324_v41 = vld [vmem:[#allocation2 + $0xec] sm:$0xf] }
  0x1e   :  { %480 = vmatpush.bf16.msra.mxu2 %v1078_v7  ;;  %v1358_v36 = vld [vmem:[#allocation2 + $0x1f4] sm:$0xf0]  ;;  %v1163_v42 = vld [vmem:[#allocation2 + $0xf8] sm:$0xf0]  ;;  %v41_v43 = vrot.slane %v40_v34, 6  ;;  %v1162_v50 = vor.u32 %v1326_v32, %v1161_v31  ;;  %vm596_vm3 = vcmask 779776  }
  0x1f   :  { %493 = vmatpush.bf16.msra.mxu3 %v1206_v11  ;;  %v1356_v46 = vld [vmem:[#allocation2 + $0x1ec] sm:$0xf]  ;;  %v1291_v47 = vld [vmem:[#allocation2 + $0x1f8] sm:$0xf0]  ;;  %v50_v48 = vrot.slane %v49_v39, 6  ;;  %v1290_v52 = vor.u32 %v1358_v36, %v1289_v35  ;;  %v1166_v53 = vor.u32 %v1324_v41, %v1163_v42  ;;  %vm605_vm4 = vcmask 1042176  }
  0x20   :  { %455 = vmatpush.bf16.msra.mxu0 %v1058_v18  ;;  %v43_v51 = vsel %vm42_vm0, %v39_v33, %v41_v43  ;;  %v1145_v56 = vld [vmem:[#allocation2 + $0xc8] sm:$0xf]  ;;  %v1322_v57 = vld [vmem:[#allocation2 + $0xd4] sm:$0xf0]  ;;  %v1294_v59 = vor.u32 %v1356_v46, %v1291_v47  ;;  %v1320_v61 = vld [vmem:[#allocation2 + $0xcc] sm:$0xf] }
  0x21   :  { %468 = vmatpush.bf16.msra.mxu1 %v1186_v23  ;;  %v45_v54 = vmul.f32 %v43_v51, %v36_v37  ;;  %v51_v55 = vsel %vm42_vm0, %v48_v38, %v50_v48  ;;  %v1273_v58 = vld [vmem:[#allocation2 + $0x1c8] sm:$0xf]  ;;  %v1354_v60 = vld [vmem:[#allocation2 + $0x1d4] sm:$0xf0]  ;;  %v1147_v62 = vld [vmem:[#allocation2 + $0xd8] sm:$0xf0]  ;;  %v1146_v2 = vor.u32 %v1322_v57, %v1145_v56 }
  0x22   :  { %481 = vmatpush.bf16.msra.mxu2 %v1062_v24  ;;  %v1352_v0 = vld [vmem:[#allocation2 + $0x1cc] sm:$0xf]  ;;  %v1275_v1 = vld [vmem:[#allocation2 + $0x1d8] sm:$0xf0]  ;;  %v1129_v3 = vld [vmem:[#allocation2 + $0xa8] sm:$0xf]  ;;  %v1274_v6 = vor.u32 %v1354_v60, %v1273_v58  ;;  %v1150_v7 = vor.u32 %v1320_v61, %v1147_v62 }
  0x23   :  { %494 = vmatpush.bf16.msra.mxu3 %v1190_v30  ;;  %v53_v63 = vadd.f32 %v51_v55, %v45_v54  ;;  %v1318_v4 = vld [vmem:[#allocation2 + $0xb4] sm:$0xf0]  ;;  %v1257_v8 = vld [vmem:[#allocation2 + $0x1a8] sm:$0xf]  ;;  %v1278_v9 = vor.u32 %v1352_v0, %v1275_v1  ;;  %v1316_v11 = vld [vmem:[#allocation2 + $0xac] sm:$0xf] }
  0x24   :  { %456 = vmatpush.bf16.msra.mxu0 %v1042_v40  ;;  %v1350_v10 = vld [vmem:[#allocation2 + $0x1b4] sm:$0xf0]  ;;  %v1131_v12 = vld [vmem:[#allocation2 + $0xb8] sm:$0xf0]  ;;  %v1348_v14 = vld [vmem:[#allocation2 + $0x1ac] sm:$0xf]  ;;  %v1130_v16 = vor.u32 %v1318_v4, %v1129_v3 }
  0x25   :  { %469 = vmatpush.bf16.msra.mxu1 %v1170_v44  ;;  %vm54_vm1 = vcmp.ge.f32.partialorder %v53_v63, 0.0  ;;  %v55_v5 = vmul.f32 0.05, %v53_v63  ;;  %v1259_v15 = vld [vmem:[#allocation2 + $0x1b8] sm:$0xf0]  ;;  %v1258_v17 = vor.u32 %v1350_v10, %v1257_v8  ;;  %v1134_v18 = vor.u32 %v1316_v11, %v1131_v12  ;;  %s1404_s0 = smov 96  }
  0x26   :  { %482 = vmatpush.bf16.msra.mxu2 %v1046_v45  ;;  %v1113_v19 = vld [vmem:[#allocation2 + $0x88] sm:$0xf]  ;;  %v1314_v20 = vld [vmem:[#allocation2 + $0x94] sm:$0xf0]  ;;  %v1262_v22 = vor.u32 %v1348_v14, %v1259_v15  ;;  %v1312_v24 = vld [vmem:[#allocation2 + $0x8c] sm:$0xf] }
  0x27   :  { %495 = vmatpush.bf16.msra.mxu3 %v1174_v49  ;;  %v56_v13 = vsel %vm54_vm1, %v53_v63, %v55_v5  ;;  %v1241_v21 = vld [vmem:[#allocation2 + $0x188] sm:$0xf]  ;;  %v1346_v23 = vld [vmem:[#allocation2 + $0x194] sm:$0xf0]  ;;  %v1115_v25 = vld [vmem:[#allocation2 + $0x98] sm:$0xf0]  ;;  %v1114_v26 = vor.u32 %v1314_v20, %v1113_v19 }
  0x28   :  { %501 = vmatpush.bf16.msrb.mxu0 %v1162_v50  ;;  %58 = vst [vmem:[#allocation1] ss:$4 sm:$0xff] %v56_v13  ;;  %v1344_v27 = vld [vmem:[#allocation2 + $0x18c] sm:$0xf]  ;;  %v1243_v28 = vld [vmem:[#allocation2 + $0x198] sm:$0xf0]  ;;  %v1242_v29 = vor.u32 %v1346_v23, %v1241_v21  ;;  %v1118_v30 = vor.u32 %v1312_v24, %v1115_v25 }
  0x29   :  { %514 = vmatpush.bf16.msrb.mxu1 %v1290_v52  ;;  %v1097_v31 = vld [vmem:[#allocation2 + $0x68] sm:$0xf]  ;;  %v1310_v32 = vld [vmem:[#allocation2 + $0x74] sm:$0xf0]  ;;  %v1308_v35 = vld [vmem:[#allocation2 + $0x6c] sm:$0xf]  ;;  %v1246_v41 = vor.u32 %v1344_v27, %v1243_v28 }
  0x2a   :  { %527 = vmatpush.bf16.msrb.mxu2 %v1166_v53  ;;  %v1225_v33 = vld [vmem:[#allocation2 + $0x168] sm:$0xf]  ;;  %v1342_v34 = vld [vmem:[#allocation2 + $0x174] sm:$0xf0]  ;;  %v1099_v36 = vld [vmem:[#allocation2 + $0x78] sm:$0xf0]  ;;  %v1098_v42 = vor.u32 %v1310_v32, %v1097_v31 }
  0x2b   :  { %540 = vmatpush.bf16.msrb.mxu3 %v1294_v59  ;;  %v1340_v43 = vld [vmem:[#allocation2 + $0x16c] sm:$0xf]  ;;  %v1227_v44 = vld [vmem:[#allocation2 + $0x178] sm:$0xf0]  ;;  %v1226_v45 = vor.u32 %v1342_v34, %v1225_v33  ;;  %v1102_v46 = vor.u32 %v1308_v35, %v1099_v36  ;;  %v1081_v47 = vld [vmem:[#allocation2 + $0x48] sm:$0xf] }
  0x2c   :  { %502 = vmatpush.bf16.msrb.mxu0 %v1146_v2  ;;  %v1306_v48 = vld [vmem:[#allocation2 + $0x54] sm:$0xf0]  ;;  %v1209_v49 = vld [vmem:[#allocation2 + $0x148] sm:$0xf]  ;;  %v1304_v51 = vld [vmem:[#allocation2 + $0x4c] sm:$0xf]  ;;  %v1230_v53 = vor.u32 %v1340_v43, %v1227_v44 }
  0x2d   :  { %515 = vmatpush.bf16.msrb.mxu1 %v1274_v6  ;;  %v1338_v50 = vld [vmem:[#allocation2 + $0x154] sm:$0xf0]  ;;  %v1083_v52 = vld [vmem:[#allocation2 + $0x58] sm:$0xf0]  ;;  %v1082_v54 = vor.u32 %v1306_v48, %v1081_v47  ;;  %v1336_v55 = vld [vmem:[#allocation2 + $0x14c] sm:$0xf] }
  0x2e   :  { %528 = vmatpush.bf16.msrb.mxu2 %v1150_v7  ;;  %v1211_v56 = vld [vmem:[#allocation2 + $0x158] sm:$0xf0]  ;;  %v1210_v57 = vor.u32 %v1338_v50, %v1209_v49  ;;  %v1086_v58 = vor.u32 %v1304_v51, %v1083_v52  ;;  %v1065_v59 = vld [vmem:[#allocation2 + $0x28] sm:$0xf]  ;;  %v1302_v60 = vld [vmem:[#allocation2 + $0x34] sm:$0xf0] }
  0x2f   :  { %541 = vmatpush.bf16.msrb.mxu3 %v1278_v9  ;;  %v59_v37 = vld.sshfl [vmem:[#allocation1] sm:$0xff pattern:$0x73625140]  ;;  %v60_v38 = vld.sshfl [vmem:[#allocation1 + $0x8] sm:$0xff pattern:$0x73625140]  ;;  %v1214_v1 = vor.u32 %v1336_v55, %v1211_v56  ;;  %v1066_v2 = vor.u32 %v1302_v60, %v1065_v59 }
  0x30   :  { %503 = vmatpush.bf16.msrb.mxu0 %v1130_v16  ;;  %v1453_v39 = vpack.c.bf16 %v59_v37, %v59_v37  ;;  %v1455_v40 = vpack.c.bf16 %v60_v38, %v60_v38  ;;  %v1193_v61 = vld [vmem:[#allocation2 + $0x128] sm:$0xf]  ;;  %v1334_v62 = vld [vmem:[#allocation2 + $0x134] sm:$0xf0]  ;;  %v1300_v63 = vld [vmem:[#allocation2 + $0x2c] sm:$0xf] }
  0x31   :  { %516 = vmatpush.bf16.msrb.mxu1 %v1258_v17  ;;  %v1067_v0 = vld [vmem:[#allocation2 + $0x38] sm:$0xf0]  ;;  %v1332_v3 = vld [vmem:[#allocation2 + $0x12c] sm:$0xf]  ;;  %v1194_v5 = vor.u32 %v1334_v62, %v1193_v61  ;;  %v1049_v7 = vld [vmem:[#allocation2 + $0x8] sm:$0xf] }
  0x32   :  { %529 = vmatpush.bf16.msrb.mxu2 %v1134_v18  ;;  %457 = vmatmul.bf16.vlgmr.msra.gmra.mxu0 %v1453_v39  ;;  %v1195_v4 = vld [vmem:[#allocation2 + $0x138] sm:$0xf0]  ;;  %v1070_v6 = vor.u32 %v1300_v63, %v1067_v0  ;;  %v1298_v8 = vld [vmem:[#allocation2 + $0x14] sm:$0xf0]  ;;  %v1177_v9 = vld [vmem:[#allocation2 + $0x108] sm:$0xf] }
  0x33   :  { %542 = vmatpush.bf16.msrb.mxu3 %v1262_v22  ;;  %470 = vmatmul.bf16.vlgmr.msra.gmra.mxu1 %v1455_v40  ;;  %v1330_v10 = vld [vmem:[#allocation2 + $0x114] sm:$0xf0]  ;;  %v1296_v11 = vld [vmem:[#allocation2 + $0xc] sm:$0xf]  ;;  %v1051_v12 = vld [vmem:[#allocation2 + $0x18] sm:$0xf0]  ;;  %v1198_v13 = vor.u32 %v1332_v3, %v1195_v4  ;;  %v1050_v14 = vor.u32 %v1298_v8, %v1049_v7 }
  0x34   :  { %504 = vmatpush.bf16.msrb.mxu0 %v1114_v26  ;;  %483 = vmatmul.bf16.vlgmr.msra.gmra.mxu2 %v1453_v39  ;;  %v1178_v15 = vor.u32 %v1330_v10, %v1177_v9  ;;  %v1054_v16 = vor.u32 %v1296_v11, %v1051_v12  ;;  %v1328_v17 = vld [vmem:[#allocation2 + $0x10c] sm:$0xf]  ;;  %v1179_v18 = vld [vmem:[#allocation2 + $0x118] sm:$0xf0]  ;;  %v1403_v20 = vmov 2.0   ;;  %vm571_vm5 = vcmask 254976  }
  0x35   :  { %517 = vmatpush.bf16.msrb.mxu1 %v1242_v29  ;;  %496 = vmatmul.bf16.vlgmr.msra.gmra.mxu3 %v1455_v40  ;;  %v1182_v19 = vor.u32 %v1328_v17, %v1179_v18  ;;  %1368 = vrcp.f32 %v1403_v20  ;;  %s1405_s2 = smov 64   ;;  %s1406_s3 = smov 32   ;;  %vm560_vm7 = vcmask 1040384   ;;  %vm564_vm8 = vcmask 1042434  }
  0x36   :  { %530 = vmatpush.bf16.msrb.mxu2 %v1118_v30  ;;  %vm904_vm9 = vcmask 1042432   ;;  %vm906_vm10 = vcmask 1043456   ;;  %vm908_vm11 = vcmask 1044480   ;;  %vm910_vm12 = vcmask 1045504  }
  0x37   :  { %543 = vmatpush.bf16.msrb.mxu3 %v1246_v41  ;;  %vm912_vm13 = vcmask 1046528   ;;  %vm921_vm14 = vcmask 261120  }
  0x38   :  { %505 = vmatpush.bf16.msrb.mxu0 %v1098_v42 }
  0x39   :  { %518 = vmatpush.bf16.msrb.mxu1 %v1226_v45 }
  0x3a   :  { %531 = vmatpush.bf16.msrb.mxu2 %v1102_v46 }
  0x3b   :  { %544 = vmatpush.bf16.msrb.mxu3 %v1230_v53  ;;  %v1369_v21 = vpop.eup %1368 }
  0x3c   :  { %506 = vmatpush.bf16.msrb.mxu0 %v1082_v54  ;;  %v580_v22 = vmul.f32 2.0, %v1369_v21  ;;  %vm584_vm6 = vweird.f32 %v1369_v21 }
  0x3d   :  { %519 = vmatpush.bf16.msrb.mxu1 %v1210_v57 }
  0x3e   :  { %532 = vmatpush.bf16.msrb.mxu2 %v1086_v58  ;;  %v581_v26 = vsub.f32 1.0, %v580_v22 }
  0x3f   :  { %545 = vmatpush.bf16.msrb.mxu3 %v1214_v1 }
  0x40   :  { %507 = vmatpush.bf16.msrb.mxu0 %v1066_v2  ;;  %v582_v34 = vmul.f32 %v1369_v21, %v581_v26 }
  0x41   :  { %520 = vmatpush.bf16.msrb.mxu1 %v1194_v5 }
  0x42   :  { %533 = vmatpush.bf16.msrb.mxu2 %v1070_v6  ;;  %v583_v48 = vadd.f32 %v1369_v21, %v582_v34 }
  0x43   :  { %546 = vmatpush.bf16.msrb.mxu3 %v1198_v13 }
  0x44   :  { %508 = vmatpush.bf16.msrb.mxu0 %v1050_v14  ;;  %v1483_v61 = vsel %vm584_vm6, %v1369_v21, %v583_v48 }
  0x45   :  { %521 = vmatpush.bf16.msrb.mxu1 %v1178_v15 }
  0x46   :  { %534 = vmatpush.bf16.msrb.mxu2 %v1054_v16 }
  0x47   :  { %509 = vmatmul.bf16.vlgmr.msrb.gmra.mxu0 %v1453_v39  ;;  %547 = vmatpush.bf16.msrb.mxu3 %v1182_v19 }
  0x48   :  { %522 = vmatmul.bf16.vlgmr.msrb.gmra.mxu1 %v1455_v40 }
  0x49   :  { %535 = vmatmul.bf16.vlgmr.msrb.gmra.mxu2 %v1453_v39 }
  0x4a   :  { %548 = vmatmul.bf16.vlgmr.msrb.gmra.mxu3 %v1455_v40 }
  0xaf   :  { %v458_v23 = vpop.f32.mrf.mxu0 }
  0xb0   :  { %v471_v24 = vpop.f32.mrf.mxu1 }
  0xb1   :  { %v1465_v25 = vadd.f32 %v471_v24, %v458_v23 }
  0xb3   :  { %v588_v27 = vsel %vm587_vm2, %v1465_v25, 0.0  ;;  %v597_v28 = vsel %vm596_vm3, %v1465_v25, 0.0  ;;  %v606_v29 = vsel %vm605_vm4, %v1465_v25, 0.0  ;;  %v572_v33 = vsel %vm571_vm5, %v1465_v25, 0.0 }
  0xb4   :  { %v589_v30 = vrot.slane %v588_v27, 4  ;;  %v598_v31 = vrot.slane %v597_v28, 4  ;;  %v607_v32 = vrot.slane %v606_v29, 4  ;;  %v573_v35 = vrot.slane %v572_v33, 4 }
  0xb6   :  { %v590_v36 = vadd.f32 %v589_v30, %v588_v27  ;;  %v599_v37 = vadd.f32 %v598_v31, %v597_v28  ;;  %v608_v38 = vadd.f32 %v607_v32, %v606_v29  ;;  %v574_v41 = vadd.f32 %v573_v35, %v572_v33 }
  0xb7   :  { %v484_v39 = vpop.f32.mrf.mxu2  ;;  %v460_v43 = vpop.f32.mrf.mxu0 }
  0xb8   :  { %v497_v40 = vpop.f32.mrf.mxu3  ;;  %v473_v44 = vpop.f32.mrf.mxu1  ;;  %v591_v45 = vrot.slane %v590_v36, 2  ;;  %v600_v46 = vrot.slane %v599_v37, 2  ;;  %v609_v47 = vrot.slane %v608_v38, 2  ;;  %v575_v49 = vrot.slane %v574_v41, 2 }
  0xb9   :  { %v1475_v42 = vadd.f32 %v497_v40, %v484_v39 }
  0xba   :  { %v592_v50 = vadd.f32 %v591_v45, %v590_v36  ;;  %v601_v51 = vadd.f32 %v600_v46, %v599_v37  ;;  %v610_v52 = vadd.f32 %v609_v47, %v608_v38  ;;  %v576_v0 = vadd.f32 %v575_v49, %v574_v41 }
  0xbb   :  { %v622_v53 = vsel %vm587_vm2, %v1475_v42, 0.0  ;;  %v630_v55 = vsel %vm596_vm3, %v1475_v42, 0.0  ;;  %v638_v56 = vsel %vm605_vm4, %v1475_v42, 0.0 }
  0xbc   :  { %v623_v54 = vrot.slane %v622_v53, 4  ;;  %v593_v57 = vrot.slane %v592_v50, 1  ;;  %v602_v58 = vrot.slane %v601_v51, 1  ;;  %v611_v59 = vrot.slane %v610_v52, 1 }
  0xbd   :  { %v631_v60 = vrot.slane %v630_v55, 4  ;;  %v639_v63 = vrot.slane %v638_v56, 4  ;;  %v577_v9 = vrot.slane %v576_v0, 1 }
  0xbe   :  { %v624_v62 = vadd.f32 %v623_v54, %v622_v53  ;;  %v594_v1 = vadd.f32 %v593_v57, %v592_v50  ;;  %v603_v2 = vadd.f32 %v602_v58, %v601_v51  ;;  %v612_v3 = vadd.f32 %v611_v59, %v610_v52 }
  0xbf   :  { %v632_v4 = vadd.f32 %v631_v60, %v630_v55  ;;  %v486_v5 = vpop.f32.mrf.mxu2  ;;  %v640_v8 = vadd.f32 %v639_v63, %v638_v56  ;;  %v578_v16 = vadd.f32 %v577_v9, %v576_v0 }
  0xc0   :  { %v499_v6 = vpop.f32.mrf.mxu3  ;;  %v625_v7 = vrot.slane %v624_v62, 2  ;;  %v595_v10 = vmul.f32 %v594_v1, %v1483_v61  ;;  %v604_v11 = vmul.f32 %v603_v2, %v1483_v61  ;;  %v613_v12 = vmul.f32 %v612_v3, %v1483_v61 }
  0xc1   :  { %v633_v13 = vrot.slane %v632_v4, 2  ;;  %v641_v22 = vrot.slane %v640_v8, 2  ;;  %v1497_v27 = vmul.f32 %v1483_v61, %v578_v16 }
  0xc2   :  { %v626_v14 = vadd.f32 %v625_v7, %v624_v62  ;;  %855 = vrot.lane.b32.xlu0 %v595_v10, %s1404_s0  ;;  %859 = vrot.lane.b32.xlu1 %v604_v11, %s1405_s2  ;;  %v737_v17 = vsub.f32 %v1465_v25, %v613_v12  ;;  %v719_v23 = vsub.f32 %v1465_v25, %v595_v10 }
  0xc3   :  { %863 = vrot.lane.b32.xlu2 %v613_v12, %s1406_s3  ;;  %v634_v21 = vadd.f32 %v633_v13, %v632_v4  ;;  %v728_v24 = vsub.f32 %v1465_v25, %v604_v11  ;;  %v642_v34 = vadd.f32 %v641_v22, %v640_v8 }
  0xc4   :  { %v510_v15 = vpop.f32.mrf.mxu0  ;;  %v627_v19 = vrot.slane %v626_v14, 1  ;;  %v738_v26 = vmul.f32 %v737_v17, %v737_v17  ;;  %v720_v39 = vmul.f32 %v719_v23, %v719_v23 }
  0xc5   :  { %v523_v18 = vpop.f32.mrf.mxu1  ;;  %v635_v29 = vrot.slane %v634_v21, 1  ;;  %v729_v40 = vmul.f32 %v728_v24, %v728_v24  ;;  %v643_v51 = vrot.slane %v642_v34, 1 }
  0xc6   :  { %v1492_v20 = vadd.f32 %v523_v18, %v510_v15  ;;  %v628_v28 = vadd.f32 %v627_v19, %v626_v14  ;;  %v739_v41 = vsel %vm605_vm4, %v738_v26, 0.0  ;;  %v721_v55 = vsel %vm587_vm2, %v720_v39, 0.0 }
  0xc7   :  { %v636_v35 = vadd.f32 %v635_v29, %v634_v21  ;;  %v1514_v56 = vsel %vm596_vm3, %v729_v40, 0.0  ;;  %v740_v57 = vrot.slane %v739_v41, 4  ;;  %v644_v63 = vadd.f32 %v643_v51, %v642_v34 }
  0xc8   :  { %v670_v30 = vsel %vm605_vm4, %v1492_v20, 0.0  ;;  %v662_v31 = vsel %vm596_vm3, %v1492_v20, 0.0  ;;  %v629_v33 = vmul.f32 %v628_v28, %v1483_v61  ;;  %v654_v38 = vsel %vm587_vm2, %v1492_v20, 0.0 }
  0xc9   :  { %v671_v32 = vrot.slane %v670_v30, 4  ;;  %v663_v37 = vrot.slane %v662_v31, 4  ;;  %v637_v45 = vmul.f32 %v636_v35, %v1483_v61  ;;  %v655_v49 = vrot.slane %v654_v38, 4 }
  0xca   :  { %867 = vrot.lane.b32.xlu0 %v629_v33, %s1404_s0  ;;  %v755_v59 = vsub.f32 %v1475_v42, %v629_v33  ;;  %v722_v4 = vrot.slane %v721_v55, 4  ;;  %v741_v8 = vadd.f32 %v740_v57, %v739_v41  ;;  %v1525_v22 = vmul.f32 %v644_v63, %v1483_v61 }
  0xcb   :  { %v672_v36 = vadd.f32 %v671_v32, %v670_v30  ;;  %v664_v48 = vadd.f32 %v663_v37, %v662_v31  ;;  %871 = vrot.lane.b32.xlu2 %v637_v45, %s1405_s2  ;;  %v656_v58 = vadd.f32 %v655_v49, %v654_v38  ;;  %v764_v23 = vsub.f32 %v1475_v42, %v637_v45 }
  0xcc   :  { %v536_v43 = vpop.f32.mrf.mxu2  ;;  %v512_v44 = vpop.f32.mrf.mxu0  ;;  %v756_v13 = vmul.f32 %v755_v59, %v755_v59  ;;  %v773_v32 = vsub.f32 %v1475_v42, %v1525_v22  ;;  %v723_v33 = vadd.f32 %v722_v4, %v721_v55  ;;  %v731_v41 = vrot.slane %v1514_v56, 4 }
  0xcd   :  { %v525_v46 = vpop.f32.mrf.mxu1  ;;  %v673_v47 = vrot.slane %v672_v36, 2  ;;  %v549_v50 = vpop.f32.mrf.mxu3  ;;  %v665_v54 = vrot.slane %v664_v48, 2  ;;  %v657_v0 = vrot.slane %v656_v58, 2  ;;  %v765_v45 = vmul.f32 %v764_v23, %v764_v23 }
  0xce   :  { %v1510_v52 = vadd.f32 %v549_v50, %v536_v43  ;;  %v757_v34 = vsel %vm587_vm2, %v756_v13, 0.0  ;;  %v774_v40 = vmul.f32 %v773_v32, %v773_v32  ;;  %v724_v57 = vrot.slane %v723_v33, 2 }
  0xcf   :  { %v674_v53 = vadd.f32 %v673_v47, %v672_v36  ;;  %v666_v62 = vadd.f32 %v665_v54, %v664_v48  ;;  %v658_v10 = vadd.f32 %v657_v0, %v656_v58  ;;  %v742_v36 = vrot.slane %v741_v8, 2 }
  0xd0   :  { %v702_v1 = vsel %vm605_vm4, %v1510_v52, 0.0  ;;  %v686_v2 = vsel %vm587_vm2, %v1510_v52, 0.0  ;;  %v694_v3 = vsel %vm596_vm3, %v1510_v52, 0.0  ;;  %v758_v49 = vrot.slane %v757_v34, 4 }
  0xd1   :  { %v675_v60 = vrot.slane %v674_v53, 1  ;;  %v667_v6 = vrot.slane %v666_v62, 1  ;;  %v703_v7 = vrot.slane %v702_v1, 4  ;;  %v687_v11 = vrot.slane %v686_v2, 4 }
  0xd2   :  { %v695_v12 = vrot.slane %v694_v3, 4  ;;  %v659_v18 = vrot.slane %v658_v10, 1  ;;  %v775_v51 = vsel %vm605_vm4, %v774_v40, 0.0  ;;  %v743_v55 = vadd.f32 %v742_v36, %v741_v8 }
  0xd3   :  { %v676_v5 = vadd.f32 %v675_v60, %v674_v53  ;;  %v668_v15 = vadd.f32 %v667_v6, %v666_v62  ;;  %v704_v16 = vadd.f32 %v703_v7, %v702_v1  ;;  %v688_v19 = vadd.f32 %v687_v11, %v686_v2 }
  0xd4   :  { %v538_v9 = vpop.f32.mrf.mxu2  ;;  %v696_v21 = vadd.f32 %v695_v12, %v694_v3  ;;  %v660_v29 = vadd.f32 %v659_v18, %v658_v10  ;;  %v776_v62 = vrot.slane %v775_v51, 4  ;;  %v732_v63 = vadd.f32 %v731_v41, %v1514_v56 }
  0xd5   :  { %v677_v14 = vmul.f32 %v676_v5, %v1483_v61  ;;  %v551_v17 = vpop.f32.mrf.mxu3  ;;  %v669_v26 = vmul.f32 %v668_v15, %v1483_v61  ;;  %v705_v28 = vrot.slane %v704_v16, 2  ;;  %v689_v30 = vrot.slane %v688_v19, 2 }
  0xd6   :  { %v697_v31 = vrot.slane %v696_v21, 2  ;;  %v661_v37 = vmul.f32 %v660_v29, %v1483_v61  ;;  %v766_v0 = vsel %vm596_vm3, %v765_v45, 0.0  ;;  %v777_v4 = vadd.f32 %v776_v62, %v775_v51 }
  0xd7   :  { %887 = vrot.lane.b32.xlu2 %v677_v14, %s1406_s3  ;;  %v809_v24 = vsub.f32 %v1492_v20, %v677_v14  ;;  %883 = vrot.lane.b32.xlu1 %v669_v26, %s1405_s2  ;;  %v706_v35 = vadd.f32 %v705_v28, %v704_v16  ;;  %v690_v38 = vadd.f32 %v689_v30, %v688_v19  ;;  %v744_v10 = vrot.slane %v743_v55, 1 }
  0xd8   :  { %v698_v39 = vadd.f32 %v697_v31, %v696_v21  ;;  %879 = vrot.lane.b32.xlu0 %v661_v37, %s1404_s0  ;;  %v791_v46 = vsub.f32 %v1492_v20, %v661_v37  ;;  %v800_v2 = vsub.f32 %v1492_v20, %v669_v26  ;;  %v759_v5 = vadd.f32 %v758_v49, %v757_v34 }
  0xd9   :  { %v810_v43 = vmul.f32 %v809_v24, %v809_v24  ;;  %v707_v44 = vrot.slane %v706_v35, 1  ;;  %v691_v47 = vrot.slane %v690_v38, 1  ;;  %v725_v8 = vadd.f32 %v724_v57, %v723_v33 }
  0xda   :  { %v699_v48 = vrot.slane %v698_v39, 1  ;;  %v792_v59 = vmul.f32 %v791_v46, %v791_v46  ;;  %v778_v11 = vrot.slane %v777_v4, 2  ;;  %v767_v12 = vrot.slane %v766_v0, 4 }
  0xdb   :  { %v708_v50 = vadd.f32 %v707_v44, %v706_v35  ;;  %v692_v53 = vadd.f32 %v691_v47, %v690_v38  ;;  %v811_v58 = vsel %vm605_vm4, %v810_v43, 0.0  ;;  %v733_v14 = vrot.slane %v732_v63, 2 }
  0xdc   :  { %v700_v54 = vadd.f32 %v699_v48, %v698_v39  ;;  %v812_v6 = vrot.slane %v811_v58, 4  ;;  %v793_v56 = vsel %vm587_vm2, %v792_v59, 0.0  ;;  %v801_v15 = vmul.f32 %v800_v2, %v800_v2 }
  0xdd   :  { %v709_v60 = vmul.f32 %v708_v50, %v1483_v61  ;;  %v693_v1 = vmul.f32 %v692_v53, %v1483_v61  ;;  %v760_v16 = vrot.slane %v759_v5, 2  ;;  %v794_v17 = vrot.slane %v793_v56, 4 }
  0xde   :  { %v701_v7 = vmul.f32 %v700_v54, %v1483_v61  ;;  %v726_v18 = vrot.slane %v725_v8, 1  ;;  %v813_v19 = vadd.f32 %v812_v6, %v811_v58  ;;  %v553_v21 = vpack.c.bf16 %v1475_v42, %v1465_v25 }
  0xdf   :  { %v845_v3 = vsub.f32 %v1510_v52, %v709_v60  ;;  %899 = vrot.lane.b32.xlu2 %v709_v60, %s1406_s3  ;;  %891 = vrot.lane.b32.xlu1 %v693_v1, %s1404_s0  ;;  %v827_v9 = vsub.f32 %v1510_v52, %v693_v1  ;;  %v745_v24 = vadd.f32 %v744_v10, %v743_v55  ;;  %v802_v31 = vsel %vm596_vm3, %v801_v15, 0.0 }
  0xe0   :  { %895 = vrot.lane.b32.xlu0 %v701_v7, %s1405_s2  ;;  %v779_v26 = vadd.f32 %v778_v11, %v777_v4  ;;  %v734_v29 = vadd.f32 %v733_v14, %v732_v63  ;;  %v768_v30 = vadd.f32 %v767_v12, %v766_v0  ;;  %v836_v32 = vsub.f32 %v1510_v52, %v701_v7 }
  0xe1   :  { %v846_v13 = vmul.f32 %v845_v3, %v845_v3  ;;  %v828_v23 = vmul.f32 %v827_v9, %v827_v9  ;;  %v761_v33 = vadd.f32 %v760_v16, %v759_v5  ;;  %v727_v34 = vadd.f32 %v726_v18, %v725_v8 }
  0xe2   :  { %v814_v35 = vrot.slane %v813_v19, 2  ;;  %v795_v36 = vadd.f32 %v794_v17, %v793_v56  ;;  %v557_v37 = vrot.slane %v553_v21, 3  ;;  %v780_v40 = vrot.slane %v779_v26, 1 }
  0xe3   :  { %v847_v28 = vsel %vm605_vm4, %v846_v13, 0.0  ;;  %v829_v39 = vsel %vm587_vm2, %v828_v23, 0.0  ;;  %v554_v41 = vpack.c.bf16 %v1510_v52, %v1492_v20  ;;  %v803_v43 = vrot.slane %v802_v31, 4 }
  0xe4   :  { %v848_v38 = vrot.slane %v847_v28, 4  ;;  %v735_v44 = vrot.slane %v734_v29, 1  ;;  %v769_v45 = vrot.slane %v768_v30, 2  ;;  %v837_v46 = vmul.f32 %v836_v32, %v836_v32 }
  0xe5   :  { %v762_v47 = vrot.slane %v761_v33, 1  ;;  %v559_v48 = vrot.slane %v554_v41, 1  ;;  %v830_v49 = vrot.slane %v829_v39, 4  ;;  %v796_v50 = vrot.slane %v795_v36, 2 }
  0xe6   :  { %v563_v51 = vsel %vm560_vm7, %v553_v21, %v557_v37  ;;  %v1568_v53 = vsub.f32 %v1465_v25, %v1497_v27  ;;  %v781_v54 = vadd.f32 %v780_v40, %v779_v26  ;;  %v815_v55 = vadd.f32 %v814_v35, %v813_v19 }
  0xe7   :  { %950 = vrot.lane.b32.xlu2 %v745_v24, %s1406_s3  ;;  %875 = vrot.lane.b32.xlu1 %v1525_v22, %s1406_s3  ;;  %v558_v22 = vrot.slane %v554_v41, 6  ;;  %v849_v57 = vadd.f32 %v848_v38, %v847_v28  ;;  %v736_v59 = vadd.f32 %v735_v44, %v734_v29  ;;  %v770_v60 = vadd.f32 %v769_v45, %v768_v30 }
  0xe8   :  { %940 = vrot.lane.b32.xlu0 %v727_v34, %s1404_s0  ;;  %v804_v62 = vadd.f32 %v803_v43, %v802_v31  ;;  %v838_v0 = vsel %vm596_vm3, %v837_v46, 0.0  ;;  %v763_v1 = vadd.f32 %v762_v47, %v761_v33  ;;  %v797_v25 = vadd.f32 %v796_v50, %v795_v36 }
  0xe9   :  { %v567_v58 = vsel %vm564_vm8, %v558_v22, %v559_v48  ;;  %v831_v2 = vadd.f32 %v830_v49, %v829_v39  ;;  %v646_v3 = vsel %vm571_vm5, %v1492_v20, 0.0  ;;  %v678_v4 = vsel %vm571_vm5, %v1510_v52, 0.0 }
  0xea   :  { %v568_v63 = vsel %vm42_vm0, %v563_v51, %v567_v58  ;;  %v816_v5 = vrot.slane %v815_v55, 1  ;;  %v850_v6 = vrot.slane %v849_v57, 2  ;;  %v647_v7 = vrot.slane %v646_v3, 4 }
  0xeb   :  { %570 = vst [vmem:[%s1625_s4] sm:$0xf] %v568_v63  ;;  %v679_v8 = vrot.slane %v678_v4, 4  ;;  %v839_v56 = vrot.slane %v838_v0, 4  ;;  %v771_v9 = vrot.slane %v770_v60, 1  ;;  %v805_v10 = vrot.slane %v804_v62, 2 }
  0xec   :  { %v648_v11 = vadd.f32 %v647_v7, %v646_v3  ;;  %v798_v13 = vrot.slane %v797_v25, 1  ;;  %v832_v14 = vrot.slane %v831_v2, 2  ;;  %v817_v15 = vadd.f32 %v816_v5, %v815_v55 }
  0xed   :  { %v680_v12 = vadd.f32 %v679_v8, %v678_v4  ;;  %v851_v16 = vadd.f32 %v850_v6, %v849_v57  ;;  %v772_v19 = vadd.f32 %v771_v9, %v770_v60  ;;  %v806_v21 = vadd.f32 %v805_v10, %v804_v62 }
  0xee   :  { %v649_v17 = vrot.slane %v648_v11, 2  ;;  %v840_v23 = vadd.f32 %v839_v56, %v838_v0  ;;  %v799_v28 = vadd.f32 %v798_v13, %v797_v25  ;;  %v833_v29 = vadd.f32 %v832_v14, %v831_v2 }
  0xef   :  { %966 = vrot.lane.b32.xlu2 %v781_v54, %s1406_s3  ;;  %945 = vrot.lane.b32.xlu1 %v736_v59, %s1405_s2  ;;  %v681_v18 = vrot.slane %v680_v12, 2  ;;  %v852_v30 = vrot.slane %v851_v16, 1  ;;  %v807_v33 = vrot.slane %v806_v21, 1  ;;  %v614_v48 = vsel %vm571_vm5, %v1475_v42, 0.0 }
  0xf0   :  { %956 = vrot.lane.b32.xlu0 %v763_v1, %s1404_s0  ;;  %v650_v24 = vadd.f32 %v649_v17, %v648_v11  ;;  %v841_v34 = vrot.slane %v840_v23, 2  ;;  %v834_v37 = vrot.slane %v833_v29, 1  ;;  %v615_v49 = vrot.slane %v614_v48, 4 }
  0xf1   :  { %v682_v26 = vadd.f32 %v681_v18, %v680_v12  ;;  %v853_v38 = vadd.f32 %v852_v30, %v851_v16  ;;  %v808_v41 = vadd.f32 %v807_v33, %v806_v21  ;;  %v711_v25 = vmul.f32 %v1568_v53, %v1568_v53 }
  0xf2   :  { %v651_v31 = vrot.slane %v650_v24, 1  ;;  %v842_v43 = vadd.f32 %v841_v34, %v840_v23  ;;  %v835_v46 = vadd.f32 %v834_v37, %v833_v29  ;;  %v616_v50 = vadd.f32 %v615_v49, %v614_v48 }
  0xf3   :  { %v683_v32 = vrot.slane %v682_v26, 1  ;;  %v712_v4 = vsel %vm571_vm5, %v711_v25, 0.0  ;;  %v1407_v11 = vmov 16.0  }
  0xf4   :  { %v652_v35 = vadd.f32 %v651_v31, %v650_v24  ;;  %v843_v47 = vrot.slane %v842_v43, 1  ;;  %v617_v51 = vrot.slane %v616_v50, 2  ;;  %v713_v6 = vrot.slane %v712_v4, 4 }
  0xf5   :  { %v684_v36 = vadd.f32 %v683_v32, %v682_v26  ;;  %1370 = vrcp.f32 %v1407_v11 }
  0xf6   :  { %v653_v39 = vmul.f32 %v652_v35, %v1483_v61  ;;  %v844_v22 = vadd.f32 %v843_v47, %v842_v43  ;;  %v618_v54 = vadd.f32 %v617_v51, %v616_v50  ;;  %v714_v53 = vadd.f32 %v713_v6, %v712_v4 }
  0xf7   :  { %982 = vrot.lane.b32.xlu2 %v817_v15, %s1406_s3  ;;  %961 = vrot.lane.b32.xlu1 %v772_v19, %s1405_s2  ;;  %v685_v40 = vmul.f32 %v684_v36, %v1483_v61 }
  0xf8   :  { %972 = vrot.lane.b32.xlu0 %v799_v28, %s1404_s0  ;;  %v782_v44 = vsub.f32 %v1492_v20, %v653_v39  ;;  %v619_v55 = vrot.slane %v618_v54, 1  ;;  %v715_v16 = vrot.slane %v714_v53, 2 }
  0xf9   :  { %v818_v45 = vsub.f32 %v1510_v52, %v685_v40 }
  0xfa   :  { %v620_v20 = vadd.f32 %v619_v55, %v618_v54  ;;  %v783_v12 = vmul.f32 %v782_v44, %v782_v44  ;;  %v716_v28 = vadd.f32 %v715_v16, %v714_v53 }
  0xfb   :  { %v1371_v21 = vpop.eup %1370  ;;  %v819_v32 = vmul.f32 %v818_v45, %v818_v45 }
  0xfc   :  { %v621_v62 = vmul.f32 %v620_v20, %v1483_v61  ;;  %v784_v19 = vsel %vm571_vm5, %v783_v12, 0.0  ;;  %v932_v30 = vmul.f32 16.0, %v1371_v21  ;;  %v717_v37 = vrot.slane %v716_v28, 1 }
  0xfd   :  { %v785_v29 = vrot.slane %v784_v19, 4  ;;  %v820_v47 = vsel %vm571_vm5, %v819_v32, 0.0  ;;  %vm936_vm15 = vweird.f32 %v1371_v21 }
  0xfe   :  { %v746_v3 = vsub.f32 %v1475_v42, %v621_v62  ;;  %v718_v48 = vadd.f32 %v717_v37, %v716_v28  ;;  %v821_v54 = vrot.slane %v820_v47, 4 }
  0xff   :  { %998 = vrot.lane.b32.xlu2 %v853_v38, %s1406_s3  ;;  %977 = vrot.lane.b32.xlu1 %v808_v41, %s1405_s2  ;;  %v786_v38 = vadd.f32 %v785_v29, %v784_v19 }
 0x100   :  { %988 = vrot.lane.b32.xlu0 %v835_v46, %s1404_s0 }
 0x101   :  { %v787_v51 = vrot.slane %v786_v38, 2 }
 0x107   :  { %993 = vrot.lane.b32.xlu1 %v844_v22, %s1405_s2 }
 0x11d   :  { %v864_v59 = vpop.permute.xlu2 %863 }
 0x125   :  { %v872_v1 = vpop.permute.xlu2 %871 }
 0x131   :  { %v888_v7 = vpop.permute.xlu2 %887 }
 0x134   :  { %v856_v57 = vpop.permute.xlu0 %855  ;;  %v860_v52 = vpop.permute.xlu1 %859 }
 0x135   :  { %v902_v58 = vsel %vm560_vm7, %v1497_v27, %v856_v57  ;;  %v747_v27 = vmul.f32 %v746_v3, %v746_v3 }
 0x136   :  { %v903_v60 = vsel %vm42_vm0, %v902_v58, %v860_v52 }
 0x137   :  { %v905_v63 = vsel %vm904_vm9, %v903_v60, %v864_v59  ;;  %v748_v56 = vsel %vm571_vm5, %v747_v27, 0.0 }
 0x138   :  { %v907_v0 = vsel %vm906_vm10, %v905_v63, %v621_v62  ;;  %v749_v13 = vrot.slane %v748_v56, 4  ;;  %v788_v63 = vadd.f32 %v787_v51, %v786_v38 }
 0x139   :  { %v900_v23 = vpop.permute.xlu2 %899 }
 0x13a   :  { %v750_v18 = vadd.f32 %v749_v13, %v748_v56 }
 0x13c   :  { %v868_v2 = vpop.permute.xlu0 %867  ;;  %v751_v31 = vrot.slane %v750_v18, 2 }
 0x13d   :  { %v909_v26 = vsel %vm908_vm11, %v907_v0, %v868_v2  ;;  %v822_v0 = vadd.f32 %v821_v54, %v820_v47 }
 0x13e   :  { %v911_v34 = vsel %vm910_vm12, %v909_v26, %v872_v1  ;;  %v752_v44 = vadd.f32 %v751_v31, %v750_v18 }
 0x13f   :  { %v823_v27 = vrot.slane %v822_v0, 2 }
 0x140   :  { %v753_v50 = vrot.slane %v752_v44, 1 }
 0x141   :  { %v951_v45 = vpop.permute.xlu2 %950  ;;  %v824_v11 = vadd.f32 %v823_v27, %v822_v0 }
 0x142   :  { %v754_v60 = vadd.f32 %v753_v50, %v752_v44 }
 0x143   :  { %v825_v19 = vrot.slane %v824_v11, 1 }
 0x149   :  { %v884_v5 = vpop.permute.xlu1 %883 }
 0x14a   :  { %v880_v8 = vpop.permute.xlu0 %879 }
 0x14b   :  { %v914_v61 = vsel %vm560_vm7, %v653_v39, %v880_v8  ;;  %v933_v39 = vsub.f32 1.0, %v932_v30  ;;  %v789_v8 = vrot.slane %v788_v63, 1 }
 0x14c   :  { %v915_v9 = vsel %vm42_vm0, %v914_v61, %v884_v5  ;;  %v1408_v5 = vmov 32.0   ;;  %v967_v61 = vpop.permute.xlu2 %966 }
 0x14d   :  { %v916_v10 = vsel %vm904_vm9, %v915_v9, %v888_v7  ;;  %v934_v49 = vmul.f32 %v1371_v21, %v933_v39  ;;  %1372 = vrcp.f32 %v1408_v5  ;;  %v790_v13 = vadd.f32 %v789_v8, %v788_v63 }
 0x14e   :  { %v917_v42 = vsel %vm906_vm10, %v916_v10, %v685_v40 }
 0x14f   :  { %v935_v59 = vadd.f32 %v1371_v21, %v934_v49 }
 0x151   :  { %v892_v14 = vpop.permute.xlu1 %891  ;;  %v937_v4 = vsel %vm936_vm15, %v1371_v21, %v935_v59 }
 0x152   :  { %v918_v15 = vsel %vm908_vm11, %v917_v42, %v892_v14  ;;  %v896_v17 = vpop.permute.xlu0 %895 }
 0x153   :  { %v919_v24 = vsel %vm910_vm12, %v918_v15, %v896_v17  ;;  %v1373_v14 = vpop.eup %1372 }
 0x154   :  { %v920_v33 = vsel %vm912_vm13, %v919_v24, %v900_v23  ;;  %v1018_v26 = vmul.f32 32.0, %v1373_v14  ;;  %v983_v31 = vpop.permute.xlu2 %982  ;;  %vm1022_vm0 = vweird.f32 %v1373_v14 }
 0x155   :  { %v923_v41 = vsel %vm921_vm14, %v920_v33, 0.0 }
 0x159   :  { %v876_v35 = vpop.permute.xlu1 %875 }
 0x15a   :  { %v913_v36 = vsel %vm912_vm13, %v911_v34, %v876_v35  ;;  %v941_v43 = vpop.permute.xlu0 %940  ;;  %v826_v34 = vadd.f32 %v825_v19, %v824_v11  ;;  %v1019_v35 = vsub.f32 1.0, %v1018_v26 }
 0x15b   :  { %v922_v40 = vsel %vm921_vm14, %v913_v36, 0.0  ;;  %v943_v20 = vadd.f32 %v941_v43, %v718_v48 }
 0x15c   :  { %v924_v46 = vadd.f32 %v923_v41, %v922_v40  ;;  %v1020_v41 = vmul.f32 %v1373_v14, %v1019_v35 }
 0x15e   :  { %v925_v22 = vrot.slane %v924_v46, 4 }
 0x160   :  { %v926_v55 = vadd.f32 %v925_v22, %v924_v46  ;;  %v1021_v22 = vadd.f32 %v1373_v14, %v1020_v41 }
 0x161   :  { %v946_v57 = vpop.permute.xlu1 %945 }
 0x162   :  { %v927_v52 = vrot.slane %v926_v55, 2  ;;  %v948_v58 = vadd.f32 %v946_v57, %v943_v20  ;;  %v957_v62 = vpop.permute.xlu0 %956  ;;  %v1023_v51 = vsel %vm1022_vm0, %v1373_v14, %v1021_v22 }
 0x164   :  { %v928_v1 = vadd.f32 %v927_v52, %v926_v55  ;;  %v953_v25 = vadd.f32 %v951_v45, %v948_v58  ;;  %v999_v45 = vpop.permute.xlu2 %998 }
 0x166   :  { %v929_v2 = vrot.slane %v928_v1, 1  ;;  %v954_v3 = vadd.f32 %v953_v25, %v754_v60 }
 0x168   :  { %v930_v6 = vadd.f32 %v929_v2, %v928_v1  ;;  %v959_v7 = vadd.f32 %v957_v62, %v954_v3 }
 0x169   :  { %v962_v56 = vpop.permute.xlu1 %961 }
 0x16a   :  { %v938_v9 = vmul.f32 %v937_v4, %v930_v6  ;;  %v964_v10 = vadd.f32 %v962_v56, %v959_v7  ;;  %v973_v15 = vpop.permute.xlu0 %972 }
 0x16c   :  { %v1002_v53 = vsub.f32 %v913_v36, %v938_v9  ;;  %v1003_v12 = vsub.f32 %v920_v33, %v938_v9  ;;  %v969_v42 = vadd.f32 %v967_v61, %v964_v10 }
 0x16e   :  { %v1004_v16 = vmul.f32 %v1002_v53, %v1002_v53  ;;  %v1005_v17 = vmul.f32 %v1003_v12, %v1003_v12  ;;  %v970_v18 = vadd.f32 %v969_v42, %v790_v13 }
 0x170   :  { %v1006_v21 = vsel %vm921_vm14, %v1004_v16, 0.0  ;;  %v1007_v23 = vsel %vm921_vm14, %v1005_v17, 0.0  ;;  %v975_v24 = vadd.f32 %v973_v15, %v970_v18 }
 0x171   :  { %v1008_v28 = vadd.f32 %v1007_v23, %v1006_v21  ;;  %v978_v29 = vpop.permute.xlu1 %977 }
 0x172   :  { %v980_v30 = vadd.f32 %v978_v29, %v975_v24  ;;  %v989_v39 = vpop.permute.xlu0 %988 }
 0x173   :  { %v1009_v32 = vrot.slane %v1008_v28, 4 }
 0x174   :  { %v985_v33 = vadd.f32 %v983_v31, %v980_v30 }
 0x175   :  { %v1010_v36 = vadd.f32 %v1009_v32, %v1008_v28 }
 0x176   :  { %v986_v37 = vadd.f32 %v985_v33, %v826_v34 }
 0x177   :  { %v1011_v38 = vrot.slane %v1010_v36, 2 }
 0x178   :  { %v991_v40 = vadd.f32 %v989_v39, %v986_v37 }
 0x179   :  { %v994_v43 = vpop.permute.xlu1 %993  ;;  %v1012_v44 = vadd.f32 %v1011_v38, %v1010_v36 }
 0x17a   :  { %v996_v46 = vadd.f32 %v994_v43, %v991_v40 }
 0x17b   :  { %v1013_v47 = vrot.slane %v1012_v44, 1 }
 0x17c   :  { %v1001_v49 = vadd.f32 %v999_v45, %v996_v46 }
 0x17d   :  { %v1014_v48 = vadd.f32 %v1013_v47, %v1012_v44 }
 0x17f   :  { %v1015_v50 = vmul.f32 2.0, %v1014_v48 }
 0x181   :  { %v1016_v54 = vadd.f32 %v1015_v50, %v1001_v49 }
 0x183   :  { %v1024_v55 = vmul.f32 %v1023_v51, %v1016_v54 }
 0x185   :  { %v1026_v20 = vrot.slane %v1024_v55, 7 }
 0x187   :  { %v1028_v57 = vsel %vm560_vm7, %v938_v9, %v1026_v20 }
 0x188   :  { %1029 = vst.msk [vmem:[%s1626_s5] sm:$0x3] %vm571_vm5, %v1028_v57 }
 0x189   :  { %1038 = vsyncpa [#allocation3], 1 }

// kernel: cnn_decoder_forward.5
= control target key start
LH: loop header
LB: loop body
LE: loop exit
PB: predicated region body
PF: predicated region fallthrough
CT: control target
= control target key end

     0   :  { %13 = vsyncpa [#allocation3], 0  ;;  %s754_s0 = inlined_call_operand.hbm [shape: f32[2,16], index: 0, kind: input, shape index: {}]   ;;  %s755_s1 = inlined_call_operand.vmem [shape: bf16[16,128], index: 1, kind: input, shape index: {}]   ;;  %s756_s2 = inlined_call_operand.vmem [shape: f32[1,128], index: 2, kind: input, shape index: {}]   ;;  %s757_s3 = inlined_call_operand.hbm [shape: f32[1,128], index: 3, kind: input, shape index: {}]   ;;  %s758_s4 = inlined_call_operand.hbm [shape: f32[1,128], index: 4, kind: input, shape index: {}]   ;;  %s759_s5 = inlined_call_operand.hbm [shape: bf16[128,256], index: 5, kind: input, shape index: {}]   ;;  %s760_s6 = inlined_call_operand.vmem [shape: bf16[2,256], index: 6, kind: output, shape index: {0}]   ;;  %s761_s7 = inlined_call_operand.vmem [shape: f32[2,64], index: 7, kind: output, shape index: {1}]  }
   0x1   :  { %14 = vsyncpa [#allocation5], 0  ;;  %s36_s26 = sshll.u32 %s757_s3, 4  ;;  %s37_s26 = int_to_ptr.hbm [resolvable:$true] %s36_s26 }
   0x2   :  { %15 = vsyncpa [#allocation8], 0  ;;  %s648_s27 = smov [#allocation4]   ;;  %s21_s8 = sshll.u32 %s754_s0, 4  ;;  %s22_s8 = int_to_ptr.hbm [resolvable:$true] %s21_s8 }
   0x3   :  { %s38_s28 = sshll.u32 %s648_s27, 4  ;;  %s649_s9 = smov [#allocation2]   ;;  %s39_s28 = int_to_ptr.vmem [resolvable:$true] %s38_s28 }
   0x4   :  { %41 = dma.hbm_to_vmem [thread:$0]  %s37_s26, 16, %s39_s28, [#allocation5]  }
   0x5   :  { %s23_s10 = sshll.u32 %s649_s9, 4  ;;  %s47_s13 = sshll.u32 %s758_s4, 4  ;;  %s24_s10 = int_to_ptr.vmem [resolvable:$true] %s23_s10  ;;  %s48_s13 = int_to_ptr.hbm [resolvable:$true] %s47_s13 }
   0x6   :  { %26 = dma.hbm_to_vmem [thread:$0]  %s22_s8, 32, %s24_s10, [#allocation3]  }
   0x7   :  { %s57_s15 = sshll.u32 %s759_s5, 4  ;;  %s650_s16 = smov [#allocation6]   ;;  %s58_s15 = int_to_ptr.hbm [resolvable:$true] %s57_s15 }
   0x8   :  { %s49_s17 = sshll.u32 %s650_s16, 4  ;;  %s651_s0 = smov [#allocation7]   ;;  %s50_s17 = int_to_ptr.vmem [resolvable:$true] %s49_s17 }
   0x9   :  { %52 = dma.hbm_to_vmem [thread:$0]  %s48_s13, 16, %s50_s17, [#allocation5]  }
   0xa   :  { %s59_s18 = sshll.u32 %s651_s0, 4  ;;  %s652_s19 = smov 128   ;;  %s60_s18 = int_to_ptr.vmem [resolvable:$true] %s59_s18 }
   0xb   :  { %s653_s20 = smov 8  }
   0xc   :  { %65 = dma.hbm_to_vmem [thread:$0]  %s58_s15, 2048, %s60_s18, [#allocation8], %s652_s19, %s652_s19, %s653_s20  }
   0xd   :  { %642 = dma.done.wait [#allocation3], 32  }
   0xe   :  { %643 = vsyncadd [#allocation3], 4294967264 }
   0xf   :  { %644 = dma.done.wait [#allocation5], 32  }
  0x10   :  { %645 = vsyncadd [#allocation5], 4294967264 }
  0x11   :  { %646 = dma.done.wait [#allocation8], 2048  }
  0x12   :  { %647 = vsyncadd [#allocation8], 4294965248  ;;  %v508_v0 = vld [vmem:[%s755_s1] sm:$0xff]  ;;  %vm97_vm0 = vcmask 130048   ;;  %v654_v3 = vmov 2.0   ;;  %vm114_vm1 = vcmask 1041408  }
  0x13   :  { %v83_v1 = vld [vmem:[#allocation2] sm:$0x3]  ;;  %108 = vmatpush.bf16.msra.mxu0 %v508_v0  ;;  %538 = vrcp.f32 %v654_v3  ;;  %v502_v10 = vld [vmem:[#allocation7 + $0x70] sm:$0xf]  ;;  %v523_v12 = vld [vmem:[#allocation7 + $0x74] sm:$0xf] }
  0x14   :  { %v84_v2 = vpack.c.bf16 %v83_v1, %v83_v1  ;;  %v535_v6 = vld [vmem:[%s756_s2] ss:$0 sm:$0xff]  ;;  %v504_v14 = vld [vmem:[#allocation7 + $0x78] sm:$0xf0]  ;;  %v494_v19 = vld [vmem:[#allocation7 + $0x60] sm:$0xf] }
  0x15   :  { %v524_v11 = vld [vmem:[#allocation7 + $0x74] sm:$0xf0]  ;;  %v507_v16 = vor.u32 %v523_v12, %v504_v14  ;;  %v522_v20 = vld [vmem:[#allocation7 + $0x64] sm:$0xf0]  ;;  %v521_v21 = vld [vmem:[#allocation7 + $0x64] sm:$0xf] }
  0x16   :  { %443 = vmatmul.msk.bf16.vlgmr.msra.gmra.mxu0 %vm97_vm0, %v84_v2  ;;  %v503_v13 = vor.u32 %v524_v11, %v502_v10  ;;  %v495_v23 = vor.u32 %v522_v20, %v494_v19  ;;  %v496_v24 = vld [vmem:[#allocation7 + $0x68] sm:$0xf0]  ;;  %v486_v29 = vld [vmem:[#allocation7 + $0x50] sm:$0xf]  ;;  %v520_v30 = vld [vmem:[#allocation7 + $0x54] sm:$0xf0] }
  0x17   :  { %273 = vmatpush.bf16.msra.mxu2 %v507_v16  ;;  %v499_v25 = vor.u32 %v521_v21, %v496_v24  ;;  %v519_v31 = vld [vmem:[#allocation7 + $0x54] sm:$0xf]  ;;  %v487_v33 = vor.u32 %v520_v30, %v486_v29  ;;  %v488_v34 = vld [vmem:[#allocation7 + $0x58] sm:$0xf0]  ;;  %v478_v38 = vld [vmem:[#allocation7 + $0x40] sm:$0xf] }
  0x18   :  { %260 = vmatpush.bf16.msra.mxu1 %v503_v13  ;;  %v491_v35 = vor.u32 %v519_v31, %v488_v34  ;;  %v518_v39 = vld [vmem:[#allocation7 + $0x44] sm:$0xf0]  ;;  %v517_v40 = vld [vmem:[#allocation7 + $0x44] sm:$0xf]  ;;  %v480_v43 = vld [vmem:[#allocation7 + $0x48] sm:$0xf0] }
  0x19   :  { %v539_v4 = vpop.eup %538  ;;  %v479_v42 = vor.u32 %v518_v39, %v478_v38  ;;  %v483_v44 = vor.u32 %v517_v40, %v480_v43  ;;  %v470_v46 = vld [vmem:[#allocation7 + $0x30] sm:$0xf]  ;;  %v516_v47 = vld [vmem:[#allocation7 + $0x34] sm:$0xf0]  ;;  %v515_v48 = vld [vmem:[#allocation7 + $0x34] sm:$0xf] }
  0x1a   :  { %v123_v5 = vmul.f32 2.0, %v539_v4  ;;  %vm127_vm2 = vweird.f32 %v539_v4  ;;  %v471_v50 = vor.u32 %v516_v47, %v470_v46  ;;  %v472_v51 = vld [vmem:[#allocation7 + $0x38] sm:$0xf0]  ;;  %v462_v54 = vld [vmem:[#allocation7 + $0x20] sm:$0xf]  ;;  %vm304_vm6 = vcmask 1041920  }
  0x1b   :  { %274 = vmatpush.bf16.msra.mxu2 %v499_v25  ;;  %v475_v52 = vor.u32 %v515_v48, %v472_v51  ;;  %v514_v55 = vld [vmem:[#allocation7 + $0x24] sm:$0xf0]  ;;  %v513_v56 = vld [vmem:[#allocation7 + $0x24] sm:$0xf]  ;;  %v464_v59 = vld [vmem:[#allocation7 + $0x28] sm:$0xf0] }
  0x1c   :  { %v124_v8 = vsub.f32 1.0, %v123_v5  ;;  %261 = vmatpush.bf16.msra.mxu1 %v495_v23  ;;  %v463_v58 = vor.u32 %v514_v55, %v462_v54  ;;  %v467_v61 = vor.u32 %v513_v56, %v464_v59  ;;  %v454_v63 = vld [vmem:[#allocation7 + $0x10] sm:$0xf]  ;;  %v512_v0 = vld [vmem:[#allocation7 + $0x14] sm:$0xf0]  ;;  %vm289_vm7 = vcmask 1040384  }
  0x1d   :  { %v511_v1 = vld [vmem:[#allocation7 + $0x14] sm:$0xf]  ;;  %v455_v2 = vor.u32 %v512_v0, %v454_v63  ;;  %v456_v3 = vld [vmem:[#allocation7 + $0x18] sm:$0xf0]  ;;  %v510_v5 = vld [vmem:[#allocation7 + $0x4] sm:$0xf0] }
  0x1e   :  { %v125_v18 = vmul.f32 %v539_v4, %v124_v8  ;;  %v509_v8 = vld [vmem:[#allocation7 + $0x4] sm:$0xf]  ;;  %v536_v23 = vld [vmem:[#allocation4] ss:$0 sm:$0xff]  ;;  %s655_s23 = smov 64   ;;  %vm295_vm8 = vcmask 517120  }
  0x1f   :  { %275 = vmatpush.bf16.msra.mxu2 %v491_v35  ;;  %vm375_vm9 = vcmask 1042432   ;;  %vm377_vm10 = vcmask 519168  }
  0x20   :  { %v126_v28 = vadd.f32 %v539_v4, %v125_v18  ;;  %262 = vmatpush.bf16.msra.mxu1 %v487_v33 }
  0x22   :  { %v717_v37 = vsel %vm127_vm2, %v539_v4, %v126_v28  ;;  %v446_v4 = vld [vmem:[#allocation7] sm:$0xf] }
  0x23   :  { %276 = vmatpush.bf16.msra.mxu2 %v483_v44  ;;  %v447_v10 = vor.u32 %v510_v5, %v446_v4 }
  0x24   :  { %263 = vmatpush.bf16.msra.mxu1 %v479_v42 }
  0x27   :  { %277 = vmatpush.bf16.msra.mxu2 %v475_v52 }
  0x28   :  { %264 = vmatpush.bf16.msra.mxu1 %v471_v50 }
  0x2b   :  { %278 = vmatpush.bf16.msra.mxu2 %v467_v61 }
  0x2c   :  { %265 = vmatpush.bf16.msra.mxu1 %v463_v58 }
  0x30   :  { %266 = vmatpush.bf16.msra.mxu1 %v455_v2 }
  0x34   :  { %267 = vmatpush.bf16.msra.mxu1 %v447_v10 }
  0x93   :  { %v110_v7 = vpop.f32.mrf.mxu0 }
  0x94   :  { %v111_v9 = vadd.f32 %v535_v6, %v110_v7  ;;  %v459_v7 = vor.u32 %v511_v1, %v456_v3 }
  0x96   :  { %v115_v15 = vsel %vm114_vm1, %v111_v9, 0.0  ;;  %279 = vmatpush.bf16.msra.mxu2 %v459_v7 }
  0x97   :  { %v116_v17 = vrot.slane %v115_v15, 4 }
  0x99   :  { %v117_v22 = vadd.f32 %v116_v17, %v115_v15 }
  0x9b   :  { %v118_v26 = vrot.slane %v117_v22, 2  ;;  %v112_v27 = vpop.f32.mrf.mxu0 }
  0x9d   :  { %v119_v32 = vadd.f32 %v118_v26, %v117_v22  ;;  %v537_v26 = vld [vmem:[#allocation6] ss:$0 sm:$0xff] }
  0x9f   :  { %v120_v36 = vrot.slane %v119_v32, 1 }
  0xa1   :  { %v121_v41 = vadd.f32 %v120_v36, %v119_v32 }
  0xa3   :  { %v129_v45 = vmul.f32 %v717_v37, %v121_v41 }
  0xa5   :  { %v130_v49 = vsub.f32 %v111_v9, %v129_v45  ;;  %v448_v9 = vld [vmem:[#allocation7 + $0x8] sm:$0xf0] }
  0xa6   :  { %v451_v12 = vor.u32 %v509_v8, %v448_v9 }
  0xa7   :  { %v131_v53 = vmul.f32 %v130_v49, %v130_v49 }
  0xa8   :  { %280 = vmatpush.bf16.msra.mxu2 %v451_v12 }
  0xa9   :  { %v132_v57 = vsel %vm114_vm1, %v131_v53, 0.0 }
  0xaa   :  { %v133_v60 = vrot.slane %v132_v57, 4 }
  0xac   :  { %v134_v62 = vadd.f32 %v133_v60, %v132_v57 }
  0xae   :  { %v135_v6 = vrot.slane %v134_v62, 2 }
  0xb0   :  { %v136_v11 = vadd.f32 %v135_v6, %v134_v62 }
  0xb2   :  { %v137_v13 = vrot.slane %v136_v11, 1 }
  0xb4   :  { %v138_v14 = vadd.f32 %v137_v13, %v136_v11 }
  0xb6   :  { %v139_v15 = vmul.f32 %v138_v14, %v717_v37 }
  0xb8   :  { %v140_v16 = vadd.f32 1e-05, %v139_v15 }
  0xba   :  { %540 = vrsqrt.f32 %v140_v16  ;;  %vm147_vm4 = vweird.f32 %v140_v16 }
  0xc0   :  { %v541_v17 = vpop.eup %540 }
  0xc1   :  { %v142_v18 = vmul.f32 %v541_v17, %v140_v16  ;;  %vm148_vm3 = vweird.f32 %v541_v17 }
  0xc2   :  { %vm149_vm5 = vmor %vm147_vm4, %vm148_vm3 }
  0xc3   :  { %v143_v19 = vmul.f32 %v541_v17, %v142_v18 }
  0xc5   :  { %v144_v20 = vmul.f32 0.5, %v143_v19 }
  0xc7   :  { %v145_v21 = vsub.f32 1.5, %v144_v20 }
  0xc9   :  { %v146_v22 = vmul.f32 %v541_v17, %v145_v21 }
  0xcb   :  { %v150_v24 = vsel %vm149_vm5, %v541_v17, %v146_v22 }
  0xcc   :  { %v151_v25 = vmul.f32 %v150_v24, %v130_v49 }
  0xce   :  { %v156_v27 = vmul.f32 %v536_v23, %v151_v25 }
  0xd0   :  { %v161_v28 = vadd.f32 %v537_v26, %v156_v27 }
  0xd2   :  { %v162_v29 = vmax.f32 %v161_v28, 0.0 }
  0xd4   :  { %v163_v30 = vpack.c.bf16 %v162_v29, %v162_v29 }
  0xd6   :  { %268 = vmatmul.bf16.vlgmr.msra.gmra.mxu1 %v163_v30  ;;  %281 = vmatmul.bf16.vlgmr.msra.gmra.mxu2 %v163_v30  ;;  %v656_v30 = vmov 4.0  }
  0xd7   :  { %542 = vrcp.f32 %v656_v30 }
 0x153   :  { %v722_v31 = vpop.f32.mrf.mxu1 }
 0x154   :  { %v305_v32 = vsel %vm304_vm6, %v722_v31, 0.0  ;;  %v296_v9 = vsel %vm295_vm8, %v722_v31, 0.0 }
 0x155   :  { %v306_v33 = vrot.slane %v305_v32, 4  ;;  %v297_v11 = vrot.slane %v296_v9, 4 }
 0x157   :  { %v307_v34 = vadd.f32 %v306_v33, %v305_v32  ;;  %v298_v13 = vadd.f32 %v297_v11, %v296_v9 }
 0x159   :  { %v282_v35 = vpop.f32.mrf.mxu2  ;;  %v308_v36 = vrot.slane %v307_v34, 2  ;;  %v299_v15 = vrot.slane %v298_v13, 2 }
 0x15a   :  { %v286_v38 = vpack.c.bf16 %v282_v35, %v722_v31  ;;  %v321_v39 = vsel %vm304_vm6, %v282_v35, 0.0  ;;  %v313_v10 = vsel %vm295_vm8, %v282_v35, 0.0 }
 0x15b   :  { %v322_v40 = vrot.slane %v321_v39, 4  ;;  %v271_v41 = vpop.f32.mrf.mxu1  ;;  %v309_v42 = vadd.f32 %v308_v36, %v307_v34  ;;  %v314_v12 = vrot.slane %v313_v10, 4  ;;  %v300_v17 = vadd.f32 %v299_v15, %v298_v13 }
 0x15c   :  { %v288_v43 = vrot.slane %v286_v38, 3 }
 0x15d   :  { %v323_v44 = vadd.f32 %v322_v40, %v321_v39  ;;  %v310_v45 = vrot.slane %v309_v42, 1  ;;  %v315_v14 = vadd.f32 %v314_v12, %v313_v10  ;;  %v301_v19 = vrot.slane %v300_v17, 1  ;;  %v543_v39 = vpop.eup %542 }
 0x15e   :  { %v292_v46 = vsel %vm289_vm7, %v286_v38, %v288_v43  ;;  %vm390_vm11 = vweird.f32 %v543_v39 }
 0x15f   :  { %v311_v47 = vadd.f32 %v310_v45, %v309_v42  ;;  %v324_v48 = vrot.slane %v323_v44, 2  ;;  %294 = vst [vmem:[%s760_s6] sm:$0x3] %v292_v46  ;;  %v316_v16 = vrot.slane %v315_v14, 2  ;;  %v302_v21 = vadd.f32 %v301_v19, %v300_v17 }
 0x161   :  { %v284_v49 = vpop.f32.mrf.mxu2  ;;  %v312_v50 = vmul.f32 %v311_v47, %v717_v37  ;;  %v325_v51 = vadd.f32 %v324_v48, %v323_v44  ;;  %v317_v18 = vadd.f32 %v316_v16, %v315_v14  ;;  %v303_v23 = vmul.f32 %v302_v21, %v717_v37 }
 0x163   :  { %366 = vrot.lane.b32.xlu0 %v312_v50, %s655_s23  ;;  %v338_v52 = vsub.f32 %v722_v31, %v312_v50  ;;  %v326_v53 = vrot.slane %v325_v51, 1  ;;  %v318_v20 = vrot.slane %v317_v18, 1  ;;  %v329_v25 = vsub.f32 %v722_v31, %v303_v23 }
 0x164   :  { %v386_v31 = vmul.f32 4.0, %v543_v39 }
 0x165   :  { %v339_v54 = vmul.f32 %v338_v52, %v338_v52  ;;  %v327_v55 = vadd.f32 %v326_v53, %v325_v51  ;;  %v319_v22 = vadd.f32 %v318_v20, %v317_v18  ;;  %v330_v27 = vmul.f32 %v329_v25, %v329_v25 }
 0x166   :  { %v387_v43 = vsub.f32 1.0, %v386_v31 }
 0x167   :  { %v340_v56 = vsel %vm304_vm6, %v339_v54, 0.0  ;;  %v328_v57 = vmul.f32 %v327_v55, %v717_v37  ;;  %v320_v24 = vmul.f32 %v319_v22, %v717_v37  ;;  %v331_v29 = vsel %vm295_vm8, %v330_v27, 0.0 }
 0x168   :  { %v341_v58 = vrot.slane %v340_v56, 4  ;;  %v332_v33 = vrot.slane %v331_v29, 4  ;;  %v388_v50 = vmul.f32 %v543_v39, %v387_v43 }
 0x169   :  { %v356_v59 = vsub.f32 %v282_v35, %v328_v57  ;;  %v347_v26 = vsub.f32 %v282_v35, %v320_v24 }
 0x16a   :  { %v342_v60 = vadd.f32 %v341_v58, %v340_v56  ;;  %v333_v38 = vadd.f32 %v332_v33, %v331_v29  ;;  %v389_v55 = vadd.f32 %v543_v39, %v388_v50 }
 0x16b   :  { %v357_v61 = vmul.f32 %v356_v59, %v356_v59  ;;  %370 = vrot.lane.b32.xlu0 %v328_v57, %s655_s23  ;;  %v348_v28 = vmul.f32 %v347_v26, %v347_v26 }
 0x16c   :  { %v343_v62 = vrot.slane %v342_v60, 2  ;;  %v334_v35 = vrot.slane %v333_v38, 2 }
 0x16d   :  { %v358_v63 = vsel %vm304_vm6, %v357_v61, 0.0  ;;  %v349_v32 = vsel %vm295_vm8, %v348_v28, 0.0  ;;  %v657_v61 = vmov 8.0  }
 0x16e   :  { %v359_v0 = vrot.slane %v358_v63, 4  ;;  %v344_v1 = vadd.f32 %v343_v62, %v342_v60  ;;  %v350_v34 = vrot.slane %v349_v32, 4  ;;  %v335_v45 = vadd.f32 %v334_v35, %v333_v38 }
 0x16f   :  { %544 = vrcp.f32 %v657_v61 }
 0x170   :  { %v345_v2 = vrot.slane %v344_v1, 1  ;;  %v360_v3 = vadd.f32 %v359_v0, %v358_v63  ;;  %v351_v41 = vadd.f32 %v350_v34, %v349_v32  ;;  %v336_v51 = vrot.slane %v335_v45, 1 }
 0x171   :  { %v391_v63 = vsel %vm390_vm11, %v543_v39, %v389_v55 }
 0x172   :  { %v346_v4 = vadd.f32 %v345_v2, %v344_v1  ;;  %v361_v5 = vrot.slane %v360_v3, 2  ;;  %v352_v42 = vrot.slane %v351_v41, 2  ;;  %v337_v56 = vadd.f32 %v336_v51, %v335_v45 }
 0x174   :  { %394 = vrot.lane.b32.xlu1 %v346_v4, %s655_s23  ;;  %v362_v6 = vadd.f32 %v361_v5, %v360_v3  ;;  %v353_v48 = vadd.f32 %v352_v42, %v351_v41 }
 0x175   :  { %v545_v3 = vpop.eup %544 }
 0x176   :  { %v363_v7 = vrot.slane %v362_v6, 1  ;;  %v354_v53 = vrot.slane %v353_v48, 1  ;;  %vm420_vm12 = vweird.f32 %v545_v3 }
 0x178   :  { %v364_v8 = vadd.f32 %v363_v7, %v362_v6  ;;  %v355_v60 = vadd.f32 %v354_v53, %v353_v48  ;;  %v416_v6 = vmul.f32 8.0, %v545_v3 }
 0x17a   :  { %v417_v9 = vsub.f32 1.0, %v416_v6 }
 0x17c   :  { %400 = vrot.lane.b32.xlu1 %v364_v8, %s655_s23  ;;  %v418_v12 = vmul.f32 %v545_v3, %v417_v9 }
 0x17e   :  { %v419_v15 = vadd.f32 %v545_v3, %v418_v12 }
 0x180   :  { %v421_v20 = vsel %vm420_vm12, %v545_v3, %v419_v15 }
 0x1d5   :  { %v367_v36 = vpop.permute.xlu0 %366 }
 0x1d6   :  { %v373_v40 = vsel %vm289_vm7, %v303_v23, %v367_v36 }
 0x1d7   :  { %v374_v37 = vsel %vm114_vm1, %v373_v40, %v320_v24 }
 0x1dd   :  { %v371_v44 = vpop.permute.xlu0 %370 }
 0x1de   :  { %v376_v46 = vsel %vm375_vm9, %v374_v37, %v371_v44 }
 0x1df   :  { %v378_v47 = vsel %vm377_vm10, %v376_v46, 0.0 }
 0x1e0   :  { %v379_v49 = vrot.slane %v378_v47, 4 }
 0x1e2   :  { %v380_v52 = vadd.f32 %v379_v49, %v378_v47 }
 0x1e4   :  { %v381_v54 = vrot.slane %v380_v52, 2 }
 0x1e6   :  { %v382_v57 = vadd.f32 %v381_v54, %v380_v52  ;;  %v395_v58 = vpop.permute.xlu1 %394 }
 0x1e7   :  { %v397_v59 = vadd.f32 %v395_v58, %v337_v56 }
 0x1e8   :  { %v383_v62 = vrot.slane %v382_v57, 1 }
 0x1e9   :  { %v398_v0 = vadd.f32 %v397_v59, %v355_v60 }
 0x1ea   :  { %v384_v1 = vadd.f32 %v383_v62, %v382_v57 }
 0x1ec   :  { %v392_v2 = vmul.f32 %v391_v63, %v384_v1 }
 0x1ee   :  { %v404_v4 = vsub.f32 %v376_v46, %v392_v2  ;;  %v401_v16 = vpop.permute.xlu1 %400 }
 0x1ef   :  { %v403_v18 = vadd.f32 %v401_v16, %v398_v0 }
 0x1f0   :  { %v405_v5 = vmul.f32 %v404_v4, %v404_v4 }
 0x1f2   :  { %v406_v7 = vsel %vm377_vm10, %v405_v5, 0.0 }
 0x1f3   :  { %v407_v8 = vrot.slane %v406_v7, 4 }
 0x1f5   :  { %v408_v10 = vadd.f32 %v407_v8, %v406_v7 }
 0x1f7   :  { %v409_v11 = vrot.slane %v408_v10, 2 }
 0x1f9   :  { %v410_v13 = vadd.f32 %v409_v11, %v408_v10 }
 0x1fb   :  { %v411_v14 = vrot.slane %v410_v13, 1 }
 0x1fd   :  { %v412_v17 = vadd.f32 %v411_v14, %v410_v13 }
 0x1ff   :  { %v413_v19 = vmul.f32 2.0, %v412_v17 }
 0x201   :  { %v414_v21 = vadd.f32 %v413_v19, %v403_v18 }
 0x203   :  { %v422_v22 = vmul.f32 %v421_v20, %v414_v21 }
 0x205   :  { %v424_v23 = vrot.slane %v422_v22, 7 }
 0x207   :  { %v426_v24 = vsel %vm289_vm7, %v392_v2, %v424_v23 }
 0x208   :  { %427 = vst.msk [vmem:[%s761_s7] sm:$0x3] %vm295_vm8, %v426_v24 }
 0x209   :  { %436 = vsyncpa [#allocation3], 1 }
 0x20a   :  { %437 = vsyncpa [#allocation5], 1 }
 0x20b   :  { %438 = vsyncpa [#allocation8], 1 }

// kernel: cnn_decoder_forward.7
= control target key start
LH: loop header
LB: loop body
LE: loop exit
PB: predicated region body
PF: predicated region fallthrough
CT: control target
= control target key end

     0   :  { %s1431_s18 = smov 0   ;;  %s1739_s0 = inlined_call_operand.vmem [shape: bf16[2,4,4,32], index: 0, kind: input, shape index: {}]   ;;  %s1740_s1 = inlined_call_operand.vmem [shape: bf16[4,128,64], index: 1, kind: input, shape index: {}]   ;;  %s1741_s2 = inlined_call_operand.vmem [shape: f32[1,32], index: 2, kind: input, shape index: {}]   ;;  %s1742_s3 = inlined_call_operand.vmem [shape: f32[1,32], index: 3, kind: input, shape index: {}]   ;;  %s1743_s4 = inlined_call_operand.vmem [shape: bf16[2,4,2,4,128], index: 4, kind: output, shape index: {0}]   ;;  %s1744_s5 = inlined_call_operand.vmem [shape: f32[2,2,64], index: 5, kind: output, shape index: {1}]  }
   0x1 LB: > { %s1138_s19 = sadd.s32 4294967295, %s1393_s18   ;;  %p1142_p0 = scmp.ge.s32.totalorder %s1393_s18, 1  ;;  %s1393_s18 = sphi %s1431_s18, %s16_s18  }
   0x2   : > { %p190_p1 = scmp.lt.s32.totalorder %s1393_s18, 3 }
   0x4   : > { %p191_p2 = pnand %p1142_p0, %p190_p1 }
   0x5   : > { %p222_p3 = scmp.lt.s32.totalorder (!%p191_p2), %s1138_s19, 1  ;;  %s1396_s28 = smov (!%p191_p2), 32  }
   0x6   : > { %194 = sbr.rel (%p191_p2) target bundleno = 493 (0x1ed), region = 36  ;;  %s1397_s29 = smov (!%p191_p2), 64  }
   0x7   : > { %s1398_s30 = smov (!%p191_p2), 96  }
   0xb   : > { %vm317_vm0 = vcmask 1040384   ;;  %vm318_vm1 = vsmask.f32 256  ;;  %vm325_vm2 = vcmask 1042432   ;;  %v1395_v0 = vmov 0   ;;  %s1750_s19 = smov (!%p222_p3, %s1138_s19), 1 }
   0xc   : > { %v280_v1 = vrot.slane %v1395_v0, 7  ;;  %vm1440_vm3 = vmand %vm317_vm0, %vm318_vm1  ;;  %vm326_vm4 = vsmask.f32 2304  ;;  %s1333_s20 = sshll.u32 %s1750_s19, 3  ;;  %v1381_v8 = vld [vmem:[%s1741_s2] ss:$0 sm:$0xff] }
   0xd   : > { %vm1445_vm5 = vmand %vm325_vm2, %vm326_vm4  ;;  %s226_s23 = scalar_lea.vmem %s1739_s0, %s1333_s20  ;;  %v1382_v13 = vld [vmem:[%s1742_s3] ss:$0 sm:$0xff]  ;;  %v1342_v2 = vld [vmem:[%s1740_s1 + $0x38] sm:$0xff]  ;;  %vm396_vm10 = vcmask 261120   ;;  %vm405_vm11 = vcmask 523264   ;;  %vm414_vm12 = vcmask 785408  }
   0xe   : > { %v320_v4 = vsel %vm1440_vm3, 0, %v280_v1  ;;  %v239_v10 = vld [vmem:[%s226_s23 + $0x4] sm:$0x3]  ;;  %v237_v11 = vld [vmem:[%s226_s23] sm:$0x3]  ;;  %503 = vmatpush.bf16.msra.mxu0 %v1342_v2  ;;  %v1341_v3 = vld [vmem:[%s1740_s1 + $0x30] sm:$0xff] }
   0xf   : > { %v1455_v5 = vsel %vm1445_vm5, %v320_v4, 0  ;;  %v243_v12 = vunpack.c.l.bf16 %v239_v10  ;;  %v241_v14 = vunpack.c.l.bf16 %v237_v11  ;;  %v238_v15 = vld [vmem:[%s226_s23 + $0x2] sm:$0x3]  ;;  %v240_v16 = vld [vmem:[%s226_s23 + $0x6] sm:$0x3]  ;;  %vm429_vm13 = vcmask 1041408  }
  0x10   : > { %v334_v6 = vshrl.u32 %v1455_v5, 16  ;;  %v336_v7 = vshll.u32 %v1455_v5, 16  ;;  %v242_v18 = vunpack.c.l.bf16 %v238_v15  ;;  %v244_v19 = vunpack.c.l.bf16 %v240_v16  ;;  %s1334_s7 = sshll.u32 %s1750_s19, 4 }
  0x11   : > { %v251_v20 = vmul.f32 %v1381_v8, %v243_v12  ;;  %v249_v21 = vmul.f32 %v1381_v8, %v241_v14  ;;  %vm432_vm14 = vcmask 1043456   ;;  %vm435_vm15 = vcmask 1045504   ;;  %s231_s10 = scalar_lea.vmem %s1743_s4, %s1334_s7 }
  0x12   : > { %v338_v9 = vrot.slane %v336_v7, 1  ;;  %v250_v22 = vmul.f32 %v1381_v8, %v242_v18  ;;  %v252_v23 = vmul.f32 %v1381_v8, %v244_v19  ;;  %504 = vmatpush.bf16.msra.mxu0 %v1341_v3  ;;  %vm1050_vm4 = vcmask 517120  }
  0x13   : > { %v259_v24 = vadd.f32 %v1382_v13, %v251_v20  ;;  %v257_v25 = vadd.f32 %v1382_v13, %v249_v21  ;;  %v1350_v20 = vld [vmem:[%s1740_s1 + $0x78] sm:$0xff] }
  0x14   : > { %v1469_v17 = vor.u32 %v338_v9, %v334_v6  ;;  %v258_v26 = vadd.f32 %v1382_v13, %v250_v22  ;;  %v260_v27 = vadd.f32 %v1382_v13, %v252_v23  ;;  %v1358_v21 = vld [vmem:[%s1740_s1 + $0xb8] sm:$0xff]  ;;  %649 = vmatpush.bf16.msra.mxu1 %v1350_v20  ;;  %v1349_v22 = vld [vmem:[%s1740_s1 + $0x70] sm:$0xff]  ;;  %v1339_v23 = vld [vmem:[%s1740_s1 + $0x20] sm:$0xff] }
  0x15   : > { %vm263_vm6 = vcmp.ge.f32.partialorder %v259_v24, 0.0  ;;  %v267_v28 = vmul.f32 0.05, %v259_v24  ;;  %vm261_vm7 = vcmp.ge.f32.partialorder %v257_v25, 0.0  ;;  %v265_v29 = vmul.f32 0.05, %v257_v25  ;;  %812 = vmatpush.bf16.msra.mxu2 %v1358_v21 }
  0x16   : > { %361 = vrot.lane.b32.xlu0 %v1469_v17, %s1396_s28  ;;  %vm262_vm8 = vcmp.ge.f32.partialorder %v258_v26, 0.0  ;;  %v266_v30 = vmul.f32 0.05, %v258_v26  ;;  %vm264_vm9 = vcmp.ge.f32.partialorder %v260_v27, 0.0  ;;  %v268_v31 = vmul.f32 0.05, %v260_v27 }
  0x17   : > { %v271_v32 = vsel %vm263_vm6, %v259_v24, %v267_v28  ;;  %v269_v33 = vsel %vm261_vm7, %v257_v25, %v265_v29  ;;  %v1348_v24 = vld [vmem:[%s1740_s1 + $0x68] sm:$0xff]  ;;  %v1357_v25 = vld [vmem:[%s1740_s1 + $0xb0] sm:$0xff]  ;;  %v1347_v28 = vld [vmem:[%s1740_s1 + $0x60] sm:$0xff] }
  0x18   : > { %v275_v34 = vpack.c.bf16 %v271_v32, %v271_v32  ;;  %v273_v35 = vpack.c.bf16 %v269_v33, %v269_v33  ;;  %v270_v36 = vsel %vm262_vm8, %v258_v26, %v266_v30  ;;  %v272_v37 = vsel %vm264_vm9, %v260_v27, %v268_v31  ;;  %650 = vmatpush.bf16.msra.mxu1 %v1349_v22  ;;  %v1366_v26 = vld [vmem:[%s1740_s1 + $0xf8] sm:$0xff]  ;;  %v1356_v29 = vld [vmem:[%s1740_s1 + $0xa8] sm:$0xff]  ;;  %v1365_v30 = vld [vmem:[%s1740_s1 + $0xf0] sm:$0xff] }
  0x19   : > { %v274_v38 = vpack.c.bf16 %v270_v36, %v270_v36  ;;  %v276_v39 = vpack.c.bf16 %v272_v37, %v272_v37  ;;  %813 = vmatpush.bf16.msra.mxu2 %v1357_v25  ;;  %939 = vmatpush.bf16.msra.mxu3 %v1366_v26  ;;  %v1338_v27 = vld [vmem:[%s1740_s1 + $0x18] sm:$0xff]  ;;  %v1337_v31 = vld [vmem:[%s1740_s1 + $0x10] sm:$0xff]  ;;  %v1355_v33 = vld [vmem:[%s1740_s1 + $0xa0] sm:$0xff] }
  0x1a   : > { %v299_v40 = vshrl.u32 %v275_v34, 16  ;;  %v302_v41 = vshll.u32 %v275_v34, 16  ;;  %v285_v42 = vshrl.u32 %v273_v35, 16  ;;  %v288_v43 = vshll.u32 %v273_v35, 16  ;;  %v1346_v32 = vld [vmem:[%s1740_s1 + $0x58] sm:$0xff]  ;;  %v1364_v34 = vld [vmem:[%s1740_s1 + $0xe8] sm:$0xff] }
  0x1b   : > { %v292_v44 = vshrl.u32 %v274_v38, 16  ;;  %v295_v45 = vshll.u32 %v274_v38, 16  ;;  %v306_v51 = vshrl.u32 %v276_v39, 16  ;;  %v309_v58 = vshll.u32 %v276_v39, 16  ;;  %v1336_v36 = vld [vmem:[%s1740_s1 + $0x8] sm:$0xff]  ;;  %v1345_v37 = vld [vmem:[%s1740_s1 + $0x50] sm:$0xff] }
  0x1c   : > { %v301_v46 = vrot.slane %v299_v40, 7  ;;  %v287_v47 = vrot.slane %v285_v42, 7  ;;  %651 = vmatpush.bf16.msra.mxu1 %v1348_v24  ;;  %v1354_v38 = vld [vmem:[%s1740_s1 + $0x98] sm:$0xff]  ;;  %v1363_v40 = vld [vmem:[%s1740_s1 + $0xe0] sm:$0xff]  ;;  %v1344_v42 = vld [vmem:[%s1740_s1 + $0x48] sm:$0xff] }
  0x1d   : > { %v294_v48 = vrot.slane %v292_v44, 7  ;;  %v308_v62 = vrot.slane %v306_v51, 7  ;;  %814 = vmatpush.bf16.msra.mxu2 %v1356_v29  ;;  %940 = vmatpush.bf16.msra.mxu3 %v1365_v30  ;;  %v1362_v44 = vld [vmem:[%s1740_s1 + $0xd8] sm:$0xff]  ;;  %v1351_v51 = vld [vmem:[%s1740_s1 + $0x80] sm:$0xff] }
  0x1e   : > { %v304_v49 = vor.u32 %v302_v41, %v301_v46  ;;  %v290_v50 = vor.u32 %v288_v43, %v287_v47  ;;  %v1335_v41 = vld [vmem:[%s1740_s1] sm:$0xff]  ;;  %v1353_v43 = vld [vmem:[%s1740_s1 + $0x90] sm:$0xff]  ;;  %v1352_v47 = vld [vmem:[%s1740_s1 + $0x88] sm:$0xff] }
  0x1f   : > { %v297_v52 = vor.u32 %v295_v45, %v294_v48  ;;  %v311_v10 = vor.u32 %v309_v58, %v308_v62  ;;  %v1343_v46 = vld [vmem:[%s1740_s1 + $0x40] sm:$0xff]  ;;  %v1361_v48 = vld [vmem:[%s1740_s1 + $0xd0] sm:$0xff] }
  0x20   : > { %v323_v53 = vsel %vm1440_vm3, 0, %v304_v49  ;;  %v321_v54 = vsel %vm1440_vm3, 0, %v290_v50  ;;  %652 = vmatpush.bf16.msra.mxu1 %v1347_v28 }
  0x21   : > { %v1479_v55 = vsel %vm1445_vm5, %v323_v53, 0  ;;  %v1483_v56 = vsel %vm1445_vm5, %v321_v54, 0  ;;  %v322_v57 = vsel %vm1440_vm3, 0, %v297_v52  ;;  %v324_v13 = vsel %vm1440_vm3, 0, %v311_v10  ;;  %815 = vmatpush.bf16.msra.mxu2 %v1355_v33  ;;  %941 = vmatpush.bf16.msra.mxu3 %v1364_v34  ;;  %v1360_v52 = vld [vmem:[%s1740_s1 + $0xc8] sm:$0xff]  ;;  %v1359_v53 = vld [vmem:[%s1740_s1 + $0xc0] sm:$0xff] }
  0x22   : > { %377 = vrot.lane.b32.xlu0 %v1479_v55, %s1397_s29  ;;  %373 = vrot.lane.b32.xlu1 %v1483_v56, %s1397_s29  ;;  %v1493_v59 = vsel %vm1445_vm5, %v322_v57, 0  ;;  %v341_v60 = vshrl.u32 %v1483_v56, 16  ;;  %v343_v61 = vshll.u32 %v1483_v56, 16  ;;  %v355_v1 = vshrl.u32 %v1479_v55, 16 }
  0x23   : > { %v348_v63 = vshrl.u32 %v1493_v59, 16  ;;  %v350_v0 = vshll.u32 %v1493_v59, 16  ;;  %375 = vrot.lane.b32.xlu2 %v1493_v59, %s1397_s29  ;;  %v357_v4 = vshll.u32 %v1479_v55, 16  ;;  %v1510_v14 = vsel %vm1445_vm5, %v324_v13, 0 }
  0x24   : > { %v345_v6 = vrot.slane %v343_v61, 1  ;;  %v384_v15 = vshll.u32 %v1510_v14, 16  ;;  %v382_v16 = vshrl.u32 %v1510_v14, 16  ;;  %653 = vmatpush.bf16.msra.mxu1 %v1346_v32  ;;  %vm1019_vm3 = vcmask 519168  }
  0x25   : > { %v352_v7 = vrot.slane %v350_v0, 1  ;;  %v359_v8 = vrot.slane %v357_v4, 1  ;;  %816 = vmatpush.bf16.msra.mxu2 %v1354_v38  ;;  %942 = vmatpush.bf16.msra.mxu3 %v1363_v40 }
  0x26   : > { %v346_v9 = vor.u32 %v345_v6, %v341_v60  ;;  %v386_v18 = vrot.slane %v384_v15, 1 }
  0x27   : > { %v353_v11 = vor.u32 %v352_v7, %v348_v63  ;;  %v360_v12 = vor.u32 %v359_v8, %v355_v1 }
  0x28   : > { %v387_v19 = vor.u32 %v386_v18, %v382_v16  ;;  %654 = vmatpush.bf16.msra.mxu1 %v1345_v37 }
  0x29   : > { %817 = vmatpush.bf16.msra.mxu2 %v1353_v43  ;;  %943 = vmatpush.bf16.msra.mxu3 %v1362_v44 }
  0x2a   : > { %365 = vrot.lane.b32.xlu1 %v353_v11, %s1396_s28  ;;  %363 = vrot.lane.b32.xlu0 %v346_v9, %s1396_s28 }
  0x2b   : > { %367 = vrot.lane.b32.xlu2 %v360_v12, %s1396_s28 }
  0x2c   : > { %655 = vmatpush.bf16.msra.mxu1 %v1344_v42 }
  0x2d   : > { %818 = vmatpush.bf16.msra.mxu2 %v1352_v47  ;;  %944 = vmatpush.bf16.msra.mxu3 %v1361_v48 }
  0x30   : > { %656 = vmatpush.bf16.msra.mxu1 %v1343_v46 }
  0x31   : > { %819 = vmatpush.bf16.msra.mxu2 %v1351_v51  ;;  %945 = vmatpush.bf16.msra.mxu3 %v1360_v52 }
  0x32   : > { %388 = vrot.lane.b32.xlu1 %v346_v9, %s1398_s30  ;;  %379 = vrot.lane.b32.xlu0 %v1510_v14, %s1397_s29 }
  0x33   : > { %390 = vrot.lane.b32.xlu2 %v353_v11, %s1398_s30 }
  0x35   : > { %946 = vmatpush.bf16.msra.mxu3 %v1359_v53 }
  0x3a   : > { %392 = vrot.lane.b32.xlu1 %v360_v12, %s1398_s30  ;;  %723 = vrot.lane.b32.xlu0 %v387_v19, %s1396_s28 }
  0x3b   : > { %394 = vrot.lane.b32.xlu2 %v387_v19, %s1398_s30 }
  0x42   : > { %726 = vrot.lane.b32.xlu1 %v1455_v5, %s1397_s29 }
  0x43   : > { %728 = vrot.lane.b32.xlu2 %v1469_v17, %s1398_s30  ;;  %v1340_v17 = vld [vmem:[%s1740_s1 + $0x28] sm:$0xff] }
  0x44   : > { %505 = vmatpush.bf16.msra.mxu0 %v1340_v17 }
  0x48   : > { %506 = vmatpush.bf16.msra.mxu0 %v1339_v23 }
  0x4c   : > { %507 = vmatpush.bf16.msra.mxu0 %v1338_v27 }
  0x50   : > { %508 = vmatpush.bf16.msra.mxu0 %v1337_v31 }
  0x54   : > { %509 = vmatpush.bf16.msra.mxu0 %v1336_v36 }
  0x58   : > { %510 = vmatpush.bf16.msra.mxu0 %v1335_v41 }
  0x7d   : > { %v376_v35 = vpop.permute.xlu2 %375 }
  0x85   : > { %v368_v45 = vpop.permute.xlu2 %367 }
  0x86   : > { %v404_v1 = vsel %vm396_vm10, %v1479_v55, %v368_v45 }
  0x88   : > { %v362_v39 = vpop.permute.xlu0 %361 }
  0x89   : > { %v398_v62 = vsel %vm396_vm10, %v1455_v5, %v362_v39 }
  0x8d   : > { %v391_v54 = vpop.permute.xlu2 %390 }
  0x94   : > { %v378_v49 = vpop.permute.xlu0 %377  ;;  %v374_v50 = vpop.permute.xlu1 %373 }
  0x95   : > { %v407_v0 = vsel %vm405_vm11, %v398_v62, %v374_v50  ;;  %v395_v8 = vpop.permute.xlu2 %394 }
  0x9c   : > { %v366_v57 = vpop.permute.xlu1 %365  ;;  %v364_v58 = vpop.permute.xlu0 %363 }
  0x9d   : > { %v400_v60 = vsel %vm396_vm10, %v1483_v56, %v364_v58  ;;  %v402_v5 = vsel %vm396_vm10, %v1493_v59, %v366_v57  ;;  %v729_v40 = vpop.permute.xlu2 %728 }
  0x9e   : > { %v409_v61 = vsel %vm405_vm11, %v400_v60, %v376_v35  ;;  %v411_v19 = vsel %vm405_vm11, %v402_v5, %v378_v49 }
  0x9f   : > { %v418_v63 = vsel %vm414_vm12, %v409_v61, %v391_v54 }
  0xa0   : > { %v555_v9 = vshrl.u32 %v418_v63, 16  ;;  %v558_v10 = vshll.u32 %v418_v63, 16  ;;  %v424_v21 = vrot.slane %v418_v63, 6 }
  0xa2   : > { %v557_v13 = vrot.slane %v555_v9, 6  ;;  %v560_v15 = vrot.slane %v558_v10, 7  ;;  %v851_v39 = vrot.slane %v558_v10, 1 }
  0xa4   : > { %v389_v4 = vpop.permute.xlu1 %388  ;;  %v380_v6 = vpop.permute.xlu0 %379  ;;  %v561_v25 = vor.u32 %v560_v15, %v557_v13  ;;  %v852_v52 = vor.u32 %v851_v39, %v555_v9 }
  0xa5   : > { %v416_v7 = vsel %vm414_vm12, %v407_v0, %v389_v4  ;;  %v413_v56 = vsel %vm405_vm11, %v404_v1, %v380_v6 }
  0xa6   : > { %v551_v11 = vshll.u32 %v416_v7, 16  ;;  %v422_v12 = vsel %vm414_vm12, %v413_v56, %v395_v8  ;;  %v549_v3 = vshrl.u32 %v416_v7, 16  ;;  %v431_v28 = vsel %vm429_vm13, %v416_v7, %v424_v21 }
  0xa7   : > { %v569_v18 = vshrl.u32 %v422_v12, 16  ;;  %v572_v55 = vshll.u32 %v422_v12, 16  ;;  %v428_v31 = vrot.slane %v422_v12, 2  ;;  %v737_v49 = vrot.slane %v422_v12, 4 }
  0xa8   : > { %v553_v16 = vrot.slane %v551_v11, 1  ;;  %v1399_v8 = vmov 16.0  }
  0xa9   : > { %v571_v26 = vrot.slane %v569_v18, 2  ;;  %v574_v27 = vrot.slane %v572_v55, 3  ;;  %v856_v50 = vrot.slane %v569_v18, 4  ;;  %1383 = vrcp.f32 %v1399_v8 }
  0xaa   : > { %v554_v24 = vor.u32 %v553_v16, %v549_v3 }
  0xab   : > { %v575_v41 = vor.u32 %v574_v27, %v571_v26 }
  0xac   : > { %v393_v2 = vpop.permute.xlu1 %392  ;;  %v724_v59 = vpop.permute.xlu0 %723  ;;  %v578_v42 = vsel %vm429_vm13, %v554_v24, %v561_v25 }
  0xad   : > { %v420_v20 = vsel %vm414_vm12, %v411_v19, %v393_v2  ;;  %v731_v37 = vsel %vm396_vm10, %v1510_v14, %v724_v59  ;;  %v857_v14 = vrot.slane %v572_v55, 5 }
  0xae   : > { %v426_v17 = vrot.slane %v420_v20, 4  ;;  %v562_v22 = vshrl.u32 %v420_v20, 16  ;;  %v565_v23 = vshll.u32 %v420_v20, 16  ;;  %v736_v32 = vrot.slane %v420_v20, 6 }
  0xaf   : > { %v1384_v19 = vpop.eup %1383 }
  0xb0   : > { %v564_v29 = vrot.slane %v562_v22, 4  ;;  %v567_v30 = vrot.slane %v565_v23, 5  ;;  %v853_v33 = vrot.slane %v562_v22, 6  ;;  %v854_v34 = vrot.slane %v565_v23, 7 }
  0xb1   : > { %v434_v35 = vsel %vm432_vm14, %v431_v28, %v426_v17  ;;  %v741_v47 = vsel %vm429_vm13, %v418_v63, %v736_v32  ;;  %v858_v63 = vor.u32 %v857_v14, %v856_v50  ;;  %v527_v26 = vmul.f32 16.0, %v1384_v19 }
  0xb2   : > { %v437_v36 = vsel %vm435_vm15, %v434_v35, %v428_v31  ;;  %v568_v38 = vor.u32 %v567_v30, %v564_v29  ;;  %v855_v48 = vor.u32 %v854_v34, %v853_v33  ;;  %v743_v58 = vsel %vm432_vm14, %v741_v47, %v737_v49 }
  0xb3   : > { %511 = vmatmul.bf16.vlgmr.msra.gmra.mxu0 %v437_v36  ;;  %v528_v32 = vsub.f32 1.0, %v527_v26  ;;  %vm531_vm1 = vweird.f32 %v1384_v19 }
  0xb4   : > { %v727_v43 = vpop.permute.xlu1 %726  ;;  %v580_v44 = vsel %vm432_vm14, %v578_v42, %v568_v38  ;;  %v868_v0 = vsel %vm429_vm13, %v852_v52, %v855_v48 }
  0xb5   : > { %v733_v45 = vsel %vm405_vm11, %v731_v37, %v727_v43  ;;  %v582_v46 = vsel %vm435_vm15, %v580_v44, %v575_v41  ;;  %v870_v4 = vsel %vm432_vm14, %v868_v0, %v858_v63  ;;  %v529_v41 = vmul.f32 %v1384_v19, %v528_v32 }
  0xb6   : > { %v735_v51 = vsel %vm414_vm12, %v733_v45, %v729_v40  ;;  %657 = vmatmul.bf16.vlgmr.msra.gmra.mxu1 %v582_v46 }
  0xb7   : > { %v739_v53 = vrot.slane %v735_v51, 2  ;;  %v859_v54 = vshrl.u32 %v735_v51, 16  ;;  %v862_v57 = vshll.u32 %v735_v51, 16  ;;  %v530_v52 = vadd.f32 %v1384_v19, %v529_v41 }
  0xb9   : > { %v861_v60 = vrot.slane %v859_v54, 2  ;;  %v864_v61 = vrot.slane %v862_v57, 3  ;;  %v745_v62 = vsel %vm435_vm15, %v743_v58, %v739_v53 }
  0xba   : > { %820 = vmatmul.bf16.vlgmr.msra.gmra.mxu2 %v745_v62 }
  0xbb   : > { %v865_v1 = vor.u32 %v864_v61, %v861_v60 }
  0xbd   : > { %v872_v6 = vsel %vm435_vm15, %v870_v4, %v865_v1  ;;  %v532_v1 = vsel %vm531_vm1, %v1384_v19, %v530_v52 }
  0xbe   : > { %947 = vmatmul.bf16.vlgmr.msra.gmra.mxu3 %v872_v6 }
 0x130   : > { %v1648_v7 = vpop.f32.mrf.mxu0 }
 0x131   : > { %v547_v9 = vpack.c.bf16 %v1648_v7, %v1648_v7  ;;  %v517_v11 = vsel %vm405_vm11, %v1648_v7, 0.0 }
 0x133   : > { %v1650_v56 = vpop.f32.mrf.mxu1  ;;  %v1664_v16 = vunpack.c.l.b16 %v547_v9 }
 0x134   : > { %v686_v13 = vpack.c.bf16 %v1650_v56, %v1650_v56  ;;  %v663_v2 = vsel %vm405_vm11, %v1650_v56, 0.0 }
 0x136   : > { %v695_v24 = vunpack.c.l.b16 %v686_v13 }
 0x138   : > { %v1654_v10 = vpop.f32.mrf.mxu0 }
 0x139   : > { %v518_v12 = vsel %vm405_vm11, %v1654_v10, 0.0  ;;  %v548_v5 = vpack.c.bf16 %v1654_v10, %v1654_v10 }
 0x13a   : > { %v519_v15 = vadd.f32 %v518_v12, %v517_v11  ;;  %v1400_v12 = vmov 4.0  }
 0x13b   : > { %v1666_v18 = vunpack.c.l.b16 %v548_v5  ;;  %v1668_v55 = vpop.f32.mrf.mxu1  ;;  %1385 = vrcp.f32 %v1400_v12 }
 0x13c   : > { %v520_v3 = vrot.slane %v519_v15, 4  ;;  %v664_v20 = vsel %vm405_vm11, %v1668_v55, 0.0  ;;  %v687_v21 = vpack.c.bf16 %v1668_v55, %v1668_v55 }
 0x13d   : > { %v692_v17 = vpack.c.b16 %v1666_v18, %v1664_v16  ;;  %v665_v22 = vadd.f32 %v664_v20, %v663_v2  ;;  %v1678_v23 = vpop.f32.mrf.mxu2 }
 0x13e   : > { %v521_v59 = vadd.f32 %v520_v3, %v519_v15  ;;  %v696_v25 = vunpack.c.l.b16 %v687_v21  ;;  %v849_v34 = vpack.c.bf16 %v1678_v23, %v1678_v23  ;;  %v826_v38 = vsel %vm405_vm11, %v1678_v23, 0.0 }
 0x13f   : > { %v666_v27 = vrot.slane %v665_v22, 4 }
 0x140   : > { %v697_v28 = vpack.c.b16 %v696_v25, %v695_v24  ;;  %v522_v31 = vrot.slane %v521_v59, 2  ;;  %v1688_v43 = vunpack.c.l.b16 %v849_v34 }
 0x141   : > { %v667_v29 = vadd.f32 %v666_v27, %v665_v22  ;;  %v1680_v30 = vpop.f32.mrf.mxu3  ;;  %v1386_v24 = vpop.eup %1385 }
 0x142   : > { %698 = vrot.lane.b32.xlu0 %v697_v28, %s1397_s29  ;;  %v523_v37 = vadd.f32 %v522_v31, %v521_v59  ;;  %v953_v46 = vsel %vm405_vm11, %v1680_v30, 0.0  ;;  %v976_v50 = vpack.c.bf16 %v1680_v30, %v1680_v30 }
 0x143   : > { %v668_v33 = vrot.slane %v667_v29, 2 }
 0x144   : > { %v524_v49 = vrot.slane %v523_v37, 1  ;;  %v985_v62 = vunpack.c.l.b16 %v976_v50 }
 0x145   : > { %v669_v35 = vadd.f32 %v668_v33, %v667_v29  ;;  %v823_v36 = vpop.f32.mrf.mxu2  ;;  %v1028_v33 = vmul.f32 4.0, %v1386_v24 }
 0x146   : > { %v827_v39 = vsel %vm405_vm11, %v823_v36, 0.0  ;;  %v850_v40 = vpack.c.bf16 %v823_v36, %v823_v36  ;;  %v525_v61 = vadd.f32 %v524_v49, %v523_v37 }
 0x147   : > { %v828_v42 = vadd.f32 %v827_v39, %v826_v38  ;;  %v670_v45 = vrot.slane %v669_v35, 1 }
 0x148   : > { %v1690_v44 = vunpack.c.l.b16 %v850_v40  ;;  %v533_v5 = vmul.f32 %v532_v1, %v525_v61 }
 0x149   : > { %v829_v47 = vrot.slane %v828_v42, 4  ;;  %v950_v48 = vpop.f32.mrf.mxu3  ;;  %v671_v58 = vadd.f32 %v670_v45, %v669_v35 }
 0x14a   : > { %v982_v14 = vpack.c.b16 %v1690_v44, %v1688_v43  ;;  %v954_v51 = vsel %vm405_vm11, %v950_v48, 0.0  ;;  %v977_v57 = vpack.c.bf16 %v950_v48, %v950_v48  ;;  %v534_v19 = vsub.f32 %v1648_v7, %v533_v5 }
 0x14b   : > { %v830_v53 = vadd.f32 %v829_v47, %v828_v42  ;;  %v955_v54 = vadd.f32 %v954_v51, %v953_v46  ;;  %v672_v9 = vmul.f32 %v671_v58, %v532_v1  ;;  %v535_v59 = vsub.f32 %v1654_v10, %v533_v5 }
 0x14c   : > { %v986_v63 = vunpack.c.l.b16 %v977_v57  ;;  %v536_v31 = vmul.f32 %v534_v19, %v534_v19  ;;  %v1029_v42 = vsub.f32 1.0, %v1028_v33 }
 0x14d   : > { %v831_v60 = vrot.slane %v830_v53, 2  ;;  %v956_v0 = vrot.slane %v955_v54, 4  ;;  %v673_v3 = vsub.f32 %v1650_v56, %v672_v9  ;;  %v674_v20 = vsub.f32 %v1668_v55, %v672_v9 }
 0x14e   : > { %v987_v8 = vpack.c.b16 %v986_v63, %v985_v62  ;;  %v537_v34 = vmul.f32 %v535_v59, %v535_v59  ;;  %v1015_v56 = vsel %vm317_vm0, %v533_v5, %v672_v9  ;;  %v538_v39 = vsel %vm405_vm11, %v536_v31, 0.0 }
 0x14f   : > { %v832_v4 = vadd.f32 %v831_v60, %v830_v53  ;;  %v957_v6 = vadd.f32 %v956_v0, %v955_v54  ;;  %v675_v28 = vmul.f32 %v673_v3, %v673_v3  ;;  %v676_v29 = vmul.f32 %v674_v20, %v674_v20 }
 0x150   : > { %988 = vrot.lane.b32.xlu1 %v987_v8, %s1397_s29  ;;  %v539_v45 = vsel %vm405_vm11, %v537_v34, 0.0  ;;  %v1030_v54 = vmul.f32 %v1386_v24, %v1029_v42  ;;  %s1147_s29 = sshll.u32 %s1750_s19, 1 }
 0x151   : > { %v833_v11 = vrot.slane %v832_v4, 1  ;;  %v958_v13 = vrot.slane %v957_v6, 2  ;;  %v677_v10 = vsel %vm405_vm11, %v675_v28, 0.0  ;;  %v540_v52 = vadd.f32 %v539_v45, %v538_v39  ;;  %s235_s6 = scalar_lea.vmem %s1744_s5, %s1147_s29 }
 0x152   : > { %v1031_v63 = vadd.f32 %v1386_v24, %v1030_v54 }
 0x153   : > { %v834_v15 = vadd.f32 %v833_v11, %v832_v4  ;;  %v959_v2 = vadd.f32 %v958_v13, %v957_v6  ;;  %v541_v62 = vrot.slane %v540_v52, 4 }
 0x155   : > { %v835_v21 = vmul.f32 %v834_v15, %v532_v1  ;;  %v960_v22 = vrot.slane %v959_v2, 1  ;;  %v542_v9 = vadd.f32 %v541_v62, %v540_v52 }
 0x157   : > { %v836_v25 = vsub.f32 %v1678_v23, %v835_v21  ;;  %v837_v26 = vsub.f32 %v823_v36, %v835_v21  ;;  %v961_v27 = vadd.f32 %v960_v22, %v959_v2  ;;  %v1016_v7 = vsel %vm429_vm13, %v1015_v56, %v835_v21 }
 0x158   : > { %v678_v23 = vsel %vm405_vm11, %v676_v29, 0.0  ;;  %v543_v3 = vrot.slane %v542_v9, 2 }
 0x159   : > { %v962_v32 = vmul.f32 %v961_v27, %v532_v1  ;;  %v838_v55 = vmul.f32 %v836_v25, %v836_v25  ;;  %v839_v35 = vmul.f32 %v837_v26, %v837_v26 }
 0x15a   : > { %v544_v25 = vadd.f32 %v543_v3, %v542_v9 }
 0x15b   : > { %v963_v37 = vsub.f32 %v1680_v30, %v962_v32  ;;  %v964_v38 = vsub.f32 %v950_v48, %v962_v32  ;;  %v1018_v36 = vsel %vm325_vm2, %v1016_v7, %v962_v32  ;;  %v840_v46 = vsel %vm405_vm11, %v838_v55, 0.0 }
 0x15c   : > { %v841_v47 = vsel %vm405_vm11, %v839_v35, 0.0  ;;  %v1020_v30 = vsel %vm1019_vm3, %v1018_v36, 0.0  ;;  %v679_v48 = vadd.f32 %v678_v23, %v677_v10  ;;  %vm1032_vm2 = vweird.f32 %v1386_v24 }
 0x15d   : > { %v965_v40 = vmul.f32 %v963_v37, %v963_v37  ;;  %v966_v41 = vmul.f32 %v964_v38, %v964_v38  ;;  %v1021_v51 = vrot.slane %v1020_v30, 4  ;;  %v842_v53 = vadd.f32 %v841_v47, %v840_v46 }
 0x15e   : > { %v680_v58 = vrot.slane %v679_v48, 4  ;;  %v1033_v12 = vsel %vm1032_vm2, %v1386_v24, %v1031_v63  ;;  %v545_v32 = vrot.slane %v544_v25, 1 }
 0x15f   : > { %v967_v49 = vsel %vm405_vm11, %v965_v40, 0.0  ;;  %v968_v50 = vsel %vm405_vm11, %v966_v41, 0.0  ;;  %v1022_v57 = vadd.f32 %v1021_v51, %v1020_v30  ;;  %v843_v0 = vrot.slane %v842_v53, 4 }
 0x160   : > { %v969_v60 = vadd.f32 %v968_v50, %v967_v49  ;;  %v681_v4 = vadd.f32 %v680_v58, %v679_v48  ;;  %v546_v35 = vadd.f32 %v545_v32, %v544_v25 }
 0x161   : > { %v1023_v61 = vrot.slane %v1022_v57, 2  ;;  %v844_v11 = vadd.f32 %v843_v0, %v842_v53 }
 0x162   : > { %v970_v6 = vrot.slane %v969_v60, 4  ;;  %v682_v13 = vrot.slane %v681_v4, 2 }
 0x163   : > { %v1024_v1 = vadd.f32 %v1023_v61, %v1022_v57  ;;  %v845_v20 = vrot.slane %v844_v11, 2 }
 0x164   : > { %v971_v15 = vadd.f32 %v970_v6, %v969_v60  ;;  %v683_v19 = vadd.f32 %v682_v13, %v681_v4 }
 0x165   : > { %v1025_v8 = vrot.slane %v1024_v1, 1  ;;  %v846_v26 = vadd.f32 %v845_v20, %v844_v11 }
 0x166   : > { %v972_v22 = vrot.slane %v971_v15, 2  ;;  %v684_v28 = vrot.slane %v683_v19, 1 }
 0x167   : > { %v1026_v5 = vadd.f32 %v1025_v8, %v1024_v1  ;;  %v847_v24 = vrot.slane %v846_v26, 1 }
 0x168   : > { %v973_v29 = vadd.f32 %v972_v22, %v971_v15  ;;  %v685_v34 = vadd.f32 %v684_v28, %v683_v19 }
 0x169   : > { %v1034_v2 = vmul.f32 %v1033_v12, %v1026_v5  ;;  %v848_v7 = vadd.f32 %v847_v24, %v846_v26 }
 0x16a   : > { %v974_v56 = vrot.slane %v973_v29, 1  ;;  %v1035_v38 = vadd.f32 %v685_v34, %v546_v35 }
 0x16b   : > { %v1038_v21 = vsub.f32 %v1018_v36, %v1034_v2 }
 0x16c   : > { %v975_v10 = vadd.f32 %v974_v56, %v973_v29  ;;  %v1036_v36 = vadd.f32 %v1035_v38, %v848_v7 }
 0x16d   : > { %v1039_v59 = vmul.f32 %v1038_v21, %v1038_v21 }
 0x16e   : > { %v1037_v40 = vadd.f32 %v1036_v36, %v975_v10 }
 0x16f   : > { %v1040_v27 = vsel %vm1019_vm3, %v1039_v59, 0.0 }
 0x170   : > { %v1041_v31 = vrot.slane %v1040_v27, 4 }
 0x172   : > { %v1042_v33 = vadd.f32 %v1041_v31, %v1040_v27 }
 0x174   : > { %v1043_v55 = vrot.slane %v1042_v33, 2 }
 0x176   : > { %v1044_v37 = vadd.f32 %v1043_v55, %v1042_v33 }
 0x178   : > { %v1045_v23 = vrot.slane %v1044_v37, 1 }
 0x17a   : > { %v1046_v39 = vadd.f32 %v1045_v23, %v1044_v37 }
 0x17c   : > { %v1047_v41 = vmul.f32 16.0, %v1046_v39 }
 0x17e   : > { %v1048_v42 = vadd.f32 %v1047_v41, %v1037_v40 }
 0x180   : > { %v1049_v45 = vsel %vm317_vm0, %v1034_v2, %v1048_v42 }
 0x181   : > { %1051 = vst.msk [vmem:[%s235_s6] sm:$0x3] %vm1050_vm4, %v1049_v45 }
 0x1b4   : > { %v699_v46 = vpop.permute.xlu0 %698 }
 0x1b5   : > { %v702_v47 = vsel %vm405_vm11, %v692_v17, %v699_v46 }
 0x1b6   : > { %704 = vst [vmem:[%s231_s10] sm:$0x3] %v702_v47 }
 0x1b7   : > { %705 = vst.sshfl [vmem:[#allocation1] sm:$0xff pattern:$0x73625140] %v702_v47 }
 0x1be   : > { %v707_v30 = vld [vmem:[#allocation1 + $0x1] ss:$4 sm:$0xff] }
 0x1bf   : > { %1228 = vst [vmem:[%s231_s10 + $0x4] sm:$0x3] %v707_v30 }
 0x1c0   : > { %711 = vst.sshfl [vmem:[#allocation1] sm:$0xff pattern:$0x73625140] %v702_v47 }
 0x1c2   : > { %v989_v48 = vpop.permute.xlu1 %988 }
 0x1c3   : > { %v992_v49 = vsel %vm405_vm11, %v982_v14, %v989_v48 }
 0x1c4   : > { %1327 = vst [vmem:[%s231_s10 + $0x2] sm:$0x3] %v992_v49 }
 0x1c7   : > { %v713_v50 = vld [vmem:[#allocation1 + $0x2] ss:$4 sm:$0xff] }
 0x1c8   : > { %1229 = vst [vmem:[%s231_s10 + $0x8] sm:$0x3] %v713_v50 }
 0x1c9   : > { %717 = vst.sshfl [vmem:[#allocation1] sm:$0xff pattern:$0x73625140] %v702_v47 }
 0x1d0   : > { %v719_v51 = vld [vmem:[#allocation1 + $0x3] ss:$4 sm:$0xff] }
 0x1d1   : > { %1230 = vst [vmem:[%s231_s10 + $0xc] sm:$0x3] %v719_v51 }
 0x1d2   : > { %996 = vst.sshfl [vmem:[#allocation1] sm:$0xff pattern:$0x73625140] %v992_v49 }
 0x1d9   : > { %v998_v16 = vld [vmem:[#allocation1 + $0x1] ss:$4 sm:$0xff] }
 0x1da   : > { %1328 = vst [vmem:[%s231_s10 + $0x6] sm:$0x3] %v998_v16 }
 0x1db   : > { %1002 = vst.sshfl [vmem:[#allocation1] sm:$0xff pattern:$0x73625140] %v992_v49 }
 0x1e2   : > { %v1004_v18 = vld [vmem:[#allocation1 + $0x2] ss:$4 sm:$0xff] }
 0x1e3   : > { %1329 = vst [vmem:[%s231_s10 + $0xa] sm:$0x3] %v1004_v18 }
 0x1e4   : > { %1008 = vst.sshfl [vmem:[#allocation1] sm:$0xff pattern:$0x73625140] %v992_v49 }
 0x1eb   : > { %v1010_v17 = vld [vmem:[#allocation1 + $0x3] ss:$4 sm:$0xff] }
 0x1ec   : > { %1330 = vst [vmem:[%s231_s10 + $0xe] sm:$0x3] %v1010_v17 }
 0x1ed PF: > { %s16_s18 = sadd.s32 1, %s1393_s18  }
 0x1ee   : > { %p13_p4 = scmp.ge.s32.totalorder %s16_s18, 4  }
 0x1f0   :  { %15 = sbr.rel (!%p13_p4) target bundleno = 1 (0x1), region = 94 }

// kernel: cnn_decoder_forward.8
= control target key start
LH: loop header
LB: loop body
LE: loop exit
PB: predicated region body
PF: predicated region fallthrough
CT: control target
= control target key end

     0   :  { %s2530_s18 = smov 0   ;;  %s3394_s0 = inlined_call_operand.vmem [shape: bf16[2,8,8,64], index: 0, kind: input, shape index: {}]   ;;  %s3395_s1 = inlined_call_operand.vmem [shape: bf16[4,256,64], index: 1, kind: input, shape index: {}]   ;;  %s3396_s2 = inlined_call_operand.vmem [shape: f32[1,64], index: 2, kind: input, shape index: {}]   ;;  %s3397_s3 = inlined_call_operand.vmem [shape: f32[1,64], index: 3, kind: input, shape index: {}]   ;;  %s3398_s4 = inlined_call_operand.vmem [shape: bf16[2,8,2,8,128], index: 4, kind: output, shape index: {0}]   ;;  %s3399_s5 = inlined_call_operand.vmem [shape: f32[2,2,64], index: 5, kind: output, shape index: {1}]  }
   0x1 LB: > { %s2006_s19 = sadd.s32 4294967295, %s2494_s18   ;;  %p2010_p0 = scmp.ge.s32.totalorder %s2494_s18, 1  ;;  %s2494_s18 = sphi %s2530_s18, %s16_s18  }
   0x2   : > { %p190_p1 = scmp.lt.s32.totalorder %s2494_s18, 3 }
   0x4   : > { %p191_p2 = pnand %p2010_p0, %p190_p1 }
   0x5   : > { %p222_p3 = scmp.lt.s32.totalorder (!%p191_p2), %s2006_s19, 1  ;;  %s2497_s28 = smov (!%p191_p2), 64  }
   0x6   : > { %194 = sbr.rel (%p191_p2) target bundleno = 547 (0x223), region = 36 }
   0xb   : > { %vm381_vm0 = vcmask 1040384   ;;  %vm382_vm1 = vsmask.f32 256  ;;  %vm393_vm2 = vcmask 1044480   ;;  %v2496_v0 = vmov 0   ;;  %s3405_s19 = smov (!%p222_p3, %s2006_s19), 1 }
   0xc   : > { %v312_v1 = vrot.slane %v2496_v0, 7  ;;  %vm2539_vm3 = vmand %vm381_vm0, %vm382_vm1  ;;  %vm394_vm4 = vsmask.f32 4352  ;;  %s2385_s20 = sshll.u32 %s3405_s19, 5  ;;  %v2564_v8 = vld [vmem:[%s3396_s2] ss:$0 sm:$0xff] }
   0xd   : > { %vm2543_vm5 = vmand %vm393_vm2, %vm394_vm4  ;;  %s226_s23 = scalar_lea.vmem %s3394_s0, %s2385_s20  ;;  %v2571_v14 = vld [vmem:[%s3397_s3] ss:$0 sm:$0xff]  ;;  %v2393_v2 = vld [vmem:[%s3395_s1 + $0x30] sm:$0xff]  ;;  %vm486_vm14 = vcmask 523264   ;;  %vm521_vm15 = vcmask 1043456   ;;  %s2386_s24 = sshll.u32 %s3405_s19, 6 }
   0xe   : > { %v384_v4 = vsel %vm2539_vm3, 0, %v312_v1  ;;  %v2467_v10 = vld [vmem:[%s226_s23 + $0x8] sm:$0xff]   ;;  %v2452_v11 = vld [vmem:[%s226_s23] sm:$0xff]   ;;  %v2566_v12 = vld [vmem:[%s226_s23 + $0x10] sm:$0xff]   ;;  %s3293_s26 = scalar_lea.vmem %s3398_s4, %s2386_s24  ;;  %vm1883_vm2 = vcmask 1041408   ;;  %vm1887_vm4 = vcmask 519168  }
   0xf   : > { %v2553_v5 = vsel %vm2543_vm5, %v384_v4, 0  ;;  %v2458_v13 = vunpack.c.h.bf16 %v2467_v10  ;;  %v2457_v15 = vunpack.c.l.bf16 %v2467_v10  ;;  %v2454_v16 = vunpack.c.h.bf16 %v2452_v11  ;;  %v2469_v18 = vld [vmem:[%s226_s23 + $0x18] sm:$0xff]   ;;  %v2401_v3 = vld [vmem:[%s3395_s1 + $0x70] sm:$0xff]  ;;  %s2015_s27 = sshll.u32 %s3405_s19, 1 }
  0x10   : > { %v406_v6 = vshrl.u32 %v2553_v5, 16  ;;  %v408_v7 = vshll.u32 %v2553_v5, 16  ;;  %v2453_v17 = vunpack.c.l.bf16 %v2452_v11  ;;  %v2461_v20 = vunpack.c.l.bf16 %v2566_v12  ;;  %s235_s6 = scalar_lea.vmem %s3399_s5, %s2015_s27 }
  0x11   : > { %v2466_v21 = vunpack.c.h.bf16 %v2469_v18  ;;  %v2465_v22 = vunpack.c.l.bf16 %v2469_v18  ;;  %v260_v23 = vmul.f32 %v2564_v8, %v2458_v13  ;;  %v258_v24 = vmul.f32 %v2564_v8, %v2454_v16 }
  0x12   : > { %v410_v9 = vrot.slane %v408_v7, 1  ;;  %v257_v25 = vmul.f32 %v2564_v8, %v2453_v17  ;;  %v259_v26 = vmul.f32 %v2564_v8, %v2457_v15  ;;  %v261_v27 = vmul.f32 %v2564_v8, %v2461_v20 }
  0x13   : > { %v264_v28 = vmul.f32 %v2564_v8, %v2466_v21  ;;  %v263_v29 = vmul.f32 %v2564_v8, %v2465_v22  ;;  %v272_v30 = vadd.f32 %v2571_v14, %v260_v23  ;;  %v270_v31 = vadd.f32 %v2571_v14, %v258_v24 }
  0x14   : > { %v411_v19 = vor.u32 %v410_v9, %v406_v6  ;;  %v269_v32 = vadd.f32 %v2571_v14, %v257_v25  ;;  %v271_v33 = vadd.f32 %v2571_v14, %v259_v26  ;;  %v273_v34 = vadd.f32 %v2571_v14, %v261_v27  ;;  %v2394_v6 = vld [vmem:[%s3395_s1 + $0x38] sm:$0xff] }
  0x15   : > { %v276_v35 = vadd.f32 %v2571_v14, %v264_v28  ;;  %v2589_v36 = vadd.f32 %v2571_v14, %v263_v29  ;;  %v2462_v37 = vunpack.c.h.bf16 %v2566_v12  ;;  %vm280_vm6 = vcmp.ge.f32.partialorder %v272_v30, 0.0  ;;  %v2402_v12 = vld [vmem:[%s3395_s1 + $0x78] sm:$0xff]  ;;  %674 = vmatpush.bf16.msra.mxu0 %v2394_v6 }
  0x16   : > { %461 = vrot.lane.b32.xlu0 %v411_v19, %s2497_s28  ;;  %v288_v38 = vmul.f32 0.05, %v272_v30  ;;  %vm278_vm7 = vcmp.ge.f32.partialorder %v270_v31, 0.0  ;;  %v286_v39 = vmul.f32 0.05, %v270_v31  ;;  %vm277_vm8 = vcmp.ge.f32.partialorder %v269_v32, 0.0  ;;  %703 = vmatpush.bf16.msra.mxu1 %v2402_v12 }
  0x17   : > { %v285_v40 = vmul.f32 0.05, %v269_v32  ;;  %vm281_vm9 = vcmp.ge.f32.partialorder %v273_v34, 0.0  ;;  %v289_v41 = vmul.f32 0.05, %v273_v34  ;;  %vm279_vm10 = vcmp.ge.f32.partialorder %v271_v33, 0.0 }
  0x18   : > { %v296_v42 = vsel %vm280_vm6, %v272_v30, %v288_v38  ;;  %v294_v43 = vsel %vm278_vm7, %v270_v31, %v286_v39  ;;  %v287_v44 = vmul.f32 0.05, %v271_v33  ;;  %vm284_vm11 = vcmp.ge.f32.partialorder %v276_v35, 0.0 }
  0x19   : > { %v304_v45 = vpack.c.bf16 %v296_v42, %v296_v42  ;;  %v302_v46 = vpack.c.bf16 %v294_v43, %v294_v43  ;;  %v293_v47 = vsel %vm277_vm8, %v269_v32, %v285_v40  ;;  %v297_v48 = vsel %vm281_vm9, %v273_v34, %v289_v41  ;;  %675 = vmatpush.bf16.msra.mxu0 %v2393_v2 }
  0x1a   : > { %v301_v49 = vpack.c.bf16 %v293_v47, %v293_v47  ;;  %v305_v50 = vpack.c.bf16 %v297_v48, %v297_v48  ;;  %v295_v51 = vsel %vm279_vm10, %v271_v33, %v287_v44  ;;  %v292_v63 = vmul.f32 0.05, %v276_v35  ;;  %704 = vmatpush.bf16.msra.mxu1 %v2401_v3 }
  0x1b   : > { %v338_v52 = vshrl.u32 %v304_v45, 16  ;;  %v341_v53 = vshll.u32 %v304_v45, 16  ;;  %v324_v54 = vshrl.u32 %v302_v46, 16  ;;  %v327_v55 = vshll.u32 %v302_v46, 16 }
  0x1c   : > { %v317_v56 = vshrl.u32 %v301_v49, 16  ;;  %v320_v57 = vshll.u32 %v301_v49, 16  ;;  %v345_v58 = vshrl.u32 %v305_v50, 16  ;;  %v348_v59 = vshll.u32 %v305_v50, 16 }
  0x1d   : > { %v340_v60 = vrot.slane %v338_v52, 7  ;;  %v326_v61 = vrot.slane %v324_v54, 7  ;;  %v303_v62 = vpack.c.bf16 %v295_v51, %v295_v51  ;;  %vm283_vm12 = vcmp.ge.f32.partialorder %v2589_v36, 0.0 }
  0x1e   : > { %v319_v0 = vrot.slane %v317_v56, 7  ;;  %v347_v1 = vrot.slane %v345_v58, 7  ;;  %v262_v4 = vmul.f32 %v2564_v8, %v2462_v37  ;;  %v291_v11 = vmul.f32 0.05, %v2589_v36 }
  0x1f   : > { %v343_v7 = vor.u32 %v341_v53, %v340_v60  ;;  %v329_v9 = vor.u32 %v327_v55, %v326_v61  ;;  %v331_v10 = vshrl.u32 %v303_v62, 16  ;;  %v334_v16 = vshll.u32 %v303_v62, 16 }
  0x20   : > { %v322_v13 = vor.u32 %v320_v57, %v319_v0  ;;  %v350_v15 = vor.u32 %v348_v59, %v347_v1  ;;  %v300_v17 = vsel %vm284_vm11, %v276_v35, %v292_v63  ;;  %v299_v41 = vsel %vm283_vm12, %v2589_v36, %v291_v11 }
  0x21   : > { %v388_v8 = vsel %vm2539_vm3, 0, %v343_v7  ;;  %v386_v18 = vsel %vm2539_vm3, 0, %v329_v9  ;;  %v333_v19 = vrot.slane %v331_v10, 7  ;;  %v308_v20 = vpack.c.bf16 %v300_v17, %v300_v17 }
  0x22   : > { %v2608_v21 = vsel %vm2543_vm5, %v388_v8, 0  ;;  %v2612_v22 = vsel %vm2543_vm5, %v386_v18, 0  ;;  %v385_v23 = vsel %vm2539_vm3, 0, %v322_v13  ;;  %v389_v24 = vsel %vm2539_vm3, 0, %v350_v15 }
  0x23   : > { %v434_v25 = vshrl.u32 %v2608_v21, 16  ;;  %v436_v26 = vshll.u32 %v2608_v21, 16  ;;  %v420_v27 = vshrl.u32 %v2612_v22, 16  ;;  %v422_v28 = vshll.u32 %v2612_v22, 16 }
  0x24   : > { %v2624_v29 = vsel %vm2543_vm5, %v385_v23, 0  ;;  %v2628_v30 = vsel %vm2543_vm5, %v389_v24, 0  ;;  %v336_v31 = vor.u32 %v334_v16, %v333_v19  ;;  %v366_v32 = vshrl.u32 %v308_v20, 16 }
  0x25   : > { %v438_v33 = vrot.slane %v436_v26, 1  ;;  %v424_v34 = vrot.slane %v422_v28, 1  ;;  %v413_v35 = vshrl.u32 %v2624_v29, 16  ;;  %v415_v37 = vshll.u32 %v2624_v29, 16  ;;  %v2418_v28 = vld [vmem:[%s3395_s1 + $0xf8] sm:$0xff] }
  0x26   : > { %v443_v38 = vshll.u32 %v2628_v30, 16  ;;  %v387_v39 = vsel %vm2539_vm3, 0, %v336_v31  ;;  %v368_v40 = vrot.slane %v366_v32, 7  ;;  %v441_v46 = vshrl.u32 %v2628_v30, 16  ;;  %v2392_v31 = vld [vmem:[%s3395_s1 + $0x28] sm:$0xff]  ;;  %1072 = vmatpush.bf16.msra.mxu3 %v2418_v28 }
  0x27   : > { %v439_v42 = vor.u32 %v438_v33, %v434_v25  ;;  %v425_v43 = vor.u32 %v424_v34, %v420_v27  ;;  %v417_v44 = vrot.slane %v415_v37, 1  ;;  %v2640_v45 = vsel %vm2543_vm5, %v387_v39, 0  ;;  %v2410_v27 = vld [vmem:[%s3395_s1 + $0xb8] sm:$0xff]  ;;  %v2400_v32 = vld [vmem:[%s3395_s1 + $0x68] sm:$0xff]  ;;  %v2409_v33 = vld [vmem:[%s3395_s1 + $0xb0] sm:$0xff]  ;;  %676 = vmatpush.bf16.msra.mxu0 %v2392_v31 }
  0x28   : > { %v445_v47 = vrot.slane %v443_v38, 1  ;;  %v429_v48 = vshll.u32 %v2640_v45, 16  ;;  %v369_v49 = vshll.u32 %v308_v20, 16  ;;  %v427_v36 = vshrl.u32 %v2640_v45, 16  ;;  %1043 = vmatpush.bf16.msra.mxu2 %v2410_v27  ;;  %v2417_v34 = vld [vmem:[%s3395_s1 + $0xf0] sm:$0xff]  ;;  %705 = vmatpush.bf16.msra.mxu1 %v2400_v32  ;;  %v2399_v37 = vld [vmem:[%s3395_s1 + $0x60] sm:$0xff] }
  0x29   : > { %469 = vrot.lane.b32.xlu2 %v439_v42, %s2497_s28  ;;  %465 = vrot.lane.b32.xlu1 %v425_v43, %s2497_s28  ;;  %v418_v50 = vor.u32 %v417_v44, %v413_v35  ;;  %v307_v51 = vpack.c.bf16 %v299_v41, %v299_v41  ;;  %v274_v52 = vadd.f32 %v2571_v14, %v262_v4  ;;  %v2391_v35 = vld [vmem:[%s3395_s1 + $0x20] sm:$0xff]  ;;  %v2408_v38 = vld [vmem:[%s3395_s1 + $0xa8] sm:$0xff]  ;;  %vm1918_vm6 = vcmask 517120  }
  0x2a   : > { %v431_v53 = vrot.slane %v429_v48, 1  ;;  %v371_v54 = vor.u32 %v369_v49, %v368_v40  ;;  %v446_v58 = vor.u32 %v445_v47, %v441_v46  ;;  %1073 = vmatpush.bf16.msra.mxu3 %v2417_v34  ;;  %v2416_v39 = vld [vmem:[%s3395_s1 + $0xe8] sm:$0xff]  ;;  %v2390_v40 = vld [vmem:[%s3395_s1 + $0x18] sm:$0xff]  ;;  %v2407_v42 = vld [vmem:[%s3395_s1 + $0xa0] sm:$0xff] }
  0x2b   : > { %463 = vrot.lane.b32.xlu0 %v418_v50, %s2497_s28  ;;  %v359_v55 = vshrl.u32 %v307_v51, 16  ;;  %v362_v56 = vshll.u32 %v307_v51, 16  ;;  %vm282_vm13 = vcmp.ge.f32.partialorder %v274_v52, 0.0  ;;  %v290_v57 = vmul.f32 0.05, %v274_v52  ;;  %677 = vmatpush.bf16.msra.mxu0 %v2391_v35  ;;  %v2398_v41 = vld [vmem:[%s3395_s1 + $0x58] sm:$0xff] }
  0x2c   : > { %v392_v59 = vsel %vm2539_vm3, 0, %v371_v54  ;;  %v432_v60 = vor.u32 %v431_v53, %v427_v36  ;;  %1044 = vmatpush.bf16.msra.mxu2 %v2409_v33  ;;  %706 = vmatpush.bf16.msra.mxu1 %v2399_v37  ;;  %v2415_v43 = vld [vmem:[%s3395_s1 + $0xe0] sm:$0xff]  ;;  %v2389_v44 = vld [vmem:[%s3395_s1 + $0x10] sm:$0xff]  ;;  %v2406_v47 = vld [vmem:[%s3395_s1 + $0x98] sm:$0xff] }
  0x2d   : > { %v2653_v61 = vsel %vm2543_vm5, %v392_v59, 0  ;;  %v361_v62 = vrot.slane %v359_v55, 7  ;;  %v298_v63 = vsel %vm282_vm13, %v274_v52, %v290_v57  ;;  %v2397_v46 = vld [vmem:[%s3395_s1 + $0x50] sm:$0xff]  ;;  %v2414_v48 = vld [vmem:[%s3395_s1 + $0xd8] sm:$0xff]  ;;  %v2388_v49 = vld [vmem:[%s3395_s1 + $0x8] sm:$0xff] }
  0x2e   : > { %v480_v14 = vshll.u32 %v2653_v61, 16  ;;  %v306_v0 = vpack.c.bf16 %v298_v63, %v298_v63  ;;  %v478_v7 = vshrl.u32 %v2653_v61, 16  ;;  %1074 = vmatpush.bf16.msra.mxu3 %v2416_v39  ;;  %v2396_v50 = vld [vmem:[%s3395_s1 + $0x48] sm:$0xff]  ;;  %v2405_v36 = vld [vmem:[%s3395_s1 + $0x90] sm:$0xff]  ;;  %v2387_v52 = vld [vmem:[%s3395_s1] sm:$0xff] }
  0x2f   : > { %v364_v1 = vor.u32 %v362_v56, %v361_v62  ;;  %678 = vmatpush.bf16.msra.mxu0 %v2390_v40  ;;  %v2413_v51 = vld [vmem:[%s3395_s1 + $0xd0] sm:$0xff]  ;;  %v2395_v53 = vld [vmem:[%s3395_s1 + $0x40] sm:$0xff]  ;;  %v2404_v54 = vld [vmem:[%s3395_s1 + $0x88] sm:$0xff] }
  0x30   : > { %v352_v4 = vshrl.u32 %v306_v0, 16  ;;  %v355_v6 = vshll.u32 %v306_v0, 16  ;;  %v482_v9 = vrot.slane %v480_v14, 1  ;;  %1045 = vmatpush.bf16.msra.mxu2 %v2408_v38  ;;  %707 = vmatpush.bf16.msra.mxu1 %v2398_v41  ;;  %v2412_v55 = vld [vmem:[%s3395_s1 + $0xc8] sm:$0xff]  ;;  %v2403_v56 = vld [vmem:[%s3395_s1 + $0x80] sm:$0xff]  ;;  %v2442_v62 = vld [vmem:[%s3395_s1 + $0x1b8] sm:$0xff] }
  0x31   : > { %471 = vrot.lane.b32.xlu2 %v446_v58, %s2497_s28  ;;  %467 = vrot.lane.b32.xlu1 %v432_v60, %s2497_s28  ;;  %v391_v10 = vsel %vm2539_vm3, 0, %v364_v1  ;;  %v2411_v57 = vld [vmem:[%s3395_s1 + $0xc0] sm:$0xff]  ;;  %v2450_v63 = vld [vmem:[%s3395_s1 + $0x1f8] sm:$0xff] }
  0x32   : > { %v2663_v11 = vsel %vm2543_vm5, %v391_v10, 0  ;;  %v354_v12 = vrot.slane %v352_v4, 7  ;;  %v483_v17 = vor.u32 %v482_v9, %v478_v7  ;;  %1075 = vmatpush.bf16.msra.mxu3 %v2415_v43  ;;  %v2441_v1 = vld [vmem:[%s3395_s1 + $0x1b0] sm:$0xff]  ;;  %v2426_v43 = vld [vmem:[%s3395_s1 + $0x138] sm:$0xff] }
  0x33   : > { %v455_v13 = vshrl.u32 %v2663_v11, 16  ;;  %v457_v15 = vshll.u32 %v2663_v11, 16  ;;  %679 = vmatpush.bf16.msra.mxu0 %v2389_v44  ;;  %v2434_v44 = vld [vmem:[%s3395_s1 + $0x178] sm:$0xff] }
  0x34   : > { %v357_v16 = vor.u32 %v355_v6, %v354_v12  ;;  %1046 = vmatpush.bf16.msra.mxu2 %v2407_v42  ;;  %708 = vmatpush.bf16.msra.mxu1 %v2397_v46 }
  0x35   : > { %v459_v8 = vrot.slane %v457_v15, 1 }
  0x36   : > { %v390_v18 = vsel %vm2539_vm3, 0, %v357_v16  ;;  %1076 = vmatpush.bf16.msra.mxu3 %v2414_v48  ;;  %vm1885_vm3 = vcmask 1042432  }
  0x37   : > { %v460_v19 = vor.u32 %v459_v8, %v455_v13  ;;  %v2671_v20 = vsel %vm2543_vm5, %v390_v18, 0  ;;  %680 = vmatpush.bf16.msra.mxu0 %v2388_v49  ;;  %v2440_v8 = vld [vmem:[%s3395_s1 + $0x1a8] sm:$0xff] }
  0x38   : > { %v448_v23 = vshrl.u32 %v2671_v20, 16  ;;  %v450_v24 = vshll.u32 %v2671_v20, 16  ;;  %1047 = vmatpush.bf16.msra.mxu2 %v2406_v47  ;;  %709 = vmatpush.bf16.msra.mxu1 %v2396_v50  ;;  %v2448_v18 = vld [vmem:[%s3395_s1 + $0x1e8] sm:$0xff] }
  0x39   : > { %484 = vrot.lane.b32.xlu2 %v483_v17, %s2497_s28  ;;  %475 = vrot.lane.b32.xlu1 %v460_v19, %s2497_s28  ;;  %v2439_v19 = vld [vmem:[%s3395_s1 + $0x1a0] sm:$0xff] }
  0x3a   : > { %v452_v25 = vrot.slane %v450_v24, 1  ;;  %1077 = vmatpush.bf16.msra.mxu3 %v2413_v51 }
  0x3b   : > { %681 = vmatpush.bf16.msra.mxu0 %v2387_v52 }
  0x3c   : > { %v453_v26 = vor.u32 %v452_v25, %v448_v23  ;;  %1048 = vmatpush.bf16.msra.mxu2 %v2405_v36  ;;  %710 = vmatpush.bf16.msra.mxu1 %v2395_v53  ;;  %v2447_v23 = vld [vmem:[%s3395_s1 + $0x1e0] sm:$0xff]  ;;  %v2425_v53 = vld [vmem:[%s3395_s1 + $0x130] sm:$0xff] }
  0x3e   : > { %473 = vrot.lane.b32.xlu0 %v453_v26, %s2497_s28  ;;  %1078 = vmatpush.bf16.msra.mxu3 %v2412_v55 }
  0x3f   : > { %1397 = vmatpush.bf16.msrb.mxu0 %v2426_v43 }
  0x40   : > { %1049 = vmatpush.bf16.msra.mxu2 %v2404_v54  ;;  %1426 = vmatpush.bf16.msrb.mxu1 %v2434_v44  ;;  %v2433_v54 = vld [vmem:[%s3395_s1 + $0x170] sm:$0xff] }
  0x42   : > { %1079 = vmatpush.bf16.msra.mxu3 %v2411_v57  ;;  %v2424_v57 = vld [vmem:[%s3395_s1 + $0x128] sm:$0xff] }
  0x43   : > { %1398 = vmatpush.bf16.msrb.mxu0 %v2425_v53 }
  0x44   : > { %1050 = vmatpush.bf16.msra.mxu2 %v2403_v56  ;;  %v2446_v56 = vld [vmem:[%s3395_s1 + $0x1d8] sm:$0xff]  ;;  %1427 = vmatpush.bf16.msrb.mxu1 %v2433_v54 }
  0x46   : > { %1689 = vmatpush.bf16.msrb.mxu3 %v2450_v63 }
  0x47   : > { %1399 = vmatpush.bf16.msrb.mxu0 %v2424_v57 }
  0x48   : > { %1660 = vmatpush.bf16.msrb.mxu2 %v2442_v62  ;;  %v2445_v62 = vld [vmem:[%s3395_s1 + $0x1d0] sm:$0xff] }
  0x4c   : > { %1661 = vmatpush.bf16.msrb.mxu2 %v2441_v1  ;;  %v2423_v1 = vld [vmem:[%s3395_s1 + $0x120] sm:$0xff] }
  0x4d   : > { %1400 = vmatpush.bf16.msrb.mxu0 %v2423_v1 }
  0x50   : > { %1662 = vmatpush.bf16.msrb.mxu2 %v2440_v8 }
  0x54   : > { %1663 = vmatpush.bf16.msrb.mxu2 %v2439_v19 }
  0x83   : > { %v2768_v58 = vpop.permute.xlu2 %469 }
  0x84   : > { %v2842_v36 = vsel %vm486_vm14, %v2608_v21, %v2768_v58  ;;  %v2438_v21 = vld [vmem:[%s3395_s1 + $0x198] sm:$0xff] }
  0x85   : > { %v839_v58 = vshrl.u32 %v2842_v36, 16  ;;  %1664 = vmatpush.bf16.msrb.mxu2 %v2438_v21 }
  0x88   : > { %v462_v59 = vpop.permute.xlu0 %461 }
  0x89   : > { %v488_v60 = vsel %vm486_vm14, %v2553_v5, %v462_v59  ;;  %v2449_v5 = vld [vmem:[%s3395_s1 + $0x1f0] sm:$0xff]  ;;  %v842_v59 = vshll.u32 %v2842_v36, 16 }
  0x8a   : > { %v806_v14 = vshrl.u32 %v488_v60, 16  ;;  %v808_v0 = vshll.u32 %v488_v60, 16  ;;  %1690 = vmatpush.bf16.msrb.mxu3 %v2449_v5  ;;  %v1264_v10 = vrot.slane %v488_v60, 4  ;;  %v2431_v5 = vld [vmem:[%s3395_s1 + $0x160] sm:$0xff] }
  0x8b   : > { %v2784_v7 = vpop.permute.xlu2 %471 }
  0x8c   : > { %v1524_v4 = vrot.slane %v806_v14, 4  ;;  %v1525_v6 = vrot.slane %v808_v0, 5  ;;  %v810_v33 = vrot.slane %v808_v0, 1  ;;  %v512_v0 = vrot.slane %v2842_v36, 4 }
  0x8e   : > { %v1526_v9 = vor.u32 %v1525_v6, %v1524_v4  ;;  %1691 = vmatpush.bf16.msrb.mxu3 %v2448_v18  ;;  %v811_v48 = vor.u32 %v810_v33, %v806_v14  ;;  %v841_v4 = vrot.slane %v839_v58, 4  ;;  %v844_v6 = vrot.slane %v842_v59, 5 }
  0x8f   : > { %v498_v33 = vsel %vm486_vm14, %v2628_v30, %v2784_v7  ;;  %v2436_v7 = vld [vmem:[%s3395_s1 + $0x188] sm:$0xff] }
  0x92   : > { %1692 = vmatpush.bf16.msrb.mxu3 %v2447_v23 }
  0x93   : > { %v485_v12 = vpop.permute.xlu2 %484 }
  0x94   : > { %v2788_v13 = vsel %vm486_vm14, %v2653_v61, %v485_v12 }
  0x95   : > { %v875_v15 = vshrl.u32 %v2788_v13, 16  ;;  %v878_v16 = vshll.u32 %v2788_v13, 16  ;;  %v2794_v17 = vsel %vm521_vm15, %v2788_v13, %v1264_v10 }
  0x96   : > { %1693 = vmatpush.bf16.msrb.mxu3 %v2446_v56 }
  0x97   : > { %v1522_v61 = vrot.slane %v878_v16, 1 }
  0x99   : > { %v1523_v24 = vor.u32 %v1522_v61, %v875_v15 }
  0x9a   : > { %1694 = vmatpush.bf16.msrb.mxu3 %v2445_v62 }
  0x9b   : > { %v466_v25 = vpop.permute.xlu1 %465  ;;  %v2813_v26 = vsel %vm521_vm15, %v1523_v24, %v1526_v9 }
  0x9c   : > { %v2817_v2 = vsel %vm486_vm14, %v2612_v22, %v466_v25  ;;  %v845_v25 = vor.u32 %v844_v6, %v841_v4  ;;  %v520_v4 = vrot.slane %v2788_v13, 4 }
  0x9d   : > { %v821_v3 = vshrl.u32 %v2817_v2, 16  ;;  %v824_v27 = vshll.u32 %v2817_v2, 16  ;;  %v464_v28 = vpop.permute.xlu0 %463  ;;  %v508_v31 = vrot.slane %v2817_v2, 4 }
  0x9e   : > { %v490_v32 = vsel %vm486_vm14, %v2624_v29, %v464_v28  ;;  %v2422_v28 = vld [vmem:[%s3395_s1 + $0x118] sm:$0xff] }
  0x9f   : > { %v812_v34 = vshrl.u32 %v490_v32, 16  ;;  %v814_v35 = vshll.u32 %v490_v32, 16  ;;  %v507_v37 = vrot.slane %v490_v32, 4  ;;  %v2825_v38 = vsel %vm521_vm15, %v490_v32, %v508_v31  ;;  %v2430_v31 = vld [vmem:[%s3395_s1 + $0x158] sm:$0xff]  ;;  %1401 = vmatpush.bf16.msrb.mxu0 %v2422_v28 }
  0xa0   : > { %711 = vmatmul.bf16.vlgmr.msra.gmra.mxu1 %v2825_v38  ;;  %v823_v22 = vrot.slane %v821_v3, 4  ;;  %v826_v39 = vrot.slane %v824_v27, 5  ;;  %v828_v61 = vrot.slane %v824_v27, 1 }
  0xa1   : > { %v523_v40 = vsel %vm521_vm15, %v488_v60, %v507_v37  ;;  %v818_v41 = vrot.slane %v812_v34, 4  ;;  %v819_v42 = vrot.slane %v814_v35, 5  ;;  %v816_v29 = vrot.slane %v814_v35, 1  ;;  %v2437_v60 = vld [vmem:[%s3395_s1 + $0x190] sm:$0xff] }
  0xa2   : > { %682 = vmatmul.bf16.vlgmr.msra.gmra.mxu0 %v523_v40  ;;  %v827_v46 = vor.u32 %v826_v39, %v823_v22  ;;  %1665 = vmatpush.bf16.msrb.mxu2 %v2437_v60  ;;  %v829_v27 = vor.u32 %v828_v61, %v821_v3  ;;  %v2421_v37 = vld [vmem:[%s3395_s1 + $0x110] sm:$0xff]  ;;  %v2444_v3 = vld [vmem:[%s3395_s1 + $0x1c8] sm:$0xff]  ;;  %v848_v40 = vshrl.u32 %v498_v33, 16 }
  0xa3   : > { %v468_v47 = vpop.permute.xlu1 %467  ;;  %v820_v49 = vor.u32 %v819_v42, %v818_v41  ;;  %v817_v50 = vor.u32 %v816_v29, %v812_v34  ;;  %1402 = vmatpush.bf16.msrb.mxu0 %v2421_v37  ;;  %v2420_v22 = vld [vmem:[%s3395_s1 + $0x108] sm:$0xff]  ;;  %1695 = vmatpush.bf16.msrb.mxu3 %v2444_v3  ;;  %v2443_v41 = vld [vmem:[%s3395_s1 + $0x1c0] sm:$0xff]  ;;  %v850_v42 = vshll.u32 %v498_v33, 16 }
  0xa4   : > { %v494_v55 = vsel %vm486_vm14, %v2640_v45, %v468_v47  ;;  %v2432_v45 = vld [vmem:[%s3395_s1 + $0x168] sm:$0xff]  ;;  %v2427_v47 = vld [vmem:[%s3395_s1 + $0x140] sm:$0xff] }
  0xa5   : > { %v884_v51 = vsel %vm521_vm15, %v811_v48, %v820_v49  ;;  %v2846_v52 = vsel %vm521_vm15, %v817_v50, %v827_v46  ;;  %v830_v63 = vshrl.u32 %v494_v55, 16  ;;  %v832_v14 = vshll.u32 %v494_v55, 16  ;;  %1428 = vmatpush.bf16.msrb.mxu1 %v2432_v45  ;;  %v2428_v39 = vld [vmem:[%s3395_s1 + $0x148] sm:$0xff]  ;;  %v2419_v46 = vld [vmem:[%s3395_s1 + $0x100] sm:$0xff] }
  0xa6   : > { %1051 = vmatmul.bf16.vlgmr.msra.gmra.mxu2 %v884_v51  ;;  %1080 = vmatmul.bf16.vlgmr.msra.gmra.mxu3 %v2846_v52  ;;  %v511_v9 = vrot.slane %v494_v55, 4  ;;  %v2889_v18 = vsel %vm521_vm15, %v494_v55, %v512_v0  ;;  %v515_v48 = vrot.slane %v498_v33, 4  ;;  %v846_v49 = vrot.slane %v842_v59, 1 }
  0xa7   : > { %v836_v10 = vrot.slane %v830_v63, 4  ;;  %v837_v12 = vrot.slane %v832_v14, 5  ;;  %v834_v8 = vrot.slane %v832_v14, 1  ;;  %1666 = vmatpush.bf16.msrb.mxu2 %v2436_v7  ;;  %1403 = vmatpush.bf16.msrb.mxu0 %v2420_v22  ;;  %v854_v50 = vrot.slane %v848_v40, 4 }
  0xa8   : > { %v2896_v19 = vsel %vm521_vm15, %v2817_v2, %v511_v9  ;;  %v2429_v2 = vld [vmem:[%s3395_s1 + $0x150] sm:$0xff]  ;;  %1696 = vmatpush.bf16.msrb.mxu3 %v2443_v41  ;;  %v855_v51 = vrot.slane %v850_v42, 5  ;;  %v852_v53 = vrot.slane %v850_v42, 1  ;;  %v535_v56 = vsel %vm521_vm15, %v2842_v36, %v515_v48 }
  0xa9   : > { %1429 = vmatpush.bf16.msrb.mxu1 %v2431_v5  ;;  %v838_v23 = vor.u32 %v837_v12, %v836_v10  ;;  %v835_v24 = vor.u32 %v834_v8, %v830_v63  ;;  %v847_v57 = vor.u32 %v846_v49, %v839_v58  ;;  %v877_v12 = vrot.slane %v875_v15, 4 }
  0xaa   : > { %v856_v45 = vor.u32 %v855_v51, %v854_v50  ;;  %v853_v59 = vor.u32 %v852_v53, %v848_v40 }
  0xab   : > { %v2911_v34 = vsel %vm521_vm15, %v829_v27, %v838_v23  ;;  %v2914_v35 = vsel %vm521_vm15, %v835_v24, %v845_v25  ;;  %1404 = vmatpush.bf16.msrb.mxu0 %v2419_v46  ;;  %v476_v62 = vpop.permute.xlu1 %475 }
  0xac   : > { %v502_v63 = vsel %vm486_vm14, %v2663_v11, %v476_v62  ;;  %v900_v14 = vsel %vm521_vm15, %v847_v57, %v856_v45  ;;  %v880_v11 = vrot.slane %v878_v16, 5 }
  0xad   : > { %1430 = vmatpush.bf16.msrb.mxu1 %v2430_v31  ;;  %v866_v1 = vshrl.u32 %v502_v63, 16  ;;  %v868_v5 = vshll.u32 %v502_v63, 16  ;;  %v519_v36 = vrot.slane %v502_v63, 4  ;;  %v544_v8 = vsel %vm521_vm15, %v502_v63, %v520_v4 }
  0xae   : > { %v881_v28 = vor.u32 %v880_v11, %v877_v12 }
  0xaf   : > { %v872_v58 = vrot.slane %v866_v1, 4  ;;  %v873_v6 = vrot.slane %v868_v5, 5  ;;  %v870_v10 = vrot.slane %v868_v5, 1 }
  0xb0   : > { %716 = vmatmul.bf16.gmra.mxu1 %v2889_v18  ;;  %v474_v32 = vpop.permute.xlu0 %473 }
  0xb1   : > { %v500_v30 = vsel %vm486_vm14, %v2671_v20, %v474_v32  ;;  %1431 = vmatpush.bf16.msrb.mxu1 %v2429_v2  ;;  %v2435_v20 = vld [vmem:[%s3395_s1 + $0x180] sm:$0xff]  ;;  %v874_v61 = vor.u32 %v873_v6, %v872_v58  ;;  %v871_v25 = vor.u32 %v870_v10, %v866_v1 }
  0xb2   : > { %687 = vmatmul.bf16.gmra.mxu0 %v2896_v19  ;;  %v857_v29 = vshrl.u32 %v500_v30, 16  ;;  %v860_v43 = vshll.u32 %v500_v30, 16  ;;  %v516_v44 = vrot.slane %v500_v30, 4  ;;  %1667 = vmatpush.bf16.msrb.mxu2 %v2435_v20  ;;  %v541_v23 = vsel %vm521_vm15, %v500_v30, %v519_v36 }
  0xb3   : > { %v912_v27 = vsel %vm521_vm15, %v871_v25, %v881_v28 }
  0xb4   : > { %v859_v54 = vrot.slane %v857_v29, 4  ;;  %v862_v55 = vrot.slane %v860_v43, 5  ;;  %v538_v21 = vsel %vm521_vm15, %v498_v33, %v516_v44  ;;  %v864_v9 = vrot.slane %v860_v43, 1 }
  0xb5   : > { %1432 = vmatpush.bf16.msrb.mxu1 %v2428_v39 }
  0xb6   : > { %1056 = vmatmul.bf16.gmra.mxu2 %v2911_v34  ;;  %1085 = vmatmul.bf16.gmra.mxu3 %v2914_v35  ;;  %v863_v60 = vor.u32 %v862_v55, %v859_v54  ;;  %v865_v24 = vor.u32 %v864_v9, %v857_v29 }
  0xb8   : > { %v904_v0 = vsel %vm521_vm15, %v853_v59, %v863_v60  ;;  %v908_v31 = vsel %vm521_vm15, %v865_v24, %v874_v61 }
  0xb9   : > { %1433 = vmatpush.bf16.msrb.mxu1 %v2427_v47 }
  0xc0   : > { %721 = vmatmul.bf16.gmra.mxu1 %v538_v21 }
  0xc2   : > { %692 = vmatmul.bf16.gmra.mxu0 %v535_v56 }
  0xc6   : > { %1061 = vmatmul.bf16.gmra.mxu2 %v900_v14  ;;  %1090 = vmatmul.bf16.gmra.mxu3 %v904_v0 }
  0xd0   : > { %726 = vmatmul.bf16.gmra.mxu1 %v544_v8 }
  0xd2   : > { %697 = vmatmul.bf16.gmra.mxu0 %v541_v23 }
  0xd6   : > { %1066 = vmatmul.bf16.gmra.mxu2 %v908_v31  ;;  %1095 = vmatmul.bf16.gmra.mxu3 %v912_v27 }
  0xe0   : > { %1434 = vmatmul.bf16.vlgmr.msrb.gmra.mxu1 %v2896_v19 }
  0xe2   : > { %1405 = vmatmul.bf16.vlgmr.msrb.gmra.mxu0 %v2825_v38 }
  0xe6   : > { %1668 = vmatmul.bf16.vlgmr.msrb.gmra.mxu2 %v2846_v52  ;;  %1697 = vmatmul.bf16.vlgmr.msrb.gmra.mxu3 %v2911_v34 }
  0xf0   : > { %1439 = vmatmul.bf16.gmra.mxu1 %v535_v56 }
  0xf2   : > { %1410 = vmatmul.bf16.gmra.mxu0 %v2889_v18 }
  0xf6   : > { %1673 = vmatmul.bf16.gmra.mxu2 %v2914_v35  ;;  %1702 = vmatmul.bf16.gmra.mxu3 %v900_v14 }
 0x100   : > { %1444 = vmatmul.bf16.gmra.mxu1 %v541_v23 }
 0x102   : > { %1415 = vmatmul.bf16.gmra.mxu0 %v538_v21 }
 0x106   : > { %1678 = vmatmul.bf16.gmra.mxu2 %v904_v0  ;;  %1707 = vmatmul.bf16.gmra.mxu3 %v908_v31 }
 0x110   : > { %1449 = vmatmul.bf16.gmra.mxu1 %v2794_v17 }
 0x112   : > { %1420 = vmatmul.bf16.gmra.mxu0 %v544_v8 }
 0x116   : > { %1683 = vmatmul.bf16.gmra.mxu2 %v912_v27  ;;  %1712 = vmatmul.bf16.gmra.mxu3 %v2813_v26 }
 0x11d   : > { %v712_v13 = vpop.f32.mrf.mxu1 }
 0x11f   : > { %v683_v15 = vpop.f32.mrf.mxu0 }
 0x120   : > { %v2978_v16 = vadd.f32 %v712_v13, %v683_v15 }
 0x122   : > { %v798_v18 = vpack.c.bf16 %v2978_v16, %v2978_v16  ;;  %v732_v17 = vsel %vm486_vm14, %v2978_v16, 0.0 }
 0x124   : > { %v2990_v37 = vunpack.c.l.b16 %v798_v18 }
 0x125   : > { %v714_v38 = vpop.f32.mrf.mxu1 }
 0x127   : > { %v685_v52 = vpop.f32.mrf.mxu0 }
 0x128   : > { %v2982_v19 = vadd.f32 %v714_v38, %v685_v52 }
 0x129   : > { %v1052_v32 = vpop.f32.mrf.mxu2  ;;  %v1081_v33 = vpop.f32.mrf.mxu3 }
 0x12a   : > { %v733_v34 = vsel %vm486_vm14, %v2982_v19, 0.0  ;;  %v799_v26 = vpack.c.bf16 %v2982_v19, %v2982_v19  ;;  %v2994_v7 = vadd.f32 %v1081_v33, %v1052_v32 }
 0x12b   : > { %v734_v35 = vadd.f32 %v733_v34, %v732_v17 }
 0x12c   : > { %v2992_v2 = vunpack.c.l.b16 %v799_v26  ;;  %v1160_v41 = vpack.c.bf16 %v2994_v7, %v2994_v7  ;;  %v1101_v1 = vsel %vm486_vm14, %v2994_v7, 0.0 }
 0x12d   : > { %v717_v30 = vpop.f32.mrf.mxu1 }
 0x12e   : > { %v1184_v3 = vpack.c.b16 %v2992_v2, %v2990_v37  ;;  %v1196_v47 = vunpack.c.l.b16 %v1160_v41 }
 0x12f   : > { %v688_v22 = vpop.f32.mrf.mxu0 }
 0x130   : > { %v2998_v39 = vadd.f32 %v717_v30, %v688_v22 }
 0x131   : > { %v1054_v40 = vpop.f32.mrf.mxu2  ;;  %v1083_v20 = vpop.f32.mrf.mxu3 }
 0x132   : > { %v735_v42 = vsel %vm486_vm14, %v2998_v39, 0.0  ;;  %v3004_v29 = vadd.f32 %v1083_v20, %v1054_v40  ;;  %v800_v50 = vpack.c.bf16 %v2998_v39, %v2998_v39  ;;  %v2498_v20 = vmov 64.0  }
 0x133   : > { %v736_v43 = vadd.f32 %v735_v42, %v734_v35  ;;  %2484 = vrcp.f32 %v2498_v20 }
 0x134   : > { %v1161_v44 = vpack.c.bf16 %v3004_v29, %v3004_v29  ;;  %v3017_v45 = vunpack.c.l.b16 %v800_v50  ;;  %v1102_v63 = vsel %vm486_vm14, %v3004_v29, 0.0 }
 0x135   : > { %v719_v46 = vpop.f32.mrf.mxu1  ;;  %v1103_v36 = vadd.f32 %v1102_v63, %v1101_v1 }
 0x136   : > { %v1197_v48 = vunpack.c.l.b16 %v1161_v44 }
 0x137   : > { %v690_v49 = vpop.f32.mrf.mxu0 }
 0x138   : > { %v3010_v51 = vadd.f32 %v719_v46, %v690_v49  ;;  %v1204_v53 = vpack.c.b16 %v1197_v48, %v1196_v47 }
 0x139   : > { %v1057_v54 = vpop.f32.mrf.mxu2  ;;  %v1086_v55 = vpop.f32.mrf.mxu3 }
 0x13a   : > { %v737_v21 = vsel %vm486_vm14, %v3010_v51, 0.0  ;;  %v801_v56 = vpack.c.bf16 %v3010_v51, %v3010_v51  ;;  %1208 = vrot.lane.b32.xlu0 %v1204_v53, %s2497_s28  ;;  %v3021_v60 = vadd.f32 %v1086_v55, %v1057_v54  ;;  %v2485_v50 = vpop.eup %2484 }
 0x13b   : > { %v738_v57 = vadd.f32 %v737_v21, %v736_v43  ;;  %v754_v63 = vmul.f32 64.0, %v2485_v50  ;;  %vm758_vm1 = vweird.f32 %v2485_v50 }
 0x13c   : > { %v3019_v59 = vunpack.c.l.b16 %v801_v56  ;;  %v1104_v5 = vsel %vm486_vm14, %v3021_v60, 0.0  ;;  %v1162_v9 = vpack.c.bf16 %v3021_v60, %v3021_v60 }
 0x13d   : > { %v722_v62 = vpop.f32.mrf.mxu1  ;;  %v1105_v11 = vadd.f32 %v1104_v5, %v1103_v36 }
 0x13e   : > { %v1185_v14 = vpack.c.b16 %v3019_v59, %v3017_v45  ;;  %v1198_v28 = vunpack.c.l.b16 %v1162_v9  ;;  %v755_v9 = vsub.f32 1.0, %v754_v63 }
 0x13f   : > { %v693_v0 = vpop.f32.mrf.mxu0 }
 0x140   : > { %v3031_v4 = vadd.f32 %v722_v62, %v693_v0 }
 0x141   : > { %v1059_v58 = vpop.f32.mrf.mxu2  ;;  %v1088_v6 = vpop.f32.mrf.mxu3 }
 0x142   : > { %v739_v10 = vsel %vm486_vm14, %v3031_v4, 0.0  ;;  %v3037_v12 = vadd.f32 %v1088_v6, %v1059_v58  ;;  %v802_v13 = vpack.c.bf16 %v3031_v4, %v3031_v4 }
 0x143   : > { %v740_v8 = vadd.f32 %v739_v10, %v738_v57 }
 0x144   : > { %v1106_v61 = vsel %vm486_vm14, %v3037_v12, 0.0  ;;  %v1163_v23 = vpack.c.bf16 %v3037_v12, %v3037_v12  ;;  %v3054_v26 = vunpack.c.l.b16 %v802_v13 }
 0x145   : > { %v1107_v24 = vadd.f32 %v1106_v61, %v1105_v11  ;;  %v724_v25 = vpop.f32.mrf.mxu1 }
 0x146   : > { %v1199_v31 = vunpack.c.l.b16 %v1163_v23 }
 0x147   : > { %v695_v27 = vpop.f32.mrf.mxu0 }
 0x148   : > { %v3045_v15 = vadd.f32 %v724_v25, %v695_v27  ;;  %v1205_v38 = vpack.c.b16 %v1199_v31, %v1198_v28  ;;  %v756_v25 = vmul.f32 %v2485_v50, %v755_v9 }
 0x149   : > { %v1062_v52 = vpop.f32.mrf.mxu2  ;;  %v1091_v18 = vpop.f32.mrf.mxu3 }
 0x14a   : > { %v741_v32 = vsel %vm486_vm14, %v3045_v15, 0.0  ;;  %v803_v33 = vpack.c.bf16 %v3045_v15, %v3045_v15  ;;  %v3051_v17 = vadd.f32 %v1091_v18, %v1062_v52  ;;  %1210 = vrot.lane.b32.xlu1 %v1205_v38, %s2497_s28  ;;  %v757_v52 = vadd.f32 %v2485_v50, %v756_v25 }
 0x14b   : > { %v742_v34 = vadd.f32 %v741_v32, %v740_v8 }
 0x14c   : > { %v3056_v35 = vunpack.c.l.b16 %v803_v33  ;;  %v1108_v30 = vsel %vm486_vm14, %v3051_v17, 0.0  ;;  %v1164_v47 = vpack.c.bf16 %v3051_v17, %v3051_v17 }
 0x14d   : > { %v1109_v22 = vadd.f32 %v1108_v30, %v1107_v24  ;;  %v727_v40 = vpop.f32.mrf.mxu1 }
 0x14e   : > { %v1186_v41 = vpack.c.b16 %v3056_v35, %v3054_v26  ;;  %v1200_v57 = vunpack.c.l.b16 %v1164_v47 }
 0x14f   : > { %v698_v42 = vpop.f32.mrf.mxu0 }
 0x150   : > { %v3062_v43 = vadd.f32 %v727_v40, %v698_v42  ;;  %v3097_v42 = vsel %vm758_vm1, %v2485_v50, %v757_v52 }
 0x151   : > { %v1064_v44 = vpop.f32.mrf.mxu2  ;;  %v1093_v46 = vpop.f32.mrf.mxu3 }
 0x152   : > { %v743_v48 = vsel %vm486_vm14, %v3062_v43, 0.0  ;;  %v3068_v49 = vadd.f32 %v1093_v46, %v1064_v44 }
 0x153   : > { %v744_v53 = vadd.f32 %v743_v48, %v742_v34 }
 0x154   : > { %v1110_v54 = vsel %vm486_vm14, %v3068_v49, 0.0  ;;  %v1165_v55 = vpack.c.bf16 %v3068_v49, %v3068_v49 }
 0x155   : > { %v1111_v21 = vadd.f32 %v1110_v54, %v1109_v22  ;;  %v729_v56 = vpop.f32.mrf.mxu1 }
 0x156   : > { %v1201_v62 = vunpack.c.l.b16 %v1165_v55 }
 0x157   : > { %v700_v0 = vpop.f32.mrf.mxu0 }
 0x158   : > { %v3074_v1 = vadd.f32 %v729_v56, %v700_v0  ;;  %v1206_v5 = vpack.c.b16 %v1201_v62, %v1200_v57 }
 0x159   : > { %v1067_v36 = vpop.f32.mrf.mxu2  ;;  %v1096_v58 = vpop.f32.mrf.mxu3 }
 0x15a   : > { %v745_v6 = vsel %vm486_vm14, %v3074_v1, 0.0  ;;  %v3078_v10 = vadd.f32 %v1096_v58, %v1067_v36  ;;  %1212 = vrot.lane.b32.xlu2 %v1206_v5, %s2497_s28 }
 0x15b   : > { %v746_v11 = vadd.f32 %v745_v6, %v744_v53 }
 0x15c   : > { %v1112_v8 = vsel %vm486_vm14, %v3078_v10, 0.0  ;;  %v1166_v18 = vpack.c.bf16 %v3078_v10, %v3078_v10 }
 0x15d   : > { %v747_v61 = vrot.slane %v746_v11, 4  ;;  %v1113_v23 = vadd.f32 %v1112_v8, %v1111_v21  ;;  %v3083_v24 = vpop.f32.mrf.mxu1 }
 0x15e   : > { %v1202_v44 = vunpack.c.l.b16 %v1166_v18 }
 0x15f   : > { %v748_v28 = vadd.f32 %v747_v61, %v746_v11  ;;  %v3085_v31 = vpop.f32.mrf.mxu0 }
 0x161   : > { %v749_v27 = vrot.slane %v748_v28, 2  ;;  %v1069_v13 = vpop.f32.mrf.mxu2  ;;  %v1098_v38 = vpop.f32.mrf.mxu3 }
 0x162   : > { %v3089_v32 = vadd.f32 %v1098_v38, %v1069_v13 }
 0x163   : > { %v750_v33 = vadd.f32 %v749_v27, %v748_v28 }
 0x164   : > { %v1114_v34 = vsel %vm486_vm14, %v3089_v32, 0.0  ;;  %v1167_v30 = vpack.c.bf16 %v3089_v32, %v3089_v32 }
 0x165   : > { %v751_v22 = vrot.slane %v750_v33, 1  ;;  %v1115_v40 = vadd.f32 %v1114_v34, %v1113_v23  ;;  %v3095_v20 = vpop.f32.mrf.mxu1 }
 0x166   : > { %v1203_v46 = vunpack.c.l.b16 %v1167_v30 }
 0x167   : > { %v752_v47 = vadd.f32 %v751_v22, %v750_v33  ;;  %v3099_v48 = vpop.f32.mrf.mxu0  ;;  %v1116_v55 = vrot.slane %v1115_v40, 4 }
 0x168   : > { %v1207_v53 = vpack.c.b16 %v1203_v46, %v1202_v44 }
 0x169   : > { %v3102_v54 = vmul.f32 %v3097_v42, %v752_v47  ;;  %v1669_v21 = vpop.f32.mrf.mxu2  ;;  %v1698_v56 = vpop.f32.mrf.mxu3  ;;  %v1117_v9 = vadd.f32 %v1116_v55, %v1115_v40 }
 0x16a   : > { %1214 = vrot.lane.b32.xlu0 %v1207_v53, %s2497_s28  ;;  %v3123_v8 = vadd.f32 %v1698_v56, %v1669_v21 }
 0x16b   : > { %v761_v57 = vsub.f32 %v2978_v16, %v3102_v54  ;;  %v762_v50 = vsub.f32 %v2982_v19, %v3102_v54  ;;  %v763_v62 = vsub.f32 %v2998_v39, %v3102_v54  ;;  %v764_v63 = vsub.f32 %v3010_v51, %v3102_v54 }
 0x16c   : > { %v765_v0 = vsub.f32 %v3031_v4, %v3102_v54  ;;  %v766_v5 = vsub.f32 %v3045_v15, %v3102_v54  ;;  %v767_v36 = vsub.f32 %v3062_v43, %v3102_v54  ;;  %v1118_v25 = vrot.slane %v1117_v9, 2 }
 0x16d   : > { %v769_v58 = vmul.f32 %v761_v57, %v761_v57  ;;  %v770_v16 = vmul.f32 %v762_v50, %v762_v50  ;;  %v771_v6 = vmul.f32 %v763_v62, %v763_v62  ;;  %v3119_v19 = vpop.f32.mrf.mxu1  ;;  %v772_v11 = vmul.f32 %v764_v63, %v764_v63 }
 0x16e   : > { %v773_v15 = vmul.f32 %v765_v0, %v765_v0  ;;  %v768_v13 = vsub.f32 %v3074_v1, %v3102_v54  ;;  %v774_v38 = vmul.f32 %v766_v5, %v766_v5  ;;  %v1119_v33 = vadd.f32 %v1118_v25, %v1117_v9 }
 0x16f   : > { %v777_v39 = vsel %vm486_vm14, %v769_v58, 0.0  ;;  %v778_v51 = vsel %vm486_vm14, %v770_v16, 0.0  ;;  %v3125_v4 = vpop.f32.mrf.mxu0  ;;  %v780_v23 = vsel %vm486_vm14, %v771_v6, 0.0  ;;  %v782_v18 = vsel %vm486_vm14, %v772_v11, 0.0 }
 0x170   : > { %v779_v61 = vadd.f32 %v778_v51, %v777_v39  ;;  %v1777_v34 = vpack.c.bf16 %v3123_v8, %v3123_v8  ;;  %v775_v40 = vmul.f32 %v767_v36, %v767_v36  ;;  %v784_v44 = vsel %vm486_vm14, %v773_v15, 0.0 }
 0x171   : > { %v1671_v28 = vpop.f32.mrf.mxu2  ;;  %v1700_v27 = vpop.f32.mrf.mxu3  ;;  %v1120_v46 = vrot.slane %v1119_v33, 1  ;;  %v776_v55 = vmul.f32 %v768_v13, %v768_v13  ;;  %v786_v56 = vsel %vm486_vm14, %v774_v38, 0.0 }
 0x172   : > { %v781_v52 = vadd.f32 %v780_v23, %v779_v61  ;;  %v3133_v30 = vadd.f32 %v1700_v27, %v1671_v28  ;;  %v1813_v50 = vunpack.c.l.b16 %v1777_v34  ;;  %v788_v5 = vsel %vm486_vm14, %v775_v40, 0.0 }
 0x173   : > { %v1121_v57 = vadd.f32 %v1120_v46, %v1119_v33  ;;  %v790_v11 = vsel %vm486_vm14, %v776_v55, 0.0 }
 0x174   : > { %v783_v22 = vadd.f32 %v782_v18, %v781_v52  ;;  %v1778_v47 = vpack.c.bf16 %v3133_v30, %v3133_v30 }
 0x175   : > { %v3138_v53 = vpop.f32.mrf.mxu1  ;;  %v1122_v36 = vmul.f32 %v1121_v57, %v3097_v42 }
 0x176   : > { %v785_v21 = vadd.f32 %v784_v44, %v783_v22  ;;  %v1814_v62 = vunpack.c.l.b16 %v1778_v47 }
 0x177   : > { %v3141_v63 = vpop.f32.mrf.mxu0  ;;  %v1123_v39 = vsub.f32 %v2994_v7, %v1122_v36  ;;  %v1124_v51 = vsub.f32 %v3004_v29, %v1122_v36  ;;  %v1125_v61 = vsub.f32 %v3021_v60, %v1122_v36  ;;  %v1126_v15 = vsub.f32 %v3037_v12, %v1122_v36 }
 0x178   : > { %v787_v0 = vadd.f32 %v786_v56, %v785_v21  ;;  %v1821_v6 = vpack.c.b16 %v1814_v62, %v1813_v50  ;;  %v1127_v25 = vsub.f32 %v3051_v17, %v1122_v36  ;;  %v1128_v28 = vsub.f32 %v3068_v49, %v1122_v36 }
 0x179   : > { %v1674_v58 = vpop.f32.mrf.mxu2  ;;  %v1703_v16 = vpop.f32.mrf.mxu3  ;;  %v1129_v27 = vsub.f32 %v3078_v10, %v1122_v36  ;;  %v1130_v13 = vsub.f32 %v3089_v32, %v1122_v36  ;;  %v1131_v38 = vmul.f32 %v1123_v39, %v1123_v39  ;;  %v1132_v52 = vmul.f32 %v1124_v51, %v1124_v51 }
 0x17a   : > { %v789_v9 = vadd.f32 %v788_v5, %v787_v0  ;;  %1825 = vrot.lane.b32.xlu1 %v1821_v6, %s2497_s28  ;;  %v1133_v7 = vmul.f32 %v1125_v61, %v1125_v61  ;;  %v1134_v29 = vmul.f32 %v1126_v15, %v1126_v15  ;;  %v1135_v22 = vmul.f32 %v1127_v25, %v1127_v25 }
 0x17b   : > { %v1139_v60 = vsel %vm486_vm14, %v1131_v38, 0.0  ;;  %v1140_v12 = vsel %vm486_vm14, %v1132_v52, 0.0  ;;  %v3158_v40 = vadd.f32 %v1703_v16, %v1674_v58  ;;  %v1136_v46 = vmul.f32 %v1128_v28, %v1128_v28 }
 0x17c   : > { %v791_v23 = vadd.f32 %v790_v11, %v789_v9  ;;  %v1141_v34 = vadd.f32 %v1140_v12, %v1139_v60  ;;  %v1142_v17 = vsel %vm486_vm14, %v1133_v7, 0.0  ;;  %v1144_v47 = vsel %vm486_vm14, %v1134_v29, 0.0 }
 0x17d   : > { %v1445_v18 = vpop.f32.mrf.mxu1  ;;  %v3167_v57 = vsel %vm381_vm0, %v3102_v54, %v1122_v36  ;;  %v1137_v50 = vmul.f32 %v1129_v27, %v1129_v27  ;;  %v1146_v62 = vsel %vm486_vm14, %v1135_v22, 0.0  ;;  %v1779_v0 = vpack.c.bf16 %v3158_v40, %v3158_v40 }
 0x17e   : > { %v1143_v44 = vadd.f32 %v1142_v17, %v1141_v34  ;;  %v792_v32 = vrot.slane %v791_v23, 4  ;;  %v3174_v16 = vadd.f32 %v3095_v20, %v3099_v48  ;;  %v1138_v9 = vmul.f32 %v1130_v13, %v1130_v13 }
 0x17f   : > { %v1416_v33 = vpop.f32.mrf.mxu0  ;;  %v1148_v11 = vsel %vm486_vm14, %v1136_v46, 0.0  ;;  %v3185_v15 = vadd.f32 %v3083_v24, %v3085_v31  ;;  %v1150_v20 = vsel %vm486_vm14, %v1137_v50, 0.0  ;;  %v1815_v48 = vunpack.c.l.b16 %v1779_v0 }
 0x180   : > { %v1145_v21 = vadd.f32 %v1144_v47, %v1143_v44  ;;  %v3163_v56 = vadd.f32 %v1445_v18, %v1416_v33  ;;  %v793_v6 = vadd.f32 %v792_v32, %v791_v23  ;;  %v3190_v13 = vadd.f32 %v3119_v19, %v3125_v4 }
 0x181   : > { %v1676_v49 = vpop.f32.mrf.mxu2  ;;  %v1705_v10 = vpop.f32.mrf.mxu3  ;;  %v1152_v7 = vsel %vm486_vm14, %v1138_v9, 0.0  ;;  %v1456_v24 = vsel %vm486_vm14, %v3174_v16, 0.0  ;;  %v3199_v29 = vadd.f32 %v3138_v53, %v3141_v63  ;;  %v1455_v19 = vsel %vm486_vm14, %v3185_v15, 0.0 }
 0x182   : > { %v3161_v55 = vadd.f32 %v1705_v10, %v1676_v49  ;;  %v1147_v58 = vadd.f32 %v1146_v62, %v1145_v21  ;;  %v1518_v51 = vpack.c.bf16 %v3163_v56, %v3163_v56  ;;  %v794_v52 = vrot.slane %v793_v6, 2 }
 0x183   : > { %v1458_v34 = vsel %vm486_vm14, %v3190_v13, 0.0  ;;  %v1457_v17 = vadd.f32 %v1456_v24, %v1455_v19  ;;  %v1460_v44 = vsel %vm486_vm14, %v3199_v29, 0.0  ;;  %v1462_v46 = vsel %vm486_vm14, %v3163_v56, 0.0 }
 0x184   : > { %v1780_v54 = vpack.c.bf16 %v3161_v55, %v3161_v55  ;;  %v1149_v39 = vadd.f32 %v1148_v11, %v1147_v58  ;;  %v3201_v60 = vunpack.c.l.b16 %v1518_v51  ;;  %v795_v63 = vadd.f32 %v794_v52, %v793_v6 }
 0x185   : > { %v1447_v5 = vpop.f32.mrf.mxu1  ;;  %v1459_v32 = vadd.f32 %v1458_v34, %v1457_v17 }
 0x186   : > { %v1816_v23 = vunpack.c.l.b16 %v1780_v54  ;;  %v1151_v27 = vadd.f32 %v1150_v20, %v1149_v39  ;;  %v796_v58 = vrot.slane %v795_v63, 1 }
 0x187   : > { %v1418_v36 = vpop.f32.mrf.mxu0  ;;  %v1461_v6 = vadd.f32 %v1460_v44, %v1459_v32 }
 0x188   : > { %v3181_v61 = vadd.f32 %v1447_v5, %v1418_v36  ;;  %v1822_v31 = vpack.c.b16 %v1816_v23, %v1815_v48  ;;  %v1153_v18 = vadd.f32 %v1152_v7, %v1151_v27  ;;  %v1719_v36 = vsel %vm486_vm14, %v3133_v30, 0.0 }
 0x189   : > { %v1679_v25 = vpop.f32.mrf.mxu2  ;;  %v1708_v28 = vpop.f32.mrf.mxu3  ;;  %v1463_v39 = vadd.f32 %v1462_v46, %v1461_v6  ;;  %v1718_v27 = vsel %vm486_vm14, %v3123_v8, 0.0 }
 0x18a   : > { %v1519_v38 = vpack.c.bf16 %v3181_v61, %v3181_v61  ;;  %1827 = vrot.lane.b32.xlu2 %v1822_v31, %s2497_s28  ;;  %v1154_v33 = vrot.slane %v1153_v18, 4  ;;  %v3210_v22 = vadd.f32 %v1708_v28, %v1679_v25  ;;  %v1464_v11 = vsel %vm486_vm14, %v3181_v61, 0.0 }
 0x18b   : > { %v797_v28 = vadd.f32 %v796_v58, %v795_v63  ;;  %v1465_v52 = vadd.f32 %v1464_v11, %v1463_v39 }
 0x18c   : > { %v3203_v12 = vunpack.c.l.b16 %v1519_v38  ;;  %v1155_v10 = vadd.f32 %v1154_v33, %v1153_v18  ;;  %v1781_v62 = vpack.c.bf16 %v3210_v22, %v3210_v22  ;;  %v1721_v38 = vsel %vm486_vm14, %v3158_v40, 0.0 }
 0x18d   : > { %v1450_v4 = vpop.f32.mrf.mxu1 }
 0x18e   : > { %v1803_v53 = vpack.c.b16 %v3203_v12, %v3201_v60  ;;  %v1156_v50 = vrot.slane %v1155_v10, 2  ;;  %v1817_v48 = vunpack.c.l.b16 %v1781_v62 }
 0x18f   : > { %v1421_v49 = vpop.f32.mrf.mxu0 }
 0x190   : > { %v3220_v0 = vadd.f32 %v1450_v4, %v1421_v49  ;;  %v1157_v9 = vadd.f32 %v1156_v50, %v1155_v10  ;;  %v1720_v4 = vadd.f32 %v1719_v36, %v1718_v27  ;;  %v1723_v49 = vsel %vm486_vm14, %v3161_v55, 0.0 }
 0x191   : > { %v1681_v47 = vpop.f32.mrf.mxu2  ;;  %v1710_v21 = vpop.f32.mrf.mxu3 }
 0x192   : > { %v3222_v5 = vadd.f32 %v1710_v21, %v1681_v47  ;;  %v1158_v20 = vrot.slane %v1157_v9, 1  ;;  %v1466_v23 = vsel %vm486_vm14, %v3220_v0, 0.0  ;;  %v1520_v31 = vpack.c.bf16 %v3220_v0, %v3220_v0 }
 0x193   : > { %v1467_v33 = vadd.f32 %v1466_v23, %v1465_v52  ;;  %v1722_v32 = vadd.f32 %v1721_v38, %v1720_v4  ;;  %v1725_v47 = vsel %vm486_vm14, %v3210_v22, 0.0 }
 0x194   : > { %v1782_v54 = vpack.c.bf16 %v3222_v5, %v3222_v5  ;;  %v1159_v24 = vadd.f32 %v1158_v20, %v1157_v9  ;;  %v3251_v21 = vunpack.c.l.b16 %v1520_v31  ;;  %v1727_v9 = vsel %vm486_vm14, %v3222_v5, 0.0 }
 0x195   : > { %v1452_v51 = vpop.f32.mrf.mxu1  ;;  %v1724_v58 = vadd.f32 %v1723_v49, %v1722_v32 }
 0x196   : > { %v1818_v25 = vunpack.c.l.b16 %v1782_v54  ;;  %v3240_v63 = vadd.f32 %v1159_v24, %v797_v28 }
 0x197   : > { %v1423_v7 = vpop.f32.mrf.mxu0  ;;  %v1726_v54 = vadd.f32 %v1725_v47, %v1724_v58 }
 0x198   : > { %v3238_v18 = vadd.f32 %v1452_v51, %v1423_v7  ;;  %v1823_v19 = vpack.c.b16 %v1818_v25, %v1817_v48 }
 0x199   : > { %v1684_v34 = vpop.f32.mrf.mxu2  ;;  %v1713_v17 = vpop.f32.mrf.mxu3  ;;  %v1728_v51 = vadd.f32 %v1727_v9, %v1726_v54 }
 0x19a   : > { %v1468_v10 = vsel %vm486_vm14, %v3238_v18, 0.0  ;;  %v1521_v44 = vpack.c.bf16 %v3238_v18, %v3238_v18  ;;  %1829 = vrot.lane.b32.xlu0 %v1823_v19, %s2497_s28  ;;  %v3255_v62 = vadd.f32 %v1713_v17, %v1684_v34 }
 0x19b   : > { %v1469_v46 = vadd.f32 %v1468_v10, %v1467_v33 }
 0x19c   : > { %v3253_v50 = vunpack.c.l.b16 %v1521_v44  ;;  %v1729_v39 = vsel %vm486_vm14, %v3255_v62, 0.0  ;;  %v1783_v25 = vpack.c.bf16 %v3255_v62, %v3255_v62 }
 0x19d   : > { %v1470_v6 = vrot.slane %v1469_v46, 4  ;;  %v1730_v38 = vadd.f32 %v1729_v39, %v1728_v51 }
 0x19e   : > { %v1804_v11 = vpack.c.b16 %v3253_v50, %v3251_v21  ;;  %v1819_v19 = vunpack.c.l.b16 %v1783_v25 }
 0x19f   : > { %v1471_v36 = vadd.f32 %v1470_v6, %v1469_v46 }
 0x1a1   : > { %v1472_v20 = vrot.slane %v1471_v36, 2  ;;  %v1686_v48 = vpop.f32.mrf.mxu2  ;;  %v1715_v23 = vpop.f32.mrf.mxu3 }
 0x1a2   : > { %v3265_v28 = vadd.f32 %v1715_v23, %v1686_v48 }
 0x1a3   : > { %v1473_v27 = vadd.f32 %v1472_v20, %v1471_v36 }
 0x1a4   : > { %v1731_v52 = vsel %vm486_vm14, %v3265_v28, 0.0  ;;  %v1784_v7 = vpack.c.bf16 %v3265_v28, %v3265_v28 }
 0x1a5   : > { %v1474_v24 = vrot.slane %v1473_v27, 1  ;;  %v1732_v31 = vadd.f32 %v1731_v52, %v1730_v38 }
 0x1a6   : > { %v1820_v4 = vunpack.c.l.b16 %v1784_v7  ;;  %v2499_v7 = vmov 4.0  }
 0x1a7   : > { %v1475_v33 = vadd.f32 %v1474_v24, %v1473_v27  ;;  %v1733_v34 = vrot.slane %v1732_v31, 4  ;;  %2486 = vrcp.f32 %v2499_v7 }
 0x1a8   : > { %v1824_v17 = vpack.c.b16 %v1820_v4, %v1819_v19 }
 0x1a9   : > { %v3272_v49 = vmul.f32 %v1475_v33, %v3097_v42  ;;  %v1734_v47 = vadd.f32 %v1733_v34, %v1732_v31 }
 0x1aa   : > { %1831 = vrot.lane.b32.xlu1 %v1824_v17, %s2497_s28 }
 0x1ab   : > { %v1477_v10 = vsub.f32 %v3185_v15, %v3272_v49  ;;  %v1478_v44 = vsub.f32 %v3174_v16, %v3272_v49  ;;  %v1479_v32 = vsub.f32 %v3190_v13, %v3272_v49  ;;  %v1480_v46 = vsub.f32 %v3199_v29, %v3272_v49 }
 0x1ac   : > { %v1481_v58 = vsub.f32 %v3163_v56, %v3272_v49  ;;  %v1482_v36 = vsub.f32 %v3181_v61, %v3272_v49  ;;  %v1209_v48 = vpop.permute.xlu0 %1208  ;;  %v1483_v56 = vsub.f32 %v3220_v0, %v3272_v49  ;;  %v1735_v61 = vrot.slane %v1734_v47, 2 }
 0x1ad   : > { %v1485_v6 = vmul.f32 %v1477_v10, %v1477_v10  ;;  %v1486_v9 = vmul.f32 %v1478_v44, %v1478_v44  ;;  %v1487_v54 = vmul.f32 %v1479_v32, %v1479_v32  ;;  %v1488_v39 = vmul.f32 %v1480_v46, %v1480_v46 }
 0x1ae   : > { %v1489_v25 = vmul.f32 %v1481_v58, %v1481_v58  ;;  %v1484_v38 = vsub.f32 %v3238_v18, %v3272_v49  ;;  %v1218_v24 = vsel %vm486_vm14, %v1184_v3, %v1209_v48  ;;  %v1490_v31 = vmul.f32 %v1482_v36, %v1482_v36  ;;  %v3314_v58 = vpop.eup %2486 }
 0x1af   : > { %v1493_v51 = vsel %vm486_vm14, %v1485_v6, 0.0  ;;  %v1494_v20 = vsel %vm486_vm14, %v1486_v9, 0.0  ;;  %v1496_v27 = vsel %vm486_vm14, %v1487_v54, 0.0  ;;  %v1498_v0 = vsel %vm486_vm14, %v1488_v39, 0.0  ;;  %1232 = vst [vmem:[%s3293_s26] sm:$0xf] %v1218_v24 }
 0x1b0   : > { %v1495_v23 = vadd.f32 %v1494_v20, %v1493_v51  ;;  %v1736_v19 = vadd.f32 %v1735_v61, %v1734_v47  ;;  %v1234_v4 = vunpack.c.h.b16 %v1218_v24  ;;  %v1491_v33 = vmul.f32 %v1483_v56, %v1483_v56 }
 0x1b1   : > { %v1500_v18 = vsel %vm486_vm14, %v1489_v25, 0.0  ;;  %v1492_v2 = vmul.f32 %v1484_v38, %v1484_v38  ;;  %v1502_v46 = vsel %vm486_vm14, %v1490_v31, 0.0  ;;  %v1896_v56 = vmul.f32 4.0, %v3314_v58 }
 0x1b2   : > { %v1497_v52 = vadd.f32 %v1496_v27, %v1495_v23  ;;  %v1737_v10 = vrot.slane %v1736_v19, 1  ;;  %v1235_v44 = vpack.c.b16 %v1234_v4, %v1234_v4  ;;  %v1504_v54 = vsel %vm486_vm14, %v1491_v33, 0.0 }
 0x1b3   : > { %v1506_v35 = vsel %vm486_vm14, %v1492_v2, 0.0  ;;  %v1884_v7 = vsel %vm1883_vm2, %v3167_v57, %v3272_v49  ;;  %vm1900_vm5 = vweird.f32 %v3314_v58 }
 0x1b4   : > { %v1499_v34 = vadd.f32 %v1498_v0, %v1497_v52  ;;  %v1213_v17 = vpop.permute.xlu2 %1212  ;;  %v1738_v47 = vadd.f32 %v1737_v10, %v1736_v19  ;;  %2176 = vst [vmem:[%s3293_s26 + $0x8] sm:$0xf] %v1235_v44  ;;  %v1897_v0 = vsub.f32 1.0, %v1896_v56 }
 0x1b5   : > { %v1226_v37 = vsel %vm486_vm14, %v1186_v41, %v1213_v17 }
 0x1b6   : > { %v1501_v3 = vadd.f32 %v1500_v18, %v1499_v34  ;;  %2179 = vst [vmem:[%s3293_s26 + $0x20] sm:$0xf] %v1226_v37  ;;  %v1250_v32 = vunpack.c.h.b16 %v1226_v37  ;;  %v1739_v36 = vmul.f32 %v1738_v47, %v3097_v42  ;;  %v1898_v37 = vmul.f32 %v3314_v58, %v1897_v0 }
 0x1b8   : > { %v1503_v6 = vadd.f32 %v1502_v46, %v1501_v3  ;;  %v1251_v9 = vpack.c.b16 %v1250_v32, %v1250_v32  ;;  %v1740_v41 = vsub.f32 %v3123_v8, %v1739_v36  ;;  %v1741_v39 = vsub.f32 %v3133_v30, %v1739_v36 }
 0x1b9   : > { %v1742_v51 = vsub.f32 %v3158_v40, %v1739_v36  ;;  %v1743_v20 = vsub.f32 %v3161_v55, %v1739_v36  ;;  %v1744_v23 = vsub.f32 %v3210_v22, %v1739_v36  ;;  %v1745_v61 = vsub.f32 %v3222_v5, %v1739_v36 }
 0x1ba   : > { %v1505_v26 = vadd.f32 %v1504_v54, %v1503_v6  ;;  %2180 = vst [vmem:[%s3293_s26 + $0x28] sm:$0xf] %v1251_v9  ;;  %v1748_v25 = vmul.f32 %v1740_v41, %v1740_v41  ;;  %v1749_v42 = vmul.f32 %v1741_v39, %v1741_v39  ;;  %v1746_v22 = vsub.f32 %v3255_v62, %v1739_v36 }
 0x1bb   : > { %v1750_v27 = vmul.f32 %v1742_v51, %v1742_v51  ;;  %v1751_v38 = vmul.f32 %v1743_v20, %v1743_v20  ;;  %v1752_v24 = vmul.f32 %v1744_v23, %v1744_v23  ;;  %v1747_v5 = vsub.f32 %v3265_v28, %v1739_v36 }
 0x1bc   : > { %v1507_v48 = vadd.f32 %v1506_v35, %v1505_v26  ;;  %v1756_v8 = vsel %vm486_vm14, %v1748_v25, 0.0  ;;  %v1757_v30 = vsel %vm486_vm14, %v1749_v42, 0.0  ;;  %v1211_v40 = vpop.permute.xlu1 %1210  ;;  %v1886_v4 = vsel %vm1885_vm3, %v1884_v7, %v1739_v36 }
 0x1bd   : > { %v1758_v52 = vadd.f32 %v1757_v30, %v1756_v8  ;;  %v1759_v31 = vsel %vm486_vm14, %v1750_v27, 0.0  ;;  %v1222_v33 = vsel %vm486_vm14, %v1185_v14, %v1211_v40  ;;  %v1753_v34 = vmul.f32 %v1745_v61, %v1745_v61 }
 0x1be   : > { %v1508_v55 = vrot.slane %v1507_v48, 4  ;;  %v1761_v57 = vsel %vm486_vm14, %v1751_v38, 0.0  ;;  %v1888_v62 = vsel %vm1887_vm4, %v1886_v4, 0.0  ;;  %2177 = vst [vmem:[%s3293_s26 + $0x10] sm:$0xf] %v1222_v33  ;;  %v1242_v49 = vunpack.c.h.b16 %v1222_v33 }
 0x1bf   : > { %v1760_v19 = vadd.f32 %v1759_v31, %v1758_v52  ;;  %v1889_v10 = vrot.slane %v1888_v62, 4  ;;  %v1754_v28 = vmul.f32 %v1746_v22, %v1746_v22  ;;  %v1763_v44 = vsel %vm486_vm14, %v1752_v24, 0.0 }
 0x1c0   : > { %v1509_v17 = vadd.f32 %v1508_v55, %v1507_v48  ;;  %v1243_v2 = vpack.c.b16 %v1242_v49, %v1242_v49  ;;  %v1755_v14 = vmul.f32 %v1747_v5, %v1747_v5  ;;  %v1765_v3 = vsel %vm486_vm14, %v1753_v34, 0.0 }
 0x1c1   : > { %v1762_v18 = vadd.f32 %v1761_v57, %v1760_v19  ;;  %v1890_v59 = vadd.f32 %v1889_v10, %v1888_v62  ;;  %v1767_v6 = vsel %vm486_vm14, %v1754_v28, 0.0  ;;  %v1899_v9 = vadd.f32 %v3314_v58, %v1898_v37 }
 0x1c2   : > { %2178 = vst [vmem:[%s3293_s26 + $0x18] sm:$0xf] %v1243_v2  ;;  %v1510_v32 = vrot.slane %v1509_v17, 2  ;;  %v1769_v26 = vsel %vm486_vm14, %v1755_v14, 0.0  ;;  %v805_v61 = vpack.c.bf16 %v3074_v1, %v3074_v1  ;;  %v804_v40 = vpack.c.bf16 %v3062_v43, %v3062_v43 }
 0x1c3   : > { %v1764_v45 = vadd.f32 %v1763_v44, %v1762_v18  ;;  %v1891_v47 = vrot.slane %v1890_v59, 2  ;;  %v1901_v51 = vsel %vm1900_vm5, %v3314_v58, %v1899_v9  ;;  %v1517_v34 = vpack.c.bf16 %v3199_v29, %v3199_v29 }
 0x1c4   : > { %v1511_v35 = vadd.f32 %v1510_v32, %v1509_v17  ;;  %v1183_v52 = vunpack.c.l.b16 %v805_v61  ;;  %v1182_v31 = vunpack.c.l.b16 %v804_v40  ;;  %v1515_v28 = vpack.c.bf16 %v3174_v16, %v3174_v16 }
 0x1c5   : > { %v1766_v46 = vadd.f32 %v1765_v3, %v1764_v45  ;;  %v1892_v36 = vadd.f32 %v1891_v47, %v1890_v59  ;;  %v1796_v18 = vunpack.c.l.b16 %v1517_v34 }
 0x1c6   : > { %v1512_v56 = vrot.slane %v1511_v35, 1  ;;  %v1187_v19 = vpack.c.b16 %v1183_v52, %v1182_v31  ;;  %v1794_v59 = vunpack.c.l.b16 %v1515_v28 }
 0x1c7   : > { %v1768_v54 = vadd.f32 %v1767_v6, %v1766_v46  ;;  %v1893_v39 = vrot.slane %v1892_v36, 1 }
 0x1c8   : > { %v1513_v38 = vadd.f32 %v1512_v56, %v1511_v35 }
 0x1c9   : > { %v1770_v41 = vadd.f32 %v1769_v26, %v1768_v54  ;;  %v1894_v48 = vadd.f32 %v1893_v39, %v1892_v36 }
 0x1ca   : > { %v1904_v22 = vadd.f32 %v3240_v63, %v1513_v38  ;;  %v1516_v63 = vpack.c.bf16 %v3190_v13, %v3190_v13  ;;  %v1514_v13 = vpack.c.bf16 %v3185_v15, %v3185_v15 }
 0x1cb   : > { %v1771_v20 = vrot.slane %v1770_v41, 4  ;;  %v1902_v25 = vmul.f32 %v1901_v51, %v1894_v48 }
 0x1cc   : > { %v1795_v44 = vunpack.c.l.b16 %v1516_v63  ;;  %v1793_v3 = vunpack.c.l.b16 %v1514_v13 }
 0x1cd   : > { %v1772_v23 = vadd.f32 %v1771_v20, %v1770_v41  ;;  %v1906_v27 = vsub.f32 %v1886_v4, %v1902_v25 }
 0x1ce   : > { %v1802_v37 = vpack.c.b16 %v1796_v18, %v1795_v44  ;;  %v1801_v46 = vpack.c.b16 %v1794_v59, %v1793_v3 }
 0x1cf   : > { %v1773_v42 = vrot.slane %v1772_v23, 2  ;;  %v1907_v30 = vmul.f32 %v1906_v27, %v1906_v27 }
 0x1d1   : > { %v1774_v8 = vadd.f32 %v1773_v42, %v1772_v23  ;;  %v1908_v58 = vsel %vm1887_vm4, %v1907_v30, 0.0 }
 0x1d2   : > { %v1909_v7 = vrot.slane %v1908_v58, 4 }
 0x1d3   : > { %v1775_v55 = vrot.slane %v1774_v8, 1 }
 0x1d4   : > { %v1910_v0 = vadd.f32 %v1909_v7, %v1908_v58 }
 0x1d5   : > { %v1776_v24 = vadd.f32 %v1775_v55, %v1774_v8 }
 0x1d6   : > { %v1911_v5 = vrot.slane %v1910_v0, 2 }
 0x1d7   : > { %v1905_v1 = vadd.f32 %v1904_v22, %v1776_v24 }
 0x1d8   : > { %v1912_v33 = vadd.f32 %v1911_v5, %v1910_v0 }
 0x1da   : > { %v1913_v62 = vrot.slane %v1912_v33, 1 }
 0x1dc   : > { %v1215_v4 = vpop.permute.xlu0 %1214  ;;  %v1914_v17 = vadd.f32 %v1913_v62, %v1912_v33 }
 0x1dd   : > { %v1230_v43 = vsel %vm486_vm14, %v1187_v19, %v1215_v4 }
 0x1de   : > { %2181 = vst [vmem:[%s3293_s26 + $0x30] sm:$0xf] %v1230_v43  ;;  %v1258_v57 = vunpack.c.h.b16 %v1230_v43  ;;  %v1915_v10 = vmul.f32 64.0, %v1914_v17 }
 0x1e0   : > { %v1259_v49 = vpack.c.b16 %v1258_v57, %v1258_v57  ;;  %v1916_v29 = vadd.f32 %v1915_v10, %v1905_v1 }
 0x1e2   : > { %2182 = vst [vmem:[%s3293_s26 + $0x38] sm:$0xf] %v1259_v49  ;;  %v1917_v2 = vsel %vm381_vm0, %v1902_v25, %v1916_v29 }
 0x1e3   : > { %1919 = vst.msk [vmem:[%s235_s6] sm:$0x3] %vm1918_vm6, %v1917_v2 }
 0x1e4   : > { %v1828_v45 = vpop.permute.xlu2 %1827 }
 0x1e5   : > { %v1839_v16 = vsel %vm486_vm14, %v1802_v37, %v1828_v45 }
 0x1e6   : > { %2377 = vst [vmem:[%s3293_s26 + $0x14] sm:$0xf] %v1839_v16  ;;  %v1860_v14 = vunpack.c.h.b16 %v1839_v16 }
 0x1e8   : > { %v1861_v32 = vpack.c.b16 %v1860_v14, %v1860_v14 }
 0x1ea   : > { %2378 = vst [vmem:[%s3293_s26 + $0x1c] sm:$0xf] %v1861_v32 }
 0x1ec   : > { %v1826_v47 = vpop.permute.xlu1 %1825 }
 0x1ed   : > { %v1835_v15 = vsel %vm486_vm14, %v1801_v46, %v1826_v47 }
 0x1ee   : > { %2375 = vst [vmem:[%s3293_s26 + $0x4] sm:$0xf] %v1835_v15  ;;  %v1852_v6 = vunpack.c.h.b16 %v1835_v15 }
 0x1f0   : > { %v1853_v9 = vpack.c.b16 %v1852_v6, %v1852_v6 }
 0x1f2   : > { %2376 = vst [vmem:[%s3293_s26 + $0xc] sm:$0xf] %v1853_v9 }
 0x20c   : > { %v1830_v54 = vpop.permute.xlu0 %1829 }
 0x20d   : > { %v1843_v36 = vsel %vm486_vm14, %v1803_v53, %v1830_v54 }
 0x20e   : > { %2379 = vst [vmem:[%s3293_s26 + $0x24] sm:$0xf] %v1843_v36  ;;  %v1868_v26 = vunpack.c.h.b16 %v1843_v36 }
 0x210   : > { %v1869_v35 = vpack.c.b16 %v1868_v26, %v1868_v26 }
 0x212   : > { %2380 = vst [vmem:[%s3293_s26 + $0x2c] sm:$0xf] %v1869_v35 }
 0x21c   : > { %v1832_v41 = vpop.permute.xlu1 %1831 }
 0x21d   : > { %v1847_v39 = vsel %vm486_vm14, %v1804_v11, %v1832_v41 }
 0x21e   : > { %2381 = vst [vmem:[%s3293_s26 + $0x34] sm:$0xf] %v1847_v39  ;;  %v1876_v51 = vunpack.c.h.b16 %v1847_v39 }
 0x220   : > { %v1877_v20 = vpack.c.b16 %v1876_v51, %v1876_v51 }
 0x222   : > { %2382 = vst [vmem:[%s3293_s26 + $0x3c] sm:$0xf] %v1877_v20 }
 0x223 PF: > { %s16_s18 = sadd.s32 1, %s2494_s18  }
 0x224   : > { %p13_p4 = scmp.ge.s32.totalorder %s16_s18, 4  }
 0x226   :  { %15 = sbr.rel (!%p13_p4) target bundleno = 1 (0x1), region = 96 }

// kernel: cnn_decoder_forward.9
= control target key start
LH: loop header
LB: loop body
LE: loop exit
PB: predicated region body
PF: predicated region fallthrough
CT: control target
= control target key end

     0   :  { %s4529_s15 = smov 0   ;;  %s5914_s0 = inlined_call_operand.vmem [shape: bf16[2,16,16,64], index: 0, kind: input, shape index: {}]   ;;  %s5915_s1 = inlined_call_operand.vmem [shape: bf16[4,256,128], index: 1, kind: input, shape index: {}]   ;;  %s5916_s2 = inlined_call_operand.vmem [shape: f32[1,64], index: 2, kind: input, shape index: {}]   ;;  %s5917_s3 = inlined_call_operand.vmem [shape: f32[1,64], index: 3, kind: input, shape index: {}]   ;;  %s5918_s4 = inlined_call_operand.vmem [shape: bf16[2,16,2,16,6], index: 4, kind: output, shape index: {}]  }
   0x1 LB: > { %s3652_s16 = sadd.s32 4294967295, %s4499_s15   ;;  %p3656_p0 = scmp.ge.s32.totalorder %s4499_s15, 1  ;;  %s4499_s15 = sphi %s4529_s15, %s14_s15  }
   0x2   : > { %p162_p1 = scmp.lt.s32.totalorder %s4499_s15, 3 }
   0x4   : > { %p163_p2 = pnand %p3656_p0, %p162_p1 }
   0x6   : > { %166 = sbr.rel (%p163_p2) target bundleno = 926 (0x39e), region = 36 }
   0xb   : > { %vm696_vm0 = vcmask 1040384   ;;  %vm697_vm1 = vsmask.f32 256  ;;  %v4501_v0 = vmov 0   ;;  %p188_p3 = scmp.lt.s32.totalorder %s3652_s16, 1  ;;  %s4502_s18 = smov 64  }
   0xc   : > { %v546_v1 = vrot.slane %v4501_v0, 7  ;;  %vm4537_vm2 = vmand %vm696_vm0, %vm697_vm1  ;;  %v4565_v11 = vld [vmem:[%s5916_s2] ss:$0 sm:$0xff]  ;;  %vm733_vm3 = vsmask.f32 7424  ;;  %v4130_v2 = vld [vmem:[%s5915_s1 + $0x198] sm:$0xff] }
   0xd   : > { %s5968_s16 = smov (!%p188_p3, %s3652_s16), 1  ;;  %v4573_v18 = vld [vmem:[%s5917_s3] ss:$0 sm:$0xff]  ;;  %s4503_s14 = smov 3  }
   0xe   : > { %v4543_v3 = vsel %vm4537_vm2, 0, %v546_v1  ;;  %v4547_v4 = vsel %vm4537_vm2, %v546_v1, 0  ;;  %s4077_s17 = sshll.u32 %s5968_s16, 7  ;;  %s4078_s23 = sshll.u32 %s5968_s16, 8 }
   0xf   : > { %v735_v5 = vshrl.u32 %v4543_v3, 16  ;;  %v737_v6 = vshll.u32 %v4543_v3, 16  ;;  %v742_v7 = vshll.u32 %v4547_v4, 16  ;;  %v1394_v8 = vshrl.u32 %v4547_v4, 16  ;;  %s4560_s21 = scalar_lea.vmem %s5914_s0, %s4077_s17  ;;  %s5430_s26 = scalar_lea.vmem %s5918_s4, %s4078_s23 }
  0x10   : > { %v4144_v12 = vld [vmem:[%s4560_s21] sm:$0xff]   ;;  %v4207_v13 = vld [vmem:[%s4560_s21 + $0x8] sm:$0xff]   ;;  %v4208_v14 = vld [vmem:[%s4560_s21 + $0x10] sm:$0xff]  }
  0x11   : > { %v739_v9 = vrot.slane %v737_v6, 1  ;;  %v744_v10 = vrot.slane %v742_v7, 1  ;;  %1426 = vrot.lane.b32.xlu1 %v1394_v8, %s4502_s18  ;;  %v4145_v16 = vunpack.c.l.bf16 %v4144_v12  ;;  %v4146_v17 = vunpack.c.h.bf16 %v4144_v12  ;;  %v4209_v42 = vld [vmem:[%s4560_s21 + $0x18] sm:$0xff]   ;;  %v4210_v63 = vld [vmem:[%s4560_s21 + $0x20] sm:$0xff]  }
  0x12   : > { %v4149_v19 = vunpack.c.l.bf16 %v4207_v13  ;;  %v4150_v20 = vunpack.c.h.bf16 %v4207_v13  ;;  %v4153_v21 = vunpack.c.l.bf16 %v4208_v14  ;;  %v4154_v22 = vunpack.c.h.bf16 %v4208_v14 }
  0x13   : > { %v740_v15 = vor.u32 %v739_v9, %v735_v5  ;;  %v267_v24 = vmul.f32 %v4565_v11, %v4145_v16  ;;  %v268_v25 = vmul.f32 %v4565_v11, %v4146_v17  ;;  %v4157_v53 = vunpack.c.l.bf16 %v4209_v42 }
  0x14   : > { %v269_v26 = vmul.f32 %v4565_v11, %v4149_v19  ;;  %v270_v27 = vmul.f32 %v4565_v11, %v4150_v20  ;;  %v271_v28 = vmul.f32 %v4565_v11, %v4153_v21  ;;  %v272_v29 = vmul.f32 %v4565_v11, %v4154_v22 }
  0x15   : > { %v745_v23 = vsel %vm733_vm3, %v740_v15, %v744_v10  ;;  %v303_v30 = vadd.f32 %v4573_v18, %v267_v24  ;;  %v304_v31 = vadd.f32 %v4573_v18, %v268_v25  ;;  %v4158_v54 = vunpack.c.h.bf16 %v4209_v42 }
  0x16   : > { %926 = vrot.lane.b32.xlu0 %v745_v23, %s4502_s18  ;;  %v305_v32 = vadd.f32 %v4573_v18, %v269_v26  ;;  %v306_v33 = vadd.f32 %v4573_v18, %v270_v27  ;;  %v307_v34 = vadd.f32 %v4573_v18, %v271_v28  ;;  %v308_v35 = vadd.f32 %v4573_v18, %v272_v29 }
  0x17   : > { %vm335_vm4 = vcmp.ge.f32.partialorder %v303_v30, 0.0  ;;  %vm336_vm5 = vcmp.ge.f32.partialorder %v304_v31, 0.0  ;;  %v367_v36 = vmul.f32 0.05, %v303_v30  ;;  %v368_v37 = vmul.f32 0.05, %v304_v31 }
  0x18   : > { %vm337_vm6 = vcmp.ge.f32.partialorder %v305_v32, 0.0  ;;  %vm338_vm7 = vcmp.ge.f32.partialorder %v306_v33, 0.0  ;;  %v369_v38 = vmul.f32 0.05, %v305_v32  ;;  %v370_v39 = vmul.f32 0.05, %v306_v33 }
  0x19   : > { %v399_v40 = vsel %vm335_vm4, %v303_v30, %v367_v36  ;;  %v400_v41 = vsel %vm336_vm5, %v304_v31, %v368_v37  ;;  %vm339_vm8 = vcmp.ge.f32.partialorder %v307_v34, 0.0  ;;  %vm340_vm9 = vcmp.ge.f32.partialorder %v308_v35, 0.0 }
  0x1a   : > { %v431_v43 = vpack.c.bf16 %v399_v40, %v399_v40  ;;  %v432_v44 = vpack.c.bf16 %v400_v41, %v400_v41  ;;  %v401_v45 = vsel %vm337_vm6, %v305_v32, %v369_v38  ;;  %v402_v46 = vsel %vm338_vm7, %v306_v33, %v370_v39  ;;  %v4086_v38 = vld [vmem:[%s5915_s1 + $0x38] sm:$0xff] }
  0x1b   : > { %v433_v47 = vpack.c.bf16 %v401_v45, %v401_v45  ;;  %v434_v48 = vpack.c.bf16 %v402_v46, %v402_v46  ;;  %v371_v49 = vmul.f32 0.05, %v307_v34  ;;  %v372_v50 = vmul.f32 0.05, %v308_v35  ;;  %1152 = vmatpush.bf16.msra.mxu0 %v4086_v38  ;;  %v4093_v38 = vld [vmem:[%s5915_s1 + $0x70] sm:$0xff] }
  0x1c   : > { %v495_v51 = vunpack.c.l.b16 %v431_v43  ;;  %v496_v52 = vunpack.c.l.b16 %v432_v44  ;;  %v273_v62 = vmul.f32 %v4565_v11, %v4157_v53  ;;  %v274_v1 = vmul.f32 %v4565_v11, %v4158_v54  ;;  %v4102_v43 = vld [vmem:[%s5915_s1 + $0xb8] sm:$0xff]  ;;  %v4101_v53 = vld [vmem:[%s5915_s1 + $0xb0] sm:$0xff] }
  0x1d   : > { %v497_v55 = vunpack.c.l.b16 %v433_v47  ;;  %v498_v56 = vunpack.c.l.b16 %v434_v48  ;;  %v403_v57 = vsel %vm339_vm8, %v307_v34, %v371_v49  ;;  %v404_v58 = vsel %vm340_vm9, %v308_v35, %v372_v50  ;;  %v4085_v48 = vld [vmem:[%s5915_s1 + $0x30] sm:$0xff]  ;;  %1812 = vmatpush.bf16.msra.mxu2 %v4102_v43 }
  0x1e   : > { %v527_v59 = vpack.c.b16 %v496_v52, %v495_v51  ;;  %v435_v60 = vpack.c.bf16 %v403_v57, %v403_v57  ;;  %v436_v61 = vpack.c.bf16 %v404_v58, %v404_v58  ;;  %v4161_v5 = vunpack.c.l.bf16 %v4210_v63  ;;  %v4211_v58 = vld [vmem:[%s4560_s21 + $0x28] sm:$0xff]  }
  0x1f   : > { %v528_v0 = vpack.c.b16 %v498_v56, %v497_v55  ;;  %v4162_v6 = vunpack.c.h.bf16 %v4210_v63  ;;  %v309_v14 = vadd.f32 %v4573_v18, %v273_v62  ;;  %v310_v17 = vadd.f32 %v4573_v18, %v274_v1  ;;  %1153 = vmatpush.bf16.msra.mxu0 %v4085_v48 }
  0x20   : > { %v551_v7 = vshrl.u32 %v527_v59, 16  ;;  %v554_v8 = vshll.u32 %v527_v59, 16  ;;  %v499_v9 = vunpack.c.l.b16 %v435_v60  ;;  %v500_v10 = vunpack.c.l.b16 %v436_v61 }
  0x21   : > { %v558_v12 = vshrl.u32 %v528_v0, 16  ;;  %v561_v13 = vshll.u32 %v528_v0, 16  ;;  %v275_v19 = vmul.f32 %v4565_v11, %v4161_v5  ;;  %vm341_vm10 = vcmp.ge.f32.partialorder %v309_v14, 0.0  ;;  %1813 = vmatpush.bf16.msra.mxu2 %v4101_v53  ;;  %v4092_v53 = vld [vmem:[%s5915_s1 + $0x68] sm:$0xff] }
  0x22   : > { %v553_v15 = vrot.slane %v551_v7, 7  ;;  %v529_v16 = vpack.c.b16 %v500_v10, %v499_v9  ;;  %v373_v21 = vmul.f32 0.05, %v309_v14  ;;  %v276_v22 = vmul.f32 %v4565_v11, %v4162_v6  ;;  %v4084_v6 = vld [vmem:[%s5915_s1 + $0x28] sm:$0xff] }
  0x23   : > { %v560_v20 = vrot.slane %v558_v12, 7  ;;  %vm342_vm11 = vcmp.ge.f32.partialorder %v310_v17, 0.0  ;;  %v374_v46 = vmul.f32 0.05, %v310_v17  ;;  %v311_v1 = vadd.f32 %v4573_v18, %v275_v19  ;;  %1154 = vmatpush.bf16.msra.mxu0 %v4084_v6 }
  0x24   : > { %v556_v23 = vor.u32 %v554_v8, %v553_v15  ;;  %v4601_v24 = vsel %vm4537_vm2, %v553_v15, 0  ;;  %v565_v25 = vshrl.u32 %v529_v16, 16  ;;  %v568_v26 = vshll.u32 %v529_v16, 16 }
  0x25   : > { %v754_v27 = vshll.u32 %v4601_v24, 16  ;;  %v1396_v28 = vshrl.u32 %v4601_v24, 16  ;;  %v563_v29 = vor.u32 %v561_v13, %v560_v20  ;;  %v4607_v30 = vsel %vm4537_vm2, %v560_v20, 0  ;;  %v4094_v20 = vld [vmem:[%s5915_s1 + $0x78] sm:$0xff] }
  0x26   : > { %v4611_v31 = vsel %vm4537_vm2, 0, %v556_v23  ;;  %v766_v32 = vshll.u32 %v4607_v30, 16  ;;  %v567_v33 = vrot.slane %v565_v25, 7  ;;  %v405_v47 = vsel %vm341_vm10, %v309_v14, %v373_v21  ;;  %v4100_v14 = vld [vmem:[%s5915_s1 + $0xa8] sm:$0xff]  ;;  %v4083_v23 = vld [vmem:[%s5915_s1 + $0x20] sm:$0xff]  ;;  %1241 = vmatpush.bf16.msra.mxu1 %v4094_v20 }
  0x27   : > { %v747_v34 = vshrl.u32 %v4611_v31, 16  ;;  %v749_v35 = vshll.u32 %v4611_v31, 16  ;;  %v756_v36 = vrot.slane %v754_v27, 1  ;;  %1428 = vrot.lane.b32.xlu1 %v1396_v28, %s4502_s18  ;;  %v4619_v37 = vsel %vm4537_vm2, 0, %v563_v29  ;;  %1814 = vmatpush.bf16.msra.mxu2 %v4100_v14  ;;  %v4099_v29 = vld [vmem:[%s5915_s1 + $0xa0] sm:$0xff] }
  0x28   : > { %v759_v39 = vshrl.u32 %v4619_v37, 16  ;;  %v761_v40 = vshll.u32 %v4619_v37, 16  ;;  %v768_v41 = vrot.slane %v766_v32, 1  ;;  %v570_v42 = vor.u32 %v568_v26, %v567_v33  ;;  %v4110_v32 = vld [vmem:[%s5915_s1 + $0xf8] sm:$0xff]  ;;  %1155 = vmatpush.bf16.msra.mxu0 %v4083_v23 }
  0x29   : > { %v751_v44 = vrot.slane %v749_v35, 1  ;;  %v4631_v45 = vsel %vm4537_vm2, %v567_v33, 0  ;;  %v406_v57 = vsel %vm342_vm11, %v310_v17, %v374_v46  ;;  %v437_v61 = vpack.c.bf16 %v405_v47, %v405_v47  ;;  %1901 = vmatpush.bf16.msra.mxu3 %v4110_v32  ;;  %v4082_v46 = vld [vmem:[%s5915_s1 + $0x18] sm:$0xff] }
  0x2a   : > { %v763_v49 = vrot.slane %v761_v40, 1  ;;  %v4639_v50 = vsel %vm4537_vm2, 0, %v570_v42  ;;  %v778_v51 = vshll.u32 %v4631_v45, 16  ;;  %v1400_v52 = vshrl.u32 %v4631_v45, 16  ;;  %1242 = vmatpush.bf16.msra.mxu1 %v4093_v38 }
  0x2b   : > { %v752_v54 = vor.u32 %v751_v44, %v747_v34  ;;  %v771_v55 = vshrl.u32 %v4639_v50, 16  ;;  %v773_v56 = vshll.u32 %v4639_v50, 16  ;;  %v438_v62 = vpack.c.bf16 %v406_v57, %v406_v57  ;;  %1815 = vmatpush.bf16.msra.mxu2 %v4099_v29 }
  0x2c   : > { %v764_v59 = vor.u32 %v763_v49, %v759_v39  ;;  %v780_v60 = vrot.slane %v778_v51, 1  ;;  %v312_v5 = vadd.f32 %v4573_v18, %v276_v22  ;;  %v501_v8 = vunpack.c.l.b16 %v437_v61  ;;  %v4098_v49 = vld [vmem:[%s5915_s1 + $0x98] sm:$0xff]  ;;  %1156 = vmatpush.bf16.msra.mxu0 %v4082_v46  ;;  %v4081_v61 = vld [vmem:[%s5915_s1 + $0x10] sm:$0xff] }
  0x2d   : > { %v757_v63 = vsel %vm733_vm3, %v752_v54, %v756_v36  ;;  %v775_v0 = vrot.slane %v773_v56, 1  ;;  %v502_v9 = vunpack.c.l.b16 %v438_v62  ;;  %v4165_v10 = vunpack.c.l.bf16 %v4211_v58 }
  0x2e   : > { %928 = vrot.lane.b32.xlu0 %v757_v63, %s4502_s18  ;;  %v769_v7 = vsel %vm733_vm3, %v764_v59, %v768_v41  ;;  %vm343_vm12 = vcmp.ge.f32.partialorder %v311_v1, 0.0  ;;  %vm344_vm13 = vcmp.ge.f32.partialorder %v312_v5, 0.0  ;;  %v375_v13 = vmul.f32 0.05, %v311_v1  ;;  %v4109_v41 = vld [vmem:[%s5915_s1 + $0xf0] sm:$0xff]  ;;  %1243 = vmatpush.bf16.msra.mxu1 %v4092_v53 }
  0x2f   : > { %930 = vrot.lane.b32.xlu2 %v769_v7, %s4502_s18  ;;  %v776_v12 = vor.u32 %v775_v0, %v771_v55  ;;  %1432 = vrot.lane.b32.xlu1 %v1400_v52, %s4502_s18  ;;  %v530_v15 = vpack.c.b16 %v502_v9, %v501_v8  ;;  %v376_v16 = vmul.f32 0.05, %v312_v5  ;;  %v4166_v17 = vunpack.c.h.bf16 %v4211_v58 }
  0x30   : > { %v277_v19 = vmul.f32 %v4565_v11, %v4165_v10  ;;  %v1398_v21 = vshrl.u32 %v4607_v30, 16  ;;  %v407_v22 = vsel %vm343_vm12, %v311_v1, %v375_v13  ;;  %1902 = vmatpush.bf16.msra.mxu3 %v4109_v41  ;;  %1816 = vmatpush.bf16.msra.mxu2 %v4098_v49  ;;  %v4097_v1 = vld [vmem:[%s5915_s1 + $0x90] sm:$0xff]  ;;  %vm972_vm8 = vcmask 523264  }
  0x31   : > { %v572_v25 = vshrl.u32 %v530_v15, 16  ;;  %v575_v26 = vshll.u32 %v530_v15, 16  ;;  %v408_v27 = vsel %vm344_vm13, %v312_v5, %v376_v16  ;;  %v439_v28 = vpack.c.bf16 %v407_v22, %v407_v22  ;;  %1157 = vmatpush.bf16.msra.mxu0 %v4081_v61  ;;  %v4080_v15 = vld [vmem:[%s5915_s1 + $0x8] sm:$0xff] }
  0x32   : > { %v781_v33 = vsel %vm733_vm3, %v776_v12, %v780_v60  ;;  %v440_v34 = vpack.c.bf16 %v408_v27, %v408_v27  ;;  %v278_v35 = vmul.f32 %v4565_v11, %v4166_v17  ;;  %v313_v36 = vadd.f32 %v4573_v18, %v277_v19 }
  0x33   : > { %v574_v39 = vrot.slane %v572_v25, 7  ;;  %v503_v40 = vunpack.c.l.b16 %v439_v28 }
  0x34   : > { %v504_v42 = vunpack.c.l.b16 %v440_v34  ;;  %v314_v43 = vadd.f32 %v4573_v18, %v278_v35  ;;  %vm345_vm14 = vcmp.ge.f32.partialorder %v313_v36, 0.0  ;;  %v377_v44 = vmul.f32 0.05, %v313_v36  ;;  %1817 = vmatpush.bf16.msra.mxu2 %v4097_v1 }
  0x35   : > { %v577_v47 = vor.u32 %v575_v26, %v574_v39  ;;  %v4693_v48 = vsel %vm4537_vm2, %v574_v39, 0  ;;  %1158 = vmatpush.bf16.msra.mxu0 %v4080_v15 }
  0x36   : > { %932 = vrot.lane.b32.xlu0 %v781_v33, %s4502_s18  ;;  %v531_v51 = vpack.c.b16 %v504_v42, %v503_v40  ;;  %v790_v52 = vshll.u32 %v4693_v48, 16  ;;  %vm346_vm15 = vcmp.ge.f32.partialorder %v314_v43, 0.0  ;;  %v378_v55 = vmul.f32 0.05, %v314_v43 }
  0x37   : > { %1430 = vrot.lane.b32.xlu2 %v1398_v21, %s4502_s18  ;;  %v4705_v54 = vsel %vm4537_vm2, 0, %v577_v47  ;;  %v409_v56 = vsel %vm345_vm14, %v313_v36, %v377_v44  ;;  %v1402_v62 = vshrl.u32 %v4693_v48, 16  ;;  %v4212_v47 = vld [vmem:[%s4560_s21 + $0x30] sm:$0xff]  }
  0x38   : > { %v579_v57 = vshrl.u32 %v531_v51, 16  ;;  %v582_v58 = vshll.u32 %v531_v51, 16  ;;  %v783_v59 = vshrl.u32 %v4705_v54, 16  ;;  %v785_v60 = vshll.u32 %v4705_v54, 16 }
  0x39   : > { %v410_v63 = vsel %vm346_vm15, %v314_v43, %v378_v55  ;;  %v441_v0 = vpack.c.bf16 %v409_v56, %v409_v56  ;;  %v792_v7 = vrot.slane %v790_v52, 1  ;;  %v4169_v49 = vunpack.c.l.bf16 %v4212_v47 }
  0x3a   : > { %v581_v5 = vrot.slane %v579_v57, 7  ;;  %v787_v6 = vrot.slane %v785_v60, 1  ;;  %v442_v8 = vpack.c.bf16 %v410_v63, %v410_v63  ;;  %v4170_v51 = vunpack.c.h.bf16 %v4212_v47 }
  0x3b   : > { %v505_v9 = vunpack.c.l.b16 %v441_v0  ;;  %v279_v52 = vmul.f32 %v4565_v11, %v4169_v49  ;;  %v4089_v49 = vld [vmem:[%s5915_s1 + $0x50] sm:$0xff] }
  0x3c   : > { %v584_v10 = vor.u32 %v582_v58, %v581_v5  ;;  %v4719_v12 = vsel %vm4537_vm2, %v581_v5, 0  ;;  %v788_v13 = vor.u32 %v787_v6, %v783_v59  ;;  %v506_v14 = vunpack.c.l.b16 %v442_v8  ;;  %v4213_v59 = vld [vmem:[%s4560_s21 + $0x38] sm:$0xff]  }
  0x3d   : > { %v802_v16 = vshll.u32 %v4719_v12, 16  ;;  %v1404_v32 = vshrl.u32 %v4719_v12, 16  ;;  %v280_v53 = vmul.f32 %v4565_v11, %v4170_v51  ;;  %v315_v55 = vadd.f32 %v4573_v18, %v279_v52  ;;  %v4106_v52 = vld [vmem:[%s5915_s1 + $0xd8] sm:$0xff] }
  0x3e   : > { %1434 = vrot.lane.b32.xlu0 %v1402_v62, %s4502_s18  ;;  %v4728_v17 = vsel %vm4537_vm2, 0, %v584_v10  ;;  %v793_v19 = vsel %vm733_vm3, %v788_v13, %v792_v7  ;;  %v532_v20 = vpack.c.b16 %v506_v14, %v505_v9  ;;  %v4173_v60 = vunpack.c.l.bf16 %v4213_v59 }
  0x3f   : > { %v795_v21 = vshrl.u32 %v4728_v17, 16  ;;  %v797_v22 = vshll.u32 %v4728_v17, 16  ;;  %934 = vrot.lane.b32.xlu2 %v793_v19, %s4502_s18  ;;  %v804_v27 = vrot.slane %v802_v16, 1  ;;  %v316_v56 = vadd.f32 %v4573_v18, %v280_v53 }
  0x40   : > { %v586_v23 = vshrl.u32 %v532_v20, 16  ;;  %v589_v25 = vshll.u32 %v532_v20, 16  ;;  %v379_v57 = vmul.f32 0.05, %v315_v55  ;;  %vm347_vm0 = vcmp.ge.f32.partialorder %v315_v55, 0.0 }
  0x41   : > { %v799_v26 = vrot.slane %v797_v22, 1  ;;  %v380_v58 = vmul.f32 0.05, %v316_v56  ;;  %vm348_vm1 = vcmp.ge.f32.partialorder %v316_v56, 0.0  ;;  %v4174_v61 = vunpack.c.h.bf16 %v4213_v59 }
  0x42   : > { %v588_v28 = vrot.slane %v586_v23, 7  ;;  %v411_v62 = vsel %vm347_vm0, %v315_v55, %v379_v57  ;;  %v281_v5 = vmul.f32 %v4565_v11, %v4173_v60 }
  0x43   : > { %v800_v29 = vor.u32 %v799_v26, %v795_v21  ;;  %v412_v63 = vsel %vm348_vm1, %v316_v56, %v380_v58  ;;  %v443_v0 = vpack.c.bf16 %v411_v62, %v411_v62  ;;  %v282_v6 = vmul.f32 %v4565_v11, %v4174_v61  ;;  %v4091_v26 = vld [vmem:[%s5915_s1 + $0x60] sm:$0xff]  ;;  %v4088_v62 = vld [vmem:[%s5915_s1 + $0x48] sm:$0xff] }
  0x44   : > { %v591_v33 = vor.u32 %v589_v25, %v588_v28  ;;  %v4737_v34 = vsel %vm4537_vm2, %v588_v28, 0  ;;  %v444_v1 = vpack.c.bf16 %v412_v63, %v412_v63  ;;  %v317_v9 = vadd.f32 %v4573_v18, %v281_v5  ;;  %v4079_v25 = vld [vmem:[%s5915_s1] sm:$0xff]  ;;  %1244 = vmatpush.bf16.msra.mxu1 %v4091_v26  ;;  %v4105_v5 = vld [vmem:[%s5915_s1 + $0xd0] sm:$0xff] }
  0x45   : > { %v805_v35 = vsel %vm733_vm3, %v800_v29, %v804_v27  ;;  %v814_v36 = vshll.u32 %v4737_v34, 16  ;;  %v1406_v43 = vshrl.u32 %v4737_v34, 16  ;;  %v507_v7 = vunpack.c.l.b16 %v443_v0  ;;  %v4096_v27 = vld [vmem:[%s5915_s1 + $0x88] sm:$0xff]  ;;  %1159 = vmatpush.bf16.msra.mxu0 %v4079_v25 }
  0x46   : > { %936 = vrot.lane.b32.xlu1 %v805_v35, %s4502_s18  ;;  %v4744_v38 = vsel %vm4537_vm2, 0, %v591_v33  ;;  %v508_v8 = vunpack.c.l.b16 %v444_v1  ;;  %v318_v10 = vadd.f32 %v4573_v18, %v282_v6  ;;  %v381_v14 = vmul.f32 0.05, %v317_v9  ;;  %v4108_v33 = vld [vmem:[%s5915_s1 + $0xe8] sm:$0xff]  ;;  %1818 = vmatpush.bf16.msra.mxu2 %v4096_v27 }
  0x47   : > { %v807_v39 = vshrl.u32 %v4744_v38, 16  ;;  %v809_v40 = vshll.u32 %v4744_v38, 16  ;;  %1436 = vrot.lane.b32.xlu2 %v1404_v32, %s4502_s18  ;;  %v816_v42 = vrot.slane %v814_v36, 1  ;;  %vm349_vm4 = vcmp.ge.f32.partialorder %v317_v9, 0.0  ;;  %v4090_v36 = vld [vmem:[%s5915_s1 + $0x58] sm:$0xff]  ;;  %1903 = vmatpush.bf16.msra.mxu3 %v4108_v33 }
  0x48   : > { %v533_v13 = vpack.c.b16 %v508_v8, %v507_v7  ;;  %v382_v15 = vmul.f32 0.05, %v318_v10  ;;  %vm350_vm5 = vcmp.ge.f32.partialorder %v318_v10, 0.0  ;;  %v413_v19 = vsel %vm349_vm4, %v317_v9, %v381_v14  ;;  %1245 = vmatpush.bf16.msra.mxu1 %v4090_v36  ;;  %v4087_v14 = vld [vmem:[%s5915_s1 + $0x40] sm:$0xff]  ;;  %v4104_v36 = vld [vmem:[%s5915_s1 + $0xc8] sm:$0xff] }
  0x49   : > { %v811_v41 = vrot.slane %v809_v40, 1  ;;  %v445_v21 = vpack.c.bf16 %v413_v19, %v413_v19  ;;  %v4095_v40 = vld [vmem:[%s5915_s1 + $0x80] sm:$0xff] }
  0x4a   : > { %v593_v16 = vshrl.u32 %v533_v13, 16  ;;  %v414_v20 = vsel %vm350_vm5, %v318_v10, %v382_v15  ;;  %1819 = vmatpush.bf16.msra.mxu2 %v4095_v40  ;;  %v596_v61 = vshll.u32 %v533_v13, 16 }
  0x4b   : > { %v812_v44 = vor.u32 %v811_v41, %v807_v39  ;;  %v446_v22 = vpack.c.bf16 %v414_v20, %v414_v20  ;;  %v509_v28 = vunpack.c.l.b16 %v445_v21  ;;  %v4107_v41 = vld [vmem:[%s5915_s1 + $0xe0] sm:$0xff] }
  0x4c   : > { %v595_v23 = vrot.slane %v593_v16, 7  ;;  %1904 = vmatpush.bf16.msra.mxu3 %v4107_v41  ;;  %1246 = vmatpush.bf16.msra.mxu1 %v4089_v49 }
  0x4d   : > { %v817_v46 = vsel %vm733_vm3, %v812_v44, %v816_v42  ;;  %v510_v29 = vunpack.c.l.b16 %v446_v22 }
  0x4e   : > { %938 = vrot.lane.b32.xlu0 %v817_v46, %s4502_s18  ;;  %1438 = vrot.lane.b32.xlu1 %v1406_v43, %s4502_s18  ;;  %v4774_v32 = vsel %vm4537_vm2, %v595_v23, 0  ;;  %v4214_v43 = vld [vmem:[%s4560_s21 + $0x40] sm:$0xff]   ;;  %v598_v13 = vor.u32 %v596_v61, %v595_v23 }
  0x4f   : > { %v1408_v35 = vshrl.u32 %v4774_v32, 16  ;;  %v534_v39 = vpack.c.b16 %v510_v29, %v509_v28  ;;  %v4177_v46 = vunpack.c.l.bf16 %v4214_v43  ;;  %v4178_v47 = vunpack.c.h.bf16 %v4214_v43 }
  0x50   : > { %1905 = vmatpush.bf16.msra.mxu3 %v4106_v52  ;;  %1247 = vmatpush.bf16.msra.mxu1 %v4088_v62  ;;  %v4825_v23 = vsel %vm4537_vm2, 0, %v598_v13  ;;  %v826_v33 = vshll.u32 %v4774_v32, 16 }
  0x51   : > { %v600_v42 = vshrl.u32 %v534_v39, 16  ;;  %v603_v44 = vshll.u32 %v534_v39, 16  ;;  %v283_v53 = vmul.f32 %v4565_v11, %v4177_v46  ;;  %v284_v55 = vmul.f32 %v4565_v11, %v4178_v47 }
  0x52   : > { %v821_v26 = vshll.u32 %v4825_v23, 16  ;;  %v819_v28 = vshrl.u32 %v4825_v23, 16 }
  0x53   : > { %v602_v51 = vrot.slane %v600_v42, 7  ;;  %v319_v59 = vadd.f32 %v4573_v18, %v283_v53  ;;  %v320_v60 = vadd.f32 %v4573_v18, %v284_v55  ;;  %v828_v42 = vrot.slane %v826_v33, 1 }
  0x54   : > { %1906 = vmatpush.bf16.msra.mxu3 %v4105_v5  ;;  %1248 = vmatpush.bf16.msra.mxu1 %v4087_v14  ;;  %v823_v29 = vrot.slane %v821_v26, 1  ;;  %v4134_v5 = vld [vmem:[%s5915_s1 + $0x1b8] sm:$0xff]  ;;  %v4216_v26 = vld [vmem:[%s4560_s21 + $0x50] sm:$0xff]  }
  0x55   : > { %v605_v56 = vor.u32 %v603_v44, %v602_v51  ;;  %v4801_v57 = vsel %vm4537_vm2, %v602_v51, 0  ;;  %v383_v6 = vmul.f32 0.05, %v319_v59  ;;  %vm351_vm6 = vcmp.ge.f32.partialorder %v319_v59, 0.0  ;;  %v4103_v44 = vld [vmem:[%s5915_s1 + $0xc0] sm:$0xff]  ;;  %2955 = vmatpush.bf16.msrb.mxu2 %v4134_v5 }
  0x56   : > { %1440 = vrot.lane.b32.xlu0 %v1408_v35, %s4502_s18  ;;  %v838_v58 = vshll.u32 %v4801_v57, 16  ;;  %vm352_vm7 = vcmp.ge.f32.partialorder %v320_v60, 0.0  ;;  %v384_v7 = vmul.f32 0.05, %v320_v60  ;;  %v824_v41 = vor.u32 %v823_v29, %v819_v28 }
  0x57   : > { %v4811_v63 = vsel %vm4537_vm2, 0, %v605_v56  ;;  %v415_v10 = vsel %vm351_vm6, %v319_v59, %v383_v6  ;;  %v4185_v29 = vunpack.c.l.bf16 %v4216_v26  ;;  %v4186_v33 = vunpack.c.h.bf16 %v4216_v26 }
  0x58   : > { %v831_v0 = vshrl.u32 %v4811_v63, 16  ;;  %v833_v1 = vshll.u32 %v4811_v63, 16  ;;  %v840_v9 = vrot.slane %v838_v58, 1  ;;  %v416_v15 = vsel %vm352_vm7, %v320_v60, %v384_v7  ;;  %1907 = vmatpush.bf16.msra.mxu3 %v4104_v36  ;;  %v4215_v60 = vld [vmem:[%s4560_s21 + $0x48] sm:$0xff]  }
  0x59   : > { %v447_v16 = vpack.c.bf16 %v415_v10, %v415_v10  ;;  %v448_v20 = vpack.c.bf16 %v416_v15, %v416_v15  ;;  %v829_v47 = vsel %vm733_vm3, %v824_v41, %v828_v42  ;;  %v287_v41 = vmul.f32 %v4565_v11, %v4185_v29 }
  0x5a   : > { %v835_v8 = vrot.slane %v833_v1, 1  ;;  %940 = vrot.lane.b32.xlu2 %v829_v47, %s4502_s18  ;;  %v4181_v1 = vunpack.c.l.bf16 %v4215_v60 }
  0x5b   : > { %v511_v21 = vunpack.c.l.b16 %v447_v16  ;;  %v512_v25 = vunpack.c.l.b16 %v448_v20 }
  0x5c   : > { %v836_v19 = vor.u32 %v835_v8, %v831_v0  ;;  %1908 = vmatpush.bf16.msra.mxu3 %v4103_v44  ;;  %v4182_v8 = vunpack.c.h.bf16 %v4215_v60  ;;  %v285_v14 = vmul.f32 %v4565_v11, %v4181_v1 }
  0x5d   : > { %v535_v27 = vpack.c.b16 %v512_v25, %v511_v21 }
  0x5e   : > { %v841_v22 = vsel %vm733_vm3, %v836_v19, %v840_v9  ;;  %v286_v15 = vmul.f32 %v4565_v11, %v4182_v8  ;;  %v321_v20 = vadd.f32 %v4573_v18, %v285_v14 }
  0x5f   : > { %942 = vrot.lane.b32.xlu1 %v841_v22, %s4502_s18  ;;  %v607_v35 = vshrl.u32 %v535_v27, 16  ;;  %v610_v39 = vshll.u32 %v535_v27, 16 }
  0x60   : > { %v322_v21 = vadd.f32 %v4573_v18, %v286_v15  ;;  %v385_v25 = vmul.f32 0.05, %v321_v20  ;;  %vm353_vm9 = vcmp.ge.f32.partialorder %v321_v20, 0.0 }
  0x61   : > { %v609_v43 = vrot.slane %v607_v35, 7 }
  0x62   : > { %vm354_vm10 = vcmp.ge.f32.partialorder %v322_v21, 0.0  ;;  %v386_v27 = vmul.f32 0.05, %v322_v21  ;;  %v417_v28 = vsel %vm353_vm9, %v321_v20, %v385_v25 }
  0x63   : > { %v612_v49 = vor.u32 %v610_v39, %v609_v43  ;;  %v4846_v55 = vsel %vm4537_vm2, %v609_v43, 0  ;;  %v449_v36 = vpack.c.bf16 %v417_v28, %v417_v28  ;;  %v1410_v39 = vshrl.u32 %v4801_v57, 16 }
  0x64   : > { %v850_v59 = vshll.u32 %v4846_v55, 16  ;;  %v1412_v7 = vshrl.u32 %v4846_v55, 16  ;;  %v418_v35 = vsel %vm354_vm10, %v322_v21, %v386_v27  ;;  %v288_v43 = vmul.f32 %v4565_v11, %v4186_v33 }
  0x65   : > { %v4842_v51 = vsel %vm4537_vm2, 0, %v612_v49  ;;  %v513_v42 = vunpack.c.l.b16 %v449_v36  ;;  %1442 = vrot.lane.b32.xlu2 %v1410_v39, %s4502_s18 }
  0x66   : > { %v845_v56 = vshll.u32 %v4842_v51, 16  ;;  %v843_v58 = vshrl.u32 %v4842_v51, 16  ;;  %v852_v6 = vrot.slane %v850_v59, 1  ;;  %v324_v47 = vadd.f32 %v4573_v18, %v288_v43 }
  0x67   : > { %1444 = vrot.lane.b32.xlu1 %v1412_v7, %s4502_s18 }
  0x68   : > { %v847_v0 = vrot.slane %v845_v56, 1  ;;  %vm356_vm12 = vcmp.ge.f32.partialorder %v324_v47, 0.0 }
  0x6a   : > { %v848_v13 = vor.u32 %v847_v0, %v843_v58 }
  0x6c   : > { %v853_v19 = vsel %vm733_vm3, %v848_v13, %v852_v6 }
  0x6d   : > { %944 = vrot.lane.b32.xlu0 %v853_v19, %s4502_s18 }
  0x83   : > { %v1427_v40 = vpop.permute.xlu1 %1426 }
  0x84   : > { %v1463_v46 = vsel %vm972_vm8, %v4547_v4, %v1427_v40  ;;  %v450_v40 = vpack.c.bf16 %v418_v35, %v418_v35 }
  0x85   : > { %v1502_v53 = vshll.u32 %v1463_v46, 16  ;;  %v323_v46 = vadd.f32 %v4573_v18, %v287_v41 }
  0x86   : > { %v514_v44 = vunpack.c.l.b16 %v450_v40 }
  0x87   : > { %v1504_v10 = vrot.slane %v1502_v53, 1  ;;  %vm355_vm11 = vcmp.ge.f32.partialorder %v323_v46, 0.0  ;;  %v388_v53 = vmul.f32 0.05, %v324_v47 }
  0x88   : > { %v927_v52 = vpop.permute.xlu0 %926  ;;  %v536_v49 = vpack.c.b16 %v514_v44, %v513_v42 }
  0x89   : > { %v4851_v4 = vsel %vm972_vm8, %v4543_v3, %v927_v52  ;;  %v4142_v3 = vld [vmem:[%s5915_s1 + $0x1f8] sm:$0xff]  ;;  %v387_v52 = vmul.f32 0.05, %v323_v46  ;;  %v420_v59 = vsel %vm356_vm12, %v324_v47, %v388_v53  ;;  %v931_v15 = vpop.permute.xlu2 %930 }
  0x8a   : > { %5941 = vst [vmem:[#allocation2_spill] sm:$0xff] %v4851_v4  ;;  %v1496_v61 = vshrl.u32 %v4851_v4, 16  ;;  %v1498_v62 = vshll.u32 %v4851_v4, 16  ;;  %1160 = vmatmul.bf16.vlgmr.msra.gmra.mxu0 %v4851_v4  ;;  %3044 = vmatpush.bf16.msrb.mxu3 %v4142_v3  ;;  %v614_v56 = vshrl.u32 %v536_v49, 16  ;;  %v452_v0 = vpack.c.bf16 %v420_v59, %v420_v59  ;;  %v4141_v59 = vld [vmem:[%s5915_s1 + $0x1f0] sm:$0xff] }
  0x8b   : > { %v419_v58 = vsel %vm355_vm11, %v323_v46, %v387_v52  ;;  %v617_v28 = vshll.u32 %v536_v49, 16 }
  0x8c   : > { %v1500_v9 = vrot.slane %v1498_v62, 1  ;;  %v451_v60 = vpack.c.bf16 %v419_v58, %v419_v58  ;;  %v616_v62 = vrot.slane %v614_v56, 7  ;;  %v516_v3 = vunpack.c.l.b16 %v452_v0  ;;  %v4133_v58 = vld [vmem:[%s5915_s1 + $0x1b0] sm:$0xff] }
  0x8d   : > { %v4921_v56 = vsel %vm972_vm8, %v4619_v37, %v931_v15  ;;  %2956 = vmatpush.bf16.msrb.mxu2 %v4133_v58 }
  0x8e   : > { %v1501_v16 = vor.u32 %v1500_v9, %v1496_v61  ;;  %v515_v1 = vunpack.c.l.b16 %v451_v60  ;;  %v4886_v5 = vsel %vm4537_vm2, %v616_v62, 0  ;;  %v4217_v9 = vld [vmem:[%s4560_s21 + $0x58] sm:$0xff]   ;;  %v619_v49 = vor.u32 %v617_v28, %v616_v62  ;;  %3045 = vmatpush.bf16.msrb.mxu3 %v4141_v59 }
  0x8f   : > { %v1414_v7 = vshrl.u32 %v4886_v5, 16  ;;  %v4190_v13 = vunpack.c.h.bf16 %v4217_v9  ;;  %v1518_v15 = vshrl.u32 %v4921_v56, 16 }
  0x90   : > { %v4874_v22 = vsel %vm733_vm3, %v1501_v16, %v1504_v10  ;;  %v537_v8 = vpack.c.b16 %v516_v3, %v515_v1  ;;  %v4189_v10 = vunpack.c.l.bf16 %v4217_v9 }
  0x91   : > { %5942 = vst [vmem:[#allocation3_spill] sm:$0xff] %v4874_v22  ;;  %1820 = vmatmul.bf16.vlgmr.msra.gmra.mxu2 %v4874_v22  ;;  %1446 = vrot.lane.b32.xlu0 %v1414_v7, %s4502_s18  ;;  %v1431_v0 = vpop.permute.xlu2 %1430  ;;  %v4934_v7 = vsel %vm4537_vm2, 0, %v619_v49 }
  0x92   : > { %v621_v19 = vshrl.u32 %v537_v8, 16  ;;  %v624_v20 = vshll.u32 %v537_v8, 16  ;;  %v289_v25 = vmul.f32 %v4565_v11, %v4189_v10  ;;  %v1467_v9 = vsel %vm972_vm8, %v4607_v30, %v1431_v0  ;;  %v4973_v0 = vld [vmem:[%s5916_s2] ss:$0 sm:$0xff] }
  0x94   : > { %v623_v27 = vrot.slane %v621_v19, 7  ;;  %v325_v29 = vadd.f32 %v4573_v18, %v289_v25  ;;  %v1524_v25 = vshll.u32 %v1467_v9, 16 }
  0x96   : > { %v626_v39 = vor.u32 %v624_v20, %v623_v27  ;;  %v389_v40 = vmul.f32 0.05, %v325_v29  ;;  %v4911_v43 = vsel %vm4537_vm2, %v623_v27, 0  ;;  %vm357_vm13 = vcmp.ge.f32.partialorder %v325_v29, 0.0 }
  0x97   : > { %v874_v46 = vshll.u32 %v4911_v43, 16  ;;  %v862_v20 = vshll.u32 %v4886_v5, 16 }
  0x98   : > { %v4907_v42 = vsel %vm4537_vm2, 0, %v626_v39  ;;  %v421_v52 = vsel %vm357_vm13, %v325_v29, %v389_v40 }
  0x99   : > { %v1429_v61 = vpop.permute.xlu1 %1428  ;;  %v867_v44 = vshrl.u32 %v4907_v42, 16  ;;  %v453_v62 = vpack.c.bf16 %v421_v52, %v421_v52  ;;  %v864_v30 = vrot.slane %v862_v20, 1 }
  0x9a   : > { %v1465_v6 = vsel %vm972_vm8, %v4601_v24, %v1429_v61  ;;  %v290_v24 = vmul.f32 %v4565_v11, %v4190_v13  ;;  %v876_v61 = vrot.slane %v874_v46, 1  ;;  %v857_v13 = vshll.u32 %v4934_v7, 16  ;;  %v4218_v46 = vld [vmem:[%s4560_s21 + $0x60] sm:$0xff]  }
  0x9b   : > { %v1512_v16 = vshll.u32 %v1465_v6, 16  ;;  %v517_v3 = vunpack.c.l.b16 %v453_v62  ;;  %v1520_v6 = vshll.u32 %v4921_v56, 16  ;;  %v4194_v58 = vunpack.c.h.bf16 %v4218_v46 }
  0x9c   : > { %v326_v33 = vadd.f32 %v4573_v18, %v290_v24  ;;  %v869_v18 = vshll.u32 %v4907_v42, 16  ;;  %v859_v19 = vrot.slane %v857_v13, 1 }
  0x9d   : > { %v1522_v24 = vrot.slane %v1520_v6, 1 }
  0x9e   : > { %v390_v41 = vmul.f32 0.05, %v326_v33  ;;  %vm358_vm14 = vcmp.ge.f32.partialorder %v326_v33, 0.0  ;;  %v871_v60 = vrot.slane %v869_v18, 1 }
  0xa0   : > { %v929_v14 = vpop.permute.xlu0 %928  ;;  %v422_v53 = vsel %vm358_vm14, %v326_v33, %v390_v41  ;;  %v872_v37 = vor.u32 %v871_v60, %v867_v44 }
  0xa1   : > { %v4895_v21 = vsel %vm972_vm8, %v4611_v31, %v929_v14  ;;  %v1514_v31 = vrot.slane %v1512_v16, 1  ;;  %v454_v1 = vpack.c.bf16 %v422_v53, %v422_v53  ;;  %v855_v16 = vshrl.u32 %v4934_v7, 16  ;;  %v1433_v52 = vpop.permute.xlu1 %1432 }
  0xa2   : > { %v1508_v26 = vshll.u32 %v4895_v21, 16  ;;  %1165 = vmatmul.bf16.gmra.mxu0 %v4895_v21  ;;  %1249 = vmatmul.bf16.vlgmr.msra.gmra.mxu1 %v4895_v21  ;;  %v1506_v35 = vshrl.u32 %v4895_v21, 16  ;;  %v877_v10 = vsel %vm733_vm3, %v872_v37, %v876_v61  ;;  %v4193_v53 = vunpack.c.l.bf16 %v4218_v46 }
  0xa3   : > { %v518_v8 = vunpack.c.l.b16 %v454_v1  ;;  %948 = vrot.lane.b32.xlu1 %v877_v10, %s4502_s18  ;;  %v860_v28 = vor.u32 %v859_v19, %v855_v16  ;;  %v292_v37 = vmul.f32 %v4973_v0, %v4194_v58  ;;  %v4219_v16 = vld [vmem:[%s4560_s21 + $0x68] sm:$0xff]   ;;  %v935_v58 = vpop.permute.xlu2 %934 }
  0xa4   : > { %v1510_v36 = vrot.slane %v1508_v26, 1  ;;  %v291_v1 = vmul.f32 %v4973_v0, %v4193_v53  ;;  %v4197_v19 = vunpack.c.l.bf16 %v4219_v16  ;;  %v4198_v20 = vunpack.c.h.bf16 %v4219_v16 }
  0xa5   : > { %v538_v14 = vpack.c.b16 %v518_v8, %v517_v3  ;;  %v865_v33 = vsel %vm733_vm3, %v860_v28, %v864_v30  ;;  %v1469_v3 = vsel %vm972_vm8, %v4631_v45, %v1433_v52  ;;  %v4984_v8 = vld [vmem:[%s5917_s3] ss:$0 sm:$0xff] }
  0xa6   : > { %v1511_v11 = vor.u32 %v1510_v36, %v1506_v35  ;;  %v1526_v35 = vrot.slane %v1524_v25, 1  ;;  %946 = vrot.lane.b32.xlu2 %v865_v33, %s4502_s18  ;;  %v327_v9 = vadd.f32 %v4984_v8, %v291_v1  ;;  %v328_v10 = vadd.f32 %v4984_v8, %v292_v37 }
  0xa7   : > { %v628_v26 = vshrl.u32 %v538_v14, 16  ;;  %v631_v27 = vshll.u32 %v538_v14, 16  ;;  %v1535_v14 = vshll.u32 %v1469_v3, 16  ;;  %v294_v33 = vmul.f32 %v4973_v0, %v4198_v20 }
  0xa8   : > { %v4917_v47 = vsel %vm733_vm3, %v1511_v11, %v1514_v31  ;;  %v1523_v31 = vor.u32 %v1522_v24, %v1518_v15  ;;  %v933_v39 = vpop.permute.xlu0 %932  ;;  %v391_v45 = vmul.f32 0.05, %v327_v9  ;;  %v392_v15 = vmul.f32 0.05, %v328_v10 }
  0xa9   : > { %1825 = vmatmul.bf16.gmra.mxu2 %v4917_v47  ;;  %1909 = vmatmul.bf16.vlgmr.msra.gmra.mxu3 %v4917_v47  ;;  %v630_v29 = vrot.slane %v628_v26, 7  ;;  %v4967_v59 = vsel %vm972_vm8, %v4639_v50, %v933_v39  ;;  %vm359_vm15 = vcmp.ge.f32.partialorder %v327_v9, 0.0  ;;  %vm360_vm0 = vcmp.ge.f32.partialorder %v328_v10, 0.0 }
  0xaa   : > { %v4961_v49 = vsel %vm733_vm3, %v1523_v31, %v1526_v35  ;;  %v1531_v50 = vshll.u32 %v4967_v59, 16  ;;  %v1529_v25 = vshrl.u32 %v4967_v59, 16  ;;  %v423_v26 = vsel %vm359_vm15, %v327_v9, %v391_v45  ;;  %v4132_v9 = vld [vmem:[%s5915_s1 + $0x1a8] sm:$0xff] }
  0xab   : > { %v633_v36 = vor.u32 %v631_v27, %v630_v29  ;;  %v4954_v41 = vsel %vm4537_vm2, %v630_v29, 0  ;;  %v424_v27 = vsel %vm360_vm0, %v328_v10, %v392_v15  ;;  %v455_v28 = vpack.c.bf16 %v423_v26, %v423_v26  ;;  %v4140_v10 = vld [vmem:[%s5915_s1 + $0x1e8] sm:$0xff]  ;;  %2957 = vmatpush.bf16.msrb.mxu2 %v4132_v9 }
  0xac   : > { %v886_v18 = vshll.u32 %v4954_v41, 16  ;;  %v1418_v62 = vshrl.u32 %v4954_v41, 16  ;;  %v1533_v24 = vrot.slane %v1531_v50, 1  ;;  %v456_v30 = vpack.c.bf16 %v424_v27, %v424_v27  ;;  %3046 = vmatpush.bf16.msrb.mxu3 %v4140_v10 }
  0xad   : > { %v4950_v40 = vsel %vm4537_vm2, 0, %v633_v36  ;;  %v293_v29 = vmul.f32 %v4973_v0, %v4197_v19  ;;  %v1416_v35 = vshrl.u32 %v4911_v43, 16  ;;  %v519_v31 = vunpack.c.l.b16 %v455_v28 }
  0xae   : > { %v879_v11 = vshrl.u32 %v4950_v40, 16  ;;  %v881_v44 = vshll.u32 %v4950_v40, 16  ;;  %v888_v61 = vrot.slane %v886_v18, 1  ;;  %1450 = vrot.lane.b32.xlu1 %v1418_v62, %s4502_s18  ;;  %v520_v36 = vunpack.c.l.b16 %v456_v30 }
  0xaf   : > { %v329_v39 = vadd.f32 %v4984_v8, %v293_v29  ;;  %v1534_v18 = vor.u32 %v1533_v24, %v1529_v25  ;;  %1448 = vrot.lane.b32.xlu2 %v1416_v35, %s4502_s18  ;;  %v4220_v24 = vld [vmem:[%s4560_s21 + $0x70] sm:$0xff]  }
  0xb0   : > { %v883_v60 = vrot.slane %v881_v44, 1  ;;  %v1537_v44 = vrot.slane %v1535_v14, 1  ;;  %v539_v46 = vpack.c.b16 %v520_v36, %v519_v31  ;;  %v1435_v50 = vpop.permute.xlu0 %1434  ;;  %v4201_v27 = vunpack.c.l.bf16 %v4220_v24 }
  0xb1   : > { %v393_v52 = vmul.f32 0.05, %v329_v39  ;;  %vm361_vm1 = vcmp.ge.f32.partialorder %v329_v39, 0.0  ;;  %v4202_v28 = vunpack.c.h.bf16 %v4220_v24 }
  0xb2   : > { %1170 = vmatmul.bf16.gmra.mxu0 %v4921_v56  ;;  %1254 = vmatmul.bf16.gmra.mxu1 %v4921_v56  ;;  %v884_v6 = vor.u32 %v883_v60, %v879_v11  ;;  %v330_v11 = vadd.f32 %v4984_v8, %v294_v33  ;;  %v635_v60 = vshrl.u32 %v539_v46, 16  ;;  %v5001_v1 = vsel %vm733_vm3, %v1534_v18, %v1537_v44 }
  0xb3   : > { %v295_v31 = vmul.f32 %v4973_v0, %v4201_v27 }
  0xb4   : > { %v889_v13 = vsel %vm733_vm3, %v884_v6, %v888_v61  ;;  %v394_v53 = vmul.f32 0.05, %v330_v11  ;;  %vm362_vm4 = vcmp.ge.f32.partialorder %v330_v11, 0.0  ;;  %v425_v61 = vsel %vm361_vm1, %v329_v39, %v393_v52 }
  0xb5   : > { %950 = vrot.lane.b32.xlu0 %v889_v13, %s4502_s18  ;;  %v457_v37 = vpack.c.bf16 %v425_v61, %v425_v61  ;;  %v5007_v6 = vsel %vm972_vm8, %v4705_v54, %v935_v58  ;;  %v637_v13 = vrot.slane %v635_v60, 7  ;;  %v1471_v54 = vsel %vm972_vm8, %v4693_v48, %v1435_v50 }
  0xb6   : > { %v426_v62 = vsel %vm362_vm4, %v330_v11, %v394_v53  ;;  %v1542_v16 = vshll.u32 %v5007_v6, 16  ;;  %v1546_v26 = vshll.u32 %v1471_v54, 16  ;;  %v1540_v30 = vshrl.u32 %v5007_v6, 16 }
  0xb7   : > { %v458_v3 = vpack.c.bf16 %v426_v62, %v426_v62  ;;  %v521_v14 = vunpack.c.l.b16 %v457_v37  ;;  %v5017_v15 = vsel %vm4537_vm2, %v637_v13, 0  ;;  %v296_v48 = vmul.f32 %v4973_v0, %v4202_v28 }
  0xb8   : > { %v1420_v19 = vshrl.u32 %v5017_v15, 16  ;;  %v1544_v29 = vrot.slane %v1542_v16, 1  ;;  %v331_v39 = vadd.f32 %v4984_v8, %v295_v31  ;;  %v1548_v44 = vrot.slane %v1546_v26, 1  ;;  %v937_v62 = vpop.permute.xlu1 %936 }
  0xb9   : > { %1830 = vmatmul.bf16.gmra.mxu2 %v4961_v49  ;;  %1914 = vmatmul.bf16.gmra.mxu3 %v4961_v49  ;;  %v522_v45 = vunpack.c.l.b16 %v458_v3  ;;  %v332_v11 = vadd.f32 %v4984_v8, %v296_v48  ;;  %v638_v52 = vshll.u32 %v539_v46, 16  ;;  %v5050_v16 = vsel %vm972_vm8, %v4728_v17, %v937_v62 }
  0xba   : > { %v1545_v18 = vor.u32 %v1544_v29, %v1540_v30  ;;  %v395_v60 = vmul.f32 0.05, %v331_v39  ;;  %vm363_vm5 = vcmp.ge.f32.partialorder %v331_v39, 0.0  ;;  %v1553_v30 = vshll.u32 %v5050_v16, 16 }
  0xbb   : > { %v540_v20 = vpack.c.b16 %v522_v45, %v521_v14  ;;  %v396_v61 = vmul.f32 0.05, %v332_v11  ;;  %vm364_vm6 = vcmp.ge.f32.partialorder %v332_v11, 0.0  ;;  %v640_v14 = vor.u32 %v638_v52, %v637_v13 }
  0xbc   : > { %v427_v9 = vsel %vm363_vm5, %v331_v39, %v395_v60  ;;  %v5044_v10 = vsel %vm733_vm3, %v1545_v18, %v1548_v44  ;;  %v1551_v39 = vshrl.u32 %v5050_v16, 16 }
  0xbd   : > { %1452 = vrot.lane.b32.xlu0 %v1420_v19, %s4502_s18  ;;  %v642_v25 = vshrl.u32 %v540_v20, 16  ;;  %v645_v35 = vshll.u32 %v540_v20, 16  ;;  %v428_v45 = vsel %vm364_vm6, %v332_v11, %v396_v61  ;;  %v459_v54 = vpack.c.bf16 %v427_v9, %v427_v9  ;;  %v1437_v19 = vpop.permute.xlu2 %1436 }
  0xbe   : > { %v460_v24 = vpack.c.bf16 %v428_v45, %v428_v45  ;;  %v1473_v13 = vsel %vm972_vm8, %v4719_v12, %v1437_v19  ;;  %v5059_v29 = vsel %vm4537_vm2, 0, %v640_v14  ;;  %v1555_v12 = vrot.slane %v1553_v30, 1  ;;  %v4221_v19 = vld [vmem:[%s4560_s21 + $0x78] sm:$0xff]  }
  0xbf   : > { %v644_v33 = vrot.slane %v642_v25, 7  ;;  %v523_v26 = vunpack.c.l.b16 %v459_v54  ;;  %v893_v17 = vshll.u32 %v5059_v29, 16  ;;  %v891_v31 = vshrl.u32 %v5059_v29, 16 }
  0xc0   : > { %v524_v28 = vunpack.c.l.b16 %v460_v24  ;;  %v1556_v62 = vor.u32 %v1555_v12, %v1551_v39  ;;  %v4206_v24 = vunpack.c.h.bf16 %v4221_v19 }
  0xc1   : > { %v647_v36 = vor.u32 %v645_v35, %v644_v33  ;;  %v5039_v37 = vsel %vm4537_vm2, %v644_v33, 0  ;;  %v1557_v35 = vshll.u32 %v1473_v13, 16  ;;  %v895_v48 = vrot.slane %v893_v17, 1  ;;  %v4139_v13 = vld [vmem:[%s5915_s1 + $0x1e0] sm:$0xff] }
  0xc2   : > { %1175 = vmatmul.bf16.gmra.mxu0 %v4967_v59  ;;  %1259 = vmatmul.bf16.gmra.mxu1 %v4967_v59  ;;  %v910_v46 = vshll.u32 %v5039_v37, 16  ;;  %v541_v33 = vpack.c.b16 %v524_v28, %v523_v26  ;;  %v4131_v28 = vld [vmem:[%s5915_s1 + $0x1a0] sm:$0xff] }
  0xc3   : > { %v5034_v53 = vsel %vm4537_vm2, 0, %v647_v36  ;;  %v898_v36 = vshll.u32 %v5017_v15, 16  ;;  %v896_v18 = vor.u32 %v895_v48, %v891_v31  ;;  %v1559_v61 = vrot.slane %v1557_v35, 1  ;;  %2958 = vmatpush.bf16.msrb.mxu2 %v4131_v28  ;;  %3047 = vmatpush.bf16.msrb.mxu3 %v4139_v13 }
  0xc4   : > { %v905_v58 = vshll.u32 %v5034_v53, 16  ;;  %v903_v3 = vshrl.u32 %v5034_v53, 16  ;;  %v912_v25 = vrot.slane %v910_v46, 1  ;;  %v649_v11 = vshrl.u32 %v541_v33, 16 }
  0xc5   : > { %v652_v44 = vshll.u32 %v541_v33, 16  ;;  %v900_v52 = vrot.slane %v898_v36, 1  ;;  %v298_v31 = vmul.f32 %v4973_v0, %v4206_v24  ;;  %v941_v24 = vpop.permute.xlu2 %940 }
  0xc6   : > { %v907_v50 = vrot.slane %v905_v58, 1  ;;  %v651_v58 = vrot.slane %v649_v11, 7  ;;  %v5125_v13 = vsel %vm972_vm8, %v4825_v23, %v941_v24 }
  0xc7   : > { %v901_v60 = vsel %vm733_vm3, %v896_v18, %v900_v52  ;;  %v334_v12 = vadd.f32 %v4984_v8, %v298_v31  ;;  %2959 = vmatpush.bf16.msrb.mxu2 %v4130_v2 }
  0xc8   : > { %v908_v20 = vor.u32 %v907_v50, %v903_v3  ;;  %952 = vrot.lane.b32.xlu2 %v901_v60, %s4502_s18  ;;  %v654_v3 = vor.u32 %v652_v44, %v651_v58  ;;  %v939_v50 = vpop.permute.xlu0 %938  ;;  %v5075_v9 = vsel %vm4537_vm2, %v651_v58, 0 }
  0xc9   : > { %1835 = vmatmul.bf16.gmra.mxu2 %v5001_v1  ;;  %1919 = vmatmul.bf16.gmra.mxu3 %v5001_v1  ;;  %v922_v54 = vshll.u32 %v5075_v9, 16  ;;  %v5088_v26 = vsel %vm972_vm8, %v4744_v38, %v939_v50  ;;  %v1424_v33 = vshrl.u32 %v5075_v9, 16  ;;  %vm366_vm9 = vcmp.ge.f32.partialorder %v334_v12, 0.0 }
  0xca   : > { %v913_v27 = vsel %vm733_vm3, %v908_v20, %v912_v25  ;;  %v5071_v46 = vsel %vm4537_vm2, 0, %v654_v3  ;;  %v5082_v20 = vsel %vm733_vm3, %v1556_v62, %v1559_v61  ;;  %v4205_v25 = vunpack.c.l.bf16 %v4221_v19  ;;  %v4126_v3 = vld [vmem:[%s5915_s1 + $0x178] sm:$0xff] }
  0xcb   : > { %954 = vrot.lane.b32.xlu1 %v913_v27, %s4502_s18  ;;  %v915_v14 = vshrl.u32 %v5071_v46, 16  ;;  %v917_v45 = vshll.u32 %v5071_v46, 16  ;;  %v1439_v27 = vpop.permute.xlu1 %1438  ;;  %v924_v17 = vrot.slane %v922_v54, 1  ;;  %v1564_v36 = vshll.u32 %v5088_v26, 16  ;;  %2673 = vmatpush.bf16.msrb.mxu1 %v4126_v3 }
  0xcc   : > { %v297_v35 = vmul.f32 %v4973_v0, %v4205_v25  ;;  %v1475_v48 = vsel %vm972_vm8, %v4737_v34, %v1439_v27  ;;  %v398_v0 = vmul.f32 0.05, %v334_v12  ;;  %v1562_v52 = vshrl.u32 %v5088_v26, 16 }
  0xcd   : > { %v919_v30 = vrot.slane %v917_v45, 1  ;;  %v1568_v18 = vshll.u32 %v1475_v48, 16  ;;  %v1566_v34 = vrot.slane %v1564_v36, 1  ;;  %v1422_v50 = vshrl.u32 %v5039_v37, 16 }
  0xce   : > { %v333_v39 = vadd.f32 %v4984_v8, %v297_v35  ;;  %v430_v60 = vsel %vm366_vm9, %v334_v12, %v398_v0  ;;  %v4118_v8 = vld [vmem:[%s5915_s1 + $0x138] sm:$0xff]  ;;  %v1575_v35 = vshll.u32 %v5125_v13, 16  ;;  %v1573_v36 = vshrl.u32 %v5125_v13, 16 }
  0xcf   : > { %v920_v38 = vor.u32 %v919_v30, %v915_v14  ;;  %v462_v62 = vpack.c.bf16 %v430_v60, %v430_v60  ;;  %v1570_v54 = vrot.slane %v1568_v18, 1  ;;  %v1567_v19 = vor.u32 %v1566_v34, %v1562_v52  ;;  %2584 = vmatpush.bf16.msrb.mxu0 %v4118_v8  ;;  %v1443_v52 = vpop.permute.xlu2 %1442 }
  0xd0   : > { %v397_v44 = vmul.f32 0.05, %v333_v39  ;;  %vm365_vm7 = vcmp.ge.f32.partialorder %v333_v39, 0.0  ;;  %1454 = vrot.lane.b32.xlu2 %v1422_v50, %s4502_s18  ;;  %v1577_v23 = vrot.slane %v1575_v35, 1 }
  0xd1   : > { %v925_v11 = vsel %vm733_vm3, %v920_v38, %v924_v17  ;;  %v526_v45 = vunpack.c.l.b16 %v462_v62  ;;  %v5119_v28 = vsel %vm733_vm3, %v1567_v19, %v1570_v54  ;;  %v1441_v17 = vpop.permute.xlu0 %1440 }
  0xd2   : > { %1180 = vmatmul.bf16.gmra.mxu0 %v5007_v6  ;;  %1264 = vmatmul.bf16.gmra.mxu1 %v5007_v6  ;;  %v429_v58 = vsel %vm365_vm7, %v333_v39, %v397_v44  ;;  %v1477_v38 = vsel %vm972_vm8, %v4774_v32, %v1441_v17  ;;  %v1578_v12 = vor.u32 %v1577_v23, %v1573_v36  ;;  %v4117_v36 = vld [vmem:[%s5915_s1 + $0x130] sm:$0xff] }
  0xd3   : > { %1456 = vrot.lane.b32.xlu1 %v1424_v33, %s4502_s18  ;;  %956 = vrot.lane.b32.xlu0 %v925_v11, %s4502_s18  ;;  %v461_v61 = vpack.c.bf16 %v429_v58, %v429_v58  ;;  %v1579_v48 = vshll.u32 %v1477_v38, 16  ;;  %v943_v44 = vpop.permute.xlu1 %942  ;;  %v4125_v23 = vld [vmem:[%s5915_s1 + $0x170] sm:$0xff] }
  0xd4   : > { %v5146_v32 = vsel %vm972_vm8, %v4811_v63, %v943_v44  ;;  %2585 = vmatpush.bf16.msrb.mxu0 %v4117_v36  ;;  %2674 = vmatpush.bf16.msrb.mxu1 %v4125_v23 }
  0xd5   : > { %v525_v14 = vunpack.c.l.b16 %v461_v61  ;;  %v1581_v39 = vrot.slane %v1579_v48, 1  ;;  %v1586_v58 = vshll.u32 %v5146_v32, 16  ;;  %v1479_v61 = vsel %vm972_vm8, %v4801_v57, %v1443_v52  ;;  %v4138_v57 = vld [vmem:[%s5915_s1 + $0x1d8] sm:$0xff] }
  0xd6   : > { %v1590_v63 = vshll.u32 %v1479_v61, 16  ;;  %3048 = vmatpush.bf16.msrb.mxu3 %v4138_v57 }
  0xd7   : > { %v542_v25 = vpack.c.b16 %v526_v45, %v525_v14  ;;  %v5140_v0 = vsel %vm733_vm3, %v1578_v12, %v1581_v39  ;;  %v1584_v14 = vshrl.u32 %v5146_v32, 16  ;;  %v1588_v45 = vrot.slane %v1586_v58, 1 }
  0xd8   : > { %v1592_v24 = vrot.slane %v1590_v63, 1 }
  0xd9   : > { %1840 = vmatmul.bf16.gmra.mxu2 %v5044_v10  ;;  %1924 = vmatmul.bf16.gmra.mxu3 %v5044_v10  ;;  %v656_v27 = vshrl.u32 %v542_v25, 16  ;;  %v659_v11 = vshll.u32 %v542_v25, 16 }
  0xdb   : > { %v658_v30 = vrot.slane %v656_v27, 7  ;;  %v1589_v27 = vor.u32 %v1588_v45, %v1584_v14  ;;  %v1445_v48 = vpop.permute.xlu1 %1444 }
  0xdc   : > { %v1481_v12 = vsel %vm972_vm8, %v4846_v55, %v1445_v48 }
  0xdd   : > { %v5129_v33 = vsel %vm4537_vm2, %v658_v30, 0  ;;  %v661_v18 = vor.u32 %v659_v11, %v658_v30  ;;  %v5170_v35 = vsel %vm733_vm3, %v1589_v27, %v1592_v24 }
  0xde   : > { %v1458_v31 = vshrl.u32 %v5129_v33, 16  ;;  %v966_v50 = vshll.u32 %v5129_v33, 16 }
  0xdf   : > { %v5151_v60 = vsel %vm4537_vm2, 0, %v661_v18  ;;  %v945_v17 = vpop.permute.xlu0 %944  ;;  %v1601_v18 = vshll.u32 %v1481_v12, 16  ;;  %vm2246_vm2 = vcmask 23552  }
  0xe0   : > { %1460 = vrot.lane.b32.xlu0 %v1458_v31, %s4502_s18  ;;  %v961_v62 = vshll.u32 %v5151_v60, 16  ;;  %v959_v8 = vshrl.u32 %v5151_v60, 16  ;;  %v968_v19 = vrot.slane %v966_v50, 1  ;;  %v5176_v31 = vsel %vm972_vm8, %v4842_v51, %v945_v17 }
  0xe1   : > { %v1597_v39 = vshll.u32 %v5176_v31, 16  ;;  %v1595_v52 = vshrl.u32 %v5176_v31, 16  ;;  %v1603_v61 = vrot.slane %v1601_v18, 1 }
  0xe2   : > { %1185 = vmatmul.bf16.gmra.mxu0 %v5050_v16  ;;  %1269 = vmatmul.bf16.gmra.mxu1 %v5050_v16  ;;  %v963_v3 = vrot.slane %v961_v62, 1 }
  0xe3   : > { %v1599_v58 = vrot.slane %v1597_v39, 1 }
  0xe4   : > { %v964_v54 = vor.u32 %v963_v3, %v959_v8 }
  0xe5   : > { %v1600_v8 = vor.u32 %v1599_v58, %v1595_v52 }
  0xe6   : > { %v969_v25 = vsel %vm733_vm3, %v964_v54, %v968_v19 }
  0xe7   : > { %970 = vrot.lane.b32.xlu2 %v969_v25, %s4502_s18  ;;  %v5195_v14 = vsel %vm733_vm3, %v1600_v8, %v1603_v61 }
  0xe9   : > { %1845 = vmatmul.bf16.gmra.mxu2 %v5082_v20  ;;  %1929 = vmatmul.bf16.gmra.mxu3 %v5082_v20 }
  0xf2   : > { %1190 = vmatmul.bf16.gmra.mxu0 %v5088_v26  ;;  %1274 = vmatmul.bf16.gmra.mxu1 %v5088_v26 }
  0xf9   : > { %1850 = vmatmul.bf16.gmra.mxu2 %v5119_v28  ;;  %1934 = vmatmul.bf16.gmra.mxu3 %v5119_v28 }
 0x100   : > { %v947_v3 = vpop.permute.xlu2 %946 }
 0x102   : > { %1195 = vmatmul.bf16.gmra.mxu0 %v5125_v13  ;;  %1279 = vmatmul.bf16.gmra.mxu1 %v5125_v13 }
 0x103   : > { %v1447_v45 = vpop.permute.xlu0 %1446 }
 0x104   : > { %v1483_v25 = vsel %vm972_vm8, %v4886_v5, %v1447_v45  ;;  %v4129_v5 = vld [vmem:[%s5915_s1 + $0x190] sm:$0xff] }
 0x105   : > { %v1612_v36 = vshll.u32 %v1483_v25, 16  ;;  %2960 = vmatpush.bf16.msrb.mxu2 %v4129_v5  ;;  %v4124_v25 = vld [vmem:[%s5915_s1 + $0x168] sm:$0xff] }
 0x106   : > { %2675 = vmatpush.bf16.msrb.mxu1 %v4124_v25 }
 0x107   : > { %v1161_v34 = vpop.f32.mrf.mxu0 }
 0x109   : > { %1855 = vmatmul.bf16.gmra.mxu2 %v5140_v0  ;;  %1939 = vmatmul.bf16.gmra.mxu3 %v5140_v0 }
 0x10f   : > { %v1163_v30 = vpop.f32.mrf.mxu0 }
 0x112   : > { %1200 = vmatmul.bf16.gmra.mxu0 %v5146_v32  ;;  %1284 = vmatmul.bf16.gmra.mxu1 %v5146_v32 }
 0x114   : > { %v1821_v38 = vpop.f32.mrf.mxu2 }
 0x119   : > { %1860 = vmatmul.bf16.gmra.mxu2 %v5170_v35  ;;  %1944 = vmatmul.bf16.gmra.mxu3 %v5170_v35 }
 0x11c   : > { %v1823_v62 = vpop.f32.mrf.mxu2 }
 0x11f   : > { %v5187_v11 = vpop.f32.mrf.mxu0  ;;  %v1250_v51 = vpop.f32.mrf.mxu1 }
 0x120   : > { %v1251_v44 = vadd.f32 %v1250_v51, %v1161_v34  ;;  %v5201_v34 = vsel %vm972_vm8, %v4934_v7, %v947_v3  ;;  %v949_v3 = vpop.permute.xlu1 %948 }
 0x121   : > { %v1608_v57 = vshll.u32 %v5201_v34, 16  ;;  %v1606_v7 = vshrl.u32 %v5201_v34, 16 }
 0x122   : > { %1205 = vmatmul.bf16.gmra.mxu0 %v5176_v31  ;;  %1289 = vmatmul.bf16.gmra.mxu1 %v5176_v31  ;;  %4235 = vtanh.f32 %v1251_v44  ;;  %v1614_v44 = vrot.slane %v1612_v36, 1 }
 0x123   : > { %v1610_v23 = vrot.slane %v1608_v57, 1  ;;  %v4116_v57 = vld [vmem:[%s5915_s1 + $0x128] sm:$0xff] }
 0x124   : > { %2586 = vmatpush.bf16.msrb.mxu0 %v4116_v57 }
 0x125   : > { %v1611_v58 = vor.u32 %v1610_v23, %v1606_v7 }
 0x127   : > { %v5192_v55 = vpop.f32.mrf.mxu0  ;;  %v1252_v50 = vpop.f32.mrf.mxu1  ;;  %v5226_v45 = vsel %vm733_vm3, %v1611_v58, %v1614_v44 }
 0x128   : > { %v1253_v63 = vadd.f32 %v1252_v50, %v1163_v30  ;;  %v4236_v54 = vpop.eup %4235 }
 0x129   : > { %1865 = vmatmul.bf16.gmra.mxu2 %v5195_v14  ;;  %1949 = vmatmul.bf16.gmra.mxu3 %v5195_v14  ;;  %v1362_v24 = vpack.c.bf16 %v4236_v54, %v4236_v54 }
 0x12a   : > { %4237 = vtanh.f32 %v1253_v63 }
 0x12b   : > { %v5211_v12 = vunpack.c.l.b16 %v1362_v24 }
 0x12c   : > { %v1826_v19 = vpop.f32.mrf.mxu2  ;;  %v1910_v2 = vpop.f32.mrf.mxu3 }
 0x12d   : > { %v1911_v27 = vadd.f32 %v1910_v2, %v1821_v38  ;;  %v4137_v38 = vld [vmem:[%s5915_s1 + $0x1d0] sm:$0xff]  ;;  %v1449_v2 = vpop.permute.xlu2 %1448 }
 0x12e   : > { %3049 = vmatpush.bf16.msrb.mxu3 %v4137_v38  ;;  %v1485_v36 = vsel %vm972_vm8, %v4911_v43, %v1449_v2 }
 0x12f   : > { %v1171_v30 = vpop.f32.mrf.mxu0  ;;  %v5206_v17 = vpop.f32.mrf.mxu1  ;;  %4239 = vtanh.f32 %v1911_v27  ;;  %v1623_v44 = vshll.u32 %v1485_v36, 16 }
 0x130   : > { %v4238_v48 = vpop.eup %4237  ;;  %v951_v36 = vpop.permute.xlu0 %950 }
 0x131   : > { %v1363_v39 = vpack.c.bf16 %v4238_v48, %v4238_v48  ;;  %v1625_v2 = vrot.slane %v1623_v44, 1 }
 0x132   : > { %1210 = vmatmul.bf16.gmra.mxu0 %v5201_v34  ;;  %1294 = vmatmul.bf16.gmra.mxu1 %v5201_v34 }
 0x133   : > { %v5213_v51 = vunpack.c.l.b16 %v1363_v39 }
 0x134   : > { %v1828_v18 = vpop.f32.mrf.mxu2  ;;  %v1912_v52 = vpop.f32.mrf.mxu3 }
 0x135   : > { %v1913_v61 = vadd.f32 %v1912_v52, %v1823_v62  ;;  %v4240_v54 = vpop.eup %4239  ;;  %v5232_v62 = vsel %vm972_vm8, %v4907_v42, %v949_v3 }
 0x136   : > { %v2022_v24 = vpack.c.bf16 %v4240_v54, %v4240_v54  ;;  %v1619_v7 = vshll.u32 %v5232_v62, 16  ;;  %v1617_v52 = vshrl.u32 %v5232_v62, 16 }
 0x137   : > { %4241 = vtanh.f32 %v1913_v61  ;;  %v1173_v50 = vpop.f32.mrf.mxu0  ;;  %v5223_v63 = vpop.f32.mrf.mxu1 }
 0x138   : > { %v2166_v58 = vunpack.c.l.b16 %v2022_v24  ;;  %v1621_v54 = vrot.slane %v1619_v7, 1 }
 0x139   : > { %1870 = vmatmul.bf16.gmra.mxu2 %v5226_v45  ;;  %1954 = vmatmul.bf16.gmra.mxu3 %v5226_v45 }
 0x13a   : > { %v1622_v25 = vor.u32 %v1621_v54, %v1617_v52 }
 0x13c   : > { %v1831_v27 = vpop.f32.mrf.mxu2  ;;  %v1915_v48 = vpop.f32.mrf.mxu3 }
 0x13d   : > { %v4242_v23 = vpop.eup %4241  ;;  %v1916_v39 = vadd.f32 %v1915_v48, %v1826_v19 }
 0x13e   : > { %v2023_v42 = vpack.c.bf16 %v4242_v23, %v4242_v23  ;;  %v5248_v23 = vsel %vm733_vm3, %v1622_v25, %v1625_v2 }
 0x13f   : > { %v1176_v5 = vpop.f32.mrf.mxu0  ;;  %v1260_v38 = vpop.f32.mrf.mxu1  ;;  %4243 = vtanh.f32 %v1916_v39  ;;  %5943 = vst [vmem:[#allocation4_spill] sm:$0xff] %v5248_v23  ;;  %v5254_v39 = vsel %vm972_vm8, %v4950_v40, %v951_v36 }
 0x140   : > { %v2167_v61 = vunpack.c.l.b16 %v2023_v42  ;;  %v1261_v3 = vadd.f32 %v1260_v38, %v1171_v30  ;;  %5944 = vst [vmem:[#allocation5_spill] sm:$0xff] %v5254_v39  ;;  %v1451_v38 = vpop.permute.xlu1 %1450 }
 0x142   : > { %1215 = vmatmul.bf16.gmra.mxu0 %v5232_v62  ;;  %1299 = vmatmul.bf16.gmra.mxu1 %v5232_v62  ;;  %v2198_v43 = vpack.c.b16 %v2167_v61, %v2166_v58  ;;  %4245 = vtanh.f32 %v1261_v3  ;;  %v1630_v61 = vshll.u32 %v5254_v39, 16 }
 0x144   : > { %v1917_v57 = vpop.f32.mrf.mxu3  ;;  %2214 = vrot.lane.b32.xlu1 %v2198_v43, %s4503_s14  ;;  %v1833_v19 = vpop.f32.mrf.mxu2  ;;  %v1632_v8 = vrot.slane %v1630_v61, 1 }
 0x145   : > { %v1918_v48 = vadd.f32 %v1917_v57, %v1828_v18  ;;  %v4244_v42 = vpop.eup %4243 }
 0x146   : > { %v2024_v44 = vpack.c.bf16 %v4244_v42, %v4244_v42 }
 0x147   : > { %4247 = vtanh.f32 %v1918_v48  ;;  %v1178_v24 = vpop.f32.mrf.mxu0  ;;  %v1262_v30 = vpop.f32.mrf.mxu1  ;;  %v1628_v48 = vshrl.u32 %v5254_v39, 16 }
 0x148   : > { %v1263_v7 = vadd.f32 %v1262_v30, %v1173_v50  ;;  %v4246_v18 = vpop.eup %4245  ;;  %v1487_v50 = vsel %vm972_vm8, %v4954_v41, %v1451_v38  ;;  %v2168_v30 = vunpack.c.l.b16 %v2024_v44 }
 0x149   : > { %1875 = vmatmul.bf16.gmra.mxu2 %v5248_v23  ;;  %1959 = vmatmul.bf16.gmra.mxu3 %v5248_v23  ;;  %v1366_v43 = vpack.c.bf16 %v4246_v18, %v4246_v18  ;;  %v1634_v40 = vshll.u32 %v1487_v50, 16  ;;  %v4128_v18 = vld [vmem:[%s5915_s1 + $0x188] sm:$0xff]  ;;  %v1633_v61 = vor.u32 %v1632_v8, %v1628_v48  ;;  %v4115_v48 = vld [vmem:[%s5915_s1 + $0x120] sm:$0xff] }
 0x14a   : > { %4249 = vtanh.f32 %v1263_v7  ;;  %2961 = vmatpush.bf16.msrb.mxu2 %v4128_v18  ;;  %2587 = vmatpush.bf16.msrb.mxu0 %v4115_v48 }
 0x14b   : > { %v5264_v38 = vunpack.c.l.b16 %v1366_v43  ;;  %v1636_v44 = vrot.slane %v1634_v40, 1 }
 0x14c   : > { %v1836_v52 = vpop.f32.mrf.mxu2  ;;  %v1920_v58 = vpop.f32.mrf.mxu3 }
 0x14d   : > { %v4248_v3 = vpop.eup %4247  ;;  %v1921_v2 = vadd.f32 %v1920_v58, %v1831_v27  ;;  %v5280_v40 = vsel %vm733_vm3, %v1633_v61, %v1636_v44 }
 0x14e   : > { %v2025_v54 = vpack.c.bf16 %v4248_v3, %v4248_v3  ;;  %5945 = vst [vmem:[#allocation6_spill] sm:$0xff] %v5280_v40 }
 0x14f   : > { %v5259_v57 = vpop.f32.mrf.mxu0  ;;  %v1265_v25 = vpop.f32.mrf.mxu1  ;;  %4251 = vtanh.f32 %v1921_v2 }
 0x150   : > { %v4250_v36 = vpop.eup %4249  ;;  %v2169_v7 = vunpack.c.l.b16 %v2025_v54  ;;  %v1266_v42 = vadd.f32 %v1265_v25, %v1176_v5  ;;  %v4136_v5 = vld [vmem:[%s5915_s1 + $0x1c8] sm:$0xff]  ;;  %v953_v54 = vpop.permute.xlu2 %952 }
 0x151   : > { %v1367_v22 = vpack.c.bf16 %v4250_v36, %v4250_v36  ;;  %3050 = vmatpush.bf16.msrb.mxu3 %v4136_v5  ;;  %v5286_v8 = vsel %vm972_vm8, %v5059_v29, %v953_v54 }
 0x152   : > { %1220 = vmatmul.bf16.gmra.mxu0 %v5254_v39  ;;  %1304 = vmatmul.bf16.gmra.mxu1 %v5254_v39  ;;  %v2199_v41 = vpack.c.b16 %v2169_v7, %v2168_v30  ;;  %4253 = vtanh.f32 %v1266_v42  ;;  %5946 = vst [vmem:[#allocation7_spill] sm:$0xff] %v5286_v8  ;;  %v1641_v29 = vshll.u32 %v5286_v8, 16  ;;  %v1639_v4 = vshrl.u32 %v5286_v8, 16 }
 0x153   : > { %v5266_v27 = vunpack.c.l.b16 %v1367_v22 }
 0x154   : > { %2216 = vrot.lane.b32.xlu2 %v2199_v41, %s4503_s14  ;;  %v1838_v58 = vpop.f32.mrf.mxu2  ;;  %v1922_v50 = vpop.f32.mrf.mxu3 }
 0x155   : > { %v1923_v3 = vadd.f32 %v1922_v50, %v1833_v19  ;;  %v4252_v36 = vpop.eup %4251  ;;  %v1453_v19 = vpop.permute.xlu0 %1452 }
 0x156   : > { %v2026_v7 = vpack.c.bf16 %v4252_v36, %v4252_v36  ;;  %v1489_v18 = vsel %vm972_vm8, %v5017_v15, %v1453_v19  ;;  %v4114_v15 = vld [vmem:[%s5915_s1 + $0x118] sm:$0xff] }
 0x157   : > { %4255 = vtanh.f32 %v1923_v3  ;;  %v5277_v43 = vpop.f32.mrf.mxu0  ;;  %v1267_v2 = vpop.f32.mrf.mxu1  ;;  %2588 = vmatpush.bf16.msrb.mxu0 %v4114_v15 }
 0x158   : > { %v1268_v25 = vadd.f32 %v1267_v2, %v1178_v24  ;;  %v4123_v24 = vld [vmem:[%s5915_s1 + $0x160] sm:$0xff]  ;;  %v4254_v30 = vpop.eup %4253  ;;  %v1645_v2 = vshll.u32 %v1489_v18, 16  ;;  %v2170_v22 = vunpack.c.l.b16 %v2026_v7 }
 0x159   : > { %1880 = vmatmul.bf16.gmra.mxu2 %v5280_v40  ;;  %1964 = vmatmul.bf16.gmra.mxu3 %v5280_v40  ;;  %v1368_v50 = vpack.c.bf16 %v4254_v30, %v4254_v30  ;;  %v1643_v40 = vrot.slane %v1641_v29, 1  ;;  %v4113_v29 = vld [vmem:[%s5915_s1 + $0x110] sm:$0xff] }
 0x15a   : > { %4257 = vtanh.f32 %v1268_v25  ;;  %2676 = vmatpush.bf16.msrb.mxu1 %v4123_v24  ;;  %v1647_v24 = vrot.slane %v1645_v2, 1 }
 0x15b   : > { %v5305_v19 = vunpack.c.l.b16 %v1368_v50  ;;  %2589 = vmatpush.bf16.msrb.mxu0 %v4113_v29 }
 0x15c   : > { %v1841_v42 = vpop.f32.mrf.mxu2  ;;  %v1925_v41 = vpop.f32.mrf.mxu3 }
 0x15d   : > { %v4256_v5 = vpop.eup %4255  ;;  %v1926_v61 = vadd.f32 %v1925_v41, %v1836_v52  ;;  %v1644_v41 = vor.u32 %v1643_v40, %v1639_v4  ;;  %v4112_v40 = vld [vmem:[%s5915_s1 + $0x108] sm:$0xff] }
 0x15e   : > { %v2027_v44 = vpack.c.bf16 %v4256_v5, %v4256_v5  ;;  %v955_v5 = vpop.permute.xlu1 %954 }
 0x15f   : > { %v1186_v3 = vpop.f32.mrf.mxu0  ;;  %v5297_v54 = vpop.f32.mrf.mxu1  ;;  %4259 = vtanh.f32 %v1926_v61  ;;  %v5318_v50 = vsel %vm733_vm3, %v1644_v41, %v1647_v24  ;;  %v5324_v4 = vsel %vm972_vm8, %v5034_v53, %v955_v5  ;;  %2590 = vmatpush.bf16.msrb.mxu0 %v4112_v40  ;;  %v4111_v53 = vld [vmem:[%s5915_s1 + $0x100] sm:$0xff] }
 0x160   : > { %v4258_v25 = vpop.eup %4257  ;;  %v2171_v36 = vunpack.c.l.b16 %v2027_v44  ;;  %5947 = vst [vmem:[#allocation8_spill] sm:$0xff] %v5318_v50  ;;  %v1650_v40 = vshrl.u32 %v5324_v4, 16 }
 0x161   : > { %v1369_v39 = vpack.c.bf16 %v4258_v25, %v4258_v25  ;;  %5948 = vst [vmem:[#allocation9_spill] sm:$0xff] %v5324_v4 }
 0x162   : > { %1225 = vmatmul.bf16.gmra.mxu0 %v5286_v8  ;;  %1309 = vmatmul.bf16.gmra.mxu1 %v5286_v8  ;;  %v2200_v52 = vpack.c.b16 %v2171_v36, %v2170_v22 }
 0x163   : > { %v5307_v48 = vunpack.c.l.b16 %v1369_v39  ;;  %2591 = vmatpush.bf16.msrb.mxu0 %v4111_v53  ;;  %v957_v53 = vpop.permute.xlu0 %956 }
 0x164   : > { %2218 = vrot.lane.b32.xlu0 %v2200_v52, %s4503_s14  ;;  %v1843_v30 = vpop.f32.mrf.mxu2  ;;  %v1927_v7 = vpop.f32.mrf.mxu3  ;;  %v1652_v52 = vshll.u32 %v5324_v4, 16 }
 0x165   : > { %v1928_v18 = vadd.f32 %v1927_v7, %v1838_v58  ;;  %v4260_v61 = vpop.eup %4259  ;;  %v1455_v58 = vpop.permute.xlu2 %1454 }
 0x166   : > { %v2028_v2 = vpack.c.bf16 %v4260_v61, %v4260_v61  ;;  %v1491_v15 = vsel %vm972_vm8, %v5039_v37, %v1455_v58  ;;  %v1654_v8 = vrot.slane %v1652_v52, 1  ;;  %v4122_v37 = vld [vmem:[%s5915_s1 + $0x158] sm:$0xff] }
 0x167   : > { %4261 = vtanh.f32 %v1928_v18  ;;  %v1188_v39 = vpop.f32.mrf.mxu0  ;;  %v5315_v44 = vpop.f32.mrf.mxu1  ;;  %v1656_v5 = vshll.u32 %v1491_v15, 16  ;;  %2677 = vmatpush.bf16.msrb.mxu1 %v4122_v37 }
 0x168   : > { %v2172_v61 = vunpack.c.l.b16 %v2028_v2  ;;  %v4135_v2 = vld [vmem:[%s5915_s1 + $0x1c0] sm:$0xff]  ;;  %v1655_v52 = vor.u32 %v1654_v8, %v1650_v40  ;;  %v5358_v8 = vsel %vm972_vm8, %v5071_v46, %v957_v53 }
 0x169   : > { %1885 = vmatmul.bf16.gmra.mxu2 %v5318_v50  ;;  %1969 = vmatmul.bf16.gmra.mxu3 %v5318_v50  ;;  %5950 = vst [vmem:[#allocation11_spill] sm:$0xff] %v5358_v8  ;;  %v4119_v46 = vld [vmem:[%s5915_s1 + $0x140] sm:$0xff] }
 0x16a   : > { %3051 = vmatpush.bf16.msrb.mxu3 %v4135_v2  ;;  %v1663_v2 = vshll.u32 %v5358_v8, 16 }
 0x16c   : > { %v1846_v25 = vpop.f32.mrf.mxu2  ;;  %v1930_v36 = vpop.f32.mrf.mxu3 }
 0x16d   : > { %v4262_v24 = vpop.eup %4261  ;;  %v1931_v41 = vadd.f32 %v1930_v36, %v1841_v42  ;;  %v4127_v42 = vld [vmem:[%s5915_s1 + $0x180] sm:$0xff] }
 0x16e   : > { %v2029_v7 = vpack.c.bf16 %v4262_v24, %v4262_v24  ;;  %2962 = vmatpush.bf16.msrb.mxu2 %v4127_v42 }
 0x16f   : > { %v1191_v18 = vpop.f32.mrf.mxu0  ;;  %v1275_v29 = vpop.f32.mrf.mxu1  ;;  %4263 = vtanh.f32 %v1931_v41 }
 0x170   : > { %v2173_v22 = vunpack.c.l.b16 %v2029_v7  ;;  %v1276_v50 = vadd.f32 %v1275_v29, %v1186_v3  ;;  %v1658_v3 = vrot.slane %v1656_v5, 1 }
 0x172   : > { %1230 = vmatmul.bf16.gmra.mxu0 %v5324_v4  ;;  %1314 = vmatmul.bf16.gmra.mxu1 %v5324_v4  ;;  %v2201_v58 = vpack.c.b16 %v2173_v22, %v2172_v61  ;;  %v4121_v22 = vld [vmem:[%s5915_s1 + $0x150] sm:$0xff]  ;;  %4265 = vtanh.f32 %v1276_v50  ;;  %v5352_v5 = vsel %vm733_vm3, %v1655_v52, %v1658_v3  ;;  %v4120_v50 = vld [vmem:[%s5915_s1 + $0x148] sm:$0xff] }
 0x173   : > { %2678 = vmatpush.bf16.msrb.mxu1 %v4121_v22  ;;  %5949 = vst [vmem:[#allocation10_spill] sm:$0xff] %v5352_v5 }
 0x174   : > { %v1932_v36 = vpop.f32.mrf.mxu3  ;;  %2220 = vrot.lane.b32.xlu1 %v2201_v58, %s4503_s14  ;;  %v1848_v15 = vpop.f32.mrf.mxu2 }
 0x175   : > { %v1933_v24 = vadd.f32 %v1932_v36, %v1843_v30  ;;  %v4264_v61 = vpop.eup %4263  ;;  %v1457_v30 = vpop.permute.xlu1 %1456 }
 0x176   : > { %v2030_v40 = vpack.c.bf16 %v4264_v61, %v4264_v61  ;;  %v1493_v42 = vsel %vm972_vm8, %v5075_v9, %v1457_v30 }
 0x177   : > { %4267 = vtanh.f32 %v1933_v24  ;;  %v1193_v7 = vpop.f32.mrf.mxu0  ;;  %v1277_v41 = vpop.f32.mrf.mxu1  ;;  %2679 = vmatpush.bf16.msrb.mxu1 %v4120_v50 }
 0x178   : > { %v1278_v29 = vadd.f32 %v1277_v41, %v1188_v39  ;;  %v4266_v39 = vpop.eup %4265  ;;  %v1667_v41 = vshll.u32 %v1493_v42, 16  ;;  %v2174_v50 = vunpack.c.l.b16 %v2030_v40 }
 0x179   : > { %1890 = vmatmul.bf16.gmra.mxu2 %v5352_v5  ;;  %1974 = vmatmul.bf16.gmra.mxu3 %v5352_v5  ;;  %v1372_v52 = vpack.c.bf16 %v4266_v39, %v4266_v39  ;;  %v1665_v5 = vrot.slane %v1663_v2, 1  ;;  %v971_v2 = vpop.permute.xlu2 %970 }
 0x17a   : > { %4269 = vtanh.f32 %v1278_v29  ;;  %v1661_v29 = vshrl.u32 %v5358_v8, 16 }
 0x17b   : > { %2680 = vmatpush.bf16.msrb.mxu1 %v4119_v46  ;;  %v5374_v39 = vunpack.c.l.b16 %v1372_v52 }
 0x17c   : > { %v1851_v37 = vpop.f32.mrf.mxu2  ;;  %v1935_v58 = vpop.f32.mrf.mxu3  ;;  %v1666_v40 = vor.u32 %v1665_v5, %v1661_v29 }
 0x17d   : > { %v4268_v3 = vpop.eup %4267  ;;  %v1936_v24 = vadd.f32 %v1935_v58, %v1846_v25  ;;  %v1669_v58 = vrot.slane %v1667_v41, 1  ;;  %v1461_v5 = vpop.permute.xlu0 %1460 }
 0x17e   : > { %v2031_v36 = vpack.c.bf16 %v4268_v3, %v4268_v3 }
 0x17f   : > { %v5369_v22 = vpop.f32.mrf.mxu0  ;;  %v1280_v53 = vpop.f32.mrf.mxu1  ;;  %4271 = vtanh.f32 %v1936_v24 }
 0x180   : > { %v4270_v61 = vpop.eup %4269  ;;  %v2175_v9 = vunpack.c.l.b16 %v2031_v36  ;;  %v1281_v30 = vadd.f32 %v1280_v53, %v1191_v18 }
 0x181   : > { %v1373_v4 = vpack.c.bf16 %v4270_v61, %v4270_v61 }
 0x182   : > { %1235 = vmatmul.bf16.gmra.mxu0 %v5358_v8  ;;  %1319 = vmatmul.bf16.gmra.mxu1 %v5358_v8  ;;  %v2202_v3 = vpack.c.b16 %v2175_v9, %v2174_v50  ;;  %4273 = vtanh.f32 %v1281_v30 }
 0x183   : > { %v5376_v25 = vunpack.c.l.b16 %v1373_v4  ;;  %v5384_v4 = vsel %vm733_vm3, %v1666_v40, %v1669_v58 }
 0x184   : > { %2222 = vrot.lane.b32.xlu2 %v2202_v3, %s4503_s14  ;;  %v1853_v42 = vpop.f32.mrf.mxu2  ;;  %v1937_v46 = vpop.f32.mrf.mxu3  ;;  %5951 = vst [vmem:[#allocation12_spill] sm:$0xff] %v5384_v4  ;;  %v1495_v3 = vsel %vm972_vm8, %v5129_v33, %v1461_v5 }
 0x185   : > { %v1938_v36 = vadd.f32 %v1937_v46, %v1848_v15  ;;  %v4272_v24 = vpop.eup %4271  ;;  %v5390_v15 = vsel %vm972_vm8, %v5151_v60, %v971_v2 }
 0x186   : > { %v2032_v29 = vpack.c.bf16 %v4272_v24, %v4272_v24  ;;  %v1678_v24 = vshll.u32 %v1495_v3, 16 }
 0x187   : > { %4275 = vtanh.f32 %v1938_v36  ;;  %v5381_v53 = vpop.f32.mrf.mxu0  ;;  %v1282_v52 = vpop.f32.mrf.mxu1  ;;  %v1672_v36 = vshrl.u32 %v5390_v15, 16 }
 0x188   : > { %v1283_v61 = vadd.f32 %v1282_v52, %v1193_v7  ;;  %v4274_v41 = vpop.eup %4273  ;;  %v1674_v7 = vshll.u32 %v5390_v15, 16 }
 0x189   : > { %1895 = vmatmul.bf16.gmra.mxu2 %v5384_v4  ;;  %1979 = vmatmul.bf16.gmra.mxu3 %v5384_v4  ;;  %v1374_v46 = vpack.c.bf16 %v4274_v41, %v4274_v41 }
 0x18a   : > { %4277 = vtanh.f32 %v1283_v61  ;;  %v2176_v61 = vunpack.c.l.b16 %v2032_v29  ;;  %v1676_v4 = vrot.slane %v1674_v7, 1 }
 0x18b   : > { %v5400_v33 = vunpack.c.l.b16 %v1374_v46 }
 0x18c   : > { %v1856_v50 = vpop.f32.mrf.mxu2  ;;  %v1940_v9 = vpop.f32.mrf.mxu3  ;;  %v1677_v29 = vor.u32 %v1676_v4, %v1672_v36 }
 0x18d   : > { %v4276_v30 = vpop.eup %4275  ;;  %v1941_v40 = vadd.f32 %v1940_v9, %v1851_v37  ;;  %v1680_v37 = vrot.slane %v1678_v24, 1 }
 0x18e   : > { %v2033_v58 = vpack.c.bf16 %v4276_v30, %v4276_v30 }
 0x18f   : > { %v1201_v52 = vpop.f32.mrf.mxu0  ;;  %v5396_v60 = vpop.f32.mrf.mxu1  ;;  %4279 = vtanh.f32 %v1941_v40 }
 0x190   : > { %v4278_v2 = vpop.eup %4277  ;;  %v2177_v18 = vunpack.c.l.b16 %v2033_v58 }
 0x191   : > { %v1375_v8 = vpack.c.bf16 %v4278_v2, %v4278_v2 }
 0x192   : > { %1324 = vmatmul.bf16.gmra.mxu1 %v5390_v15  ;;  %2592 = vmatmul.bf16.vlgmr.msrb.gmra.mxu0 %v4895_v21  ;;  %v2203_v23 = vpack.c.b16 %v2177_v18, %v2176_v61  ;;  %v1258_v21 = vadd.f32 %v5223_v63, %v5192_v55 }
 0x193   : > { %v5402_v5 = vunpack.c.l.b16 %v1375_v8  ;;  %v5412_v8 = vsel %vm733_vm3, %v1677_v29, %v1680_v37  ;;  %vm2302_vm3 = vcmask 44032  }
 0x194   : > { %2224 = vrot.lane.b32.xlu0 %v2203_v23, %s4503_s14  ;;  %v1858_v41 = vpop.f32.mrf.mxu2  ;;  %v1942_v9 = vpop.f32.mrf.mxu3  ;;  %v1256_v23 = vadd.f32 %v5206_v17, %v5187_v11 }
 0x195   : > { %v1943_v30 = vadd.f32 %v1942_v9, %v1853_v42  ;;  %v2124_v7 = vpack.c.b16 %v5402_v5, %v5400_v33  ;;  %v4280_v18 = vpop.eup %4279 }
 0x196   : > { %v2034_v42 = vpack.c.bf16 %v4280_v18, %v4280_v18 }
 0x197   : > { %4281 = vtanh.f32 %v1943_v30  ;;  %v1203_v3 = vpop.f32.mrf.mxu0  ;;  %v5407_v58 = vpop.f32.mrf.mxu1 }
 0x198   : > { %4283 = vtanh.f32 %v1258_v21  ;;  %v2178_v61 = vunpack.c.l.b16 %v2034_v42 }
 0x199   : > { %1984 = vmatmul.bf16.gmra.mxu3 %v5412_v8  ;;  %2963 = vmatmul.bf16.vlgmr.msrb.gmra.mxu2 %v4917_v47  ;;  %4285 = vtanh.f32 %v1256_v23 }
 0x19c   : > { %v1861_v4 = vpop.f32.mrf.mxu2  ;;  %v1945_v46 = vpop.f32.mrf.mxu3 }
 0x19d   : > { %v4282_v40 = vpop.eup %4281  ;;  %v1946_v2 = vadd.f32 %v1945_v46, %v1856_v50 }
 0x19e   : > { %v2035_v36 = vpack.c.bf16 %v4282_v40, %v4282_v40  ;;  %v4284_v9 = vpop.eup %4283 }
 0x19f   : > { %v1206_v55 = vpop.f32.mrf.mxu0  ;;  %v1290_v63 = vpop.f32.mrf.mxu1  ;;  %4287 = vtanh.f32 %v1946_v2  ;;  %v1365_v30 = vpack.c.bf16 %v4284_v9, %v4284_v9 }
 0x1a0   : > { %v2179_v24 = vunpack.c.l.b16 %v2035_v36  ;;  %v1291_v37 = vadd.f32 %v1290_v63, %v1201_v52  ;;  %v4286_v11 = vpop.eup %4285 }
 0x1a1   : > { %v1364_v50 = vpack.c.bf16 %v4286_v11, %v4286_v11  ;;  %v2089_v46 = vunpack.c.l.b16 %v1365_v30 }
 0x1a2   : > { %2597 = vmatmul.bf16.gmra.mxu0 %v4921_v56  ;;  %2681 = vmatmul.bf16.vlgmr.msrb.gmra.mxu1 %v4921_v56  ;;  %v2204_v47 = vpack.c.b16 %v2179_v24, %v2178_v61  ;;  %4289 = vtanh.f32 %v1291_v37 }
 0x1a3   : > { %v2088_v56 = vunpack.c.l.b16 %v1364_v50 }
 0x1a4   : > { %v1947_v17 = vpop.f32.mrf.mxu3  ;;  %2226 = vrot.lane.b32.xlu1 %v2204_v47, %s4503_s14  ;;  %v1863_v29 = vpop.f32.mrf.mxu2 }
 0x1a5   : > { %v1948_v21 = vadd.f32 %v1947_v17, %v1858_v41  ;;  %v4288_v23 = vpop.eup %4287  ;;  %v2119_v61 = vpack.c.b16 %v2089_v46, %v2088_v56 }
 0x1a6   : > { %v2036_v40 = vpack.c.bf16 %v4288_v23, %v4288_v23 }
 0x1a7   : > { %4291 = vtanh.f32 %v1948_v21  ;;  %v1208_v18 = vpop.f32.mrf.mxu0  ;;  %v1292_v52 = vpop.f32.mrf.mxu1 }
 0x1a8   : > { %v1293_v42 = vadd.f32 %v1292_v52, %v1203_v3  ;;  %v4290_v36 = vpop.eup %4289  ;;  %v2180_v9 = vunpack.c.l.b16 %v2036_v40 }
 0x1a9   : > { %2968 = vmatmul.bf16.gmra.mxu2 %v4961_v49  ;;  %3052 = vmatmul.bf16.vlgmr.msrb.gmra.mxu3 %v4961_v49  ;;  %v1378_v47 = vpack.c.bf16 %v4290_v36, %v4290_v36 }
 0x1aa   : > { %4293 = vtanh.f32 %v1293_v42 }
 0x1ab   : > { %v5434_v40 = vunpack.c.l.b16 %v1378_v47 }
 0x1ac   : > { %v1866_v2 = vpop.f32.mrf.mxu2  ;;  %v1950_v63 = vpop.f32.mrf.mxu3 }
 0x1ad   : > { %v4292_v41 = vpop.eup %4291  ;;  %v1951_v3 = vadd.f32 %v1950_v63, %v1861_v4 }
 0x1ae   : > { %v2037_v24 = vpack.c.bf16 %v4292_v41, %v4292_v41  ;;  %v2217_v37 = vpop.permute.xlu2 %2216 }
 0x1af   : > { %v2252_v11 = vsel %vm2246_vm2, %v2119_v61, %v2217_v37  ;;  %v5425_v17 = vpop.f32.mrf.mxu0  ;;  %v1295_v49 = vpop.f32.mrf.mxu1  ;;  %4295 = vtanh.f32 %v1951_v3 }
 0x1b0   : > { %v4294_v30 = vpop.eup %4293  ;;  %v2181_v21 = vunpack.c.l.b16 %v2037_v24  ;;  %v2306_v50 = vunpack.c.l.b16 %v2252_v11  ;;  %v2307_v52 = vunpack.c.h.b16 %v2252_v11  ;;  %v1296_v23 = vadd.f32 %v1295_v49, %v1206_v55 }
 0x1b1   : > { %v1379_v42 = vpack.c.bf16 %v4294_v30, %v4294_v30  ;;  %v5952_v24 = vpack.c.b16 %v5213_v51, %v5211_v12 }
 0x1b2   : > { %v2308_v4 = vpack.c.b16 %v2306_v50, %v2306_v50  ;;  %v2309_v46 = vpack.c.b16 %v2307_v52, %v2307_v52  ;;  %2602 = vmatmul.bf16.gmra.mxu0 %v4967_v59  ;;  %2686 = vmatmul.bf16.gmra.mxu1 %v4967_v59  ;;  %v2205_v56 = vpack.c.b16 %v2181_v21, %v2180_v9  ;;  %4297 = vtanh.f32 %v1296_v23 }
 0x1b3   : > { %v5436_v36 = vunpack.c.l.b16 %v1379_v42 }
 0x1b4   : > { %3821 = vst.msk [vmem:[%s5430_s26 + $0x10] sm:$0xf] %vm2302_vm3, %v2308_v4  ;;  %2228 = vrot.lane.b32.xlu2 %v2205_v56, %s4503_s14  ;;  %v1868_v55 = vpop.f32.mrf.mxu2  ;;  %v1952_v63 = vpop.f32.mrf.mxu3 }
 0x1b5   : > { %3822 = vst.msk [vmem:[%s5430_s26 + $0x14] sm:$0xf] %vm2302_vm3, %v2309_v46  ;;  %v1953_v41 = vadd.f32 %v1952_v63, %v1863_v29  ;;  %v2126_v61 = vpack.c.b16 %v5436_v36, %v5434_v40  ;;  %v4296_v29 = vpop.eup %4295 }
 0x1b6   : > { %v2215_v59 = vpop.permute.xlu1 %2214  ;;  %v2038_v52 = vpack.c.bf16 %v4296_v29, %v4296_v29 }
 0x1b7   : > { %4299 = vtanh.f32 %v1953_v41  ;;  %v2249_v37 = vsel %vm2246_vm2, %v5952_v24, %v2215_v59  ;;  %v5449_v9 = vpop.f32.mrf.mxu0  ;;  %v1297_v47 = vpop.f32.mrf.mxu1 }
 0x1b8   : > { %v2296_v3 = vunpack.c.l.b16 %v2249_v37  ;;  %v2297_v11 = vunpack.c.h.b16 %v2249_v37  ;;  %v1298_v49 = vadd.f32 %v1297_v47, %v1208_v18  ;;  %v4298_v50 = vpop.eup %4297 }
 0x1b9   : > { %2973 = vmatmul.bf16.gmra.mxu2 %v5001_v1  ;;  %3057 = vmatmul.bf16.gmra.mxu3 %v5001_v1  ;;  %v1380_v4 = vpack.c.bf16 %v4298_v50, %v4298_v50  ;;  %v2182_v1 = vunpack.c.l.b16 %v2038_v52  ;;  %v1271_v50 = vadd.f32 %v5297_v54, %v5259_v57 }
 0x1ba   : > { %v2298_v30 = vpack.c.b16 %v2296_v3, %v2296_v3  ;;  %v2299_v21 = vpack.c.b16 %v2297_v11, %v2297_v11  ;;  %4301 = vtanh.f32 %v1298_v49 }
 0x1bb   : > { %v5461_v37 = vunpack.c.l.b16 %v1380_v4 }
 0x1bc   : > { %2303 = vst.msk [vmem:[%s5430_s26] sm:$0xf] %vm2302_vm3, %v2298_v30  ;;  %v1871_v12 = vpop.f32.mrf.mxu2  ;;  %v1955_v51 = vpop.f32.mrf.mxu3 }
 0x1bd   : > { %v4300_v23 = vpop.eup %4299  ;;  %2304 = vst.msk [vmem:[%s5430_s26 + $0x4] sm:$0xf] %vm2302_vm3, %v2299_v21  ;;  %v1956_v18 = vadd.f32 %v1955_v51, %v1866_v2 }
 0x1be   : > { %v2039_v42 = vpack.c.bf16 %v4300_v23, %v4300_v23 }
 0x1bf   : > { %v1216_v46 = vpop.f32.mrf.mxu0  ;;  %v5457_v56 = vpop.f32.mrf.mxu1  ;;  %4303 = vtanh.f32 %v1956_v18 }
 0x1c0   : > { %v4302_v63 = vpop.eup %4301  ;;  %v2183_v41 = vunpack.c.l.b16 %v2039_v42 }
 0x1c1   : > { %v1381_v59 = vpack.c.bf16 %v4302_v63, %v4302_v63 }
 0x1c2   : > { %2607 = vmatmul.bf16.gmra.mxu0 %v5007_v6  ;;  %2691 = vmatmul.bf16.gmra.mxu1 %v5007_v6  ;;  %v2206_v24 = vpack.c.b16 %v2183_v41, %v2182_v1  ;;  %v1273_v6 = vadd.f32 %v5315_v44, %v5277_v43 }
 0x1c3   : > { %v5463_v47 = vunpack.c.l.b16 %v1381_v59 }
 0x1c4   : > { %2230 = vrot.lane.b32.xlu0 %v2206_v24, %s4503_s14  ;;  %v1873_v2 = vpop.f32.mrf.mxu2  ;;  %v1957_v3 = vpop.f32.mrf.mxu3 }
 0x1c5   : > { %v1958_v11 = vadd.f32 %v1957_v3, %v1868_v55  ;;  %v2127_v49 = vpack.c.b16 %v5463_v47, %v5461_v37  ;;  %v4304_v21 = vpop.eup %4303 }
 0x1c6   : > { %v2040_v55 = vpack.c.bf16 %v4304_v21, %v4304_v21 }
 0x1c7   : > { %4305 = vtanh.f32 %v1958_v11  ;;  %v1218_v29 = vpop.f32.mrf.mxu0  ;;  %v5468_v30 = vpop.f32.mrf.mxu1 }
 0x1c8   : > { %4307 = vtanh.f32 %v1273_v6  ;;  %v2184_v1 = vunpack.c.l.b16 %v2040_v55 }
 0x1c9   : > { %2978 = vmatmul.bf16.gmra.mxu2 %v5044_v10  ;;  %3062 = vmatmul.bf16.gmra.mxu3 %v5044_v10  ;;  %4309 = vtanh.f32 %v1271_v50 }
 0x1cc   : > { %v1876_v52 = vpop.f32.mrf.mxu2  ;;  %v1960_v51 = vpop.f32.mrf.mxu3 }
 0x1cd   : > { %v4306_v23 = vpop.eup %4305  ;;  %v1961_v4 = vadd.f32 %v1960_v51, %v1871_v12 }
 0x1ce   : > { %v2041_v42 = vpack.c.bf16 %v4306_v23, %v4306_v23  ;;  %v4308_v41 = vpop.eup %4307 }
 0x1cf   : > { %v1221_v18 = vpop.f32.mrf.mxu0  ;;  %v1305_v63 = vpop.f32.mrf.mxu1  ;;  %4311 = vtanh.f32 %v1961_v4  ;;  %v1371_v24 = vpack.c.bf16 %v4308_v41, %v4308_v41 }
 0x1d0   : > { %v2185_v43 = vunpack.c.l.b16 %v2041_v42  ;;  %v1306_v44 = vadd.f32 %v1305_v63, %v1216_v46  ;;  %v4310_v57 = vpop.eup %4309  ;;  %v5953_v46 = vpack.c.b16 %v5266_v27, %v5264_v38 }
 0x1d1   : > { %v1370_v11 = vpack.c.bf16 %v4310_v57, %v4310_v57  ;;  %v2095_v42 = vunpack.c.l.b16 %v1371_v24 }
 0x1d2   : > { %2612 = vmatmul.bf16.gmra.mxu0 %v5050_v16  ;;  %2696 = vmatmul.bf16.gmra.mxu1 %v5050_v16  ;;  %v2207_v10 = vpack.c.b16 %v2185_v43, %v2184_v1  ;;  %4313 = vtanh.f32 %v1306_v44 }
 0x1d3   : > { %v2094_v63 = vunpack.c.l.b16 %v1370_v11 }
 0x1d4   : > { %v1962_v54 = vpop.f32.mrf.mxu3  ;;  %2232 = vrot.lane.b32.xlu1 %v2207_v10, %s4503_s14  ;;  %v1878_v59 = vpop.f32.mrf.mxu2 }
 0x1d5   : > { %v1963_v3 = vadd.f32 %v1962_v54, %v1873_v2  ;;  %v4312_v50 = vpop.eup %4311  ;;  %v2122_v41 = vpack.c.b16 %v2095_v42, %v2094_v63 }
 0x1d6   : > { %v2219_v12 = vpop.permute.xlu0 %2218  ;;  %v2042_v38 = vpack.c.bf16 %v4312_v50, %v4312_v50 }
 0x1d7   : > { %4315 = vtanh.f32 %v1963_v3  ;;  %v2255_v6 = vsel %vm2246_vm2, %v5953_v46, %v2219_v12  ;;  %v1223_v21 = vpop.f32.mrf.mxu0  ;;  %v1307_v16 = vpop.f32.mrf.mxu1 }
 0x1d8   : > { %v2316_v55 = vunpack.c.l.b16 %v2255_v6  ;;  %v2317_v51 = vunpack.c.h.b16 %v2255_v6  ;;  %v1308_v23 = vadd.f32 %v1307_v16, %v1218_v29  ;;  %v4314_v27 = vpop.eup %4313  ;;  %v2186_v57 = vunpack.c.l.b16 %v2042_v38 }
 0x1d9   : > { %2983 = vmatmul.bf16.gmra.mxu2 %v5082_v20  ;;  %3067 = vmatmul.bf16.gmra.mxu3 %v5082_v20  ;;  %v1384_v54 = vpack.c.bf16 %v4314_v27, %v4314_v27  ;;  %v5954_v27 = vpack.c.b16 %v5307_v48, %v5305_v19 }
 0x1da   : > { %v2318_v2 = vpack.c.b16 %v2316_v55, %v2316_v55  ;;  %v2319_v4 = vpack.c.b16 %v2317_v51, %v2317_v51  ;;  %4317 = vtanh.f32 %v1308_v23 }
 0x1db   : > { %v5494_v42 = vunpack.c.l.b16 %v1384_v54 }
 0x1dc   : > { %3823 = vst.msk [vmem:[%s5430_s26 + $0x20] sm:$0xf] %vm2302_vm3, %v2318_v2  ;;  %v1881_v1 = vpop.f32.mrf.mxu2  ;;  %v1965_v43 = vpop.f32.mrf.mxu3 }
 0x1dd   : > { %v4316_v44 = vpop.eup %4315  ;;  %3824 = vst.msk [vmem:[%s5430_s26 + $0x24] sm:$0xf] %vm2302_vm3, %v2319_v4  ;;  %v1966_v24 = vadd.f32 %v1965_v43, %v1876_v52 }
 0x1de   : > { %v2043_v29 = vpack.c.bf16 %v4316_v44, %v4316_v44  ;;  %v2223_v10 = vpop.permute.xlu2 %2222 }
 0x1df   : > { %v2261_v20 = vsel %vm2246_vm2, %v2122_v41, %v2223_v10  ;;  %v5490_v3 = vpop.f32.mrf.mxu0  ;;  %v1310_v12 = vpop.f32.mrf.mxu1  ;;  %4319 = vtanh.f32 %v1966_v24 }
 0x1e0   : > { %v4318_v11 = vpop.eup %4317  ;;  %v2187_v46 = vunpack.c.l.b16 %v2043_v29  ;;  %v2336_v6 = vunpack.c.l.b16 %v2261_v20  ;;  %v2337_v16 = vunpack.c.h.b16 %v2261_v20  ;;  %v1311_v50 = vadd.f32 %v1310_v12, %v1221_v18 }
 0x1e1   : > { %v1385_v55 = vpack.c.bf16 %v4318_v11, %v4318_v11 }
 0x1e2   : > { %v2338_v51 = vpack.c.b16 %v2336_v6, %v2336_v6  ;;  %v2339_v23 = vpack.c.b16 %v2337_v16, %v2337_v16  ;;  %2617 = vmatmul.bf16.gmra.mxu0 %v5088_v26  ;;  %2701 = vmatmul.bf16.gmra.mxu1 %v5088_v26  ;;  %v2208_v52 = vpack.c.b16 %v2187_v46, %v2186_v57  ;;  %4321 = vtanh.f32 %v1311_v50 }
 0x1e3   : > { %v5496_v2 = vunpack.c.l.b16 %v1385_v55 }
 0x1e4   : > { %3827 = vst.msk [vmem:[%s5430_s26 + $0x40] sm:$0xf] %vm2302_vm3, %v2338_v51  ;;  %2234 = vrot.lane.b32.xlu2 %v2208_v52, %s4503_s14  ;;  %v1883_v4 = vpop.f32.mrf.mxu2  ;;  %v1967_v63 = vpop.f32.mrf.mxu3 }
 0x1e5   : > { %3828 = vst.msk [vmem:[%s5430_s26 + $0x44] sm:$0xf] %vm2302_vm3, %v2339_v23  ;;  %v1968_v18 = vadd.f32 %v1967_v63, %v1878_v59  ;;  %v2129_v38 = vpack.c.b16 %v5496_v2, %v5494_v42  ;;  %v4320_v59 = vpop.eup %4319 }
 0x1e6   : > { %v2221_v26 = vpop.permute.xlu1 %2220  ;;  %v2044_v12 = vpack.c.bf16 %v4320_v59, %v4320_v59 }
 0x1e7   : > { %4323 = vtanh.f32 %v1968_v18  ;;  %v2258_v43 = vsel %vm2246_vm2, %v5954_v27, %v2221_v26  ;;  %v5509_v44 = vpop.f32.mrf.mxu0  ;;  %v1312_v41 = vpop.f32.mrf.mxu1 }
 0x1e8   : > { %v2326_v29 = vunpack.c.l.b16 %v2258_v43  ;;  %v2327_v10 = vunpack.c.h.b16 %v2258_v43  ;;  %v1313_v57 = vadd.f32 %v1312_v41, %v1223_v21  ;;  %v4322_v20 = vpop.eup %4321 }
 0x1e9   : > { %2988 = vmatmul.bf16.gmra.mxu2 %v5119_v28  ;;  %3072 = vmatmul.bf16.gmra.mxu3 %v5119_v28  ;;  %v1386_v6 = vpack.c.bf16 %v4322_v20, %v4322_v20  ;;  %v2188_v28 = vunpack.c.l.b16 %v2044_v12 }
 0x1ea   : > { %v2328_v54 = vpack.c.b16 %v2326_v29, %v2326_v29  ;;  %v2329_v24 = vpack.c.b16 %v2327_v10, %v2327_v10  ;;  %4325 = vtanh.f32 %v1313_v57  ;;  %v1286_v57 = vadd.f32 %v5396_v60, %v5369_v22 }
 0x1eb   : > { %v5521_v63 = vunpack.c.l.b16 %v1386_v6 }
 0x1ec   : > { %3825 = vst.msk [vmem:[%s5430_s26 + $0x30] sm:$0xf] %vm2302_vm3, %v2328_v54  ;;  %v1886_v19 = vpop.f32.mrf.mxu2  ;;  %v1970_v48 = vpop.f32.mrf.mxu3 }
 0x1ed   : > { %v4324_v11 = vpop.eup %4323  ;;  %3826 = vst.msk [vmem:[%s5430_s26 + $0x34] sm:$0xf] %vm2302_vm3, %v2329_v24  ;;  %v1971_v21 = vadd.f32 %v1970_v48, %v1881_v1 }
 0x1ee   : > { %v2045_v46 = vpack.c.bf16 %v4324_v11, %v4324_v11 }
 0x1ef   : > { %v1231_v16 = vpop.f32.mrf.mxu0  ;;  %v5517_v50 = vpop.f32.mrf.mxu1  ;;  %4327 = vtanh.f32 %v1971_v21 }
 0x1f0   : > { %v4326_v55 = vpop.eup %4325  ;;  %v2189_v51 = vunpack.c.l.b16 %v2045_v46 }
 0x1f1   : > { %v1387_v23 = vpack.c.bf16 %v4326_v55, %v4326_v55 }
 0x1f2   : > { %2622 = vmatmul.bf16.gmra.mxu0 %v5125_v13  ;;  %2706 = vmatmul.bf16.gmra.mxu1 %v5125_v13  ;;  %v2209_v52 = vpack.c.b16 %v2189_v51, %v2188_v28  ;;  %v1288_v13 = vadd.f32 %v5407_v58, %v5381_v53 }
 0x1f3   : > { %v5523_v18 = vunpack.c.l.b16 %v1387_v23 }
 0x1f4   : > { %2236 = vrot.lane.b32.xlu0 %v2209_v52, %s4503_s14  ;;  %v1888_v1 = vpop.f32.mrf.mxu2  ;;  %v1972_v26 = vpop.f32.mrf.mxu3 }
 0x1f5   : > { %v1973_v27 = vadd.f32 %v1972_v26, %v1883_v4  ;;  %v2130_v43 = vpack.c.b16 %v5523_v18, %v5521_v63  ;;  %v4328_v10 = vpop.eup %4327 }
 0x1f6   : > { %v2046_v4 = vpack.c.bf16 %v4328_v10, %v4328_v10 }
 0x1f7   : > { %4329 = vtanh.f32 %v1973_v27  ;;  %v1233_v41 = vpop.f32.mrf.mxu0  ;;  %v5528_v29 = vpop.f32.mrf.mxu1 }
 0x1f8   : > { %4331 = vtanh.f32 %v1288_v13  ;;  %v2190_v11 = vunpack.c.l.b16 %v2046_v4 }
 0x1f9   : > { %2993 = vmatmul.bf16.gmra.mxu2 %v5140_v0  ;;  %3077 = vmatmul.bf16.gmra.mxu3 %v5140_v0  ;;  %4333 = vtanh.f32 %v1286_v57 }
 0x1fc   : > { %v1891_v59 = vpop.f32.mrf.mxu2  ;;  %v1975_v54 = vpop.f32.mrf.mxu3 }
 0x1fd   : > { %v4330_v24 = vpop.eup %4329  ;;  %v1976_v12 = vadd.f32 %v1975_v54, %v1886_v19 }
 0x1fe   : > { %v2047_v20 = vpack.c.bf16 %v4330_v24, %v4330_v24  ;;  %v4332_v6 = vpop.eup %4331 }
 0x1ff   : > { %v1320_v48 = vpop.f32.mrf.mxu1  ;;  %v1236_v58 = vpop.f32.mrf.mxu0  ;;  %4335 = vtanh.f32 %v1976_v12  ;;  %v1377_v55 = vpack.c.bf16 %v4332_v6, %v4332_v6 }
 0x200   : > { %v2191_v46 = vunpack.c.l.b16 %v2047_v20  ;;  %v1321_v53 = vadd.f32 %v1320_v48, %v1231_v16  ;;  %v4334_v22 = vpop.eup %4333  ;;  %v5955_v16 = vpack.c.b16 %v5376_v25, %v5374_v39 }
 0x201   : > { %v1376_v51 = vpack.c.bf16 %v4334_v22, %v4334_v22  ;;  %v2101_v10 = vunpack.c.l.b16 %v1377_v55 }
 0x202   : > { %2627 = vmatmul.bf16.gmra.mxu0 %v5146_v32  ;;  %2711 = vmatmul.bf16.gmra.mxu1 %v5146_v32  ;;  %v2210_v0 = vpack.c.b16 %v2191_v46, %v2190_v11  ;;  %4337 = vtanh.f32 %v1321_v53 }
 0x203   : > { %v2100_v4 = vunpack.c.l.b16 %v1376_v51 }
 0x204   : > { %v1977_v60 = vpop.f32.mrf.mxu3  ;;  %2238 = vrot.lane.b32.xlu1 %v2210_v0, %s4503_s14  ;;  %v1893_v21 = vpop.f32.mrf.mxu2 }
 0x205   : > { %v1978_v28 = vadd.f32 %v1977_v60, %v1888_v1  ;;  %v4336_v32 = vpop.eup %4335 }
 0x206   : > { %v2225_v19 = vpop.permute.xlu0 %2224  ;;  %v2048_v54 = vpack.c.bf16 %v4336_v32, %v4336_v32 }
 0x207   : > { %4339 = vtanh.f32 %v1978_v28  ;;  %v2264_v23 = vsel %vm2246_vm2, %v5955_v16, %v2225_v19  ;;  %v1322_v52 = vpop.f32.mrf.mxu1  ;;  %v1238_v39 = vpop.f32.mrf.mxu0 }
 0x208   : > { %v2346_v26 = vunpack.c.l.b16 %v2264_v23  ;;  %v2347_v27 = vunpack.c.h.b16 %v2264_v23  ;;  %v1323_v13 = vadd.f32 %v1322_v52, %v1233_v41  ;;  %v4338_v25 = vpop.eup %4337  ;;  %v2125_v41 = vpack.c.b16 %v2101_v10, %v2100_v4 }
 0x209   : > { %2998 = vmatmul.bf16.gmra.mxu2 %v5170_v35  ;;  %3082 = vmatmul.bf16.gmra.mxu3 %v5170_v35  ;;  %v2192_v46 = vunpack.c.l.b16 %v2048_v54  ;;  %v1390_v53 = vpack.c.bf16 %v4338_v25, %v4338_v25 }
 0x20a   : > { %v2348_v1 = vpack.c.b16 %v2346_v26, %v2346_v26  ;;  %v2349_v57 = vpack.c.b16 %v2347_v27, %v2347_v27  ;;  %4341 = vtanh.f32 %v1323_v13 }
 0x20b   : > { %v5552_v32 = vunpack.c.l.b16 %v1390_v53 }
 0x20c   : > { %3829 = vst.msk [vmem:[%s5430_s26 + $0x50] sm:$0xf] %vm2302_vm3, %v2348_v1  ;;  %v1896_v24 = vpop.f32.mrf.mxu2  ;;  %v1980_v20 = vpop.f32.mrf.mxu3 }
 0x20d   : > { %v4340_v12 = vpop.eup %4339  ;;  %3830 = vst.msk [vmem:[%s5430_s26 + $0x54] sm:$0xf] %vm2302_vm3, %v2349_v57  ;;  %v1981_v35 = vadd.f32 %v1980_v20, %v1891_v59 }
 0x20e   : > { %v2049_v48 = vpack.c.bf16 %v4340_v12, %v4340_v12  ;;  %v2229_v11 = vpop.permute.xlu2 %2228 }
 0x20f   : > { %v2270_v6 = vsel %vm2246_vm2, %v2125_v41, %v2229_v11  ;;  %v1325_v0 = vpop.f32.mrf.mxu1  ;;  %4343 = vtanh.f32 %v1981_v35 }
 0x210   : > { %v4342_v22 = vpop.eup %4341  ;;  %v2193_v60 = vunpack.c.l.b16 %v2049_v48  ;;  %v2366_v55 = vunpack.c.l.b16 %v2270_v6  ;;  %v2367_v28 = vunpack.c.h.b16 %v2270_v6  ;;  %v1326_v19 = vadd.f32 %v1325_v0, %v1236_v58  ;;  %v5561_v58 = vpop.f32.mrf.mxu0 }
 0x211   : > { %v1391_v51 = vpack.c.bf16 %v4342_v22, %v4342_v22 }
 0x212   : > { %v2368_v16 = vpack.c.b16 %v2366_v55, %v2366_v55  ;;  %v2369_v23 = vpack.c.b16 %v2367_v28, %v2367_v28  ;;  %2632 = vmatmul.bf16.gmra.mxu0 %v5176_v31  ;;  %2716 = vmatmul.bf16.gmra.mxu1 %v5176_v31  ;;  %v2211_v52 = vpack.c.b16 %v2193_v60, %v2192_v46  ;;  %4345 = vtanh.f32 %v1326_v19 }
 0x213   : > { %v5554_v59 = vunpack.c.l.b16 %v1391_v51 }
 0x214   : > { %3833 = vst.msk [vmem:[%s5430_s26 + $0x70] sm:$0xf] %vm2302_vm3, %v2368_v16  ;;  %2240 = vrot.lane.b32.xlu2 %v2211_v52, %s4503_s14  ;;  %v1898_v26 = vpop.f32.mrf.mxu2  ;;  %v1982_v27 = vpop.f32.mrf.mxu3 }
 0x215   : > { %3834 = vst.msk [vmem:[%s5430_s26 + $0x74] sm:$0xf] %vm2302_vm3, %v2369_v23  ;;  %v1983_v13 = vadd.f32 %v1982_v27, %v1893_v21  ;;  %v2132_v31 = vpack.c.b16 %v5554_v59, %v5552_v32  ;;  %v4344_v20 = vpop.eup %4343 }
 0x216   : > { %v2227_v10 = vpop.permute.xlu1 %2226  ;;  %v2050_v48 = vpack.c.bf16 %v4344_v20, %v4344_v20 }
 0x217   : > { %4347 = vtanh.f32 %v1983_v13  ;;  %v2267_v1 = vsel %vm2246_vm2, %v2124_v7, %v2227_v10  ;;  %v1327_v57 = vpop.f32.mrf.mxu1  ;;  %v1301_v13 = vadd.f32 %v5457_v56, %v5425_v17 }
 0x218   : > { %v2356_v4 = vunpack.c.l.b16 %v2267_v1  ;;  %v2357_v54 = vunpack.c.h.b16 %v2267_v1  ;;  %v1328_v25 = vadd.f32 %v1327_v57, %v1238_v39  ;;  %v4346_v41 = vpop.eup %4345  ;;  %v5575_v39 = vpop.f32.mrf.mxu0  ;;  %v2194_v6 = vunpack.c.l.b16 %v2050_v48 }
 0x219   : > { %3003 = vmatmul.bf16.gmra.mxu2 %v5195_v14  ;;  %3087 = vmatmul.bf16.gmra.mxu3 %v5195_v14  ;;  %v1392_v46 = vpack.c.bf16 %v4346_v41, %v4346_v41 }
 0x21a   : > { %v2358_v21 = vpack.c.b16 %v2356_v4, %v2356_v4  ;;  %v2359_v12 = vpack.c.b16 %v2357_v54, %v2357_v54  ;;  %4349 = vtanh.f32 %v1328_v25 }
 0x21b   : > { %v5581_v55 = vunpack.c.l.b16 %v1392_v46 }
 0x21c   : > { %3831 = vst.msk [vmem:[%s5430_s26 + $0x60] sm:$0xf] %vm2302_vm3, %v2358_v21  ;;  %v1985_v33 = vpop.f32.mrf.mxu3  ;;  %v2964_v5 = vpop.f32.mrf.mxu2 }
 0x21d   : > { %v4348_v7 = vpop.eup %4347  ;;  %3832 = vst.msk [vmem:[%s5430_s26 + $0x64] sm:$0xf] %vm2302_vm3, %v2359_v12  ;;  %v1986_v53 = vadd.f32 %v1985_v33, %v1896_v24 }
 0x21e   : > { %v2051_v11 = vpack.c.bf16 %v4348_v7, %v4348_v7 }
 0x21f   : > { %v5577_v35 = vpop.f32.mrf.mxu1  ;;  %4351 = vtanh.f32 %v1986_v53 }
 0x220   : > { %v4350_v14 = vpop.eup %4349  ;;  %v2195_v0 = vunpack.c.l.b16 %v2051_v11  ;;  %v2598_v27 = vpop.f32.mrf.mxu0 }
 0x221   : > { %v1393_v22 = vpack.c.bf16 %v4350_v14, %v4350_v14 }
 0x222   : > { %2637 = vmatmul.bf16.gmra.mxu0 %v5201_v34  ;;  %2721 = vmatmul.bf16.gmra.mxu1 %v5201_v34  ;;  %v2212_v60 = vpack.c.b16 %v2195_v0, %v2194_v6  ;;  %v1303_v34 = vadd.f32 %v5468_v30, %v5449_v9 }
 0x223   : > { %v5583_v28 = vunpack.c.l.b16 %v1393_v22  ;;  %v5956_v22 = vld [vmem:[#allocation4_spill] sm:$0xff] }
 0x224   : > { %2242 = vrot.lane.b32.xlu0 %v2212_v60, %s4503_s14  ;;  %v1987_v19 = vpop.f32.mrf.mxu3  ;;  %v2966_v24 = vpop.f32.mrf.mxu2 }
 0x225   : > { %v1988_v51 = vadd.f32 %v1987_v19, %v1898_v26  ;;  %v2133_v16 = vpack.c.b16 %v5583_v28, %v5581_v55  ;;  %v4352_v52 = vpop.eup %4351 }
 0x226   : > { %v2052_v26 = vpack.c.bf16 %v4352_v52, %v4352_v52 }
 0x227   : > { %4353 = vtanh.f32 %v1988_v51  ;;  %v5588_v23 = vpop.f32.mrf.mxu1 }
 0x228   : > { %4355 = vtanh.f32 %v1303_v34  ;;  %v2196_v20 = vunpack.c.l.b16 %v2052_v26  ;;  %v2600_v17 = vpop.f32.mrf.mxu0 }
 0x229   : > { %3008 = vmatmul.bf16.gmra.mxu2 %v5226_v45  ;;  %3092 = vmatmul.bf16.gmra.mxu3 %v5226_v45  ;;  %4357 = vtanh.f32 %v1301_v13 }
 0x22c   : > { %v2969_v10 = vpop.f32.mrf.mxu2  ;;  %v3053_v1 = vpop.f32.mrf.mxu3 }
 0x22d   : > { %v4354_v57 = vpop.eup %4353  ;;  %v3054_v54 = vadd.f32 %v3053_v1, %v2964_v5 }
 0x22e   : > { %v2053_v4 = vpack.c.bf16 %v4354_v57, %v4354_v57  ;;  %v4356_v21 = vpop.eup %4355 }
 0x22f   : > { %v2687_v25 = vpop.f32.mrf.mxu1  ;;  %4359 = vtanh.f32 %v3054_v54  ;;  %v4358_v56 = vpop.eup %4357  ;;  %v1383_v48 = vpack.c.bf16 %v4356_v21, %v4356_v21 }
 0x230   : > { %v2197_v9 = vunpack.c.l.b16 %v2053_v4  ;;  %v2688_v30 = vadd.f32 %v2687_v25, %v2598_v27  ;;  %v1382_v7 = vpack.c.bf16 %v4358_v56, %v4358_v56  ;;  %v2603_v52 = vpop.f32.mrf.mxu0 }
 0x231   : > { %v2107_v0 = vunpack.c.l.b16 %v1383_v48  ;;  %v5957_v48 = vld [vmem:[#allocation5_spill] sm:$0xff] }
 0x232   : > { %2642 = vmatmul.bf16.gmra.mxu0 %v5232_v62  ;;  %2726 = vmatmul.bf16.gmra.mxu1 %v5232_v62  ;;  %v2213_v45 = vpack.c.b16 %v2197_v9, %v2196_v20  ;;  %4361 = vtanh.f32 %v2688_v30 }
 0x234   : > { %v2971_v12 = vpop.f32.mrf.mxu2  ;;  %v3055_v41 = vpop.f32.mrf.mxu3  ;;  %2244 = vrot.lane.b32.xlu1 %v2213_v45, %s4503_s14 }
 0x235   : > { %v3056_v33 = vadd.f32 %v3055_v41, %v2966_v24  ;;  %v4360_v46 = vpop.eup %4359  ;;  %v2106_v24 = vunpack.c.l.b16 %v1382_v7 }
 0x236   : > { %v2231_v5 = vpop.permute.xlu0 %2230  ;;  %v3165_v51 = vpack.c.bf16 %v4360_v46, %v4360_v46 }
 0x237   : > { %4363 = vtanh.f32 %v3056_v33  ;;  %v2273_v11 = vsel %vm2246_vm2, %v2126_v61, %v2231_v5  ;;  %v2689_v62 = vpop.f32.mrf.mxu1  ;;  %v2128_v27 = vpack.c.b16 %v2107_v0, %v2106_v24 }
 0x238   : > { %v2376_v53 = vunpack.c.l.b16 %v2273_v11  ;;  %v2377_v14 = vunpack.c.h.b16 %v2273_v11  ;;  %v2690_v6 = vadd.f32 %v2689_v62, %v2600_v17  ;;  %v4362_v40 = vpop.eup %4361  ;;  %v3309_v1 = vunpack.c.l.b16 %v3165_v51 }
 0x239   : > { %3013 = vmatmul.bf16.gmra.mxu2 %v5956_v22  ;;  %3097 = vmatmul.bf16.gmra.mxu3 %v5956_v22  ;;  %v2796_v57 = vpack.c.bf16 %v4362_v40, %v4362_v40 }
 0x23a   : > { %v2378_v60 = vpack.c.b16 %v2376_v53, %v2376_v53  ;;  %v2379_v19 = vpack.c.b16 %v2377_v14, %v2377_v14  ;;  %4365 = vtanh.f32 %v2690_v6  ;;  %v2605_v14 = vpop.f32.mrf.mxu0 }
 0x23b   : > { %v5612_v5 = vunpack.c.l.b16 %v2796_v57 }
 0x23c   : > { %3835 = vst.msk [vmem:[%s5430_s26 + $0x80] sm:$0xf] %vm2302_vm3, %v2378_v60  ;;  %v2974_v36 = vpop.f32.mrf.mxu2  ;;  %v3058_v61 = vpop.f32.mrf.mxu3 }
 0x23d   : > { %v4364_v34 = vpop.eup %4363  ;;  %3836 = vst.msk [vmem:[%s5430_s26 + $0x84] sm:$0xf] %vm2302_vm3, %v2379_v19  ;;  %v3059_v4 = vadd.f32 %v3058_v61, %v2969_v10 }
 0x23e   : > { %v3166_v13 = vpack.c.bf16 %v4364_v34, %v4364_v34  ;;  %v2235_v26 = vpop.permute.xlu2 %2234 }
 0x23f   : > { %v2279_v54 = vsel %vm2246_vm2, %v2128_v27, %v2235_v26  ;;  %v2692_v25 = vpop.f32.mrf.mxu1  ;;  %4367 = vtanh.f32 %v3059_v4 }
 0x240   : > { %v4366_v20 = vpop.eup %4365  ;;  %v3310_v9 = vunpack.c.l.b16 %v3166_v13  ;;  %v2396_v30 = vunpack.c.l.b16 %v2279_v54  ;;  %v2397_v21 = vunpack.c.h.b16 %v2279_v54  ;;  %v2693_v45 = vadd.f32 %v2692_v25, %v2603_v52  ;;  %v5959_v54 = vld [vmem:[#allocation7_spill] sm:$0xff] }
 0x241   : > { %v2797_v17 = vpack.c.bf16 %v4366_v20, %v4366_v20 }
 0x242   : > { %v2398_v56 = vpack.c.b16 %v2396_v30, %v2396_v30  ;;  %v2399_v41 = vpack.c.b16 %v2397_v21, %v2397_v21  ;;  %2647 = vmatmul.bf16.gmra.mxu0 %v5957_v48  ;;  %2731 = vmatmul.bf16.gmra.mxu1 %v5957_v48  ;;  %v3341_v33 = vpack.c.b16 %v3310_v9, %v3309_v1  ;;  %4369 = vtanh.f32 %v2693_v45 }
 0x243   : > { %v5614_v10 = vunpack.c.l.b16 %v2797_v17  ;;  %v1318_v17 = vadd.f32 %v5528_v29, %v5509_v44  ;;  %v1316_v48 = vadd.f32 %v5517_v50, %v5490_v3  ;;  %v5961_v44 = vld [vmem:[#allocation9_spill] sm:$0xff] }
 0x244   : > { %3839 = vst.msk [vmem:[%s5430_s26 + $0xa0] sm:$0xf] %vm2302_vm3, %v2398_v56  ;;  %v2976_v7 = vpop.f32.mrf.mxu2  ;;  %v3060_v11 = vpop.f32.mrf.mxu3  ;;  %3357 = vrot.lane.b32.xlu2 %v3341_v33, %s4503_s14 }
 0x245   : > { %3840 = vst.msk [vmem:[%s5430_s26 + $0xa4] sm:$0xf] %vm2302_vm3, %v2399_v41  ;;  %v3061_v62 = vadd.f32 %v3060_v11, %v2971_v12  ;;  %v3262_v46 = vpack.c.b16 %v5614_v10, %v5612_v5  ;;  %v4368_v24 = vpop.eup %4367  ;;  %v5958_v12 = vld [vmem:[#allocation6_spill] sm:$0xff]  ;;  %v5960_v41 = vld [vmem:[#allocation8_spill] sm:$0xff] }
 0x246   : > { %v2233_v53 = vpop.permute.xlu1 %2232  ;;  %v3167_v34 = vpack.c.bf16 %v4368_v24, %v4368_v24 }
 0x247   : > { %4371 = vtanh.f32 %v3061_v62  ;;  %v2276_v6 = vsel %vm2246_vm2, %v2127_v49, %v2233_v53  ;;  %v2694_v0 = vpop.f32.mrf.mxu1 }
 0x248   : > { %v2386_v22 = vunpack.c.l.b16 %v2276_v6  ;;  %v2387_v60 = vunpack.c.h.b16 %v2276_v6  ;;  %v2695_v19 = vadd.f32 %v2694_v0, %v2605_v14  ;;  %v4370_v61 = vpop.eup %4369  ;;  %v3311_v1 = vunpack.c.l.b16 %v3167_v34 }
 0x249   : > { %3018 = vmatmul.bf16.gmra.mxu2 %v5958_v12  ;;  %3102 = vmatmul.bf16.gmra.mxu3 %v5958_v12  ;;  %v2798_v27 = vpack.c.bf16 %v4370_v61, %v4370_v61 }
 0x24a   : > { %v2388_v51 = vpack.c.b16 %v2386_v22, %v2386_v22  ;;  %v2389_v40 = vpack.c.b16 %v2387_v60, %v2387_v60  ;;  %4373 = vtanh.f32 %v2695_v19 }
 0x24b   : > { %v5635_v20 = vunpack.c.l.b16 %v2798_v27 }
 0x24c   : > { %3837 = vst.msk [vmem:[%s5430_s26 + $0x90] sm:$0xf] %vm2302_vm3, %v2388_v51  ;;  %v2979_v37 = vpop.f32.mrf.mxu2  ;;  %v3063_v47 = vpop.f32.mrf.mxu3 }
 0x24d   : > { %v4372_v49 = vpop.eup %4371  ;;  %3838 = vst.msk [vmem:[%s5430_s26 + $0x94] sm:$0xf] %vm2302_vm3, %v2389_v40  ;;  %v3064_v13 = vadd.f32 %v3063_v47, %v2974_v36 }
 0x24e   : > { %v3168_v52 = vpack.c.bf16 %v4372_v49, %v4372_v49  ;;  %v5962_v49 = vld [vmem:[#allocation10_spill] sm:$0xff] }
 0x24f   : > { %4375 = vtanh.f32 %v3064_v13 }
 0x250   : > { %v4374_v26 = vpop.eup %4373  ;;  %v3312_v57 = vunpack.c.l.b16 %v3168_v52 }
 0x251   : > { %v2799_v4 = vpack.c.bf16 %v4374_v26, %v4374_v26 }
 0x252   : > { %2652 = vmatmul.bf16.gmra.mxu0 %v5959_v54  ;;  %2736 = vmatmul.bf16.gmra.mxu1 %v5959_v54  ;;  %v3342_v25 = vpack.c.b16 %v3312_v57, %v3311_v1 }
 0x253   : > { %v5637_v9 = vunpack.c.l.b16 %v2799_v4 }
 0x254   : > { %v2981_v30 = vpop.f32.mrf.mxu2  ;;  %v3065_v21 = vpop.f32.mrf.mxu3  ;;  %3359 = vrot.lane.b32.xlu0 %v3342_v25, %s4503_s14 }
 0x255   : > { %v3066_v45 = vadd.f32 %v3065_v21, %v2976_v7  ;;  %v3263_v36 = vpack.c.b16 %v5637_v9, %v5635_v20  ;;  %v4376_v56 = vpop.eup %4375 }
 0x256   : > { %v3169_v33 = vpack.c.bf16 %v4376_v56, %v4376_v56 }
 0x257   : > { %4377 = vtanh.f32 %v3066_v45 }
 0x258   : > { %4379 = vtanh.f32 %v1318_v17  ;;  %v3313_v6 = vunpack.c.l.b16 %v3169_v33 }
 0x259   : > { %3023 = vmatmul.bf16.gmra.mxu2 %v5960_v41  ;;  %3107 = vmatmul.bf16.gmra.mxu3 %v5960_v41  ;;  %4381 = vtanh.f32 %v1316_v48  ;;  %v5963_v48 = vld [vmem:[#allocation11_spill] sm:$0xff] }
 0x25c   : > { %v2984_v11 = vpop.f32.mrf.mxu2  ;;  %v3068_v62 = vpop.f32.mrf.mxu3 }
 0x25d   : > { %v4378_v7 = vpop.eup %4377  ;;  %v3069_v14 = vadd.f32 %v3068_v62, %v2979_v37 }
 0x25e   : > { %v3170_v53 = vpack.c.bf16 %v4378_v7, %v4378_v7  ;;  %v4380_v22 = vpop.eup %4379 }
 0x25f   : > { %4383 = vtanh.f32 %v3069_v14  ;;  %v4382_v60 = vpop.eup %4381  ;;  %v1389_v50 = vpack.c.bf16 %v4380_v22, %v4380_v22 }
 0x260   : > { %v3314_v0 = vunpack.c.l.b16 %v3170_v53  ;;  %v1388_v51 = vpack.c.bf16 %v4382_v60, %v4382_v60 }
 0x261   : > { %v2113_v47 = vunpack.c.l.b16 %v1389_v50 }
 0x262   : > { %2657 = vmatmul.bf16.gmra.mxu0 %v5961_v44  ;;  %2741 = vmatmul.bf16.gmra.mxu1 %v5961_v44  ;;  %v3343_v29 = vpack.c.b16 %v3314_v0, %v3313_v6  ;;  %v2112_v13 = vunpack.c.l.b16 %v1388_v51  ;;  %v5673_v6 = vpop.f32.mrf.mxu0 }
 0x264   : > { %v2986_v19 = vpop.f32.mrf.mxu2  ;;  %v3070_v3 = vpop.f32.mrf.mxu3  ;;  %3361 = vrot.lane.b32.xlu1 %v3343_v29, %s4503_s14  ;;  %v2131_v2 = vpack.c.b16 %v2113_v47, %v2112_v13  ;;  %v5964_v29 = vld [vmem:[#allocation12_spill] sm:$0xff] }
 0x265   : > { %v3071_v24 = vadd.f32 %v3070_v3, %v2981_v30  ;;  %v4384_v37 = vpop.eup %4383 }
 0x266   : > { %v2237_v12 = vpop.permute.xlu0 %2236  ;;  %v3171_v26 = vpack.c.bf16 %v4384_v37, %v4384_v37 }
 0x267   : > { %4385 = vtanh.f32 %v3071_v24  ;;  %v2282_v40 = vsel %vm2246_vm2, %v2129_v38, %v2237_v12 }
 0x268   : > { %v2406_v61 = vunpack.c.l.b16 %v2282_v40  ;;  %v2407_v34 = vunpack.c.h.b16 %v2282_v40  ;;  %v3315_v30 = vunpack.c.l.b16 %v3171_v26 }
 0x269   : > { %3028 = vmatmul.bf16.gmra.mxu2 %v5962_v49  ;;  %3112 = vmatmul.bf16.gmra.mxu3 %v5962_v49 }
 0x26a   : > { %v2408_v52 = vpack.c.b16 %v2406_v61, %v2406_v61  ;;  %v2409_v27 = vpack.c.b16 %v2407_v34, %v2407_v34  ;;  %v5683_v61 = vpop.f32.mrf.mxu0 }
 0x26c   : > { %3841 = vst.msk [vmem:[%s5430_s26 + $0xb0] sm:$0xf] %vm2302_vm3, %v2408_v52  ;;  %v2989_v1 = vpop.f32.mrf.mxu2  ;;  %v3073_v57 = vpop.f32.mrf.mxu3 }
 0x26d   : > { %v4386_v42 = vpop.eup %4385  ;;  %3842 = vst.msk [vmem:[%s5430_s26 + $0xb4] sm:$0xf] %vm2302_vm3, %v2409_v27  ;;  %v3074_v54 = vadd.f32 %v3073_v57, %v2984_v11  ;;  %v2685_v27 = vadd.f32 %v5588_v23, %v5575_v39 }
 0x26e   : > { %v3172_v38 = vpack.c.bf16 %v4386_v42, %v4386_v42  ;;  %v2241_v4 = vpop.permute.xlu2 %2240 }
 0x26f   : > { %v2288_v25 = vsel %vm2246_vm2, %v2131_v2, %v2241_v4  ;;  %4387 = vtanh.f32 %v3074_v54 }
 0x270   : > { %v3316_v21 = vunpack.c.l.b16 %v3172_v38  ;;  %v2426_v45 = vunpack.c.l.b16 %v2288_v25  ;;  %v2427_v17 = vunpack.c.h.b16 %v2288_v25 }
 0x272   : > { %v2428_v56 = vpack.c.b16 %v2426_v45, %v2426_v45  ;;  %v2429_v41 = vpack.c.b16 %v2427_v17, %v2427_v17  ;;  %2662 = vmatmul.bf16.gmra.mxu0 %v5963_v48  ;;  %2746 = vmatmul.bf16.gmra.mxu1 %v5963_v48  ;;  %v3344_v33 = vpack.c.b16 %v3316_v21, %v3315_v30  ;;  %v5698_v23 = vpop.f32.mrf.mxu0  ;;  %v5965_v30 = vld [vmem:[#allocation2_spill] sm:$0xff] }
 0x274   : > { %3845 = vst.msk [vmem:[%s5430_s26 + $0xd0] sm:$0xf] %vm2302_vm3, %v2428_v56  ;;  %v2991_v62 = vpop.f32.mrf.mxu2  ;;  %v3075_v7 = vpop.f32.mrf.mxu3  ;;  %3363 = vrot.lane.b32.xlu2 %v3344_v33, %s4503_s14 }
 0x275   : > { %3846 = vst.msk [vmem:[%s5430_s26 + $0xd4] sm:$0xf] %vm2302_vm3, %v2429_v41  ;;  %v3076_v11 = vadd.f32 %v3075_v7, %v2986_v19  ;;  %v4388_v44 = vpop.eup %4387  ;;  %v5677_v19 = vpop.f32.mrf.mxu1 }
 0x276   : > { %v2239_v53 = vpop.permute.xlu1 %2238  ;;  %v3173_v50 = vpack.c.bf16 %v4388_v44, %v4388_v44 }
 0x277   : > { %4389 = vtanh.f32 %v3076_v11  ;;  %v2285_v14 = vsel %vm2246_vm2, %v2130_v43, %v2239_v53 }
 0x278   : > { %v2416_v0 = vunpack.c.l.b16 %v2285_v14  ;;  %v2417_v22 = vunpack.c.h.b16 %v2285_v14  ;;  %v3317_v51 = vunpack.c.l.b16 %v3173_v50  ;;  %v5966_v14 = vld [vmem:[#allocation3_spill] sm:$0xff] }
 0x279   : > { %3033 = vmatmul.bf16.gmra.mxu2 %v5964_v29  ;;  %3117 = vmatmul.bf16.gmra.mxu3 %v5964_v29 }
 0x27a   : > { %v2418_v60 = vpack.c.b16 %v2416_v0, %v2416_v0  ;;  %v2419_v3 = vpack.c.b16 %v2417_v22, %v2417_v22  ;;  %v5709_v29 = vpop.f32.mrf.mxu0 }
 0x27c   : > { %3843 = vst.msk [vmem:[%s5430_s26 + $0xc0] sm:$0xf] %vm2302_vm3, %v2418_v60  ;;  %v2994_v63 = vpop.f32.mrf.mxu2  ;;  %v3078_v18 = vpop.f32.mrf.mxu3 }
 0x27d   : > { %v4390_v24 = vpop.eup %4389  ;;  %3844 = vst.msk [vmem:[%s5430_s26 + $0xc4] sm:$0xf] %vm2302_vm3, %v2419_v3  ;;  %v3079_v12 = vadd.f32 %v3078_v18, %v2989_v1  ;;  %v5688_v49 = vpop.f32.mrf.mxu1 }
 0x27e   : > { %v3174_v43 = vpack.c.bf16 %v4390_v24, %v4390_v24 }
 0x27f   : > { %4391 = vtanh.f32 %v3079_v12 }
 0x280   : > { %v3318_v40 = vunpack.c.l.b16 %v3174_v43 }
 0x282   : > { %2667 = vmatmul.bf16.gmra.mxu0 %v5390_v15  ;;  %2751 = vmatmul.bf16.gmra.mxu1 %v5390_v15  ;;  %v3345_v34 = vpack.c.b16 %v3318_v40, %v3317_v51  ;;  %v2683_v15 = vadd.f32 %v5577_v35, %v5561_v58 }
 0x284   : > { %v2996_v37 = vpop.f32.mrf.mxu2  ;;  %v3080_v47 = vpop.f32.mrf.mxu3  ;;  %3365 = vrot.lane.b32.xlu0 %v3345_v34, %s4503_s14 }
 0x285   : > { %v3081_v52 = vadd.f32 %v3080_v47, %v2991_v62  ;;  %v4392_v13 = vpop.eup %4391  ;;  %v5696_v38 = vpop.f32.mrf.mxu1 }
 0x286   : > { %v3175_v26 = vpack.c.bf16 %v4392_v13, %v4392_v13 }
 0x287   : > { %4393 = vtanh.f32 %v3081_v52 }
 0x288   : > { %4395 = vtanh.f32 %v2685_v27  ;;  %v3319_v54 = vunpack.c.l.b16 %v3175_v26 }
 0x289   : > { %3038 = vmatmul.bf16.gmra.mxu2 %v5412_v8  ;;  %3122 = vmatmul.bf16.gmra.mxu3 %v5412_v8  ;;  %4397 = vtanh.f32 %v2683_v15  ;;  %v5721_v15 = vpop.f32.mrf.mxu0 }
 0x28c   : > { %v2999_v1 = vpop.f32.mrf.mxu2  ;;  %v3083_v57 = vpop.f32.mrf.mxu3 }
 0x28d   : > { %v4394_v42 = vpop.eup %4393  ;;  %v3084_v4 = vadd.f32 %v3083_v57, %v2994_v63  ;;  %v5706_v53 = vpop.f32.mrf.mxu1 }
 0x28e   : > { %v3176_v2 = vpack.c.bf16 %v4394_v42, %v4394_v42  ;;  %v4396_v25 = vpop.eup %4395  ;;  %v2705_v20 = vadd.f32 %v5706_v53, %v5709_v29 }
 0x28f   : > { %4399 = vtanh.f32 %v3084_v4  ;;  %v4398_v58 = vpop.eup %4397  ;;  %v2795_v45 = vpack.c.bf16 %v4396_v25, %v4396_v25 }
 0x290   : > { %v3320_v39 = vunpack.c.l.b16 %v3176_v2  ;;  %v2794_v41 = vpack.c.bf16 %v4398_v58, %v4398_v58 }
 0x291   : > { %v3230_v11 = vunpack.c.l.b16 %v2795_v45  ;;  %v5735_v45 = vpop.f32.mrf.mxu0 }
 0x292   : > { %2756 = vmatmul.bf16.gmra.mxu1 %v5965_v30  ;;  %v3346_v8 = vpack.c.b16 %v3320_v39, %v3319_v54  ;;  %v3229_v44 = vunpack.c.l.b16 %v2794_v41 }
 0x294   : > { %v3001_v35 = vpop.f32.mrf.mxu2  ;;  %v3085_v21 = vpop.f32.mrf.mxu3  ;;  %3367 = vrot.lane.b32.xlu1 %v3346_v8, %s4503_s14  ;;  %v3261_v3 = vpack.c.b16 %v3230_v11, %v3229_v44 }
 0x295   : > { %v3086_v17 = vadd.f32 %v3085_v21, %v2996_v37  ;;  %v4400_v7 = vpop.eup %4399  ;;  %v5716_v52 = vpop.f32.mrf.mxu1 }
 0x296   : > { %v2243_v56 = vpop.permute.xlu0 %2242  ;;  %v3177_v60 = vpack.c.bf16 %v4400_v7, %v4400_v7 }
 0x297   : > { %4401 = vtanh.f32 %v3086_v17  ;;  %v2291_v48 = vsel %vm2246_vm2, %v2132_v31, %v2243_v56 }
 0x298   : > { %v2436_v33 = vunpack.c.l.b16 %v2291_v48  ;;  %v2437_v62 = vunpack.c.h.b16 %v2291_v48  ;;  %v3321_v43 = vunpack.c.l.b16 %v3177_v60 }
 0x299   : > { %3127 = vmatmul.bf16.gmra.mxu3 %v5966_v14  ;;  %v5742_v11 = vpop.f32.mrf.mxu0  ;;  %v2698_v14 = vadd.f32 %v5677_v19, %v5673_v6 }
 0x29a   : > { %v2438_v0 = vpack.c.b16 %v2436_v33, %v2436_v33  ;;  %v2439_v22 = vpack.c.b16 %v2437_v62, %v2437_v62  ;;  %v2700_v62 = vadd.f32 %v5688_v49, %v5683_v61 }
 0x29c   : > { %3847 = vst.msk [vmem:[%s5430_s26 + $0xe0] sm:$0xf] %vm2302_vm3, %v2438_v0  ;;  %v3004_v32 = vpop.f32.mrf.mxu2  ;;  %v3088_v59 = vpop.f32.mrf.mxu3 }
 0x29d   : > { %v4402_v31 = vpop.eup %4401  ;;  %3848 = vst.msk [vmem:[%s5430_s26 + $0xe4] sm:$0xf] %vm2302_vm3, %v2439_v22  ;;  %v3089_v18 = vadd.f32 %v3088_v59, %v2999_v1  ;;  %v5731_v21 = vpop.f32.mrf.mxu1 }
 0x29e   : > { %v3178_v50 = vpack.c.bf16 %v4402_v31, %v4402_v31  ;;  %v3358_v63 = vpop.permute.xlu2 %3357 }
 0x29f   : > { %v3391_v24 = vsel %vm2246_vm2, %v3261_v3, %v3358_v63  ;;  %4403 = vtanh.f32 %v3089_v18 }
 0x2a0   : > { %v3322_v12 = vunpack.c.l.b16 %v3178_v50  ;;  %v3438_v51 = vunpack.c.l.b16 %v3391_v24  ;;  %v3439_v40 = vunpack.c.h.b16 %v3391_v24 }
 0x2a1   : > { %v5748_v49 = vpop.f32.mrf.mxu0 }
 0x2a2   : > { %v3440_v34 = vpack.c.b16 %v3438_v51, %v3438_v51  ;;  %v3441_v37 = vpack.c.b16 %v3439_v40, %v3439_v40  ;;  %v3347_v47 = vpack.c.b16 %v3322_v12, %v3321_v43 }
 0x2a4   : > { %4043 = vst.msk [vmem:[%s5430_s26 + $0x8] sm:$0xf] %vm2302_vm3, %v3440_v34  ;;  %v3006_v27 = vpop.f32.mrf.mxu2  ;;  %v3090_v13 = vpop.f32.mrf.mxu3  ;;  %3369 = vrot.lane.b32.xlu2 %v3347_v47, %s4503_s14 }
 0x2a5   : > { %4044 = vst.msk [vmem:[%s5430_s26 + $0xc] sm:$0xf] %vm2302_vm3, %v3441_v37  ;;  %v3091_v26 = vadd.f32 %v3090_v13, %v3001_v35  ;;  %v4404_v4 = vpop.eup %4403  ;;  %v5738_v33 = vpop.f32.mrf.mxu1 }
 0x2a6   : > { %v2245_v1 = vpop.permute.xlu1 %2244  ;;  %v3179_v25 = vpack.c.bf16 %v4404_v4, %v4404_v4 }
 0x2a7   : > { %4405 = vtanh.f32 %v3091_v26  ;;  %v2294_v57 = vsel %vm2246_vm2, %v2133_v16, %v2245_v1 }
 0x2a8   : > { %v2446_v42 = vunpack.c.l.b16 %v2294_v57  ;;  %v2447_v2 = vunpack.c.h.b16 %v2294_v57  ;;  %v3323_v28 = vunpack.c.l.b16 %v3179_v25 }
 0x2a9   : > { %v5759_v5 = vpop.f32.mrf.mxu0 }
 0x2aa   : > { %v2448_v54 = vpack.c.b16 %v2446_v42, %v2446_v42  ;;  %v2449_v39 = vpack.c.b16 %v2447_v2, %v2447_v2 }
 0x2ac   : > { %3849 = vst.msk [vmem:[%s5430_s26 + $0xf0] sm:$0xf] %vm2302_vm3, %v2448_v54  ;;  %v3009_v30 = vpop.f32.mrf.mxu2  ;;  %v3093_v8 = vpop.f32.mrf.mxu3 }
 0x2ad   : > { %v4406_v58 = vpop.eup %4405  ;;  %3850 = vst.msk [vmem:[%s5430_s26 + $0xf4] sm:$0xf] %vm2302_vm3, %v2449_v39  ;;  %v3094_v55 = vadd.f32 %v3093_v8, %v3004_v32  ;;  %v5746_v50 = vpop.f32.mrf.mxu1 }
 0x2ae   : > { %v3180_v35 = vpack.c.bf16 %v4406_v58, %v4406_v58 }
 0x2af   : > { %4407 = vtanh.f32 %v3094_v55 }
 0x2b0   : > { %v3324_v16 = vunpack.c.l.b16 %v3180_v35 }
 0x2b2   : > { %v3348_v17 = vpack.c.b16 %v3324_v16, %v3323_v28 }
 0x2b4   : > { %v3011_v56 = vpop.f32.mrf.mxu2  ;;  %v3095_v41 = vpop.f32.mrf.mxu3  ;;  %3371 = vrot.lane.b32.xlu0 %v3348_v17, %s4503_s14 }
 0x2b5   : > { %v3096_v48 = vadd.f32 %v3095_v41, %v3006_v27  ;;  %v4408_v7 = vpop.eup %4407  ;;  %v5755_v57 = vpop.f32.mrf.mxu1 }
 0x2b6   : > { %v3181_v0 = vpack.c.bf16 %v4408_v7, %v4408_v7 }
 0x2b7   : > { %4409 = vtanh.f32 %v3096_v48 }
 0x2b8   : > { %4411 = vtanh.f32 %v2700_v62  ;;  %v3325_v31 = vunpack.c.l.b16 %v3181_v0 }
 0x2b9   : > { %4413 = vtanh.f32 %v2698_v14  ;;  %v5771_v14 = vpop.f32.mrf.mxu0 }
 0x2bc   : > { %v3014_v22 = vpop.f32.mrf.mxu2  ;;  %v3098_v44 = vpop.f32.mrf.mxu3 }
 0x2bd   : > { %v4410_v60 = vpop.eup %4409  ;;  %v3099_v59 = vadd.f32 %v3098_v44, %v3009_v30  ;;  %v5767_v48 = vpop.f32.mrf.mxu1 }
 0x2be   : > { %v3182_v32 = vpack.c.bf16 %v4410_v60, %v4410_v60  ;;  %v4412_v63 = vpop.eup %4411 }
 0x2bf   : > { %4415 = vtanh.f32 %v3099_v59  ;;  %v4414_v18 = vpop.eup %4413  ;;  %v2801_v19 = vpack.c.bf16 %v4412_v63, %v4412_v63 }
 0x2c0   : > { %v3326_v3 = vunpack.c.l.b16 %v3182_v32  ;;  %v2800_v51 = vpack.c.bf16 %v4414_v18, %v4414_v18 }
 0x2c1   : > { %v3236_v27 = vunpack.c.l.b16 %v2801_v19  ;;  %v5785_v19 = vpop.f32.mrf.mxu0 }
 0x2c2   : > { %v3349_v61 = vpack.c.b16 %v3326_v3, %v3325_v31  ;;  %v3235_v1 = vunpack.c.l.b16 %v2800_v51 }
 0x2c4   : > { %v3016_v24 = vpop.f32.mrf.mxu2  ;;  %v3100_v6 = vpop.f32.mrf.mxu3  ;;  %3373 = vrot.lane.b32.xlu1 %v3349_v61, %s4503_s14  ;;  %v3264_v10 = vpack.c.b16 %v3236_v27, %v3235_v1 }
 0x2c5   : > { %v3101_v43 = vadd.f32 %v3100_v6, %v3011_v56  ;;  %v4416_v47 = vpop.eup %4415 }
 0x2c6   : > { %v3360_v12 = vpop.permute.xlu0 %3359  ;;  %v3183_v42 = vpack.c.bf16 %v4416_v47, %v4416_v47 }
 0x2c7   : > { %4417 = vtanh.f32 %v3101_v43  ;;  %v3394_v40 = vsel %vm2246_vm2, %v3262_v46, %v3360_v12  ;;  %v2703_v43 = vadd.f32 %v5696_v38, %v5698_v23  ;;  %v2713_v38 = vadd.f32 %v5738_v33, %v5742_v11 }
 0x2c8   : > { %v3448_v34 = vunpack.c.l.b16 %v3394_v40  ;;  %v3449_v37 = vunpack.c.h.b16 %v3394_v40  ;;  %v3327_v8 = vunpack.c.l.b16 %v3183_v42  ;;  %v2708_v33 = vadd.f32 %v5716_v52, %v5721_v15 }
 0x2c9   : > { %v5796_v23 = vpop.f32.mrf.mxu0 }
 0x2ca   : > { %v3450_v13 = vpack.c.b16 %v3448_v34, %v3448_v34  ;;  %v3451_v26 = vpack.c.b16 %v3449_v37, %v3449_v37  ;;  %v2715_v34 = vadd.f32 %v5746_v50, %v5748_v49  ;;  %v2710_v49 = vadd.f32 %v5731_v21, %v5735_v45 }
 0x2cc   : > { %4045 = vst.msk [vmem:[%s5430_s26 + $0x18] sm:$0xf] %vm2302_vm3, %v3450_v13  ;;  %v3019_v2 = vpop.f32.mrf.mxu2  ;;  %v3103_v4 = vpop.f32.mrf.mxu3 }
 0x2cd   : > { %v4418_v54 = vpop.eup %4417  ;;  %4046 = vst.msk [vmem:[%s5430_s26 + $0x1c] sm:$0xf] %vm2302_vm3, %v3451_v26  ;;  %v3104_v25 = vadd.f32 %v3103_v4, %v3014_v22 }
 0x2ce   : > { %v3184_v46 = vpack.c.bf16 %v4418_v54, %v4418_v54  ;;  %v3364_v39 = vpop.permute.xlu2 %3363 }
 0x2cf   : > { %v3400_v30 = vsel %vm2246_vm2, %v3264_v10, %v3364_v39  ;;  %4419 = vtanh.f32 %v3104_v25 }
 0x2d0   : > { %v3328_v58 = vunpack.c.l.b16 %v3184_v46  ;;  %v3468_v35 = vunpack.c.l.b16 %v3400_v30  ;;  %v3469_v55 = vunpack.c.h.b16 %v3400_v30 }
 0x2d1   : > { %v5805_v45 = vpop.f32.mrf.mxu0 }
 0x2d2   : > { %v3470_v28 = vpack.c.b16 %v3468_v35, %v3468_v35  ;;  %v3471_v16 = vpack.c.b16 %v3469_v55, %v3469_v55  ;;  %v3350_v17 = vpack.c.b16 %v3328_v58, %v3327_v8 }
 0x2d4   : > { %4049 = vst.msk [vmem:[%s5430_s26 + $0x38] sm:$0xf] %vm2302_vm3, %v3470_v28  ;;  %v3021_v56 = vpop.f32.mrf.mxu2  ;;  %v3105_v41 = vpop.f32.mrf.mxu3  ;;  %3375 = vrot.lane.b32.xlu2 %v3350_v17, %s4503_s14 }
 0x2d5   : > { %4050 = vst.msk [vmem:[%s5430_s26 + $0x3c] sm:$0xf] %vm2302_vm3, %v3471_v16  ;;  %v3106_v62 = vadd.f32 %v3105_v41, %v3016_v24  ;;  %v4420_v60 = vpop.eup %4419  ;;  %v5781_v24 = vpop.f32.mrf.mxu1 }
 0x2d6   : > { %v3362_v7 = vpop.permute.xlu1 %3361  ;;  %v3185_v31 = vpack.c.bf16 %v4420_v60, %v4420_v60 }
 0x2d7   : > { %4421 = vtanh.f32 %v3106_v62  ;;  %v3397_v0 = vsel %vm2246_vm2, %v3263_v36, %v3362_v7 }
 0x2d8   : > { %v3458_v22 = vunpack.c.l.b16 %v3397_v0  ;;  %v3459_v44 = vunpack.c.h.b16 %v3397_v0  ;;  %v3329_v9 = vunpack.c.l.b16 %v3185_v31 }
 0x2da   : > { %v3460_v32 = vpack.c.b16 %v3458_v22, %v3458_v22  ;;  %v3461_v59 = vpack.c.b16 %v3459_v44, %v3459_v44 }
 0x2dc   : > { %4047 = vst.msk [vmem:[%s5430_s26 + $0x28] sm:$0xf] %vm2302_vm3, %v3460_v32  ;;  %v3108_v3 = vpop.f32.mrf.mxu3  ;;  %v3024_v18 = vpop.f32.mrf.mxu2 }
 0x2dd   : > { %v4422_v63 = vpop.eup %4421  ;;  %4048 = vst.msk [vmem:[%s5430_s26 + $0x2c] sm:$0xf] %vm2302_vm3, %v3461_v59  ;;  %v3109_v6 = vadd.f32 %v3108_v3, %v3019_v2  ;;  %v5792_v37 = vpop.f32.mrf.mxu1 }
 0x2de   : > { %v3186_v61 = vpack.c.bf16 %v4422_v63, %v4422_v63 }
 0x2df   : > { %4423 = vtanh.f32 %v3109_v6 }
 0x2e0   : > { %v3330_v36 = vunpack.c.l.b16 %v3186_v61  ;;  %4425 = vtanh.f32 %v2705_v20 }
 0x2e1   : > { %4427 = vtanh.f32 %v2703_v43 }
 0x2e2   : > { %v3351_v12 = vpack.c.b16 %v3330_v36, %v3329_v9  ;;  %v2640_v36 = vpop.f32.mrf.mxu0 }
 0x2e4   : > { %v3110_v51 = vpop.f32.mrf.mxu3  ;;  %3377 = vrot.lane.b32.xlu0 %v3351_v12, %s4503_s14  ;;  %v3026_v53 = vpop.f32.mrf.mxu2 }
 0x2e5   : > { %v3111_v40 = vadd.f32 %v3110_v51, %v3021_v56  ;;  %v4424_v29 = vpop.eup %4423  ;;  %v5802_v8 = vpop.f32.mrf.mxu1 }
 0x2e6   : > { %v4426_v47 = vpop.eup %4425  ;;  %v3187_v13 = vpack.c.bf16 %v4424_v29, %v4424_v29 }
 0x2e7   : > { %4429 = vtanh.f32 %v3111_v40  ;;  %v4428_v27 = vpop.eup %4427  ;;  %v2803_v42 = vpack.c.bf16 %v4426_v47, %v4426_v47 }
 0x2e8   : > { %4431 = vtanh.f32 %v2715_v34  ;;  %v2802_v4 = vpack.c.bf16 %v4428_v27, %v4428_v27  ;;  %v3331_v54 = vunpack.c.l.b16 %v3187_v13 }
 0x2e9   : > { %4433 = vtanh.f32 %v2713_v38  ;;  %v3238_v46 = vunpack.c.l.b16 %v2803_v42 }
 0x2ea   : > { %v3237_v30 = vunpack.c.l.b16 %v2802_v4 }
 0x2ec   : > { %v3113_v26 = vpop.f32.mrf.mxu3  ;;  %v3029_v11 = vpop.f32.mrf.mxu2  ;;  %v3265_v55 = vpack.c.b16 %v3238_v46, %v3237_v30 }
 0x2ed   : > { %v4430_v1 = vpop.eup %4429  ;;  %v3114_v50 = vadd.f32 %v3113_v26, %v3024_v18  ;;  %v2729_v18 = vpop.f32.mrf.mxu1 }
 0x2ee   : > { %v3188_v2 = vpack.c.bf16 %v4430_v1, %v4430_v1  ;;  %v4432_v39 = vpop.eup %4431 }
 0x2ef   : > { %4435 = vtanh.f32 %v3114_v50  ;;  %v4434_v58 = vpop.eup %4433  ;;  %v2807_v21 = vpack.c.bf16 %v4432_v39, %v4432_v39  ;;  %v5821_v39 = vpop.f32.mrf.mxu0 }
 0x2f0   : > { %v3332_v10 = vunpack.c.l.b16 %v3188_v2  ;;  %4437 = vtanh.f32 %v2710_v49  ;;  %v2806_v52 = vpack.c.bf16 %v4434_v58, %v4434_v58 }
 0x2f1   : > { %4439 = vtanh.f32 %v2708_v33  ;;  %v3242_v62 = vunpack.c.l.b16 %v2807_v21  ;;  %v2720_v21 = vadd.f32 %v5767_v48, %v5771_v14  ;;  %v2730_v48 = vadd.f32 %v2729_v18, %v2640_v36 }
 0x2f2   : > { %v3352_v25 = vpack.c.b16 %v3332_v10, %v3331_v54  ;;  %v3241_v44 = vunpack.c.l.b16 %v2806_v52  ;;  %v2723_v36 = vadd.f32 %v5781_v24, %v5785_v19 }
 0x2f4   : > { %v3115_v35 = vpop.f32.mrf.mxu3  ;;  %3379 = vrot.lane.b32.xlu1 %v3352_v25, %s4503_s14  ;;  %v3031_v59 = vpop.f32.mrf.mxu2  ;;  %v3267_v61 = vpack.c.b16 %v3242_v62, %v3241_v44 }
 0x2f5   : > { %v3116_v28 = vadd.f32 %v3115_v35, %v3026_v53  ;;  %v4436_v41 = vpop.eup %4435  ;;  %v5818_v50 = vpop.f32.mrf.mxu1 }
 0x2f6   : > { %v3366_v16 = vpop.permute.xlu0 %3365  ;;  %v4438_v7 = vpop.eup %4437  ;;  %v3189_v32 = vpack.c.bf16 %v4436_v41, %v4436_v41 }
 0x2f7   : > { %4441 = vtanh.f32 %v3116_v28  ;;  %v3403_v15 = vsel %vm2246_vm2, %v3265_v55, %v3366_v16  ;;  %v4440_v60 = vpop.eup %4439  ;;  %v2805_v63 = vpack.c.bf16 %v4438_v7, %v4438_v7  ;;  %v5833_v41 = vpop.f32.mrf.mxu0 }
 0x2f8   : > { %v3478_v17 = vunpack.c.l.b16 %v3403_v15  ;;  %v3479_v56 = vunpack.c.h.b16 %v3403_v15  ;;  %v2804_v9 = vpack.c.bf16 %v4440_v60, %v4440_v60  ;;  %v3333_v51 = vunpack.c.l.b16 %v3189_v32 }
 0x2f9   : > { %v3240_v29 = vunpack.c.l.b16 %v2805_v63 }
 0x2fa   : > { %v3480_v0 = vpack.c.b16 %v3478_v17, %v3478_v17  ;;  %v3481_v22 = vpack.c.b16 %v3479_v56, %v3479_v56  ;;  %v3239_v13 = vunpack.c.l.b16 %v2804_v9  ;;  %v2718_v17 = vadd.f32 %v5755_v57, %v5759_v5 }
 0x2fc   : > { %4051 = vst.msk [vmem:[%s5430_s26 + $0x48] sm:$0xf] %vm2302_vm3, %v3480_v0  ;;  %v3118_v31 = vpop.f32.mrf.mxu3  ;;  %v3266_v1 = vpack.c.b16 %v3240_v29, %v3239_v13  ;;  %v3034_v2 = vpop.f32.mrf.mxu2 }
 0x2fd   : > { %v4442_v3 = vpop.eup %4441  ;;  %4052 = vst.msk [vmem:[%s5430_s26 + $0x4c] sm:$0xf] %vm2302_vm3, %v3481_v22  ;;  %v3119_v43 = vadd.f32 %v3118_v31, %v3029_v11  ;;  %v5829_v15 = vpop.f32.mrf.mxu1  ;;  %v2728_v22 = vadd.f32 %v5802_v8, %v5805_v45 }
 0x2fe   : > { %v3190_v6 = vpack.c.bf16 %v4442_v3, %v4442_v3  ;;  %v3370_v20 = vpop.permute.xlu2 %3369 }
 0x2ff   : > { %v3409_v12 = vsel %vm2246_vm2, %v3267_v61, %v3370_v20  ;;  %4443 = vtanh.f32 %v3119_v43  ;;  %v5840_v3 = vpop.f32.mrf.mxu0 }
 0x300   : > { %v3334_v40 = vunpack.c.l.b16 %v3190_v6  ;;  %v3498_v34 = vunpack.c.l.b16 %v3409_v12  ;;  %v3499_v53 = vunpack.c.h.b16 %v3409_v12  ;;  %v2725_v6 = vadd.f32 %v5792_v37, %v5796_v23 }
 0x302   : > { %v3500_v47 = vpack.c.b16 %v3498_v34, %v3498_v34  ;;  %v3501_v38 = vpack.c.b16 %v3499_v53, %v3499_v53  ;;  %v3353_v27 = vpack.c.b16 %v3334_v40, %v3333_v51 }
 0x304   : > { %4055 = vst.msk [vmem:[%s5430_s26 + $0x68] sm:$0xf] %vm2302_vm3, %v3500_v47  ;;  %v3120_v26 = vpop.f32.mrf.mxu3  ;;  %3381 = vrot.lane.b32.xlu2 %v3353_v27, %s4503_s14  ;;  %v3036_v16 = vpop.f32.mrf.mxu2 }
 0x305   : > { %4056 = vst.msk [vmem:[%s5430_s26 + $0x6c] sm:$0xf] %vm2302_vm3, %v3501_v38  ;;  %v3121_v42 = vadd.f32 %v3120_v26, %v3031_v59  ;;  %v4444_v46 = vpop.eup %4443  ;;  %v5838_v60 = vpop.f32.mrf.mxu1 }
 0x306   : > { %v3368_v4 = vpop.permute.xlu1 %3367  ;;  %v3191_v25 = vpack.c.bf16 %v4444_v46, %v4444_v46 }
 0x307   : > { %4445 = vtanh.f32 %v3121_v42  ;;  %v3406_v49 = vsel %vm2246_vm2, %v3266_v1, %v3368_v4  ;;  %v5849_v27 = vpop.f32.mrf.mxu0 }
 0x308   : > { %v3488_v54 = vunpack.c.l.b16 %v3406_v49  ;;  %v3489_v10 = vunpack.c.h.b16 %v3406_v49  ;;  %v3335_v28 = vunpack.c.l.b16 %v3191_v25 }
 0x30a   : > { %v3490_v33 = vpack.c.b16 %v3488_v54, %v3488_v54  ;;  %v3491_v11 = vpack.c.b16 %v3489_v10, %v3489_v10 }
 0x30c   : > { %4053 = vst.msk [vmem:[%s5430_s26 + $0x58] sm:$0xf] %vm2302_vm3, %v3490_v33  ;;  %v3123_v30 = vpop.f32.mrf.mxu3  ;;  %v3039_v44 = vpop.f32.mrf.mxu2 }
 0x30d   : > { %v4446_v58 = vpop.eup %4445  ;;  %4054 = vst.msk [vmem:[%s5430_s26 + $0x5c] sm:$0xf] %vm2302_vm3, %v3491_v11  ;;  %v3124_v55 = vadd.f32 %v3123_v30, %v3034_v2  ;;  %v5847_v47 = vpop.f32.mrf.mxu1 }
 0x30e   : > { %v3192_v35 = vpack.c.bf16 %v4446_v58, %v4446_v58 }
 0x30f   : > { %4447 = vtanh.f32 %v3124_v55 }
 0x310   : > { %v3336_v52 = vunpack.c.l.b16 %v3192_v35  ;;  %4449 = vtanh.f32 %v2720_v21 }
 0x311   : > { %4451 = vtanh.f32 %v2718_v17 }
 0x312   : > { %v3354_v56 = vpack.c.b16 %v3336_v52, %v3335_v28 }
 0x314   : > { %v3125_v62 = vpop.f32.mrf.mxu3  ;;  %3383 = vrot.lane.b32.xlu0 %v3354_v56, %s4503_s14  ;;  %v3041_v40 = vpop.f32.mrf.mxu2 }
 0x315   : > { %v3126_v7 = vadd.f32 %v3125_v62, %v3036_v16  ;;  %v4448_v14 = vpop.eup %4447  ;;  %v2742_v35 = vpop.f32.mrf.mxu1 }
 0x316   : > { %v4450_v0 = vpop.eup %4449  ;;  %v3193_v5 = vpack.c.bf16 %v4448_v14, %v4448_v14  ;;  %v2653_v56 = vpop.f32.mrf.mxu0 }
 0x317   : > { %4453 = vtanh.f32 %v3126_v7  ;;  %v4452_v57 = vpop.eup %4451  ;;  %v2809_v31 = vpack.c.bf16 %v4450_v0, %v4450_v0 }
 0x318   : > { %4455 = vtanh.f32 %v2730_v48  ;;  %v2808_v61 = vpack.c.bf16 %v4452_v57, %v4452_v57  ;;  %v3337_v20 = vunpack.c.l.b16 %v3193_v5 }
 0x319   : > { %4457 = vtanh.f32 %v2728_v22  ;;  %v3244_v45 = vunpack.c.l.b16 %v2809_v31 }
 0x31a   : > { %v3243_v12 = vunpack.c.l.b16 %v2808_v61  ;;  %v2735_v61 = vadd.f32 %v5829_v15, %v5833_v41  ;;  %v2740_v15 = vadd.f32 %v5847_v47, %v5849_v27  ;;  %v2738_v41 = vadd.f32 %v5838_v60, %v5840_v3 }
 0x31c   : > { %v3128_v32 = vpop.f32.mrf.mxu3  ;;  %v3268_v53 = vpack.c.b16 %v3244_v45, %v3243_v12 }
 0x31d   : > { %v4454_v59 = vpop.eup %4453  ;;  %v3129_v18 = vadd.f32 %v3128_v32, %v3039_v44  ;;  %v2744_v32 = vpop.f32.mrf.mxu1 }
 0x31e   : > { %v3194_v63 = vpack.c.bf16 %v4454_v59, %v4454_v59  ;;  %v4456_v9 = vpop.eup %4455 }
 0x31f   : > { %4459 = vtanh.f32 %v3129_v18  ;;  %v4458_v51 = vpop.eup %4457  ;;  %v2813_v29 = vpack.c.bf16 %v4456_v9, %v4456_v9  ;;  %v2733_v18 = vadd.f32 %v5818_v50, %v5821_v39  ;;  %v2743_v9 = vadd.f32 %v2742_v35, %v2653_v56 }
 0x320   : > { %v3338_v8 = vunpack.c.l.b16 %v3194_v63  ;;  %4461 = vtanh.f32 %v2725_v6  ;;  %v2812_v38 = vpack.c.bf16 %v4458_v51, %v4458_v51  ;;  %v2655_v63 = vpop.f32.mrf.mxu0 }
 0x321   : > { %4463 = vtanh.f32 %v2723_v36  ;;  %v3248_v1 = vunpack.c.l.b16 %v2813_v29 }
 0x322   : > { %v3355_v43 = vpack.c.b16 %v3338_v8, %v3337_v20  ;;  %v3247_v49 = vunpack.c.l.b16 %v2812_v38  ;;  %v2745_v8 = vadd.f32 %v2744_v32, %v2655_v63 }
 0x324   : > { %v3130_v34 = vpop.f32.mrf.mxu3  ;;  %3385 = vrot.lane.b32.xlu1 %v3355_v43, %s4503_s14  ;;  %v3270_v11 = vpack.c.b16 %v3248_v1, %v3247_v49 }
 0x325   : > { %v3131_v37 = vadd.f32 %v3130_v34, %v3041_v40  ;;  %v4460_v26 = vpop.eup %4459  ;;  %v5871_v6 = vpop.f32.mrf.mxu1 }
 0x326   : > { %v3372_v23 = vpop.permute.xlu0 %3371  ;;  %v4462_v42 = vpop.eup %4461  ;;  %v3195_v10 = vpack.c.bf16 %v4460_v26, %v4460_v26 }
 0x327   : > { %4465 = vtanh.f32 %v3131_v37  ;;  %v3412_v24 = vsel %vm2246_vm2, %v3268_v53, %v3372_v23  ;;  %v4464_v54 = vpop.eup %4463  ;;  %v2811_v33 = vpack.c.bf16 %v4462_v42, %v4462_v42 }
 0x328   : > { %v3508_v19 = vunpack.c.l.b16 %v3412_v24  ;;  %v3509_v13 = vunpack.c.h.b16 %v3412_v24  ;;  %v2810_v58 = vpack.c.bf16 %v4464_v54, %v4464_v54  ;;  %v3339_v21 = vunpack.c.l.b16 %v3195_v10  ;;  %v5873_v20 = vpop.f32.mrf.mxu0 }
 0x329   : > { %v3246_v17 = vunpack.c.l.b16 %v2811_v33  ;;  %4467 = vtanh.f32 %v2735_v61 }
 0x32a   : > { %v3510_v2 = vpack.c.b16 %v3508_v19, %v3508_v19  ;;  %v3511_v4 = vpack.c.b16 %v3509_v13, %v3509_v13  ;;  %v3245_v14 = vunpack.c.l.b16 %v2810_v58  ;;  %4469 = vtanh.f32 %v2733_v18 }
 0x32b   : > { %4471 = vtanh.f32 %v2745_v8 }
 0x32c   : > { %4057 = vst.msk [vmem:[%s5430_s26 + $0x78] sm:$0xf] %vm2302_vm3, %v3510_v2  ;;  %v3269_v0 = vpack.c.b16 %v3246_v17, %v3245_v14  ;;  %4473 = vtanh.f32 %v2743_v9 }
 0x32d   : > { %v4466_v46 = vpop.eup %4465  ;;  %4058 = vst.msk [vmem:[%s5430_s26 + $0x7c] sm:$0xf] %vm2302_vm3, %v3511_v4  ;;  %v2749_v12 = vpop.f32.mrf.mxu1  ;;  %4475 = vtanh.f32 %v2740_v15 }
 0x32e   : > { %v3196_v25 = vpack.c.bf16 %v4466_v46, %v4466_v46  ;;  %v3376_v30 = vpop.permute.xlu2 %3375  ;;  %4477 = vtanh.f32 %v2738_v41 }
 0x32f   : > { %v3418_v55 = vsel %vm2246_vm2, %v3270_v11, %v3376_v30  ;;  %v4468_v45 = vpop.eup %4467 }
 0x330   : > { %v3340_v28 = vunpack.c.l.b16 %v3196_v25  ;;  %v3528_v16 = vunpack.c.l.b16 %v3418_v55  ;;  %v3529_v52 = vunpack.c.h.b16 %v3418_v55  ;;  %v4470_v36 = vpop.eup %4469  ;;  %v2815_v43 = vpack.c.bf16 %v4468_v45, %v4468_v45  ;;  %v2660_v40 = vpop.f32.mrf.mxu0 }
 0x331   : > { %v2814_v51 = vpack.c.bf16 %v4470_v36, %v4470_v36  ;;  %v4472_v39 = vpop.eup %4471 }
 0x332   : > { %v3530_v62 = vpack.c.b16 %v3528_v16, %v3528_v16  ;;  %v3531_v7 = vpack.c.b16 %v3529_v52, %v3529_v52  ;;  %v3356_v48 = vpack.c.b16 %v3340_v28, %v3339_v21  ;;  %v3250_v50 = vunpack.c.l.b16 %v2815_v43  ;;  %v4474_v53 = vpop.eup %4473 }
 0x333   : > { %v3249_v34 = vunpack.c.l.b16 %v2814_v51  ;;  %v2819_v37 = vpack.c.bf16 %v4472_v39, %v4472_v39  ;;  %v2818_v38 = vpack.c.bf16 %v4474_v53, %v4474_v53  ;;  %v4476_v1 = vpop.eup %4475 }
 0x334   : > { %4061 = vst.msk [vmem:[%s5430_s26 + $0x98] sm:$0xf] %vm2302_vm3, %v3530_v62  ;;  %3387 = vrot.lane.b32.xlu2 %v3356_v48, %s4503_s14  ;;  %v4478_v2 = vpop.eup %4477  ;;  %v2817_v4 = vpack.c.bf16 %v4476_v1, %v4476_v1 }
 0x335   : > { %4062 = vst.msk [vmem:[%s5430_s26 + $0x9c] sm:$0xf] %vm2302_vm3, %v3531_v7  ;;  %v3271_v29 = vpack.c.b16 %v3250_v50, %v3249_v34  ;;  %v2752_v24 = vpop.f32.mrf.mxu1  ;;  %v3254_v27 = vunpack.c.l.b16 %v2819_v37  ;;  %v3253_v3 = vunpack.c.l.b16 %v2818_v38  ;;  %v2816_v10 = vpack.c.bf16 %v4478_v2, %v4478_v2 }
 0x336   : > { %v3374_v22 = vpop.permute.xlu1 %3373  ;;  %v3252_v25 = vunpack.c.l.b16 %v2817_v4 }
 0x337   : > { %v3415_v44 = vsel %vm2246_vm2, %v3269_v0, %v3374_v22  ;;  %v3273_v49 = vpack.c.b16 %v3254_v27, %v3253_v3  ;;  %v3251_v55 = vunpack.c.l.b16 %v2816_v10  ;;  %v2750_v0 = vadd.f32 %v2749_v12, %v2660_v40 }
 0x338   : > { %v3518_v57 = vunpack.c.l.b16 %v3415_v44  ;;  %v3519_v5 = vunpack.c.h.b16 %v3415_v44  ;;  %v2663_v26 = vpop.f32.mrf.mxu0  ;;  %v2748_v22 = vadd.f32 %v5871_v6, %v5873_v20 }
 0x339   : > { %v3272_v28 = vpack.c.b16 %v3252_v25, %v3251_v55  ;;  %4479 = vtanh.f32 %v2750_v0  ;;  %v2753_v9 = vadd.f32 %v2752_v24, %v2663_v26 }
 0x33a   : > { %v3520_v59 = vpack.c.b16 %v3518_v57, %v3518_v57  ;;  %v3521_v31 = vpack.c.b16 %v3519_v5, %v3519_v5  ;;  %4481 = vtanh.f32 %v2748_v22 }
 0x33c   : > { %4059 = vst.msk [vmem:[%s5430_s26 + $0x88] sm:$0xf] %vm2302_vm3, %v3520_v59 }
 0x33d   : > { %4060 = vst.msk [vmem:[%s5430_s26 + $0x8c] sm:$0xf] %vm2302_vm3, %v3521_v31  ;;  %v2754_v30 = vpop.f32.mrf.mxu1 }
 0x33f   : > { %v4480_v32 = vpop.eup %4479 }
 0x340   : > { %v2665_v21 = vpop.f32.mrf.mxu0  ;;  %v4482_v31 = vpop.eup %4481  ;;  %v2821_v63 = vpack.c.bf16 %v4480_v32, %v4480_v32 }
 0x341   : > { %v2820_v61 = vpack.c.bf16 %v4482_v31, %v4482_v31  ;;  %v2755_v18 = vadd.f32 %v2754_v30, %v2665_v21 }
 0x342   : > { %v3256_v8 = vunpack.c.l.b16 %v2821_v63 }
 0x343   : > { %v3255_v36 = vunpack.c.l.b16 %v2820_v61 }
 0x345   : > { %v2757_v48 = vpop.f32.mrf.mxu1  ;;  %v3274_v6 = vpack.c.b16 %v3256_v8, %v3255_v36 }
 0x348   : > { %v2668_v14 = vpop.f32.mrf.mxu0 }
 0x349   : > { %v2758_v59 = vadd.f32 %v2757_v48, %v2668_v14 }
 0x34d   : > { %v2759_v44 = vpop.f32.mrf.mxu1 }
 0x350   : > { %v2670_v57 = vpop.f32.mrf.mxu0 }
 0x351   : > { %v2760_v5 = vadd.f32 %v2759_v44, %v2670_v57 }
 0x353   : > { %4483 = vtanh.f32 %v2760_v5 }
 0x354   : > { %4485 = vtanh.f32 %v2758_v59 }
 0x355   : > { %4487 = vtanh.f32 %v2755_v18 }
 0x356   : > { %v3378_v23 = vpop.permute.xlu0 %3377  ;;  %4489 = vtanh.f32 %v2753_v9 }
 0x357   : > { %v3421_v19 = vsel %vm2246_vm2, %v3271_v29, %v3378_v23 }
 0x358   : > { %v3538_v13 = vunpack.c.l.b16 %v3421_v19  ;;  %v3539_v47 = vunpack.c.h.b16 %v3421_v19 }
 0x359   : > { %v4484_v45 = vpop.eup %4483 }
 0x35a   : > { %v3540_v42 = vpack.c.b16 %v3538_v13, %v3538_v13  ;;  %v3541_v60 = vpack.c.b16 %v3539_v47, %v3539_v47  ;;  %v4486_v43 = vpop.eup %4485  ;;  %v2825_v20 = vpack.c.bf16 %v4484_v45, %v4484_v45 }
 0x35b   : > { %v2824_v51 = vpack.c.bf16 %v4486_v43, %v4486_v43  ;;  %v4488_v41 = vpop.eup %4487 }
 0x35c   : > { %4063 = vst.msk [vmem:[%s5430_s26 + $0xa8] sm:$0xf] %vm2302_vm3, %v3540_v42  ;;  %v3260_v39 = vunpack.c.l.b16 %v2825_v20  ;;  %v4490_v37 = vpop.eup %4489  ;;  %v2823_v23 = vpack.c.bf16 %v4488_v41, %v4488_v41 }
 0x35d   : > { %4064 = vst.msk [vmem:[%s5430_s26 + $0xac] sm:$0xf] %vm2302_vm3, %v3541_v60  ;;  %v3259_v29 = vunpack.c.l.b16 %v2824_v51  ;;  %v2822_v19 = vpack.c.bf16 %v4490_v37, %v4490_v37 }
 0x35e   : > { %v3382_v54 = vpop.permute.xlu2 %3381  ;;  %v3258_v26 = vunpack.c.l.b16 %v2823_v23 }
 0x35f   : > { %v3427_v46 = vsel %vm2246_vm2, %v3273_v49, %v3382_v54  ;;  %v3276_v38 = vpack.c.b16 %v3260_v39, %v3259_v29  ;;  %v3257_v60 = vunpack.c.l.b16 %v2822_v19 }
 0x360   : > { %v3558_v33 = vunpack.c.l.b16 %v3427_v46  ;;  %v3559_v11 = vunpack.c.h.b16 %v3427_v46 }
 0x361   : > { %v3275_v3 = vpack.c.b16 %v3258_v26, %v3257_v60 }
 0x362   : > { %v3560_v58 = vpack.c.b16 %v3558_v33, %v3558_v33  ;;  %v3561_v35 = vpack.c.b16 %v3559_v11, %v3559_v11 }
 0x364   : > { %4067 = vst.msk [vmem:[%s5430_s26 + $0xc8] sm:$0xf] %vm2302_vm3, %v3560_v58 }
 0x365   : > { %4068 = vst.msk [vmem:[%s5430_s26 + $0xcc] sm:$0xf] %vm2302_vm3, %v3561_v35 }
 0x366   : > { %v3380_v16 = vpop.permute.xlu1 %3379 }
 0x367   : > { %v3424_v52 = vsel %vm2246_vm2, %v3272_v28, %v3380_v16 }
 0x368   : > { %v3548_v17 = vunpack.c.l.b16 %v3424_v52  ;;  %v3549_v56 = vunpack.c.h.b16 %v3424_v52 }
 0x36a   : > { %v3550_v62 = vpack.c.b16 %v3548_v17, %v3548_v17  ;;  %v3551_v7 = vpack.c.b16 %v3549_v56, %v3549_v56 }
 0x36c   : > { %4065 = vst.msk [vmem:[%s5430_s26 + $0xb8] sm:$0xf] %vm2302_vm3, %v3550_v62 }
 0x36d   : > { %4066 = vst.msk [vmem:[%s5430_s26 + $0xbc] sm:$0xf] %vm2302_vm3, %v3551_v7 }
 0x386   : > { %v3384_v12 = vpop.permute.xlu0 %3383 }
 0x387   : > { %v3430_v40 = vsel %vm2246_vm2, %v3274_v6, %v3384_v12 }
 0x388   : > { %v3568_v15 = vunpack.c.l.b16 %v3430_v40  ;;  %v3569_v50 = vunpack.c.h.b16 %v3430_v40 }
 0x38a   : > { %v3570_v34 = vpack.c.b16 %v3568_v15, %v3568_v15  ;;  %v3571_v53 = vpack.c.b16 %v3569_v50, %v3569_v50 }
 0x38c   : > { %4069 = vst.msk [vmem:[%s5430_s26 + $0xd8] sm:$0xf] %vm2302_vm3, %v3570_v34 }
 0x38d   : > { %4070 = vst.msk [vmem:[%s5430_s26 + $0xdc] sm:$0xf] %vm2302_vm3, %v3571_v53 }
 0x38e   : > { %v3388_v24 = vpop.permute.xlu2 %3387 }
 0x38f   : > { %v3436_v13 = vsel %vm2246_vm2, %v3276_v38, %v3388_v24 }
 0x390   : > { %v3588_v47 = vunpack.c.l.b16 %v3436_v13  ;;  %v3589_v27 = vunpack.c.h.b16 %v3436_v13 }
 0x392   : > { %v3590_v1 = vpack.c.b16 %v3588_v47, %v3588_v47  ;;  %v3591_v42 = vpack.c.b16 %v3589_v27, %v3589_v27 }
 0x394   : > { %4073 = vst.msk [vmem:[%s5430_s26 + $0xf8] sm:$0xf] %vm2302_vm3, %v3590_v1 }
 0x395   : > { %4074 = vst.msk [vmem:[%s5430_s26 + $0xfc] sm:$0xf] %vm2302_vm3, %v3591_v42 }
 0x396   : > { %v3386_v2 = vpop.permute.xlu1 %3385 }
 0x397   : > { %v3433_v4 = vsel %vm2246_vm2, %v3275_v3, %v3386_v2 }
 0x398   : > { %v3578_v49 = vunpack.c.l.b16 %v3433_v4  ;;  %v3579_v54 = vunpack.c.h.b16 %v3433_v4 }
 0x39a   : > { %v3580_v10 = vpack.c.b16 %v3578_v49, %v3578_v49  ;;  %v3581_v46 = vpack.c.b16 %v3579_v54, %v3579_v54 }
 0x39c   : > { %4071 = vst.msk [vmem:[%s5430_s26 + $0xe8] sm:$0xf] %vm2302_vm3, %v3580_v10 }
 0x39d   : > { %4072 = vst.msk [vmem:[%s5430_s26 + $0xec] sm:$0xf] %vm2302_vm3, %v3581_v46 }
 0x39e PF: > { %s14_s15 = sadd.s32 1, %s4499_s15  }
 0x39f   : > { %p11_p4 = scmp.ge.s32.totalorder %s14_s15, 4  }
 0x3a1   :  { %13 = sbr.rel (!%p11_p4) target bundleno = 1 (0x1), region = 100 }

</bundles_post_ra>
